<compile_context>
chip_gen: v7x
topology: tpu7x:2x2x1
jax: 0.10.0
libtpu: 0.0.40
codegen_flags: <defaults>
</compile_context>

<pallas_src>
import jax
import jax.numpy as jnp
from jax.experimental import pallas as pl
from jax.experimental.pallas import tpu as pltpu

EPS = 1e-5
LANES = 128                       # every channel / feature dim padded to one vreg of lanes
VMEM_LIMIT = 48 * 1024 * 1024     # > default scoped VMEM on all gens, < v7x physical 64 MiB


def _sigmoid(z):
    # Single EUP transcendental instead of exp + reciprocal.
    return 0.5 * jnp.tanh(0.5 * z) + 0.5


# --------------------------- conv layer kernels ------------------------------

def conv_stats_kernel(x_ref, w_ref, s1_ref, s2_ref):
    # One image tile: (HW, Kp) @ (Kp, 128) bf16 MXU matmul, f32 accumulate.
    # s1/s2 are accumulated in the same pass while y is still in vregs.
    y = jnp.dot(x_ref[...], w_ref[...], preferred_element_type=jnp.float32)
    s1_ref[...] = jnp.sum(y, axis=0, keepdims=True)
    s2_ref[...] = jnp.sum(y * y, axis=0, keepdims=True)


def conv_bn_sig_pool(cols3, w, gamma, beta, pool_mat):
    """Conv (as im2col matmul) + batch-stats BN + sigmoid + fused 2x2 avg-pool.

    cols3:    (N, HW, Kp)   bf16 im2col patches, one grid step per image
    w:        (Kp, 128)     bf16 weight, output channels zero-padded to 128 lanes
    pool_mat: (HW/4, HW)    f32 constant pooling matrix (0.25 entries)
    returns   (N, HW/4, 128) bf16 pooled activations
    """
    n, hw, kp = cols3.shape
    hwp = pool_mat.shape[0]
    inv_cnt = 1.0 / float(n * hw)          # BN statistics are global over N*OH*OW rows

    # ---- pass A: per-image partial sums for the global batch statistics ----
    s1p, s2p = pl.pallas_call(
        conv_stats_kernel,
        grid=(n,),
        in_specs=[
            pl.BlockSpec((None, hw, kp), lambda i: (i, 0, 0)),
            pl.BlockSpec((kp, LANES), lambda i: (0, 0)),
        ],
        out_specs=(
            pl.BlockSpec((None, 1, LANES), lambda i: (i, 0, 0)),
            pl.BlockSpec((None, 1, LANES), lambda i: (i, 0, 0)),
        ),
        out_shape=(
            jax.ShapeDtypeStruct((n, 1, LANES), jnp.float32),
            jax.ShapeDtypeStruct((n, 1, LANES), jnp.float32),
        ),
        compiler_params=pltpu.CompilerParams(
            dimension_semantics=("parallel",), vmem_limit_bytes=VMEM_LIMIT),
        cost_estimate=pl.CostEstimate(
            flops=int(2 * n * hw * kp * LANES), transcendentals=0,
            bytes_accessed=int(cols3.size * 2 + w.size * 2 + 2 * n * LANES * 4)),
    )(cols3, w)

    # Tiny glue reduction of the per-image partials -> global sums (1, 128).
    s1 = jnp.sum(s1p, axis=0)
    s2 = jnp.sum(s2p, axis=0)

    # ---- pass B: recompute matmul, normalize, sigmoid, fused pool, bf16 out ----
    def norm_pool_kernel(x_ref, w_ref, s1_ref, s2_ref, g_ref, b_ref, p_ref, o_ref):
        y = jnp.dot(x_ref[...], w_ref[...], preferred_element_type=jnp.float32)
        mean = s1_ref[...] * inv_cnt
        var = jnp.maximum(s2_ref[...] * inv_cnt - mean * mean, 0.0)     # biased variance
        z = g_ref[...] * (y - mean) * jax.lax.rsqrt(var + EPS) + b_ref[...]
        sig = _sigmoid(z)
        # 2x2 stride-2 average pool as (HW/4, HW) @ (HW, 128) matmul on the MXU.
        o_ref[...] = jnp.dot(p_ref[...], sig,
                             preferred_element_type=jnp.float32).astype(o_ref.dtype)

    pooled = pl.pallas_call(
        norm_pool_kernel,
        grid=(n,),
        in_specs=[
            pl.BlockSpec((None, hw, kp), lambda i: (i, 0, 0)),
            pl.BlockSpec((kp, LANES), lambda i: (0, 0)),
            pl.BlockSpec((1, LANES), lambda i: (0, 0)),
            pl.BlockSpec((1, LANES), lambda i: (0, 0)),
            pl.BlockSpec((1, LANES), lambda i: (0, 0)),
            pl.BlockSpec((1, LANES), lambda i: (0, 0)),
            pl.BlockSpec((hwp, hw), lambda i: (0, 0)),
        ],
        out_specs=pl.BlockSpec((None, hwp, LANES), lambda i: (i, 0, 0)),
        out_shape=jax.ShapeDtypeStruct((n, hwp, LANES), jnp.bfloat16),
        compiler_params=pltpu.CompilerParams(
            dimension_semantics=("parallel",), vmem_limit_bytes=VMEM_LIMIT),
        cost_estimate=pl.CostEstimate(
            flops=int(2 * n * hw * kp * LANES + 2 * n * hwp * hw * LANES),
            transcendentals=int(n * hw * LANES),
            bytes_accessed=int(cols3.size * 2 + w.size * 2 + pool_mat.size * 4
                               + n * hwp * LANES * 2)),
    )(cols3, w, s1, s2, gamma, beta, pool_mat)
    return pooled


# --------------------------- fused FC chain kernel ----------------------------

def fc_chain_kernel(x_ref, w3_ref, g3_ref, be3_ref, w4_ref, g4_ref, be4_ref,
                    w5_ref, b5_ref, o_ref):
    # fc1 + BN(120,2) + sigmoid -> fc2 + BN(84,2) + sigmoid -> fc3 (+bias); all in VMEM.
    def bn_sig(y, g, b):
        inv_n = 1.0 / y.shape[0]
        s1 = jnp.sum(y, axis=0, keepdims=True)
        s2 = jnp.sum(y * y, axis=0, keepdims=True)
        mean = s1 * inv_n
        var = jnp.maximum(s2 * inv_n - mean * mean, 0.0)
        return _sigmoid(g * (y - mean) * jax.lax.rsqrt(var + EPS) + b)

    h = jnp.dot(x_ref[...], w3_ref[...], preferred_element_type=jnp.float32)
    h = bn_sig(h, g3_ref[...], be3_ref[...])
    h = jnp.dot(h.astype(jnp.bfloat16), w4_ref[...], preferred_element_type=jnp.float32)
    h = bn_sig(h, g4_ref[...], be4_ref[...])
    o_ref[...] = jnp.dot(h.astype(jnp.bfloat16), w5_ref[...],
                         preferred_element_type=jnp.float32) + b5_ref[...]


def fc_chain(x, p):
    n, k = x.shape
    args = (x, p["w3"], p["g3"], p["be3"], p["w4"], p["g4"], p["be4"], p["w5"], p["b5"])
    flops = 2 * n * (k * LANES + LANES * LANES + LANES * LANES)
    bytes_acc = sum(int(a.size * a.dtype.itemsize) for a in args) + n * LANES * 4
    return pl.pallas_call(
        fc_chain_kernel,
        out_shape=jax.ShapeDtypeStruct((n, LANES), jnp.float32),
        in_specs=[pl.BlockSpec(memory_space=pltpu.MemorySpace.VMEM) for _ in args],
        out_specs=pl.BlockSpec(memory_space=pltpu.MemorySpace.VMEM),
        compiler_params=pltpu.CompilerParams(vmem_limit_bytes=VMEM_LIMIT),
        cost_estimate=pl.CostEstimate(flops=int(flops), transcendentals=int(2 * n * LANES),
                                      bytes_accessed=int(bytes_acc)),
    )(*args)


# ------------------------------- XLA glue -------------------------------------

def im2col(x_nhwc, k, padding, k_pad):
    # TODO(synk): generate patches inside the conv kernel to avoid the ~k*k HBM blowup.
    if padding:
        x_nhwc = jnp.pad(x_nhwc, ((0, 0), (padding, padding), (padding, padding), (0, 0)))
    n, h, w, c = x_nhwc.shape
    oh, ow = h - k + 1, w - k + 1
    cols = [x_nhwc[:, i:i + oh, j:j + ow, :] for i in range(k) for j in range(k)]
    patches = jnp.stack(cols, axis=3).reshape(n, oh * ow, k * k * c)   # (kh,kw,c) feature order
    if k_pad > k * k * c:
        patches = jnp.pad(patches, ((0, 0), (0, 0), (0, k_pad - k * k * c)))
    return patches, (oh, ow)


def pool_matrix(oh, ow):
    # Constant (OH*OW/4, OH*OW) matrix implementing a 2x2 stride-2 average pool.
    hp, wp = oh // 2, ow // 2
    src = jnp.arange(oh * ow)
    dst = (src // ow // 2) * wp + (src % ow) // 2
    return (jnp.arange(hp * wp)[:, None] == dst[None, :]).astype(jnp.float32) * 0.25


# ------------------------- parameters (deterministic) --------------------------

def init_params(key):
    ks = jax.random.split(key, 5)
    f32, bf16 = jnp.float32, jnp.bfloat16

    def gamma_beta():
        return jnp.ones((1, LANES), f32), jnp.zeros((1, LANES), f32)

    def pad_to(w, rows, cols):
        return jnp.pad(w, ((0, rows - w.shape[0]), (0, cols - w.shape[1]))).astype(bf16)

    p = {}
    # conv1: torch layout (6,1,5,5) -> im2col rows in (kh, kw, ic) order, K 25 -> 32.
    w1_t = 0.1 * jax.random.normal(ks[0], (6, 1, 5, 5), f32)
    p["w1"] = pad_to(jnp.transpose(w1_t, (2, 3, 1, 0)).reshape(25, 6), 32, LANES)
    p["g1"], p["be1"] = gamma_beta()
    # Conv biases dropped: batch-stats BN subtracts the channel mean right after (exact).

    # conv2: torch layout (16,6,5,5) -> rows (kh, kw, ic), K 150 -> 160.
    w2_t = 0.1 * jax.random.normal(ks[1], (16, 6, 5, 5), f32)
    p["w2"] = pad_to(jnp.transpose(w2_t, (2, 3, 1, 0)).reshape(150, 16), 160, LANES)
    p["g2"], p["be2"] = gamma_beta()

    # fc1: torch Linear(400,120) expects NCHW-flatten (c,h,w) feature order; we flatten
    # the pooled conv2 output in native (h,w,c128) order, so permute/scatter the weight
    # rows once here (free at init, replaces the runtime transpose).
    w3_t = 0.1 * jax.random.normal(ks[2], (400, 120), f32)            # rows = c*25 + h*5 + w
    w3_hwc = jnp.transpose(w3_t.reshape(16, 5, 5, 120), (1, 2, 0, 3))  # (h, w, c, out)
    w3_pad = jnp.zeros((5, 5, LANES, 120), f32).at[:, :, :16, :].set(w3_hwc)
    p["w3"] = pad_to(w3_pad.reshape(25 * LANES, 120), 25 * LANES, LANES)
    p["g3"], p["be3"] = gamma_beta()

    # fc2: 120 -> 84 (rows padded so fc1's padded lanes, which hold sigmoid(0)=0.5,
    # hit zero weight rows and contribute nothing).
    p["w4"] = pad_to(0.1 * jax.random.normal(ks[3], (120, 84), f32), LANES, LANES)
    p["g4"], p["be4"] = gamma_beta()

    # fc3: 84 -> 10 (with bias; padded rows/cols zero).
    p["w5"] = pad_to(0.1 * jax.random.normal(ks[4], (84, 10), f32), LANES, LANES)
    p["b5"] = jnp.zeros((1, LANES), f32)
    return p


# --------------------------------- forward -------------------------------------

def lenet_forward(x_nchw, p):
    n = x_nchw.shape[0]
    x = jnp.transpose(x_nchw, (0, 2, 3, 1)).astype(jnp.bfloat16)       # NHWC (N,28,28,1)

    # conv1 (1->6, k=5, pad=2) + BN(6,4) + sigmoid + fused 2x2 avg-pool
    cols1, (oh1, ow1) = im2col(x, 5, 2, 32)                            # (N, 784, 32)
    y = conv_bn_sig_pool(cols1, p["w1"], p["g1"], p["be1"],
                         pool_matrix(oh1, ow1))                        # (N, 196, 128) bf16
    y = y.reshape(n, oh1 // 2, ow1 // 2, LANES)[..., :6]               # (N,14,14,6) real chans

    # conv2 (6->16, k=5) + BN(16,4) + sigmoid + fused 2x2 avg-pool
    cols2, (oh2, ow2) = im2col(y, 5, 0, 160)                           # (N, 100, 160)
    y = conv_bn_sig_pool(cols2, p["w2"], p["g2"], p["be2"],
                         pool_matrix(oh2, ow2))                        # (N, 25, 128) bf16

    # Flatten in native (h, w, c128) order — no runtime NCHW transpose, no channel
    # slice: w3 rows for the padded lanes are zero, so their 0.5s contribute nothing.
    y = y.reshape(n, 25 * LANES)                                       # (N, 3200) bf16

    out = fc_chain(y, p)                                               # (N, 128) f32
    return out[:, :10]                                                 # slice at the very end


if __name__ == "__main__":
    key = jax.random.PRNGKey(0)
    kx, kp = jax.random.split(key)
    x = jax.random.normal(kx, (2, 1, 28, 28), jnp.float32)   # LeNet expects 28x28
    params = init_params(kp)

    out = jax.jit(lenet_forward)(x, params)
    out = jax.block_until_ready(out)

    assert out.shape == (2, 10), out.shape
    assert bool(jnp.all(jnp.isfinite(out)))
    print("KERNEL_OK")
</pallas_src>

<mosaic_0001>
module attributes {stable_mosaic.version = 11 : i64} {
  func.func @conv_stats_kernel(%arg0: i32, %arg1: memref<1x784x32xbf16, #tpu.memory_space<vmem>>, %arg2: memref<32x128xbf16, #tpu.memory_space<vmem>>, %arg3: memref<1x1x128xf32, #tpu.memory_space<vmem>>, %arg4: memref<1x1x128xf32, #tpu.memory_space<vmem>>) attributes {dimension_semantics = [#tpu.dimension_semantics<parallel>], iteration_bounds = array<i64: 2>, scalar_prefetch = 0 : i64, scratch_operands = 0 : i64, tpu.core_type = #tpu.core_type<tc>, window_params = [{transform_indices = @transform_0, window_bounds = array<i64: 1, 784, 32>}, {pipeline_mode = #tpu.pipeline_mode<synchronous>, transform_indices = @transform_1, window_bounds = array<i64: 32, 128>}, {transform_indices = @transform_2, window_bounds = array<i64: 1, 1, 128>}, {transform_indices = @transform_3, window_bounds = array<i64: 1, 1, 128>}]} {
    %c0 = arith.constant 0 : index
    %c0_0 = arith.constant 0 : index
    %c0_1 = arith.constant 0 : index
    %0 = vector.load %arg1[%c0, %c0_0, %c0_1] : memref<1x784x32xbf16, #tpu.memory_space<vmem>>, vector<1x784x32xbf16>
    %1 = vector.shape_cast %0 : vector<1x784x32xbf16> to vector<784x32xbf16>
    %c0_2 = arith.constant 0 : index
    %c0_3 = arith.constant 0 : index
    %2 = vector.load %arg2[%c0_2, %c0_3] : memref<32x128xbf16, #tpu.memory_space<vmem>>, vector<32x128xbf16>
    %cst = arith.constant dense<0.000000e+00> : vector<784x128xf32>
    %3 = tpu.matmul %1, %2, %cst {dimension_numbers = #tpu.dot_dimension_numbers<[1], [0], [0], [1], [0, 0, 1, 1], [], []>} : vector<784x32xbf16>, vector<32x128xbf16>, vector<784x128xf32> -> vector<784x128xf32>
    %cst_4 = arith.constant dense<0.000000e+00> : vector<128xf32>
    %4 = vector.multi_reduction <add>, %3, %cst_4 [0] : vector<784x128xf32> to vector<128xf32>
    %5 = vector.shape_cast %4 : vector<128xf32> to vector<1x128xf32>
    %c0_5 = arith.constant 0 : index
    %c0_6 = arith.constant 0 : index
    %c0_7 = arith.constant 0 : index
    %6 = vector.load %arg3[%c0_5, %c0_6, %c0_7] : memref<1x1x128xf32, #tpu.memory_space<vmem>>, vector<1x1x128xf32>
    %7 = vector.shape_cast %6 : vector<1x1x128xf32> to vector<1x128xf32>
    %8 = vector.shape_cast %5 : vector<1x128xf32> to vector<1x1x128xf32>
    tpu.vector_store %arg3[%c0_5, %c0_6, %c0_7], %8 {strides = array<i32>} : memref<1x1x128xf32, #tpu.memory_space<vmem>>, vector<1x1x128xf32>,
    %9 = arith.mulf %3, %3 : vector<784x128xf32>
    %cst_8 = arith.constant dense<0.000000e+00> : vector<128xf32>
    %10 = vector.multi_reduction <add>, %9, %cst_8 [0] : vector<784x128xf32> to vector<128xf32>
    %11 = vector.shape_cast %10 : vector<128xf32> to vector<1x128xf32>
    %c0_9 = arith.constant 0 : index
    %c0_10 = arith.constant 0 : index
    %c0_11 = arith.constant 0 : index
    %12 = vector.load %arg4[%c0_9, %c0_10, %c0_11] : memref<1x1x128xf32, #tpu.memory_space<vmem>>, vector<1x1x128xf32>
    %13 = vector.shape_cast %12 : vector<1x1x128xf32> to vector<1x128xf32>
    %14 = vector.shape_cast %11 : vector<1x128xf32> to vector<1x1x128xf32>
    tpu.vector_store %arg4[%c0_9, %c0_10, %c0_11], %14 {strides = array<i32>} : memref<1x1x128xf32, #tpu.memory_space<vmem>>, vector<1x1x128xf32>,
    return
  }
  func.func @transform_0(%arg0: i32) -> (i32, i32, i32) {
    %c0_i32 = arith.constant 0 : i32
    %c0_i32_0 = arith.constant 0 : i32
    %c0_i32_1 = arith.constant 0 : i32
    return %arg0, %c0_i32, %c0_i32_0 : i32, i32, i32
  }
  func.func @transform_1(%arg0: i32) -> (i32, i32) {
    %c0_i32 = arith.constant 0 : i32
    %c0_i32_0 = arith.constant 0 : i32
    %c0_i32_1 = arith.constant 0 : i32
    return %c0_i32, %c0_i32_0 : i32, i32
  }
  func.func @transform_2(%arg0: i32) -> (i32, i32, i32) {
    %c0_i32 = arith.constant 0 : i32
    %c0_i32_0 = arith.constant 0 : i32
    %c0_i32_1 = arith.constant 0 : i32
    return %arg0, %c0_i32, %c0_i32_0 : i32, i32, i32
  }
  func.func @transform_3(%arg0: i32) -> (i32, i32, i32) {
    %c0_i32 = arith.constant 0 : i32
    %c0_i32_0 = arith.constant 0 : i32
    %c0_i32_1 = arith.constant 0 : i32
    return %arg0, %c0_i32, %c0_i32_0 : i32, i32, i32
  }
}

module attributes {stable_mosaic.version = 11 : i64} {
  func.func @norm_pool_kernel(%arg0: i32, %arg1: memref<1x784x32xbf16, #tpu.memory_space<vmem>>, %arg2: memref<32x128xbf16, #tpu.memory_space<vmem>>, %arg3: memref<1x128xf32, #tpu.memory_space<vmem>>, %arg4: memref<1x128xf32, #tpu.memory_space<vmem>>, %arg5: memref<1x128xf32, #tpu.memory_space<vmem>>, %arg6: memref<1x128xf32, #tpu.memory_space<vmem>>, %arg7: memref<196x784xf32, #tpu.memory_space<vmem>>, %arg8: memref<1x196x128xbf16, #tpu.memory_space<vmem>>) attributes {dimension_semantics = [#tpu.dimension_semantics<parallel>], iteration_bounds = array<i64: 2>, scalar_prefetch = 0 : i64, scratch_operands = 0 : i64, tpu.core_type = #tpu.core_type<tc>, window_params = [{transform_indices = @transform_0, window_bounds = array<i64: 1, 784, 32>}, {pipeline_mode = #tpu.pipeline_mode<synchronous>, transform_indices = @transform_1, window_bounds = array<i64: 32, 128>}, {pipeline_mode = #tpu.pipeline_mode<synchronous>, transform_indices = @transform_2, window_bounds = array<i64: 1, 128>}, {pipeline_mode = #tpu.pipeline_mode<synchronous>, transform_indices = @transform_3, window_bounds = array<i64: 1, 128>}, {pipeline_mode = #tpu.pipeline_mode<synchronous>, transform_indices = @transform_4, window_bounds = array<i64: 1, 128>}, {pipeline_mode = #tpu.pipeline_mode<synchronous>, transform_indices = @transform_5, window_bounds = array<i64: 1, 128>}, {pipeline_mode = #tpu.pipeline_mode<synchronous>, transform_indices = @transform_6, window_bounds = array<i64: 196, 784>}, {transform_indices = @transform_7, window_bounds = array<i64: 1, 196, 128>}]} {
    %c0 = arith.constant 0 : index
    %c0_0 = arith.constant 0 : index
    %c0_1 = arith.constant 0 : index
    %0 = vector.load %arg1[%c0, %c0_0, %c0_1] : memref<1x784x32xbf16, #tpu.memory_space<vmem>>, vector<1x784x32xbf16>
    %1 = vector.shape_cast %0 : vector<1x784x32xbf16> to vector<784x32xbf16>
    %c0_2 = arith.constant 0 : index
    %c0_3 = arith.constant 0 : index
    %2 = vector.load %arg2[%c0_2, %c0_3] : memref<32x128xbf16, #tpu.memory_space<vmem>>, vector<32x128xbf16>
    %cst = arith.constant dense<0.000000e+00> : vector<784x128xf32>
    %3 = tpu.matmul %1, %2, %cst {dimension_numbers = #tpu.dot_dimension_numbers<[1], [0], [0], [1], [0, 0, 1, 1], [], []>} : vector<784x32xbf16>, vector<32x128xbf16>, vector<784x128xf32> -> vector<784x128xf32>
    %c0_4 = arith.constant 0 : index
    %c0_5 = arith.constant 0 : index
    %4 = vector.load %arg3[%c0_4, %c0_5] : memref<1x128xf32, #tpu.memory_space<vmem>>, vector<1x128xf32>
    %cst_6 = arith.constant 6.37755089E-4 : f32
    %5 = vector.broadcast %cst_6 : f32 to vector<1x128xf32>
    %6 = arith.mulf %4, %5 : vector<1x128xf32>
    %c0_7 = arith.constant 0 : index
    %c0_8 = arith.constant 0 : index
    %7 = vector.load %arg4[%c0_7, %c0_8] : memref<1x128xf32, #tpu.memory_space<vmem>>, vector<1x128xf32>
    %cst_9 = arith.constant 6.37755089E-4 : f32
    %8 = vector.broadcast %cst_9 : f32 to vector<1x128xf32>
    %9 = arith.mulf %7, %8 : vector<1x128xf32>
    %10 = arith.mulf %6, %6 : vector<1x128xf32>
    %11 = arith.subf %9, %10 : vector<1x128xf32>
    %cst_10 = arith.constant 0.000000e+00 : f32
    %12 = vector.broadcast %cst_10 : f32 to vector<1x128xf32>
    %13 = arith.maximumf %11, %12 : vector<1x128xf32>
    %c0_11 = arith.constant 0 : index
    %c0_12 = arith.constant 0 : index
    %14 = vector.load %arg5[%c0_11, %c0_12] : memref<1x128xf32, #tpu.memory_space<vmem>>, vector<1x128xf32>
    %15 = vector.broadcast %6 : vector<1x128xf32> to vector<784x128xf32>
    %16 = arith.subf %3, %15 : vector<784x128xf32>
    %17 = vector.broadcast %14 : vector<1x128xf32> to vector<784x128xf32>
    %18 = arith.mulf %17, %16 : vector<784x128xf32>
    %cst_13 = arith.constant 9.99999974E-6 : f32
    %19 = vector.broadcast %cst_13 : f32 to vector<1x128xf32>
    %20 = arith.addf %13, %19 : vector<1x128xf32>
    %21 = math.rsqrt %20 : vector<1x128xf32>
    %22 = vector.broadcast %21 : vector<1x128xf32> to vector<784x128xf32>
    %23 = arith.mulf %18, %22 : vector<784x128xf32>
    %c0_14 = arith.constant 0 : index
    %c0_15 = arith.constant 0 : index
    %24 = vector.load %arg6[%c0_14, %c0_15] : memref<1x128xf32, #tpu.memory_space<vmem>>, vector<1x128xf32>
    %25 = vector.broadcast %24 : vector<1x128xf32> to vector<784x128xf32>
    %26 = arith.addf %23, %25 : vector<784x128xf32>
    %cst_16 = arith.constant 5.000000e-01 : f32
    %27 = vector.broadcast %cst_16 : f32 to vector<784x128xf32>
    %28 = arith.mulf %27, %26 : vector<784x128xf32>
    %29 = math.tanh %28 : vector<784x128xf32>
    %cst_17 = arith.constant 5.000000e-01 : f32
    %30 = vector.broadcast %cst_17 : f32 to vector<784x128xf32>
    %31 = arith.mulf %30, %29 : vector<784x128xf32>
    %cst_18 = arith.constant 5.000000e-01 : f32
    %32 = vector.broadcast %cst_18 : f32 to vector<784x128xf32>
    %33 = arith.addf %31, %32 : vector<784x128xf32>
    %c0_19 = arith.constant 0 : index
    %c0_20 = arith.constant 0 : index
    %34 = vector.load %arg7[%c0_19, %c0_20] : memref<196x784xf32, #tpu.memory_space<vmem>>, vector<196x784xf32>
    %cst_21 = arith.constant dense<0.000000e+00> : vector<196x128xf32>
    %35 = tpu.matmul %34, %33, %cst_21 {dimension_numbers = #tpu.dot_dimension_numbers<[1], [0], [0], [1], [0, 0, 1, 1], [], []>} : vector<196x784xf32>, vector<784x128xf32>, vector<196x128xf32> -> vector<196x128xf32>
    %36 = arith.truncf %35 : vector<196x128xf32> to vector<196x128xbf16>
    %c0_22 = arith.constant 0 : index
    %c0_23 = arith.constant 0 : index
    %c0_24 = arith.constant 0 : index
    %37 = vector.load %arg8[%c0_22, %c0_23, %c0_24] : memref<1x196x128xbf16, #tpu.memory_space<vmem>>, vector<1x196x128xbf16>
    %38 = vector.shape_cast %37 : vector<1x196x128xbf16> to vector<196x128xbf16>
    %39 = vector.shape_cast %36 : vector<196x128xbf16> to vector<1x196x128xbf16>
    tpu.vector_store %arg8[%c0_22, %c0_23, %c0_24], %39 {strides = array<i32>} : memref<1x196x128xbf16, #tpu.memory_space<vmem>>, vector<1x196x128xbf16>,
    return
  }
  func.func @transform_0(%arg0: i32) -> (i32, i32, i32) {
    %c0_i32 = arith.constant 0 : i32
    %c0_i32_0 = arith.constant 0 : i32
    %c0_i32_1 = arith.constant 0 : i32
    return %arg0, %c0_i32, %c0_i32_0 : i32, i32, i32
  }
  func.func @transform_1(%arg0: i32) -> (i32, i32) {
    %c0_i32 = arith.constant 0 : i32
    %c0_i32_0 = arith.constant 0 : i32
    %c0_i32_1 = arith.constant 0 : i32
    return %c0_i32, %c0_i32_0 : i32, i32
  }
  func.func @transform_2(%arg0: i32) -> (i32, i32) {
    %c0_i32 = arith.constant 0 : i32
    %c0_i32_0 = arith.constant 0 : i32
    %c0_i32_1 = arith.constant 0 : i32
    return %c0_i32, %c0_i32_0 : i32, i32
  }
  func.func @transform_3(%arg0: i32) -> (i32, i32) {
    %c0_i32 = arith.constant 0 : i32
    %c0_i32_0 = arith.constant 0 : i32
    %c0_i32_1 = arith.constant 0 : i32
    return %c0_i32, %c0_i32_0 : i32, i32
  }
  func.func @transform_4(%arg0: i32) -> (i32, i32) {
    %c0_i32 = arith.constant 0 : i32
    %c0_i32_0 = arith.constant 0 : i32
    %c0_i32_1 = arith.constant 0 : i32
    return %c0_i32, %c0_i32_0 : i32, i32
  }
  func.func @transform_5(%arg0: i32) -> (i32, i32) {
    %c0_i32 = arith.constant 0 : i32
    %c0_i32_0 = arith.constant 0 : i32
    %c0_i32_1 = arith.constant 0 : i32
    return %c0_i32, %c0_i32_0 : i32, i32
  }
  func.func @transform_6(%arg0: i32) -> (i32, i32) {
    %c0_i32 = arith.constant 0 : i32
    %c0_i32_0 = arith.constant 0 : i32
    %c0_i32_1 = arith.constant 0 : i32
    return %c0_i32, %c0_i32_0 : i32, i32
  }
  func.func @transform_7(%arg0: i32) -> (i32, i32, i32) {
    %c0_i32 = arith.constant 0 : i32
    %c0_i32_0 = arith.constant 0 : i32
    %c0_i32_1 = arith.constant 0 : i32
    return %arg0, %c0_i32, %c0_i32_0 : i32, i32, i32
  }
}

module attributes {stable_mosaic.version = 11 : i64} {
  func.func @conv_stats_kernel(%arg0: i32, %arg1: memref<1x100x160xbf16, #tpu.memory_space<vmem>>, %arg2: memref<160x128xbf16, #tpu.memory_space<vmem>>, %arg3: memref<1x1x128xf32, #tpu.memory_space<vmem>>, %arg4: memref<1x1x128xf32, #tpu.memory_space<vmem>>) attributes {dimension_semantics = [#tpu.dimension_semantics<parallel>], iteration_bounds = array<i64: 2>, scalar_prefetch = 0 : i64, scratch_operands = 0 : i64, tpu.core_type = #tpu.core_type<tc>, window_params = [{transform_indices = @transform_0, window_bounds = array<i64: 1, 100, 160>}, {pipeline_mode = #tpu.pipeline_mode<synchronous>, transform_indices = @transform_1, window_bounds = array<i64: 160, 128>}, {transform_indices = @transform_2, window_bounds = array<i64: 1, 1, 128>}, {transform_indices = @transform_3, window_bounds = array<i64: 1, 1, 128>}]} {
    %c0 = arith.constant 0 : index
    %c0_0 = arith.constant 0 : index
    %c0_1 = arith.constant 0 : index
    %0 = vector.load %arg1[%c0, %c0_0, %c0_1] : memref<1x100x160xbf16, #tpu.memory_space<vmem>>, vector<1x100x160xbf16>
    %1 = vector.shape_cast %0 : vector<1x100x160xbf16> to vector<100x160xbf16>
    %c0_2 = arith.constant 0 : index
    %c0_3 = arith.constant 0 : index
    %2 = vector.load %arg2[%c0_2, %c0_3] : memref<160x128xbf16, #tpu.memory_space<vmem>>, vector<160x128xbf16>
    %cst = arith.constant dense<0.000000e+00> : vector<100x128xf32>
    %3 = tpu.matmul %1, %2, %cst {dimension_numbers = #tpu.dot_dimension_numbers<[1], [0], [0], [1], [0, 0, 1, 1], [], []>} : vector<100x160xbf16>, vector<160x128xbf16>, vector<100x128xf32> -> vector<100x128xf32>
    %cst_4 = arith.constant dense<0.000000e+00> : vector<128xf32>
    %4 = vector.multi_reduction <add>, %3, %cst_4 [0] : vector<100x128xf32> to vector<128xf32>
    %5 = vector.shape_cast %4 : vector<128xf32> to vector<1x128xf32>
    %c0_5 = arith.constant 0 : index
    %c0_6 = arith.constant 0 : index
    %c0_7 = arith.constant 0 : index
    %6 = vector.load %arg3[%c0_5, %c0_6, %c0_7] : memref<1x1x128xf32, #tpu.memory_space<vmem>>, vector<1x1x128xf32>
    %7 = vector.shape_cast %6 : vector<1x1x128xf32> to vector<1x128xf32>
    %8 = vector.shape_cast %5 : vector<1x128xf32> to vector<1x1x128xf32>
    tpu.vector_store %arg3[%c0_5, %c0_6, %c0_7], %8 {strides = array<i32>} : memref<1x1x128xf32, #tpu.memory_space<vmem>>, vector<1x1x128xf32>,
    %9 = arith.mulf %3, %3 : vector<100x128xf32>
    %cst_8 = arith.constant dense<0.000000e+00> : vector<128xf32>
    %10 = vector.multi_reduction <add>, %9, %cst_8 [0] : vector<100x128xf32> to vector<128xf32>
    %11 = vector.shape_cast %10 : vector<128xf32> to vector<1x128xf32>
    %c0_9 = arith.constant 0 : index
    %c0_10 = arith.constant 0 : index
    %c0_11 = arith.constant 0 : index
    %12 = vector.load %arg4[%c0_9, %c0_10, %c0_11] : memref<1x1x128xf32, #tpu.memory_space<vmem>>, vector<1x1x128xf32>
    %13 = vector.shape_cast %12 : vector<1x1x128xf32> to vector<1x128xf32>
    %14 = vector.shape_cast %11 : vector<1x128xf32> to vector<1x1x128xf32>
    tpu.vector_store %arg4[%c0_9, %c0_10, %c0_11], %14 {strides = array<i32>} : memref<1x1x128xf32, #tpu.memory_space<vmem>>, vector<1x1x128xf32>,
    return
  }
  func.func @transform_0(%arg0: i32) -> (i32, i32, i32) {
    %c0_i32 = arith.constant 0 : i32
    %c0_i32_0 = arith.constant 0 : i32
    %c0_i32_1 = arith.constant 0 : i32
    return %arg0, %c0_i32, %c0_i32_0 : i32, i32, i32
  }
  func.func @transform_1(%arg0: i32) -> (i32, i32) {
    %c0_i32 = arith.constant 0 : i32
    %c0_i32_0 = arith.constant 0 : i32
    %c0_i32_1 = arith.constant 0 : i32
    return %c0_i32, %c0_i32_0 : i32, i32
  }
  func.func @transform_2(%arg0: i32) -> (i32, i32, i32) {
    %c0_i32 = arith.constant 0 : i32
    %c0_i32_0 = arith.constant 0 : i32
    %c0_i32_1 = arith.constant 0 : i32
    return %arg0, %c0_i32, %c0_i32_0 : i32, i32, i32
  }
  func.func @transform_3(%arg0: i32) -> (i32, i32, i32) {
    %c0_i32 = arith.constant 0 : i32
    %c0_i32_0 = arith.constant 0 : i32
    %c0_i32_1 = arith.constant 0 : i32
    return %arg0, %c0_i32, %c0_i32_0 : i32, i32, i32
  }
}

module attributes {stable_mosaic.version = 11 : i64} {
  func.func @norm_pool_kernel(%arg0: i32, %arg1: memref<1x100x160xbf16, #tpu.memory_space<vmem>>, %arg2: memref<160x128xbf16, #tpu.memory_space<vmem>>, %arg3: memref<1x128xf32, #tpu.memory_space<vmem>>, %arg4: memref<1x128xf32, #tpu.memory_space<vmem>>, %arg5: memref<1x128xf32, #tpu.memory_space<vmem>>, %arg6: memref<1x128xf32, #tpu.memory_space<vmem>>, %arg7: memref<25x100xf32, #tpu.memory_space<vmem>>, %arg8: memref<1x25x128xbf16, #tpu.memory_space<vmem>>) attributes {dimension_semantics = [#tpu.dimension_semantics<parallel>], iteration_bounds = array<i64: 2>, scalar_prefetch = 0 : i64, scratch_operands = 0 : i64, tpu.core_type = #tpu.core_type<tc>, window_params = [{transform_indices = @transform_0, window_bounds = array<i64: 1, 100, 160>}, {pipeline_mode = #tpu.pipeline_mode<synchronous>, transform_indices = @transform_1, window_bounds = array<i64: 160, 128>}, {pipeline_mode = #tpu.pipeline_mode<synchronous>, transform_indices = @transform_2, window_bounds = array<i64: 1, 128>}, {pipeline_mode = #tpu.pipeline_mode<synchronous>, transform_indices = @transform_3, window_bounds = array<i64: 1, 128>}, {pipeline_mode = #tpu.pipeline_mode<synchronous>, transform_indices = @transform_4, window_bounds = array<i64: 1, 128>}, {pipeline_mode = #tpu.pipeline_mode<synchronous>, transform_indices = @transform_5, window_bounds = array<i64: 1, 128>}, {pipeline_mode = #tpu.pipeline_mode<synchronous>, transform_indices = @transform_6, window_bounds = array<i64: 25, 100>}, {transform_indices = @transform_7, window_bounds = array<i64: 1, 25, 128>}]} {
    %c0 = arith.constant 0 : index
    %c0_0 = arith.constant 0 : index
    %c0_1 = arith.constant 0 : index
    %0 = vector.load %arg1[%c0, %c0_0, %c0_1] : memref<1x100x160xbf16, #tpu.memory_space<vmem>>, vector<1x100x160xbf16>
    %1 = vector.shape_cast %0 : vector<1x100x160xbf16> to vector<100x160xbf16>
    %c0_2 = arith.constant 0 : index
    %c0_3 = arith.constant 0 : index
    %2 = vector.load %arg2[%c0_2, %c0_3] : memref<160x128xbf16, #tpu.memory_space<vmem>>, vector<160x128xbf16>
    %cst = arith.constant dense<0.000000e+00> : vector<100x128xf32>
    %3 = tpu.matmul %1, %2, %cst {dimension_numbers = #tpu.dot_dimension_numbers<[1], [0], [0], [1], [0, 0, 1, 1], [], []>} : vector<100x160xbf16>, vector<160x128xbf16>, vector<100x128xf32> -> vector<100x128xf32>
    %c0_4 = arith.constant 0 : index
    %c0_5 = arith.constant 0 : index
    %4 = vector.load %arg3[%c0_4, %c0_5] : memref<1x128xf32, #tpu.memory_space<vmem>>, vector<1x128xf32>
    %cst_6 = arith.constant 5.000000e-03 : f32
    %5 = vector.broadcast %cst_6 : f32 to vector<1x128xf32>
    %6 = arith.mulf %4, %5 : vector<1x128xf32>
    %c0_7 = arith.constant 0 : index
    %c0_8 = arith.constant 0 : index
    %7 = vector.load %arg4[%c0_7, %c0_8] : memref<1x128xf32, #tpu.memory_space<vmem>>, vector<1x128xf32>
    %cst_9 = arith.constant 5.000000e-03 : f32
    %8 = vector.broadcast %cst_9 : f32 to vector<1x128xf32>
    %9 = arith.mulf %7, %8 : vector<1x128xf32>
    %10 = arith.mulf %6, %6 : vector<1x128xf32>
    %11 = arith.subf %9, %10 : vector<1x128xf32>
    %cst_10 = arith.constant 0.000000e+00 : f32
    %12 = vector.broadcast %cst_10 : f32 to vector<1x128xf32>
    %13 = arith.maximumf %11, %12 : vector<1x128xf32>
    %c0_11 = arith.constant 0 : index
    %c0_12 = arith.constant 0 : index
    %14 = vector.load %arg5[%c0_11, %c0_12] : memref<1x128xf32, #tpu.memory_space<vmem>>, vector<1x128xf32>
    %15 = vector.broadcast %6 : vector<1x128xf32> to vector<100x128xf32>
    %16 = arith.subf %3, %15 : vector<100x128xf32>
    %17 = vector.broadcast %14 : vector<1x128xf32> to vector<100x128xf32>
    %18 = arith.mulf %17, %16 : vector<100x128xf32>
    %cst_13 = arith.constant 9.99999974E-6 : f32
    %19 = vector.broadcast %cst_13 : f32 to vector<1x128xf32>
    %20 = arith.addf %13, %19 : vector<1x128xf32>
    %21 = math.rsqrt %20 : vector<1x128xf32>
    %22 = vector.broadcast %21 : vector<1x128xf32> to vector<100x128xf32>
    %23 = arith.mulf %18, %22 : vector<100x128xf32>
    %c0_14 = arith.constant 0 : index
    %c0_15 = arith.constant 0 : index
    %24 = vector.load %arg6[%c0_14, %c0_15] : memref<1x128xf32, #tpu.memory_space<vmem>>, vector<1x128xf32>
    %25 = vector.broadcast %24 : vector<1x128xf32> to vector<100x128xf32>
    %26 = arith.addf %23, %25 : vector<100x128xf32>
    %cst_16 = arith.constant 5.000000e-01 : f32
    %27 = vector.broadcast %cst_16 : f32 to vector<100x128xf32>
    %28 = arith.mulf %27, %26 : vector<100x128xf32>
    %29 = math.tanh %28 : vector<100x128xf32>
    %cst_17 = arith.constant 5.000000e-01 : f32
    %30 = vector.broadcast %cst_17 : f32 to vector<100x128xf32>
    %31 = arith.mulf %30, %29 : vector<100x128xf32>
    %cst_18 = arith.constant 5.000000e-01 : f32
    %32 = vector.broadcast %cst_18 : f32 to vector<100x128xf32>
    %33 = arith.addf %31, %32 : vector<100x128xf32>
    %c0_19 = arith.constant 0 : index
    %c0_20 = arith.constant 0 : index
    %34 = vector.load %arg7[%c0_19, %c0_20] : memref<25x100xf32, #tpu.memory_space<vmem>>, vector<25x100xf32>
    %cst_21 = arith.constant dense<0.000000e+00> : vector<25x128xf32>
    %35 = tpu.matmul %34, %33, %cst_21 {dimension_numbers = #tpu.dot_dimension_numbers<[1], [0], [0], [1], [0, 0, 1, 1], [], []>} : vector<25x100xf32>, vector<100x128xf32>, vector<25x128xf32> -> vector<25x128xf32>
    %36 = arith.truncf %35 : vector<25x128xf32> to vector<25x128xbf16>
    %c0_22 = arith.constant 0 : index
    %c0_23 = arith.constant 0 : index
    %c0_24 = arith.constant 0 : index
    %37 = vector.load %arg8[%c0_22, %c0_23, %c0_24] : memref<1x25x128xbf16, #tpu.memory_space<vmem>>, vector<1x25x128xbf16>
    %38 = vector.shape_cast %37 : vector<1x25x128xbf16> to vector<25x128xbf16>
    %39 = vector.shape_cast %36 : vector<25x128xbf16> to vector<1x25x128xbf16>
    tpu.vector_store %arg8[%c0_22, %c0_23, %c0_24], %39 {strides = array<i32>} : memref<1x25x128xbf16, #tpu.memory_space<vmem>>, vector<1x25x128xbf16>,
    return
  }
  func.func @transform_0(%arg0: i32) -> (i32, i32, i32) {
    %c0_i32 = arith.constant 0 : i32
    %c0_i32_0 = arith.constant 0 : i32
    %c0_i32_1 = arith.constant 0 : i32
    return %arg0, %c0_i32, %c0_i32_0 : i32, i32, i32
  }
  func.func @transform_1(%arg0: i32) -> (i32, i32) {
    %c0_i32 = arith.constant 0 : i32
    %c0_i32_0 = arith.constant 0 : i32
    %c0_i32_1 = arith.constant 0 : i32
    return %c0_i32, %c0_i32_0 : i32, i32
  }
  func.func @transform_2(%arg0: i32) -> (i32, i32) {
    %c0_i32 = arith.constant 0 : i32
    %c0_i32_0 = arith.constant 0 : i32
    %c0_i32_1 = arith.constant 0 : i32
    return %c0_i32, %c0_i32_0 : i32, i32
  }
  func.func @transform_3(%arg0: i32) -> (i32, i32) {
    %c0_i32 = arith.constant 0 : i32
    %c0_i32_0 = arith.constant 0 : i32
    %c0_i32_1 = arith.constant 0 : i32
    return %c0_i32, %c0_i32_0 : i32, i32
  }
  func.func @transform_4(%arg0: i32) -> (i32, i32) {
    %c0_i32 = arith.constant 0 : i32
    %c0_i32_0 = arith.constant 0 : i32
    %c0_i32_1 = arith.constant 0 : i32
    return %c0_i32, %c0_i32_0 : i32, i32
  }
  func.func @transform_5(%arg0: i32) -> (i32, i32) {
    %c0_i32 = arith.constant 0 : i32
    %c0_i32_0 = arith.constant 0 : i32
    %c0_i32_1 = arith.constant 0 : i32
    return %c0_i32, %c0_i32_0 : i32, i32
  }
  func.func @transform_6(%arg0: i32) -> (i32, i32) {
    %c0_i32 = arith.constant 0 : i32
    %c0_i32_0 = arith.constant 0 : i32
    %c0_i32_1 = arith.constant 0 : i32
    return %c0_i32, %c0_i32_0 : i32, i32
  }
  func.func @transform_7(%arg0: i32) -> (i32, i32, i32) {
    %c0_i32 = arith.constant 0 : i32
    %c0_i32_0 = arith.constant 0 : i32
    %c0_i32_1 = arith.constant 0 : i32
    return %arg0, %c0_i32, %c0_i32_0 : i32, i32, i32
  }
}

module attributes {stable_mosaic.version = 11 : i64} {
  func.func @fc_chain_kernel(%arg0: memref<2x3200xbf16, #tpu.memory_space<vmem>>, %arg1: memref<3200x128xbf16, #tpu.memory_space<vmem>>, %arg2: memref<1x128xf32, #tpu.memory_space<vmem>>, %arg3: memref<1x128xf32, #tpu.memory_space<vmem>>, %arg4: memref<128x128xbf16, #tpu.memory_space<vmem>>, %arg5: memref<1x128xf32, #tpu.memory_space<vmem>>, %arg6: memref<1x128xf32, #tpu.memory_space<vmem>>, %arg7: memref<128x128xbf16, #tpu.memory_space<vmem>>, %arg8: memref<1x128xf32, #tpu.memory_space<vmem>>, %arg9: memref<2x128xf32, #tpu.memory_space<vmem>>) attributes {dimension_semantics = [], scalar_prefetch = 0 : i64, scratch_operands = 0 : i64, tpu.core_type = #tpu.core_type<tc>} {
    %c0 = arith.constant 0 : index
    %c0_0 = arith.constant 0 : index
    %0 = vector.load %arg0[%c0, %c0_0] : memref<2x3200xbf16, #tpu.memory_space<vmem>>, vector<2x3200xbf16>
    %c0_1 = arith.constant 0 : index
    %c0_2 = arith.constant 0 : index
    %1 = vector.load %arg1[%c0_1, %c0_2] : memref<3200x128xbf16, #tpu.memory_space<vmem>>, vector<3200x128xbf16>
    %cst = arith.constant dense<0.000000e+00> : vector<2x128xf32>
    %2 = tpu.matmul %0, %1, %cst {dimension_numbers = #tpu.dot_dimension_numbers<[1], [0], [0], [1], [0, 0, 1, 1], [], []>} : vector<2x3200xbf16>, vector<3200x128xbf16>, vector<2x128xf32> -> vector<2x128xf32>
    %c0_3 = arith.constant 0 : index
    %c0_4 = arith.constant 0 : index
    %3 = vector.load %arg2[%c0_3, %c0_4] : memref<1x128xf32, #tpu.memory_space<vmem>>, vector<1x128xf32>
    %c0_5 = arith.constant 0 : index
    %c0_6 = arith.constant 0 : index
    %4 = vector.load %arg3[%c0_5, %c0_6] : memref<1x128xf32, #tpu.memory_space<vmem>>, vector<1x128xf32>
    %cst_7 = arith.constant dense<0.000000e+00> : vector<128xf32>
    %5 = vector.multi_reduction <add>, %2, %cst_7 [0] : vector<2x128xf32> to vector<128xf32>
    %6 = vector.shape_cast %5 : vector<128xf32> to vector<1x128xf32>
    %7 = arith.mulf %2, %2 : vector<2x128xf32>
    %cst_8 = arith.constant dense<0.000000e+00> : vector<128xf32>
    %8 = vector.multi_reduction <add>, %7, %cst_8 [0] : vector<2x128xf32> to vector<128xf32>
    %9 = vector.shape_cast %8 : vector<128xf32> to vector<1x128xf32>
    %cst_9 = arith.constant 5.000000e-01 : f32
    %10 = vector.broadcast %cst_9 : f32 to vector<1x128xf32>
    %11 = arith.mulf %6, %10 : vector<1x128xf32>
    %cst_10 = arith.constant 5.000000e-01 : f32
    %12 = vector.broadcast %cst_10 : f32 to vector<1x128xf32>
    %13 = arith.mulf %9, %12 : vector<1x128xf32>
    %14 = arith.mulf %11, %11 : vector<1x128xf32>
    %15 = arith.subf %13, %14 : vector<1x128xf32>
    %cst_11 = arith.constant 0.000000e+00 : f32
    %16 = vector.broadcast %cst_11 : f32 to vector<1x128xf32>
    %17 = arith.maximumf %15, %16 : vector<1x128xf32>
    %18 = vector.broadcast %11 : vector<1x128xf32> to vector<2x128xf32>
    %19 = arith.subf %2, %18 : vector<2x128xf32>
    %20 = vector.broadcast %3 : vector<1x128xf32> to vector<2x128xf32>
    %21 = arith.mulf %20, %19 : vector<2x128xf32>
    %cst_12 = arith.constant 9.99999974E-6 : f32
    %22 = vector.broadcast %cst_12 : f32 to vector<1x128xf32>
    %23 = arith.addf %17, %22 : vector<1x128xf32>
    %24 = math.rsqrt %23 : vector<1x128xf32>
    %25 = vector.broadcast %24 : vector<1x128xf32> to vector<2x128xf32>
    %26 = arith.mulf %21, %25 : vector<2x128xf32>
    %27 = vector.broadcast %4 : vector<1x128xf32> to vector<2x128xf32>
    %28 = arith.addf %26, %27 : vector<2x128xf32>
    %cst_13 = arith.constant 5.000000e-01 : f32
    %29 = vector.broadcast %cst_13 : f32 to vector<2x128xf32>
    %30 = arith.mulf %29, %28 : vector<2x128xf32>
    %31 = math.tanh %30 : vector<2x128xf32>
    %cst_14 = arith.constant 5.000000e-01 : f32
    %32 = vector.broadcast %cst_14 : f32 to vector<2x128xf32>
    %33 = arith.mulf %32, %31 : vector<2x128xf32>
    %cst_15 = arith.constant 5.000000e-01 : f32
    %34 = vector.broadcast %cst_15 : f32 to vector<2x128xf32>
    %35 = arith.addf %33, %34 : vector<2x128xf32>
    %36 = arith.truncf %35 : vector<2x128xf32> to vector<2x128xbf16>
    %c0_16 = arith.constant 0 : index
    %c0_17 = arith.constant 0 : index
    %37 = vector.load %arg4[%c0_16, %c0_17] : memref<128x128xbf16, #tpu.memory_space<vmem>>, vector<128x128xbf16>
    %cst_18 = arith.constant dense<0.000000e+00> : vector<2x128xf32>
    %38 = tpu.matmul %36, %37, %cst_18 {dimension_numbers = #tpu.dot_dimension_numbers<[1], [0], [0], [1], [0, 0, 1, 1], [], []>} : vector<2x128xbf16>, vector<128x128xbf16>, vector<2x128xf32> -> vector<2x128xf32>
    %c0_19 = arith.constant 0 : index
    %c0_20 = arith.constant 0 : index
    %39 = vector.load %arg5[%c0_19, %c0_20] : memref<1x128xf32, #tpu.memory_space<vmem>>, vector<1x128xf32>
    %c0_21 = arith.constant 0 : index
    %c0_22 = arith.constant 0 : index
    %40 = vector.load %arg6[%c0_21, %c0_22] : memref<1x128xf32, #tpu.memory_space<vmem>>, vector<1x128xf32>
    %cst_23 = arith.constant dense<0.000000e+00> : vector<128xf32>
    %41 = vector.multi_reduction <add>, %38, %cst_23 [0] : vector<2x128xf32> to vector<128xf32>
    %42 = vector.shape_cast %41 : vector<128xf32> to vector<1x128xf32>
    %43 = arith.mulf %38, %38 : vector<2x128xf32>
    %cst_24 = arith.constant dense<0.000000e+00> : vector<128xf32>
    %44 = vector.multi_reduction <add>, %43, %cst_24 [0] : vector<2x128xf32> to vector<128xf32>
    %45 = vector.shape_cast %44 : vector<128xf32> to vector<1x128xf32>
    %cst_25 = arith.constant 5.000000e-01 : f32
    %46 = vector.broadcast %cst_25 : f32 to vector<1x128xf32>
    %47 = arith.mulf %42, %46 : vector<1x128xf32>
    %cst_26 = arith.constant 5.000000e-01 : f32
    %48 = vector.broadcast %cst_26 : f32 to vector<1x128xf32>
    %49 = arith.mulf %45, %48 : vector<1x128xf32>
    %50 = arith.mulf %47, %47 : vector<1x128xf32>
    %51 = arith.subf %49, %50 : vector<1x128xf32>
    %cst_27 = arith.constant 0.000000e+00 : f32
    %52 = vector.broadcast %cst_27 : f32 to vector<1x128xf32>
    %53 = arith.maximumf %51, %52 : vector<1x128xf32>
    %54 = vector.broadcast %47 : vector<1x128xf32> to vector<2x128xf32>
    %55 = arith.subf %38, %54 : vector<2x128xf32>
    %56 = vector.broadcast %39 : vector<1x128xf32> to vector<2x128xf32>
    %57 = arith.mulf %56, %55 : vector<2x128xf32>
    %cst_28 = arith.constant 9.99999974E-6 : f32
    %58 = vector.broadcast %cst_28 : f32 to vector<1x128xf32>
    %59 = arith.addf %53, %58 : vector<1x128xf32>
    %60 = math.rsqrt %59 : vector<1x128xf32>
    %61 = vector.broadcast %60 : vector<1x128xf32> to vector<2x128xf32>
    %62 = arith.mulf %57, %61 : vector<2x128xf32>
    %63 = vector.broadcast %40 : vector<1x128xf32> to vector<2x128xf32>
    %64 = arith.addf %62, %63 : vector<2x128xf32>
    %cst_29 = arith.constant 5.000000e-01 : f32
    %65 = vector.broadcast %cst_29 : f32 to vector<2x128xf32>
    %66 = arith.mulf %65, %64 : vector<2x128xf32>
    %67 = math.tanh %66 : vector<2x128xf32>
    %cst_30 = arith.constant 5.000000e-01 : f32
    %68 = vector.broadcast %cst_30 : f32 to vector<2x128xf32>
    %69 = arith.mulf %68, %67 : vector<2x128xf32>
    %cst_31 = arith.constant 5.000000e-01 : f32
    %70 = vector.broadcast %cst_31 : f32 to vector<2x128xf32>
    %71 = arith.addf %69, %70 : vector<2x128xf32>
    %72 = arith.truncf %71 : vector<2x128xf32> to vector<2x128xbf16>
    %c0_32 = arith.constant 0 : index
    %c0_33 = arith.constant 0 : index
    %73 = vector.load %arg7[%c0_32, %c0_33] : memref<128x128xbf16, #tpu.memory_space<vmem>>, vector<128x128xbf16>
    %cst_34 = arith.constant dense<0.000000e+00> : vector<2x128xf32>
    %74 = tpu.matmul %72, %73, %cst_34 {dimension_numbers = #tpu.dot_dimension_numbers<[1], [0], [0], [1], [0, 0, 1, 1], [], []>} : vector<2x128xbf16>, vector<128x128xbf16>, vector<2x128xf32> -> vector<2x128xf32>
    %c0_35 = arith.constant 0 : index
    %c0_36 = arith.constant 0 : index
    %75 = vector.load %arg8[%c0_35, %c0_36] : memref<1x128xf32, #tpu.memory_space<vmem>>, vector<1x128xf32>
    %76 = vector.broadcast %75 : vector<1x128xf32> to vector<2x128xf32>
    %77 = arith.addf %74, %76 : vector<2x128xf32>
    %c0_37 = arith.constant 0 : index
    %c0_38 = arith.constant 0 : index
    %78 = vector.load %arg9[%c0_37, %c0_38] : memref<2x128xf32, #tpu.memory_space<vmem>>, vector<2x128xf32>
    tpu.vector_store %arg9[%c0_37, %c0_38], %77 {strides = array<i32>} : memref<2x128xf32, #tpu.memory_space<vmem>>, vector<2x128xf32>,
    return
  }
}

</mosaic_0001>

<bundles_post_ra>
// kernel: lenet_forward.5
= control target key start
LH: loop header
LB: loop body
LE: loop exit
PB: predicated region body
PF: predicated region fallthrough
CT: control target
= control target key end

     0   :  { %s1942_s12 = smov 0   ;;  %s2415_s0 = inlined_call_operand.vmem [shape: bf16[2,784,32], index: 0, kind: input, shape index: {}]   ;;  %s2416_s1 = inlined_call_operand.vmem [shape: bf16[32,128], index: 1, kind: input, shape index: {}]   ;;  %s2417_s2 = inlined_call_operand.vmem [shape: f32[2,1,128], index: 2, kind: output, shape index: {0}]   ;;  %s2418_s3 = inlined_call_operand.vmem [shape: f32[2,1,128], index: 3, kind: output, shape index: {1}]  }
   0x1 LB: > { %s1487_s13 = sadd.s32 4294967295, %s1918_s12   ;;  %p1491_p0 = scmp.ge.s32.totalorder %s1918_s12, 1  ;;  %s1918_s12 = sphi %s1942_s12, %s14_s12  }
   0x2   : > { %p140_p1 = scmp.lt.s32.totalorder %s1918_s12, 3 }
   0x4   : > { %p141_p2 = pnand %p1491_p0, %p140_p1 }
   0x6   : > { %144 = sbr.rel (%p141_p2) target bundleno = 541 (0x21d), region = 28 }
   0xd   : > { %v1861_v0 = vld [vmem:[%s2416_s1] sm:$0xff]   ;;  %v1920_v1 = vmov 0.0   ;;  %v1862_v2 = vld [vmem:[%s2416_s1 + $0x8] sm:$0xff]   ;;  %vm1921_vm0 = vmmov 0   ;;  %p165_p3 = scmp.lt.s32.totalorder %s1487_s13, 1  ;;  %vm536_vm1 = vcmask 261120  }
   0xe   : > { %1646 = vmatprep.subr.bf16.mxu0 %v1920_v1  ;;  %1846 = vmatprep.subr.bf16.mxu1 %v1920_v1 }
   0xf   : > { %1647 = vmatpush3.bf16.msra.mxu0 %v1861_v0  ;;  %1650 = vmatprep.mubr.msk.bf16.mxu0 %vm1921_vm0, %v1920_v1  ;;  %s2426_s13 = smov (!%p165_p3, %s1487_s13), 1 }
  0x10   : > { %1648 = vmatprep.subr.bf16.mxu0 %v1920_v1  ;;  %1848 = vmatpush3.bf16.msra.mxu1 %v1861_v0  ;;  %s1850_s18 = smul.u32 392, %s2426_s13  ;;  %s172_s24 = scalar_lea.vmem %s2417_s2, %s2426_s13 }
  0x11   : > { %1847 = vmatprep.subr.bf16.mxu1 %v1920_v1  ;;  %1750 = vmatprep.mubr.msk.bf16.mxu1 %vm1921_vm0, %v1920_v1  ;;  %s175_s27 = scalar_lea.vmem %s2418_s3, %s2426_s13 }
  0x12   : > { %s1970_s21 = scalar_lea.vmem %s2415_s0, %s1850_s18 }
  0x13   : > { %1649 = vmatpush3.bf16.msra.mxu0 %v1862_v2  ;;  %v1863_v3 = vld [vmem:[%s1970_s21] sm:$0xff]   ;;  %v1864_v4 = vld [vmem:[%s1970_s21 + $0x8] sm:$0xff]   ;;  %v1865_v6 = vld [vmem:[%s1970_s21 + $0x10] sm:$0xff]  }
  0x14   : > { %1849 = vmatpush3.bf16.msra.mxu1 %v1862_v2  ;;  %v1876_v5 = vld [vmem:[%s1970_s21 + $0xc8] sm:$0xff]   ;;  %v1878_v7 = vld [vmem:[%s1970_s21 + $0xd0] sm:$0xff]   ;;  %v1866_v8 = vld [vmem:[%s1970_s21 + $0x18] sm:$0xff]  }
  0x15   : > { %v1880_v9 = vld [vmem:[%s1970_s21 + $0xd8] sm:$0xff]   ;;  %v1867_v10 = vld [vmem:[%s1970_s21 + $0x20] sm:$0xff]   ;;  %v1868_v12 = vld [vmem:[%s1970_s21 + $0x28] sm:$0xff]  }
  0x16   : > { %1651 = vmatmul.mubr.msk.bf16.vlgmr.msra.gmra.mrb[0].mxu0 %vm536_vm1, %v1863_v3  ;;  %v1882_v11 = vld [vmem:[%s1970_s21 + $0xe0] sm:$0xff]   ;;  %v1884_v13 = vld [vmem:[%s1970_s21 + $0xe8] sm:$0xff]   ;;  %v1869_v14 = vld [vmem:[%s1970_s21 + $0x30] sm:$0xff]  }
  0x17   : > { %1654 = vmatprep.mubr.msk.bf16.mxu0 %vm1921_vm0, %v1920_v1  ;;  %1751 = vmatmul.mubr.msk.bf16.vlgmr.msra.gmra.mrb[0].mxu1 %vm536_vm1, %v1876_v5  ;;  %v1886_v15 = vld [vmem:[%s1970_s21 + $0xf0] sm:$0xff]   ;;  %v1870_v16 = vld [vmem:[%s1970_s21 + $0x38] sm:$0xff]   ;;  %v1871_v18 = vld [vmem:[%s1970_s21 + $0x40] sm:$0xff]  }
  0x18   : > { %1754 = vmatprep.mubr.msk.bf16.mxu1 %vm1921_vm0, %v1920_v1  ;;  %v1888_v17 = vld [vmem:[%s1970_s21 + $0xf8] sm:$0xff]   ;;  %v1890_v19 = vld [vmem:[%s1970_s21 + $0x100] sm:$0xff]   ;;  %v1872_v20 = vld [vmem:[%s1970_s21 + $0x48] sm:$0xff]  }
  0x19   : > { %v1892_v21 = vld [vmem:[%s1970_s21 + $0x108] sm:$0xff]   ;;  %v1873_v22 = vld [vmem:[%s1970_s21 + $0x50] sm:$0xff]   ;;  %v1874_v24 = vld [vmem:[%s1970_s21 + $0x58] sm:$0xff]  }
  0x1a   : > { %v1894_v23 = vld [vmem:[%s1970_s21 + $0x110] sm:$0xff]   ;;  %v1896_v25 = vld [vmem:[%s1970_s21 + $0x118] sm:$0xff]   ;;  %v1875_v26 = vld [vmem:[%s1970_s21 + $0x60] sm:$0xff]  }
  0x1b   : > { %v1898_v27 = vld [vmem:[%s1970_s21 + $0x120] sm:$0xff]   ;;  %v1877_v28 = vld [vmem:[%s1970_s21 + $0x68] sm:$0xff]   ;;  %v1879_v30 = vld [vmem:[%s1970_s21 + $0x70] sm:$0xff]  }
  0x1c   : > { %v1900_v29 = vld [vmem:[%s1970_s21 + $0x128] sm:$0xff]   ;;  %v1901_v31 = vld [vmem:[%s1970_s21 + $0x130] sm:$0xff]   ;;  %v1881_v32 = vld [vmem:[%s1970_s21 + $0x78] sm:$0xff]  }
  0x1d   : > { %v1902_v33 = vld [vmem:[%s1970_s21 + $0x138] sm:$0xff]   ;;  %v1883_v34 = vld [vmem:[%s1970_s21 + $0x80] sm:$0xff]   ;;  %v1885_v36 = vld [vmem:[%s1970_s21 + $0x88] sm:$0xff]  }
  0x1e   : > { %1655 = vmatmul.mubr.msk.bf16.gmra.mrb[4].mxu0 %vm536_vm1, %v1864_v4  ;;  %v1903_v35 = vld [vmem:[%s1970_s21 + $0x140] sm:$0xff]   ;;  %v1904_v37 = vld [vmem:[%s1970_s21 + $0x148] sm:$0xff]   ;;  %v1887_v38 = vld [vmem:[%s1970_s21 + $0x90] sm:$0xff]  }
  0x1f   : > { %1658 = vmatprep.mubr.msk.bf16.mxu0 %vm1921_vm0, %v1920_v1  ;;  %1755 = vmatmul.mubr.msk.bf16.gmra.mrb[4].mxu1 %vm536_vm1, %v1878_v7  ;;  %v1905_v39 = vld [vmem:[%s1970_s21 + $0x150] sm:$0xff]   ;;  %v1889_v40 = vld [vmem:[%s1970_s21 + $0x98] sm:$0xff]   ;;  %v1891_v42 = vld [vmem:[%s1970_s21 + $0xa0] sm:$0xff]  }
  0x20   : > { %1758 = vmatprep.mubr.msk.bf16.mxu1 %vm1921_vm0, %v1920_v1  ;;  %v1906_v41 = vld [vmem:[%s1970_s21 + $0x158] sm:$0xff]   ;;  %v1907_v43 = vld [vmem:[%s1970_s21 + $0x160] sm:$0xff]   ;;  %v1893_v44 = vld [vmem:[%s1970_s21 + $0xa8] sm:$0xff]  }
  0x21   : > { %v1908_v45 = vld [vmem:[%s1970_s21 + $0x168] sm:$0xff]   ;;  %v1895_v46 = vld [vmem:[%s1970_s21 + $0xb0] sm:$0xff]   ;;  %v1897_v48 = vld [vmem:[%s1970_s21 + $0xb8] sm:$0xff]  }
  0x22   : > { %v1909_v47 = vld [vmem:[%s1970_s21 + $0x170] sm:$0xff]   ;;  %v1910_v49 = vld [vmem:[%s1970_s21 + $0x178] sm:$0xff]   ;;  %v1899_v50 = vld [vmem:[%s1970_s21 + $0xc0] sm:$0xff]  }
  0x23   : > { %v1911_v51 = vld [vmem:[%s1970_s21 + $0x180] sm:$0xff]  }
  0x26   : > { %1659 = vmatmul.mubr.msk.bf16.gmra.mrb[8].mxu0 %vm536_vm1, %v1865_v6 }
  0x27   : > { %1662 = vmatprep.mubr.msk.bf16.mxu0 %vm1921_vm0, %v1920_v1  ;;  %1759 = vmatmul.mubr.msk.bf16.gmra.mrb[8].mxu1 %vm536_vm1, %v1880_v9 }
  0x28   : > { %1762 = vmatprep.mubr.msk.bf16.mxu1 %vm1921_vm0, %v1920_v1 }
  0x2e   : > { %1663 = vmatmul.mubr.msk.bf16.gmra.mrb[12].mxu0 %vm536_vm1, %v1866_v8 }
  0x2f   : > { %1666 = vmatprep.mubr.msk.bf16.mxu0 %vm1921_vm0, %v1920_v1  ;;  %1763 = vmatmul.mubr.msk.bf16.gmra.mrb[12].mxu1 %vm536_vm1, %v1882_v11 }
  0x30   : > { %1766 = vmatprep.mubr.msk.bf16.mxu1 %vm1921_vm0, %v1920_v1 }
  0x36   : > { %1667 = vmatmul.mubr.msk.bf16.gmra.mrb[16].mxu0 %vm536_vm1, %v1867_v10 }
  0x37   : > { %1670 = vmatprep.mubr.msk.bf16.mxu0 %vm1921_vm0, %v1920_v1  ;;  %1767 = vmatmul.mubr.msk.bf16.gmra.mrb[16].mxu1 %vm536_vm1, %v1884_v13 }
  0x38   : > { %1770 = vmatprep.mubr.msk.bf16.mxu1 %vm1921_vm0, %v1920_v1 }
  0x3e   : > { %1671 = vmatmul.mubr.msk.bf16.gmra.mrb[20].mxu0 %vm536_vm1, %v1868_v12 }
  0x3f   : > { %1674 = vmatprep.mubr.msk.bf16.mxu0 %vm1921_vm0, %v1920_v1  ;;  %1771 = vmatmul.mubr.msk.bf16.gmra.mrb[20].mxu1 %vm536_vm1, %v1886_v15 }
  0x40   : > { %1774 = vmatprep.mubr.msk.bf16.mxu1 %vm1921_vm0, %v1920_v1 }
  0x46   : > { %1675 = vmatmul.mubr.msk.bf16.gmra.mrb[24].mxu0 %vm536_vm1, %v1869_v14 }
  0x47   : > { %1678 = vmatprep.mubr.msk.bf16.mxu0 %vm1921_vm0, %v1920_v1  ;;  %1775 = vmatmul.mubr.msk.bf16.gmra.mrb[24].mxu1 %vm536_vm1, %v1888_v17 }
  0x48   : > { %1778 = vmatprep.mubr.msk.bf16.mxu1 %vm1921_vm0, %v1920_v1 }
  0x4e   : > { %1679 = vmatmul.mubr.msk.bf16.gmra.mrb[28].mxu0 %vm536_vm1, %v1870_v16 }
  0x4f   : > { %1682 = vmatprep.mubr.msk.bf16.mxu0 %vm1921_vm0, %v1920_v1  ;;  %1779 = vmatmul.mubr.msk.bf16.gmra.mrb[28].mxu1 %vm536_vm1, %v1890_v19 }
  0x50   : > { %1782 = vmatprep.mubr.msk.bf16.mxu1 %vm1921_vm0, %v1920_v1 }
  0x56   : > { %1683 = vmatmul.mubr.msk.bf16.gmra.mrb[32].mxu0 %vm536_vm1, %v1871_v18 }
  0x57   : > { %1686 = vmatprep.mubr.msk.bf16.mxu0 %vm1921_vm0, %v1920_v1  ;;  %1783 = vmatmul.mubr.msk.bf16.gmra.mrb[32].mxu1 %vm536_vm1, %v1892_v21 }
  0x58   : > { %1786 = vmatprep.mubr.msk.bf16.mxu1 %vm1921_vm0, %v1920_v1 }
  0x5e   : > { %1687 = vmatmul.mubr.msk.bf16.gmra.mrb[36].mxu0 %vm536_vm1, %v1872_v20 }
  0x5f   : > { %1690 = vmatprep.mubr.msk.bf16.mxu0 %vm1921_vm0, %v1920_v1  ;;  %1787 = vmatmul.mubr.msk.bf16.gmra.mrb[36].mxu1 %vm536_vm1, %v1894_v23 }
  0x60   : > { %1790 = vmatprep.mubr.msk.bf16.mxu1 %vm1921_vm0, %v1920_v1 }
  0x66   : > { %1691 = vmatmul.mubr.msk.bf16.gmra.mrb[40].mxu0 %vm536_vm1, %v1873_v22 }
  0x67   : > { %1694 = vmatprep.mubr.msk.bf16.mxu0 %vm1921_vm0, %v1920_v1  ;;  %1791 = vmatmul.mubr.msk.bf16.gmra.mrb[40].mxu1 %vm536_vm1, %v1896_v25 }
  0x68   : > { %1794 = vmatprep.mubr.msk.bf16.mxu1 %vm1921_vm0, %v1920_v1 }
  0x6e   : > { %1695 = vmatmul.mubr.msk.bf16.gmra.mrb[44].mxu0 %vm536_vm1, %v1874_v24 }
  0x6f   : > { %1698 = vmatprep.mubr.msk.bf16.mxu0 %vm1921_vm0, %v1920_v1  ;;  %1795 = vmatmul.mubr.msk.bf16.gmra.mrb[44].mxu1 %vm536_vm1, %v1898_v27 }
  0x70   : > { %1798 = vmatprep.mubr.msk.bf16.mxu1 %vm1921_vm0, %v1920_v1 }
  0x76   : > { %1699 = vmatmul.mubr.msk.bf16.gmra.mrb[48].mxu0 %vm536_vm1, %v1875_v26 }
  0x77   : > { %1702 = vmatprep.mubr.msk.bf16.mxu0 %vm1921_vm0, %v1920_v1  ;;  %1799 = vmatmul.mubr.msk.bf16.gmra.mrb[48].mxu1 %vm536_vm1, %v1900_v29 }
  0x78   : > { %1802 = vmatprep.mubr.msk.bf16.mxu1 %vm1921_vm0, %v1920_v1 }
  0x7e   : > { %1703 = vmatmul.mubr.msk.bf16.gmra.mrb[52].mxu0 %vm536_vm1, %v1877_v28 }
  0x7f   : > { %1706 = vmatprep.mubr.msk.bf16.mxu0 %vm1921_vm0, %v1920_v1  ;;  %1803 = vmatmul.mubr.msk.bf16.gmra.mrb[52].mxu1 %vm536_vm1, %v1901_v31 }
  0x80   : > { %1806 = vmatprep.mubr.msk.bf16.mxu1 %vm1921_vm0, %v1920_v1 }
  0x86   : > { %1707 = vmatmul.mubr.msk.bf16.gmra.mrb[56].mxu0 %vm536_vm1, %v1879_v30 }
  0x87   : > { %1710 = vmatprep.mubr.msk.bf16.mxu0 %vm1921_vm0, %v1920_v1  ;;  %1807 = vmatmul.mubr.msk.bf16.gmra.mrb[56].mxu1 %vm536_vm1, %v1902_v33 }
  0x88   : > { %1810 = vmatprep.mubr.msk.bf16.mxu1 %vm1921_vm0, %v1920_v1 }
  0x8e   : > { %1711 = vmatmul.mubr.msk.bf16.gmra.mrb[60].mxu0 %vm536_vm1, %v1881_v32 }
  0x8f   : > { %1714 = vmatprep.mubr.msk.bf16.mxu0 %vm1921_vm0, %v1920_v1  ;;  %1811 = vmatmul.mubr.msk.bf16.gmra.mrb[60].mxu1 %vm536_vm1, %v1903_v35 }
  0x90   : > { %1814 = vmatprep.mubr.msk.bf16.mxu1 %vm1921_vm0, %v1920_v1 }
  0x96   : > { %1715 = vmatmul.mubr.msk.bf16.gmra.mrb[64].mxu0 %vm536_vm1, %v1883_v34 }
  0x97   : > { %1718 = vmatprep.mubr.msk.bf16.mxu0 %vm1921_vm0, %v1920_v1  ;;  %1815 = vmatmul.mubr.msk.bf16.gmra.mrb[64].mxu1 %vm536_vm1, %v1904_v37 }
  0x98   : > { %1818 = vmatprep.mubr.msk.bf16.mxu1 %vm1921_vm0, %v1920_v1 }
  0x9e   : > { %1719 = vmatmul.mubr.msk.bf16.gmra.mrb[68].mxu0 %vm536_vm1, %v1885_v36 }
  0x9f   : > { %1722 = vmatprep.mubr.msk.bf16.mxu0 %vm1921_vm0, %v1920_v1  ;;  %1819 = vmatmul.mubr.msk.bf16.gmra.mrb[68].mxu1 %vm536_vm1, %v1905_v39 }
  0xa0   : > { %1822 = vmatprep.mubr.msk.bf16.mxu1 %vm1921_vm0, %v1920_v1 }
  0xa6   : > { %1723 = vmatmul.mubr.msk.bf16.gmra.mrb[72].mxu0 %vm536_vm1, %v1887_v38 }
  0xa7   : > { %1726 = vmatprep.mubr.msk.bf16.mxu0 %vm1921_vm0, %v1920_v1  ;;  %1823 = vmatmul.mubr.msk.bf16.gmra.mrb[72].mxu1 %vm536_vm1, %v1906_v41 }
  0xa8   : > { %1826 = vmatprep.mubr.msk.bf16.mxu1 %vm1921_vm0, %v1920_v1 }
  0xae   : > { %1727 = vmatmul.mubr.msk.bf16.gmra.mrb[76].mxu0 %vm536_vm1, %v1889_v40 }
  0xaf   : > { %1730 = vmatprep.mubr.msk.bf16.mxu0 %vm1921_vm0, %v1920_v1  ;;  %1827 = vmatmul.mubr.msk.bf16.gmra.mrb[76].mxu1 %vm536_vm1, %v1907_v43 }
  0xb0   : > { %1830 = vmatprep.mubr.msk.bf16.mxu1 %vm1921_vm0, %v1920_v1 }
  0xb6   : > { %1731 = vmatmul.mubr.msk.bf16.gmra.mrb[80].mxu0 %vm536_vm1, %v1891_v42 }
  0xb7   : > { %1734 = vmatprep.mubr.msk.bf16.mxu0 %vm1921_vm0, %v1920_v1  ;;  %1831 = vmatmul.mubr.msk.bf16.gmra.mrb[80].mxu1 %vm536_vm1, %v1908_v45 }
  0xb8   : > { %1834 = vmatprep.mubr.msk.bf16.mxu1 %vm1921_vm0, %v1920_v1 }
  0xbe   : > { %1735 = vmatmul.mubr.msk.bf16.gmra.mrb[84].mxu0 %vm536_vm1, %v1893_v44 }
  0xbf   : > { %1738 = vmatprep.mubr.msk.bf16.mxu0 %vm1921_vm0, %v1920_v1  ;;  %1835 = vmatmul.mubr.msk.bf16.gmra.mrb[84].mxu1 %vm536_vm1, %v1909_v47 }
  0xc0   : > { %1838 = vmatprep.mubr.msk.bf16.mxu1 %vm1921_vm0, %v1920_v1 }
  0xc6   : > { %1739 = vmatmul.mubr.msk.bf16.gmra.mrb[88].mxu0 %vm536_vm1, %v1895_v46 }
  0xc7   : > { %1742 = vmatprep.mubr.msk.bf16.mxu0 %vm1921_vm0, %v1920_v1  ;;  %1839 = vmatmul.mubr.msk.bf16.gmra.mrb[88].mxu1 %vm536_vm1, %v1910_v49 }
  0xc8   : > { %1842 = vmatprep.mubr.msk.bf16.mxu1 %vm1921_vm0, %v1920_v1 }
  0xce   : > { %1743 = vmatmul.mubr.msk.bf16.gmra.mrb[92].mxu0 %vm536_vm1, %v1897_v48 }
  0xcf   : > { %1746 = vmatprep.mubr.msk.bf16.mxu0 %vm1921_vm0, %v1920_v1  ;;  %1843 = vmatmul.mubr.msk.bf16.gmra.mrb[92].mxu1 %vm536_vm1, %v1911_v51 }
  0xd6   : > { %1747 = vmatmul.mubr.msk.bf16.gmra.mrb[96].mxu0 %vm536_vm1, %v1899_v50 }
  0xe9   : > { %v718_v52 = vpop.f32.mrb[0].mxu0 }
  0xea   : > { %v1652_v53 = vpop.f32.mrb[1].mxu0  ;;  %v1213_v55 = vmul.f32 %v718_v52, %v718_v52  ;;  %v2164_v6 = vpop.f32.mrb[0].mxu1 }
  0xeb   : > { %v721_v54 = vpop.f32.mrb[2].mxu0  ;;  %v1752_v7 = vpop.f32.mrb[1].mxu1 }
  0xec   : > { %v1109_v56 = vadd.f32 %v721_v54, %v718_v52  ;;  %v1214_v57 = vmul.f32 %v721_v54, %v721_v54  ;;  %v1653_v58 = vpop.f32.mrb[3].mxu0  ;;  %v2166_v8 = vpop.f32.mrb[2].mxu1 }
  0xed   : > { %v1753_v10 = vpop.f32.mrb[3].mxu1 }
  0xee   : > { %v1311_v59 = vadd.f32 %v1214_v57, %v1213_v55 }
  0xf1   : > { %v726_v60 = vpop.f32.mrb[4].mxu0 }
  0xf2   : > { %v1110_v61 = vadd.f32 %v1109_v56, %v726_v60  ;;  %v1215_v62 = vmul.f32 %v726_v60, %v726_v60  ;;  %v1656_v63 = vpop.f32.mrb[5].mxu0  ;;  %v2168_v20 = vpop.f32.mrb[4].mxu1 }
  0xf3   : > { %v729_v0 = vpop.f32.mrb[6].mxu0  ;;  %v1756_v21 = vpop.f32.mrb[5].mxu1 }
  0xf4   : > { %v1312_v2 = vadd.f32 %v1311_v59, %v1215_v62  ;;  %v1111_v1 = vadd.f32 %v1110_v61, %v729_v0  ;;  %v1216_v3 = vmul.f32 %v729_v0, %v729_v0  ;;  %v1657_v4 = vpop.f32.mrb[7].mxu0  ;;  %v2170_v22 = vpop.f32.mrb[6].mxu1 }
  0xf5   : > { %v1757_v24 = vpop.f32.mrb[7].mxu1 }
  0xf6   : > { %v1313_v5 = vadd.f32 %v1312_v2, %v1216_v3 }
  0xf9   : > { %v734_v9 = vpop.f32.mrb[8].mxu0 }
  0xfa   : > { %v1112_v11 = vadd.f32 %v1111_v1, %v734_v9  ;;  %v1217_v12 = vmul.f32 %v734_v9, %v734_v9  ;;  %v1660_v13 = vpop.f32.mrb[9].mxu0  ;;  %v2172_v34 = vpop.f32.mrb[8].mxu1 }
  0xfb   : > { %v737_v14 = vpop.f32.mrb[10].mxu0  ;;  %v1760_v35 = vpop.f32.mrb[9].mxu1 }
  0xfc   : > { %v1314_v15 = vadd.f32 %v1313_v5, %v1217_v12  ;;  %v1113_v16 = vadd.f32 %v1112_v11, %v737_v14  ;;  %v1218_v17 = vmul.f32 %v737_v14, %v737_v14  ;;  %v1661_v18 = vpop.f32.mrb[11].mxu0  ;;  %v2174_v36 = vpop.f32.mrb[10].mxu1 }
  0xfd   : > { %v1761_v38 = vpop.f32.mrb[11].mxu1 }
  0xfe   : > { %v1315_v19 = vadd.f32 %v1314_v15, %v1218_v17 }
 0x101   : > { %v742_v23 = vpop.f32.mrb[12].mxu0 }
 0x102   : > { %v1114_v25 = vadd.f32 %v1113_v16, %v742_v23  ;;  %v1219_v26 = vmul.f32 %v742_v23, %v742_v23  ;;  %v1664_v27 = vpop.f32.mrb[13].mxu0  ;;  %v2176_v48 = vpop.f32.mrb[12].mxu1 }
 0x103   : > { %v745_v28 = vpop.f32.mrb[14].mxu0  ;;  %v1764_v49 = vpop.f32.mrb[13].mxu1 }
 0x104   : > { %v1316_v29 = vadd.f32 %v1315_v19, %v1219_v26  ;;  %v1115_v30 = vadd.f32 %v1114_v25, %v745_v28  ;;  %v1220_v31 = vmul.f32 %v745_v28, %v745_v28  ;;  %v1665_v32 = vpop.f32.mrb[15].mxu0  ;;  %v2178_v50 = vpop.f32.mrb[14].mxu1 }
 0x105   : > { %v1765_v52 = vpop.f32.mrb[15].mxu1 }
 0x106   : > { %v1317_v33 = vadd.f32 %v1316_v29, %v1220_v31 }
 0x109   : > { %v750_v37 = vpop.f32.mrb[16].mxu0 }
 0x10a   : > { %v1116_v39 = vadd.f32 %v1115_v30, %v750_v37  ;;  %v1221_v40 = vmul.f32 %v750_v37, %v750_v37  ;;  %v1668_v41 = vpop.f32.mrb[17].mxu0  ;;  %v2180_v62 = vpop.f32.mrb[16].mxu1 }
 0x10b   : > { %v753_v42 = vpop.f32.mrb[18].mxu0  ;;  %v1768_v63 = vpop.f32.mrb[17].mxu1 }
 0x10c   : > { %v1318_v43 = vadd.f32 %v1317_v33, %v1221_v40  ;;  %v1117_v44 = vadd.f32 %v1116_v39, %v753_v42  ;;  %v1222_v45 = vmul.f32 %v753_v42, %v753_v42  ;;  %v1669_v46 = vpop.f32.mrb[19].mxu0  ;;  %v2182_v0 = vpop.f32.mrb[18].mxu1 }
 0x10d   : > { %v1769_v1 = vpop.f32.mrb[19].mxu1 }
 0x10e   : > { %v1319_v47 = vadd.f32 %v1318_v43, %v1222_v45 }
 0x111   : > { %v758_v51 = vpop.f32.mrb[20].mxu0 }
 0x112   : > { %v1118_v53 = vadd.f32 %v1117_v44, %v758_v51  ;;  %v1223_v54 = vmul.f32 %v758_v51, %v758_v51  ;;  %v1672_v55 = vpop.f32.mrb[21].mxu0  ;;  %v2184_v14 = vpop.f32.mrb[20].mxu1 }
 0x113   : > { %v761_v56 = vpop.f32.mrb[22].mxu0  ;;  %v1772_v15 = vpop.f32.mrb[21].mxu1 }
 0x114   : > { %v1320_v57 = vadd.f32 %v1319_v47, %v1223_v54  ;;  %v1119_v58 = vadd.f32 %v1118_v53, %v761_v56  ;;  %v1224_v59 = vmul.f32 %v761_v56, %v761_v56  ;;  %v1673_v60 = vpop.f32.mrb[23].mxu0  ;;  %v2186_v16 = vpop.f32.mrb[22].mxu1 }
 0x115   : > { %v1773_v18 = vpop.f32.mrb[23].mxu1 }
 0x116   : > { %v1321_v61 = vadd.f32 %v1320_v57, %v1224_v59 }
 0x119   : > { %v766_v2 = vpop.f32.mrb[24].mxu0 }
 0x11a   : > { %v1120_v3 = vadd.f32 %v1119_v58, %v766_v2  ;;  %v1225_v4 = vmul.f32 %v766_v2, %v766_v2  ;;  %v1676_v5 = vpop.f32.mrb[25].mxu0  ;;  %v2188_v30 = vpop.f32.mrb[24].mxu1 }
 0x11b   : > { %v769_v7 = vpop.f32.mrb[26].mxu0  ;;  %v1776_v31 = vpop.f32.mrb[25].mxu1 }
 0x11c   : > { %v1322_v9 = vadd.f32 %v1321_v61, %v1225_v4  ;;  %v1121_v10 = vadd.f32 %v1120_v3, %v769_v7  ;;  %v1226_v11 = vmul.f32 %v769_v7, %v769_v7  ;;  %v1677_v12 = vpop.f32.mrb[27].mxu0  ;;  %v2190_v32 = vpop.f32.mrb[26].mxu1 }
 0x11d   : > { %v1777_v35 = vpop.f32.mrb[27].mxu1 }
 0x11e   : > { %v1323_v13 = vadd.f32 %v1322_v9, %v1226_v11 }
 0x121   : > { %v774_v17 = vpop.f32.mrb[28].mxu0 }
 0x122   : > { %v1122_v19 = vadd.f32 %v1121_v10, %v774_v17  ;;  %v1227_v21 = vmul.f32 %v774_v17, %v774_v17  ;;  %v1680_v23 = vpop.f32.mrb[29].mxu0  ;;  %v2192_v46 = vpop.f32.mrb[28].mxu1 }
 0x123   : > { %v777_v24 = vpop.f32.mrb[30].mxu0  ;;  %v1780_v47 = vpop.f32.mrb[29].mxu1 }
 0x124   : > { %v1324_v25 = vadd.f32 %v1323_v13, %v1227_v21  ;;  %v1123_v26 = vadd.f32 %v1122_v19, %v777_v24  ;;  %v1228_v27 = vmul.f32 %v777_v24, %v777_v24  ;;  %v1681_v28 = vpop.f32.mrb[31].mxu0  ;;  %v2194_v49 = vpop.f32.mrb[30].mxu1 }
 0x125   : > { %v1781_v52 = vpop.f32.mrb[31].mxu1 }
 0x126   : > { %v1325_v29 = vadd.f32 %v1324_v25, %v1228_v27 }
 0x129   : > { %v782_v33 = vpop.f32.mrb[32].mxu0 }
 0x12a   : > { %v1124_v37 = vadd.f32 %v1123_v26, %v782_v33  ;;  %v1229_v38 = vmul.f32 %v782_v33, %v782_v33  ;;  %v1684_v39 = vpop.f32.mrb[33].mxu0  ;;  %v2196_v63 = vpop.f32.mrb[32].mxu1 }
 0x12b   : > { %v785_v40 = vpop.f32.mrb[34].mxu0  ;;  %v1784_v2 = vpop.f32.mrb[33].mxu1 }
 0x12c   : > { %v1326_v41 = vadd.f32 %v1325_v29, %v1229_v38  ;;  %v1125_v42 = vadd.f32 %v1124_v37, %v785_v40  ;;  %v1230_v43 = vmul.f32 %v785_v40, %v785_v40  ;;  %v1685_v44 = vpop.f32.mrb[35].mxu0  ;;  %v2198_v1 = vpop.f32.mrb[34].mxu1 }
 0x12d   : > { %v1785_v4 = vpop.f32.mrb[35].mxu1 }
 0x12e   : > { %v1327_v45 = vadd.f32 %v1326_v41, %v1230_v43 }
 0x131   : > { %v790_v51 = vpop.f32.mrb[36].mxu0 }
 0x132   : > { %v1126_v53 = vadd.f32 %v1125_v42, %v790_v51  ;;  %v1231_v54 = vmul.f32 %v790_v51, %v790_v51  ;;  %v1688_v55 = vpop.f32.mrb[37].mxu0  ;;  %v2200_v18 = vpop.f32.mrb[36].mxu1 }
 0x133   : > { %v793_v56 = vpop.f32.mrb[38].mxu0  ;;  %v1788_v19 = vpop.f32.mrb[37].mxu1 }
 0x134   : > { %v1328_v57 = vadd.f32 %v1327_v45, %v1231_v54  ;;  %v1127_v58 = vadd.f32 %v1126_v53, %v793_v56  ;;  %v1232_v59 = vmul.f32 %v793_v56, %v793_v56  ;;  %v1689_v60 = vpop.f32.mrb[39].mxu0  ;;  %v2202_v21 = vpop.f32.mrb[38].mxu1 }
 0x135   : > { %v1789_v24 = vpop.f32.mrb[39].mxu1 }
 0x136   : > { %v1329_v61 = vadd.f32 %v1328_v57, %v1232_v59 }
 0x139   : > { %v798_v3 = vpop.f32.mrb[40].mxu0 }
 0x13a   : > { %v1128_v5 = vadd.f32 %v1127_v58, %v798_v3  ;;  %v1233_v7 = vmul.f32 %v798_v3, %v798_v3  ;;  %v1692_v9 = vpop.f32.mrb[41].mxu0  ;;  %v2204_v38 = vpop.f32.mrb[40].mxu1 }
 0x13b   : > { %v801_v10 = vpop.f32.mrb[42].mxu0  ;;  %v1792_v39 = vpop.f32.mrb[41].mxu1 }
 0x13c   : > { %v1330_v11 = vadd.f32 %v1329_v61, %v1233_v7  ;;  %v1129_v12 = vadd.f32 %v1128_v5, %v801_v10  ;;  %v1234_v13 = vmul.f32 %v801_v10, %v801_v10  ;;  %v1693_v15 = vpop.f32.mrb[43].mxu0  ;;  %v2206_v40 = vpop.f32.mrb[42].mxu1 }
 0x13d   : > { %v1793_v42 = vpop.f32.mrb[43].mxu1 }
 0x13e   : > { %v1331_v17 = vadd.f32 %v1330_v11, %v1234_v13 }
 0x141   : > { %v806_v23 = vpop.f32.mrb[44].mxu0 }
 0x142   : > { %v1130_v25 = vadd.f32 %v1129_v12, %v806_v23  ;;  %v1235_v26 = vmul.f32 %v806_v23, %v806_v23  ;;  %v1696_v27 = vpop.f32.mrb[45].mxu0  ;;  %v2208_v56 = vpop.f32.mrb[44].mxu1 }
 0x143   : > { %v809_v28 = vpop.f32.mrb[46].mxu0  ;;  %v1796_v57 = vpop.f32.mrb[45].mxu1 }
 0x144   : > { %v1332_v29 = vadd.f32 %v1331_v17, %v1235_v26  ;;  %v1131_v31 = vadd.f32 %v1130_v25, %v809_v28  ;;  %v1236_v33 = vmul.f32 %v809_v28, %v809_v28  ;;  %v1697_v35 = vpop.f32.mrb[47].mxu0  ;;  %v2210_v58 = vpop.f32.mrb[46].mxu1 }
 0x145   : > { %v1797_v60 = vpop.f32.mrb[47].mxu1 }
 0x146   : > { %v1333_v37 = vadd.f32 %v1332_v29, %v1236_v33 }
 0x149   : > { %v814_v41 = vpop.f32.mrb[48].mxu0 }
 0x14a   : > { %v1132_v43 = vadd.f32 %v1131_v31, %v814_v41  ;;  %v1237_v44 = vmul.f32 %v814_v41, %v814_v41  ;;  %v1700_v45 = vpop.f32.mrb[49].mxu0  ;;  %v2212_v12 = vpop.f32.mrb[48].mxu1 }
 0x14b   : > { %v817_v47 = vpop.f32.mrb[50].mxu0  ;;  %v1800_v13 = vpop.f32.mrb[49].mxu1 }
 0x14c   : > { %v1334_v51 = vadd.f32 %v1333_v37, %v1237_v44  ;;  %v1133_v52 = vadd.f32 %v1132_v43, %v817_v47  ;;  %v1238_v53 = vmul.f32 %v817_v47, %v817_v47  ;;  %v1701_v54 = vpop.f32.mrb[51].mxu0  ;;  %v2214_v15 = vpop.f32.mrb[50].mxu1 }
 0x14d   : > { %v1801_v19 = vpop.f32.mrb[51].mxu1 }
 0x14e   : > { %v1335_v55 = vadd.f32 %v1334_v51, %v1238_v53 }
 0x151   : > { %v822_v59 = vpop.f32.mrb[52].mxu0 }
 0x152   : > { %v1134_v61 = vadd.f32 %v1133_v52, %v822_v59  ;;  %v1239_v2 = vmul.f32 %v822_v59, %v822_v59  ;;  %v1704_v3 = vpop.f32.mrb[53].mxu0  ;;  %v2216_v35 = vpop.f32.mrb[52].mxu1 }
 0x153   : > { %v825_v4 = vpop.f32.mrb[54].mxu0  ;;  %v1804_v37 = vpop.f32.mrb[53].mxu1 }
 0x154   : > { %v1336_v5 = vadd.f32 %v1335_v55, %v1239_v2  ;;  %v1135_v7 = vadd.f32 %v1134_v61, %v825_v4  ;;  %v1240_v9 = vmul.f32 %v825_v4, %v825_v4  ;;  %v1705_v10 = vpop.f32.mrb[55].mxu0  ;;  %v2218_v39 = vpop.f32.mrb[54].mxu1 }
 0x155   : > { %v1805_v42 = vpop.f32.mrb[55].mxu1 }
 0x156   : > { %v1337_v11 = vadd.f32 %v1336_v5, %v1240_v9 }
 0x159   : > { %v830_v17 = vpop.f32.mrb[56].mxu0 }
 0x15a   : > { %v1136_v23 = vadd.f32 %v1135_v7, %v830_v17  ;;  %v1241_v24 = vmul.f32 %v830_v17, %v830_v17  ;;  %v1708_v25 = vpop.f32.mrb[57].mxu0  ;;  %v2220_v57 = vpop.f32.mrb[56].mxu1 }
 0x15b   : > { %v833_v26 = vpop.f32.mrb[58].mxu0  ;;  %v1808_v59 = vpop.f32.mrb[57].mxu1 }
 0x15c   : > { %v1338_v27 = vadd.f32 %v1337_v11, %v1241_v24  ;;  %v1137_v28 = vadd.f32 %v1136_v23, %v833_v26  ;;  %v1242_v29 = vmul.f32 %v833_v26, %v833_v26  ;;  %v1709_v31 = vpop.f32.mrb[59].mxu0  ;;  %v2222_v60 = vpop.f32.mrb[58].mxu1 }
 0x15d   : > { %v1809_v2 = vpop.f32.mrb[59].mxu1 }
 0x15e   : > { %v1339_v33 = vadd.f32 %v1338_v27, %v1242_v29 }
 0x161   : > { %v838_v41 = vpop.f32.mrb[60].mxu0 }
 0x162   : > { %v1138_v43 = vadd.f32 %v1137_v28, %v838_v41  ;;  %v1243_v44 = vmul.f32 %v838_v41, %v838_v41  ;;  %v1712_v45 = vpop.f32.mrb[61].mxu0  ;;  %v2224_v19 = vpop.f32.mrb[60].mxu1 }
 0x163   : > { %v841_v47 = vpop.f32.mrb[62].mxu0  ;;  %v1812_v23 = vpop.f32.mrb[61].mxu1 }
 0x164   : > { %v1340_v51 = vadd.f32 %v1339_v33, %v1243_v44  ;;  %v1139_v52 = vadd.f32 %v1138_v43, %v841_v47  ;;  %v1244_v53 = vmul.f32 %v841_v47, %v841_v47  ;;  %v1713_v54 = vpop.f32.mrb[63].mxu0  ;;  %v2226_v24 = vpop.f32.mrb[62].mxu1 }
 0x165   : > { %v1813_v26 = vpop.f32.mrb[63].mxu1 }
 0x166   : > { %v1341_v55 = vadd.f32 %v1340_v51, %v1244_v53 }
 0x169   : > { %v846_v61 = vpop.f32.mrb[64].mxu0 }
 0x16a   : > { %v1140_v3 = vadd.f32 %v1139_v52, %v846_v61  ;;  %v1245_v4 = vmul.f32 %v846_v61, %v846_v61  ;;  %v1716_v5 = vpop.f32.mrb[65].mxu0  ;;  %v2228_v44 = vpop.f32.mrb[64].mxu1 }
 0x16b   : > { %v849_v7 = vpop.f32.mrb[66].mxu0  ;;  %v1816_v45 = vpop.f32.mrb[65].mxu1 }
 0x16c   : > { %v1342_v9 = vadd.f32 %v1341_v55, %v1245_v4  ;;  %v1141_v10 = vadd.f32 %v1140_v3, %v849_v7  ;;  %v1246_v11 = vmul.f32 %v849_v7, %v849_v7  ;;  %v1717_v13 = vpop.f32.mrb[67].mxu0  ;;  %v2230_v47 = vpop.f32.mrb[66].mxu1 }
 0x16d   : > { %v1817_v52 = vpop.f32.mrb[67].mxu1 }
 0x16e   : > { %v1343_v17 = vadd.f32 %v1342_v9, %v1246_v11 }
 0x171   : > { %v854_v25 = vpop.f32.mrb[68].mxu0 }
 0x172   : > { %v1142_v27 = vadd.f32 %v1141_v10, %v854_v25  ;;  %v1247_v28 = vmul.f32 %v854_v25, %v854_v25  ;;  %v1720_v29 = vpop.f32.mrb[69].mxu0  ;;  %v2232_v7 = vpop.f32.mrb[68].mxu1 }
 0x173   : > { %v857_v31 = vpop.f32.mrb[70].mxu0  ;;  %v1820_v9 = vpop.f32.mrb[69].mxu1 }
 0x174   : > { %v1344_v33 = vadd.f32 %v1343_v17, %v1247_v28  ;;  %v1143_v37 = vadd.f32 %v1142_v27, %v857_v31  ;;  %v1248_v41 = vmul.f32 %v857_v31, %v857_v31  ;;  %v1721_v42 = vpop.f32.mrb[71].mxu0  ;;  %v2234_v10 = vpop.f32.mrb[70].mxu1 }
 0x175   : > { %v1821_v13 = vpop.f32.mrb[71].mxu1 }
 0x176   : > { %v1345_v43 = vadd.f32 %v1344_v33, %v1248_v41 }
 0x179   : > { %v862_v51 = vpop.f32.mrb[72].mxu0 }
 0x17a   : > { %v1144_v53 = vadd.f32 %v1143_v37, %v862_v51  ;;  %v1249_v54 = vmul.f32 %v862_v51, %v862_v51  ;;  %v1724_v55 = vpop.f32.mrb[73].mxu0  ;;  %v2236_v37 = vpop.f32.mrb[72].mxu1 }
 0x17b   : > { %v865_v59 = vpop.f32.mrb[74].mxu0  ;;  %v1824_v41 = vpop.f32.mrb[73].mxu1 }
 0x17c   : > { %v1346_v61 = vadd.f32 %v1345_v43, %v1249_v54  ;;  %v1145_v2 = vadd.f32 %v1144_v53, %v865_v59  ;;  %v1250_v3 = vmul.f32 %v865_v59, %v865_v59  ;;  %v1725_v4 = vpop.f32.mrb[75].mxu0  ;;  %v2238_v42 = vpop.f32.mrb[74].mxu1 }
 0x17d   : > { %v1825_v45 = vpop.f32.mrb[75].mxu1 }
 0x17e   : > { %v1347_v5 = vadd.f32 %v1346_v61, %v1250_v3 }
 0x181   : > { %v870_v11 = vpop.f32.mrb[76].mxu0 }
 0x182   : > { %v1146_v17 = vadd.f32 %v1145_v2, %v870_v11  ;;  %v1251_v23 = vmul.f32 %v870_v11, %v870_v11  ;;  %v1728_v25 = vpop.f32.mrb[77].mxu0  ;;  %v2240_v4 = vpop.f32.mrb[76].mxu1 }
 0x183   : > { %v873_v26 = vpop.f32.mrb[78].mxu0 }
 0x184   : > { %v1348_v27 = vadd.f32 %v1347_v5, %v1251_v23  ;;  %v1147_v28 = vadd.f32 %v1146_v17, %v873_v26  ;;  %v1252_v29 = vmul.f32 %v873_v26, %v873_v26  ;;  %v1729_v31 = vpop.f32.mrb[79].mxu0  ;;  %v1828_v5 = vpop.f32.mrb[77].mxu1 }
 0x185   : > { %v2242_v9 = vpop.f32.mrb[78].mxu1 }
 0x186   : > { %v1349_v33 = vadd.f32 %v1348_v27, %v1252_v29  ;;  %v1829_v13 = vpop.f32.mrb[79].mxu1 }
 0x189   : > { %v878_v43 = vpop.f32.mrb[80].mxu0 }
 0x18a   : > { %v1148_v51 = vadd.f32 %v1147_v28, %v878_v43  ;;  %v1253_v52 = vmul.f32 %v878_v43, %v878_v43  ;;  %v1732_v53 = vpop.f32.mrb[81].mxu0  ;;  %v2244_v41 = vpop.f32.mrb[80].mxu1 }
 0x18b   : > { %v881_v54 = vpop.f32.mrb[82].mxu0  ;;  %v1832_v43 = vpop.f32.mrb[81].mxu1 }
 0x18c   : > { %v1350_v55 = vadd.f32 %v1349_v33, %v1253_v52  ;;  %v1149_v59 = vadd.f32 %v1148_v51, %v881_v54  ;;  %v1254_v61 = vmul.f32 %v881_v54, %v881_v54  ;;  %v1733_v2 = vpop.f32.mrb[83].mxu0  ;;  %v2246_v45 = vpop.f32.mrb[82].mxu1 }
 0x18d   : > { %v1833_v52 = vpop.f32.mrb[83].mxu1 }
 0x18e   : > { %v1351_v3 = vadd.f32 %v1350_v55, %v1254_v61 }
 0x191   : > { %v886_v11 = vpop.f32.mrb[84].mxu0 }
 0x192   : > { %v1150_v17 = vadd.f32 %v1149_v59, %v886_v11  ;;  %v1255_v23 = vmul.f32 %v886_v11, %v886_v11  ;;  %v1736_v25 = vpop.f32.mrb[85].mxu0  ;;  %v2248_v13 = vpop.f32.mrb[84].mxu1 }
 0x193   : > { %v889_v26 = vpop.f32.mrb[86].mxu0  ;;  %2421 = vst [vmem:[#allocation2_spill] sm:$0xff] %v2248_v13 }
 0x194   : > { %v1352_v27 = vadd.f32 %v1351_v3, %v1255_v23  ;;  %v1151_v28 = vadd.f32 %v1150_v17, %v889_v26  ;;  %v1256_v29 = vmul.f32 %v889_v26, %v889_v26  ;;  %v1737_v31 = vpop.f32.mrb[87].mxu0  ;;  %v1836_v17 = vpop.f32.mrb[85].mxu1 }
 0x195   : > { %v2250_v23 = vpop.f32.mrb[86].mxu1 }
 0x196   : > { %v1353_v33 = vadd.f32 %v1352_v27, %v1256_v29  ;;  %2422 = vst [vmem:[#allocation3_spill] sm:$0xff] %v2250_v23  ;;  %v1837_v26 = vpop.f32.mrb[87].mxu1 }
 0x199   : > { %v894_v51 = vpop.f32.mrb[88].mxu0 }
 0x19a   : > { %v1152_v53 = vadd.f32 %v1151_v28, %v894_v51  ;;  %v1257_v54 = vmul.f32 %v894_v51, %v894_v51  ;;  %v1740_v55 = vpop.f32.mrb[89].mxu0 }
 0x19b   : > { %v897_v61 = vpop.f32.mrb[90].mxu0 }
 0x19c   : > { %v1354_v59 = vadd.f32 %v1353_v33, %v1257_v54  ;;  %v1153_v2 = vadd.f32 %v1152_v53, %v897_v61  ;;  %v1258_v5 = vmul.f32 %v897_v61, %v897_v61  ;;  %v1741_v11 = vpop.f32.mrb[91].mxu0  ;;  %v2252_v53 = vpop.f32.mrb[88].mxu1 }
 0x19d   : > { %v1840_v54 = vpop.f32.mrb[89].mxu1 }
 0x19e   : > { %v1355_v3 = vadd.f32 %v1354_v59, %v1258_v5  ;;  %v2254_v61 = vpop.f32.mrb[90].mxu1 }
 0x19f   : > { %v1841_v5 = vpop.f32.mrb[91].mxu1 }
 0x1a1   : > { %v902_v25 = vpop.f32.mrb[92].mxu0 }
 0x1a2   : > { %v1154_v27 = vadd.f32 %v1153_v2, %v902_v25  ;;  %v1259_v29 = vmul.f32 %v902_v25, %v902_v25  ;;  %v1744_v31 = vpop.f32.mrb[93].mxu0 }
 0x1a3   : > { %v905_v43 = vpop.f32.mrb[94].mxu0 }
 0x1a4   : > { %v1356_v28 = vadd.f32 %v1355_v3, %v1259_v29  ;;  %v1155_v51 = vadd.f32 %v1154_v27, %v905_v43  ;;  %v1260_v52 = vmul.f32 %v905_v43, %v905_v43  ;;  %v1745_v55 = vpop.f32.mrb[95].mxu0  ;;  %v1263_v3 = vmul.f32 %v2164_v6, %v2164_v6  ;;  %v2259_v43 = vpop.f32.mrb[92].mxu1 }
 0x1a6   : > { %v1357_v33 = vadd.f32 %v1356_v28, %v1260_v52  ;;  %v1844_v28 = vpop.f32.mrb[93].mxu1  ;;  %v1264_v52 = vmul.f32 %v2166_v8, %v2166_v8 }
 0x1a7   : > { %v2264_v55 = vpop.f32.mrb[94].mxu1 }
 0x1a9   : > { %v910_v59 = vpop.f32.mrb[96].mxu0 }
 0x1aa   : > { %v1156_v11 = vadd.f32 %v1155_v51, %v910_v59  ;;  %v1261_v17 = vmul.f32 %v910_v59, %v910_v59  ;;  %v1748_v23 = vpop.f32.mrb[97].mxu0 }
 0x1ab   : > { %v913_v26 = vpop.f32.mrb[98].mxu0 }
 0x1ac   : > { %v1358_v2 = vadd.f32 %v1357_v33, %v1261_v17  ;;  %v1157_v25 = vadd.f32 %v1156_v11, %v913_v26  ;;  %v1262_v31 = vmul.f32 %v913_v26, %v913_v26  ;;  %v1749_v13 = vpop.f32.mrb[99].mxu0  ;;  %v1845_v33 = vpop.f32.mrb[95].mxu1  ;;  %v1267_v17 = vmul.f32 %v2172_v34, %v2172_v34 }
 0x1ad   : > { %v1265_v13 = vmul.f32 %v2168_v20, %v2168_v20 }
 0x1ae   : > { %v1158_v27 = vadd.f32 %v1157_v25, %v2164_v6  ;;  %v1359_v29 = vadd.f32 %v1358_v2, %v1262_v31  ;;  %v1266_v6 = vmul.f32 %v2170_v22, %v2170_v22  ;;  %v1268_v2 = vmul.f32 %v2174_v36, %v2174_v36 }
 0x1b0   : > { %v1159_v51 = vadd.f32 %v1158_v27, %v2166_v8  ;;  %v1360_v23 = vadd.f32 %v1359_v29, %v1263_v3 }
 0x1b2   : > { %v1160_v54 = vadd.f32 %v1159_v51, %v2168_v20  ;;  %v1361_v59 = vadd.f32 %v1360_v23, %v1264_v52  ;;  %v1269_v20 = vmul.f32 %v2176_v48, %v2176_v48 }
 0x1b4   : > { %v1161_v5 = vadd.f32 %v1160_v54, %v2170_v22  ;;  %v1362_v11 = vadd.f32 %v1361_v59, %v1265_v13  ;;  %v1270_v22 = vmul.f32 %v2178_v50, %v2178_v50 }
 0x1b6   : > { %v1162_v8 = vadd.f32 %v1161_v5, %v2172_v34  ;;  %v1363_v26 = vadd.f32 %v1362_v11, %v1266_v6  ;;  %v1271_v34 = vmul.f32 %v2180_v62, %v2180_v62 }
 0x1b8   : > { %v1163_v25 = vadd.f32 %v1162_v8, %v2174_v36  ;;  %v1364_v31 = vadd.f32 %v1363_v26, %v1267_v17  ;;  %v1272_v36 = vmul.f32 %v2182_v0, %v2182_v0 }
 0x1ba   : > { %v1164_v3 = vadd.f32 %v1163_v25, %v2176_v48  ;;  %v1365_v27 = vadd.f32 %v1364_v31, %v1268_v2  ;;  %v1273_v48 = vmul.f32 %v2184_v14, %v2184_v14 }
 0x1bc   : > { %v1165_v29 = vadd.f32 %v1164_v3, %v2178_v50  ;;  %v1366_v28 = vadd.f32 %v1365_v27, %v1269_v20  ;;  %v1274_v50 = vmul.f32 %v2186_v16, %v2186_v16 }
 0x1be   : > { %v1166_v52 = vadd.f32 %v1165_v29, %v2180_v62  ;;  %v1367_v51 = vadd.f32 %v1366_v28, %v1270_v22  ;;  %v1275_v62 = vmul.f32 %v2188_v30, %v2188_v30 }
 0x1c0   : > { %v1167_v23 = vadd.f32 %v1166_v52, %v2182_v0  ;;  %v1368_v33 = vadd.f32 %v1367_v51, %v1271_v34  ;;  %v1276_v0 = vmul.f32 %v2190_v32, %v2190_v32 }
 0x1c2   : > { %v1168_v13 = vadd.f32 %v1167_v23, %v2184_v14  ;;  %v1369_v54 = vadd.f32 %v1368_v33, %v1272_v36  ;;  %v1277_v14 = vmul.f32 %v2192_v46, %v2192_v46 }
 0x1c4   : > { %v1169_v59 = vadd.f32 %v1168_v13, %v2186_v16  ;;  %v1370_v6 = vadd.f32 %v1369_v54, %v1273_v48  ;;  %v1278_v16 = vmul.f32 %v2194_v49, %v2194_v49 }
 0x1c6   : > { %v1371_v5 = vadd.f32 %v1370_v6, %v1274_v50  ;;  %v1170_v11 = vadd.f32 %v1169_v59, %v2188_v30  ;;  %v1279_v30 = vmul.f32 %v2196_v63, %v2196_v63  ;;  %v1287_v59 = vmul.f32 %v2212_v12, %v2212_v12 }
 0x1c8   : > { %v1171_v17 = vadd.f32 %v1170_v11, %v2190_v32  ;;  %v1372_v8 = vadd.f32 %v1371_v5, %v1275_v62  ;;  %v1280_v32 = vmul.f32 %v2198_v1, %v2198_v1  ;;  %v1288_v5 = vmul.f32 %v2214_v15, %v2214_v15 }
 0x1ca   : > { %v1172_v26 = vadd.f32 %v1171_v17, %v2192_v46  ;;  %v1373_v2 = vadd.f32 %v1372_v8, %v1276_v0  ;;  %v1281_v46 = vmul.f32 %v2200_v18, %v2200_v18  ;;  %v1289_v0 = vmul.f32 %v2216_v35, %v2216_v35 }
 0x1cb   : > { %v1290_v8 = vmul.f32 %v2218_v39, %v2218_v39 }
 0x1cc   : > { %v1173_v25 = vadd.f32 %v1172_v26, %v2194_v49  ;;  %v1374_v31 = vadd.f32 %v1373_v2, %v1277_v14  ;;  %v1282_v49 = vmul.f32 %v2202_v21, %v2202_v21  ;;  %v1291_v26 = vmul.f32 %v2220_v57, %v2220_v57 }
 0x1ce   : > { %v1174_v20 = vadd.f32 %v1173_v25, %v2196_v63  ;;  %v1375_v3 = vadd.f32 %v1374_v31, %v1278_v16  ;;  %v1283_v63 = vmul.f32 %v2204_v38, %v2204_v38  ;;  %v1292_v16 = vmul.f32 %v2222_v60, %v2222_v60 }
 0x1cf   : > { %v1293_v31 = vmul.f32 %v2224_v19, %v2224_v19 }
 0x1d0   : > { %v1175_v27 = vadd.f32 %v1174_v20, %v2198_v1  ;;  %v1376_v22 = vadd.f32 %v1375_v3, %v1279_v30  ;;  %v1284_v1 = vmul.f32 %v2206_v40, %v2206_v40  ;;  %v1294_v20 = vmul.f32 %v2226_v24, %v2226_v24 }
 0x1d2   : > { %v1176_v29 = vadd.f32 %v1175_v27, %v2200_v18  ;;  %v1377_v28 = vadd.f32 %v1376_v22, %v1280_v32  ;;  %v1285_v18 = vmul.f32 %v2208_v56, %v2208_v56  ;;  %v1295_v32 = vmul.f32 %v2228_v44, %v2228_v44 }
 0x1d3   : > { %v1296_v22 = vmul.f32 %v2230_v47, %v2230_v47 }
 0x1d4   : > { %v1177_v34 = vadd.f32 %v1176_v29, %v2202_v21  ;;  %v1378_v52 = vadd.f32 %v1377_v28, %v1281_v46  ;;  %v1286_v21 = vmul.f32 %v2210_v58, %v2210_v58  ;;  %v1297_v29 = vmul.f32 %v2232_v7, %v2232_v7 }
 0x1d6   : > { %v1178_v51 = vadd.f32 %v1177_v34, %v2204_v38  ;;  %v1379_v36 = vadd.f32 %v1378_v52, %v1282_v49  ;;  %v1298_v49 = vmul.f32 %v2234_v10, %v2234_v10  ;;  %v1299_v52 = vmul.f32 %v2236_v37, %v2236_v37 }
 0x1d8   : > { %v1179_v23 = vadd.f32 %v1178_v51, %v2206_v40  ;;  %v1380_v33 = vadd.f32 %v1379_v36, %v1283_v63  ;;  %v1300_v51 = vmul.f32 %v2238_v42, %v2238_v42 }
 0x1da   : > { %v1180_v48 = vadd.f32 %v1179_v23, %v2208_v56  ;;  %v1381_v13 = vadd.f32 %v1380_v33, %v1284_v1  ;;  %v1301_v1 = vmul.f32 %v2240_v4, %v2240_v4  ;;  %v1302_v33 = vmul.f32 %v2242_v9, %v2242_v9 }
 0x1dc   : > { %v1181_v54 = vadd.f32 %v1180_v48, %v2210_v58  ;;  %v1382_v50 = vadd.f32 %v1381_v13, %v1285_v18  ;;  %v1303_v48 = vmul.f32 %v2244_v41, %v2244_v41 }
 0x1de   : > { %v1182_v38 = vadd.f32 %v1181_v54, %v2212_v12  ;;  %v1383_v6 = vadd.f32 %v1382_v50, %v1286_v21  ;;  %v1304_v21 = vmul.f32 %v2246_v45, %v2246_v45 }
 0x1e0   : > { %v1384_v40 = vadd.f32 %v1383_v6, %v1287_v59  ;;  %v1183_v62 = vadd.f32 %v1182_v38, %v2214_v15 }
 0x1e2   : > { %v1385_v56 = vadd.f32 %v1384_v40, %v1288_v5  ;;  %v1184_v11 = vadd.f32 %v1183_v62, %v2216_v35  ;;  %v1307_v5 = vmul.f32 %v2252_v53, %v2252_v53 }
 0x1e4   : > { %v1386_v58 = vadd.f32 %v1385_v56, %v1289_v0  ;;  %v1185_v17 = vadd.f32 %v1184_v11, %v2218_v39  ;;  %v1308_v11 = vmul.f32 %v2254_v61, %v2254_v61  ;;  %v1309_v0 = vmul.f32 %v2259_v43, %v2259_v43 }
 0x1e6   : > { %v1387_v12 = vadd.f32 %v1386_v58, %v1290_v8  ;;  %v1186_v14 = vadd.f32 %v1185_v17, %v2220_v57 }
 0x1e8   : > { %v1388_v2 = vadd.f32 %v1387_v12, %v1291_v26  ;;  %v1187_v15 = vadd.f32 %v1186_v14, %v2222_v60 }
 0x1ea   : > { %v1389_v25 = vadd.f32 %v1388_v2, %v1292_v16  ;;  %v1188_v35 = vadd.f32 %v1187_v15, %v2224_v19 }
 0x1ec   : > { %v1390_v30 = vadd.f32 %v1389_v25, %v1293_v31  ;;  %v1189_v39 = vadd.f32 %v1188_v35, %v2226_v24 }
 0x1ee   : > { %v1391_v3 = vadd.f32 %v1390_v30, %v1294_v20  ;;  %v1190_v57 = vadd.f32 %v1189_v39, %v2228_v44 }
 0x1f0   : > { %v1392_v27 = vadd.f32 %v1391_v3, %v1295_v32  ;;  %v1191_v60 = vadd.f32 %v1190_v57, %v2230_v47 }
 0x1f2   : > { %v1393_v46 = vadd.f32 %v1392_v27, %v1296_v22  ;;  %v1192_v19 = vadd.f32 %v1191_v60, %v2232_v7 }
 0x1f4   : > { %v1394_v28 = vadd.f32 %v1393_v46, %v1297_v29  ;;  %v1193_v24 = vadd.f32 %v1192_v19, %v2234_v10 }
 0x1f6   : > { %v1395_v34 = vadd.f32 %v1394_v28, %v1298_v49  ;;  %v1194_v44 = vadd.f32 %v1193_v24, %v2236_v37 }
 0x1f8   : > { %v1396_v63 = vadd.f32 %v1395_v34, %v1299_v52  ;;  %v1195_v47 = vadd.f32 %v1194_v44, %v2238_v42 }
 0x1fa   : > { %v1397_v36 = vadd.f32 %v1396_v63, %v1300_v51  ;;  %v1196_v7 = vadd.f32 %v1195_v47, %v2240_v4  ;;  %v2423_v4 = vld [vmem:[#allocation2_spill] sm:$0xff] }
 0x1fb   : > { %v1305_v38 = vmul.f32 %v2423_v4, %v2423_v4 }
 0x1fc   : > { %v1398_v23 = vadd.f32 %v1397_v36, %v1301_v1  ;;  %v1197_v10 = vadd.f32 %v1196_v7, %v2242_v9  ;;  %v2424_v9 = vld [vmem:[#allocation3_spill] sm:$0xff] }
 0x1fd   : > { %v1306_v40 = vmul.f32 %v2424_v9, %v2424_v9 }
 0x1fe   : > { %v1399_v18 = vadd.f32 %v1398_v23, %v1302_v33  ;;  %v1198_v37 = vadd.f32 %v1197_v10, %v2244_v41 }
 0x200   : > { %v1400_v13 = vadd.f32 %v1399_v18, %v1303_v48  ;;  %v1199_v42 = vadd.f32 %v1198_v37, %v2246_v45 }
 0x202   : > { %v1401_v54 = vadd.f32 %v1400_v13, %v1304_v21  ;;  %v1200_v50 = vadd.f32 %v1199_v42, %v2423_v4 }
 0x204   : > { %v1402_v59 = vadd.f32 %v1401_v54, %v1305_v38  ;;  %v1201_v6 = vadd.f32 %v1200_v50, %v2424_v9 }
 0x206   : > { %v1403_v62 = vadd.f32 %v1402_v59, %v1306_v40  ;;  %v1202_v41 = vadd.f32 %v1201_v6, %v2252_v53  ;;  %v1310_v53 = vmul.f32 %v2264_v55, %v2264_v55 }
 0x208   : > { %v1404_v56 = vadd.f32 %v1403_v62, %v1307_v5  ;;  %v1203_v45 = vadd.f32 %v1202_v41, %v2254_v61 }
 0x20a   : > { %v1405_v58 = vadd.f32 %v1404_v56, %v1308_v11  ;;  %v1204_v17 = vadd.f32 %v1203_v45, %v2259_v43 }
 0x20c   : > { %v1406_v8 = vadd.f32 %v1405_v58, %v1309_v0  ;;  %v1205_v12 = vadd.f32 %v1204_v17, %v2264_v55 }
 0x20e   : > { %v1206_v14 = vrot.slane %v1205_v12, 4  ;;  %v1407_v26 = vadd.f32 %v1406_v8, %v1310_v53 }
 0x210   : > { %v1207_v2 = vadd.f32 %v1206_v14, %v1205_v12  ;;  %v1408_v15 = vrot.slane %v1407_v26, 4 }
 0x212   : > { %v1208_v16 = vrot.slane %v1207_v2, 2  ;;  %v1409_v61 = vadd.f32 %v1408_v15, %v1407_v26 }
 0x214   : > { %v1209_v25 = vadd.f32 %v1208_v16, %v1207_v2  ;;  %v1410_v35 = vrot.slane %v1409_v61, 2 }
 0x216   : > { %v1210_v31 = vrot.slane %v1209_v25, 1  ;;  %v1411_v30 = vadd.f32 %v1410_v35, %v1409_v61 }
 0x218   : > { %v1211_v43 = vadd.f32 %v1210_v31, %v1209_v25  ;;  %v1412_v39 = vrot.slane %v1411_v30, 1 }
 0x21a   : > { %1212 = vst [vmem:[%s172_s24] sm:$0x1] %v1211_v43  ;;  %v1413_v55 = vadd.f32 %v1412_v39, %v1411_v30 }
 0x21c   : > { %1414 = vst [vmem:[%s175_s27] sm:$0x1] %v1413_v55 }
 0x21d PF: > { %s14_s12 = sadd.s32 1, %s1918_s12  }
 0x21e   : > { %p11_p4 = scmp.ge.s32.totalorder %s14_s12, 4  }
 0x220   :  { %13 = sbr.rel (!%p11_p4) target bundleno = 1 (0x1), region = 70 }

// kernel: lenet_forward.6
= control target key start
LH: loop header
LB: loop body
LE: loop exit
PB: predicated region body
PF: predicated region fallthrough
CT: control target
= control target key end

     0   :  { %s4475_s24 = smov 0   ;;  %s5814_s0 = inlined_call_operand.vmem [shape: bf16[2,784,32], index: 0, kind: input, shape index: {}]   ;;  %s5815_s1 = inlined_call_operand.vmem [shape: bf16[32,128], index: 1, kind: input, shape index: {}]   ;;  %s5816_s2 = inlined_call_operand.vmem [shape: f32[1,128], index: 2, kind: input, shape index: {}]   ;;  %s5817_s3 = inlined_call_operand.vmem [shape: f32[1,128], index: 3, kind: input, shape index: {}]   ;;  %s5818_s4 = inlined_call_operand.vmem [shape: f32[1,128], index: 4, kind: input, shape index: {}]   ;;  %s5819_s5 = inlined_call_operand.vmem [shape: f32[1,128], index: 5, kind: input, shape index: {}]   ;;  %s5820_s6 = inlined_call_operand.vmem [shape: f32[196,784], index: 6, kind: input, shape index: {}]   ;;  %s5821_s7 = inlined_call_operand.vmem [shape: bf16[2,196,128], index: 7, kind: output, shape index: {}]  }
   0x1 LB: > { %s3223_s25 = sadd.s32 4294967295, %s4430_s24   ;;  %p3227_p0 = scmp.ge.s32.totalorder %s4430_s24, 1  ;;  %s4430_s24 = sphi %s4475_s24, %s17_s24  }
   0x2   : > { %p237_p1 = scmp.lt.s32.totalorder %s4430_s24, 3 }
   0x4   : > { %p238_p2 = pnand %p3227_p0, %p237_p1 }
   0x5   : > { %v4171_v0 = vld [vmem:[%s5815_s1] sm:$0xff] (!%p238_p2)   ;;  %v4432_v1 = vmov (!%p238_p2), 0.0   ;;  %v4172_v2 = vld [vmem:[%s5815_s1 + $0x8] sm:$0xff] (!%p238_p2)   ;;  %vm4433_vm0 = vmmov (!%p238_p2), 0   ;;  %p269_p3 = scmp.lt.s32.totalorder (!%p238_p2), %s3223_s25, 1  ;;  %vm639_vm1 = vcmask (!%p238_p2), 261120   ;;  %v1221_v38 = vlaneseq (!%p238_p2) }
   0x6   : > { %241 = sbr.rel (%p238_p2) target bundleno = 1049 (0x419), region = 48  ;;  %3558 = vmatprep.subr.bf16.mxu0 (!%p238_p2), %v4432_v1  ;;  %3562 = vmatprep.mubr.msk.bf16.mxu0 (!%p238_p2), %vm4433_vm0, %v4432_v1  ;;  %v4434_v18 = vmov (!%p238_p2), 0.0|0.0   ;;  %v1212_v27 = vld [vmem:[%s5816_s2] sm:$0x1] (!%p238_p2)  ;;  %vm2206_vm2 = vcmask (!%p238_p2), 130048  }
   0x7   : > { %3559 = vmatpush3.bf16.msra.mxu0 (!%p238_p2), %v4171_v0  ;;  %3984 = vmatprep.subr.bf16.mxu1 (!%p238_p2), %v4434_v18  ;;  %v1213_v28 = vmul.f32 (!%p238_p2), 0.0006377551, %v1212_v27  ;;  %v1214_v30 = vld [vmem:[%s5817_s3] sm:$0x1] (!%p238_p2)  ;;  %v1222_v39 = vshrl.u32 (!%p238_p2), %v1221_v38, 7 }
   0x8   : > { %3560 = vmatprep.subr.bf16.mxu0 (!%p238_p2), %v4432_v1  ;;  %v1215_v31 = vmul.f32 (!%p238_p2), 0.0006377551, %v1214_v30  ;;  %v4622_v45 = vld [vmem:[%s5818_s4] ss:$0 sm:$0xff] (!%p238_p2) }
   0x9   : > { %v1216_v32 = vmul.f32 (!%p238_p2), %v1213_v28, %v1213_v28  ;;  %v1223_v41 = vsub.s32 (!%p238_p2), 0, %v1222_v39  ;;  %v4633_v54 = vld [vmem:[%s5819_s5] ss:$0 sm:$0xff] (!%p238_p2) }
   0xb   : > { %3561 = vmatpush3.bf16.msra.mxu0 (!%p238_p2), %v4172_v2  ;;  %v1217_v33 = vsub.f32 (!%p238_p2), %v1215_v31, %v1216_v32  ;;  %v4615_v42 = vrot.slane (!%p238_p2), %v1213_v28, %v1223_v41 }
   0xc   : > { %3837 = vmatprep.subr.bf16.mxu0 (!%p238_p2), %v4434_v18 }
   0xd   : > { %s5823_s25 = smov (!%p269_p3, %s3223_s25), 1  ;;  %v1218_v35 = vmax.f32 %v1217_v33, 0.0 }
   0xe   : > { %s4158_s30 = smul.u32 392, %s5823_s25 }
   0xf   : > { %v1428_v36 = vadd.f32 1e-05, %v1218_v35  ;;  %s4159_s21 = smul.u32 100, %s5823_s25 }
  0x10   : > { %s4499_s10 = scalar_lea.vmem %s5814_s0, %s4158_s30 }
  0x11   : > { %v4173_v3 = vld [vmem:[%s4499_s10] sm:$0xff]   ;;  %v4174_v4 = vld [vmem:[%s4499_s10 + $0x8] sm:$0xff]   ;;  %v4175_v5 = vld [vmem:[%s4499_s10 + $0x10] sm:$0xff]   ;;  %4222 = vrsqrt.f32 %v1428_v36  ;;  %s5796_s26 = scalar_lea.vmem %s5821_s7, %s4159_s21 }
  0x12   : > { %3563 = vmatmul.mubr.msk.bf16.vlgmr.msra.gmra.mrb[0].mxu0 %vm639_vm1, %v4173_v3  ;;  %v4176_v6 = vld [vmem:[%s4499_s10 + $0x18] sm:$0xff]   ;;  %v4177_v7 = vld [vmem:[%s4499_s10 + $0x20] sm:$0xff]   ;;  %v4178_v8 = vld [vmem:[%s4499_s10 + $0x28] sm:$0xff]  }
  0x13   : > { %3566 = vmatprep.mubr.msk.bf16.mxu0 %vm4433_vm0, %v4432_v1  ;;  %v4179_v9 = vld [vmem:[%s4499_s10 + $0x30] sm:$0xff]   ;;  %v4180_v10 = vld [vmem:[%s4499_s10 + $0x38] sm:$0xff]   ;;  %v4181_v11 = vld [vmem:[%s4499_s10 + $0x40] sm:$0xff]  }
  0x14   : > { %v4182_v12 = vld [vmem:[%s4499_s10 + $0x48] sm:$0xff]   ;;  %v4183_v13 = vld [vmem:[%s4499_s10 + $0x50] sm:$0xff]   ;;  %v4184_v14 = vld [vmem:[%s4499_s10 + $0x58] sm:$0xff]  }
  0x15   : > { %v4185_v15 = vld [vmem:[%s4499_s10 + $0x60] sm:$0xff]   ;;  %v4186_v16 = vld [vmem:[%s4499_s10 + $0x68] sm:$0xff]   ;;  %v4187_v17 = vld [vmem:[%s4499_s10 + $0x70] sm:$0xff]  }
  0x16   : > { %v4188_v19 = vld [vmem:[%s4499_s10 + $0x78] sm:$0xff]   ;;  %v4189_v20 = vld [vmem:[%s4499_s10 + $0x80] sm:$0xff]   ;;  %v4190_v21 = vld [vmem:[%s4499_s10 + $0x88] sm:$0xff]  }
  0x17   : > { %v4191_v22 = vld [vmem:[%s4499_s10 + $0x90] sm:$0xff]   ;;  %v4192_v23 = vld [vmem:[%s4499_s10 + $0x98] sm:$0xff]   ;;  %v4193_v24 = vld [vmem:[%s4499_s10 + $0xa0] sm:$0xff]  }
  0x18   : > { %v4194_v25 = vld [vmem:[%s4499_s10 + $0xa8] sm:$0xff]   ;;  %v4195_v26 = vld [vmem:[%s4499_s10 + $0xb0] sm:$0xff]   ;;  %v4196_v29 = vld [vmem:[%s4499_s10 + $0xb8] sm:$0xff]  }
  0x19   : > { %v4197_v34 = vld [vmem:[%s4499_s10 + $0xc0] sm:$0xff]   ;;  %v4198_v37 = vld [vmem:[%s4499_s10 + $0xc8] sm:$0xff]   ;;  %v4199_v40 = vld [vmem:[%s4499_s10 + $0xd0] sm:$0xff]  }
  0x1a   : > { %3567 = vmatmul.mubr.msk.bf16.gmra.mrb[4].mxu0 %vm639_vm1, %v4174_v4  ;;  %v4200_v49 = vld [vmem:[%s4499_s10 + $0xd8] sm:$0xff]   ;;  %v4201_v0 = vld [vmem:[%s4499_s10 + $0xe0] sm:$0xff]   ;;  %v4203_v36 = vld [vmem:[%s4499_s10 + $0xf0] sm:$0xff]  }
  0x1b   : > { %3570 = vmatprep.mubr.msk.bf16.mxu0 %vm4433_vm0, %v4432_v1  ;;  %v4223_v43 = vpop.eup %4222 }
  0x1c   : > { %v4625_v47 = vrot.slane %v4223_v43, %v1223_v41 }
  0x22   : > { %3571 = vmatmul.mubr.msk.bf16.gmra.mrb[8].mxu0 %vm639_vm1, %v4175_v5 }
  0x23   : > { %3574 = vmatprep.mubr.msk.bf16.mxu0 %vm4433_vm0, %v4432_v1 }
  0x2a   : > { %3575 = vmatmul.mubr.msk.bf16.gmra.mrb[12].mxu0 %vm639_vm1, %v4176_v6 }
  0x2b   : > { %3578 = vmatprep.mubr.msk.bf16.mxu0 %vm4433_vm0, %v4432_v1 }
  0x32   : > { %3579 = vmatmul.mubr.msk.bf16.gmra.mrb[16].mxu0 %vm639_vm1, %v4177_v7 }
  0x33   : > { %3582 = vmatprep.mubr.msk.bf16.mxu0 %vm4433_vm0, %v4432_v1 }
  0x3a   : > { %3583 = vmatmul.mubr.msk.bf16.gmra.mrb[20].mxu0 %vm639_vm1, %v4178_v8 }
  0x3b   : > { %3586 = vmatprep.mubr.msk.bf16.mxu0 %vm4433_vm0, %v4432_v1 }
  0x42   : > { %3587 = vmatmul.mubr.msk.bf16.gmra.mrb[24].mxu0 %vm639_vm1, %v4179_v9 }
  0x43   : > { %3590 = vmatprep.mubr.msk.bf16.mxu0 %vm4433_vm0, %v4432_v1 }
  0x4a   : > { %3591 = vmatmul.mubr.msk.bf16.gmra.mrb[28].mxu0 %vm639_vm1, %v4180_v10 }
  0x4b   : > { %3594 = vmatprep.mubr.msk.bf16.mxu0 %vm4433_vm0, %v4432_v1 }
  0x52   : > { %3595 = vmatmul.mubr.msk.bf16.gmra.mrb[32].mxu0 %vm639_vm1, %v4181_v11 }
  0x53   : > { %3598 = vmatprep.mubr.msk.bf16.mxu0 %vm4433_vm0, %v4432_v1 }
  0x5a   : > { %3599 = vmatmul.mubr.msk.bf16.gmra.mrb[36].mxu0 %vm639_vm1, %v4182_v12 }
  0x5b   : > { %3602 = vmatprep.mubr.msk.bf16.mxu0 %vm4433_vm0, %v4432_v1 }
  0x62   : > { %3603 = vmatmul.mubr.msk.bf16.gmra.mrb[40].mxu0 %vm639_vm1, %v4183_v13 }
  0x63   : > { %3606 = vmatprep.mubr.msk.bf16.mxu0 %vm4433_vm0, %v4432_v1 }
  0x6a   : > { %3607 = vmatmul.mubr.msk.bf16.gmra.mrb[44].mxu0 %vm639_vm1, %v4184_v14 }
  0x6b   : > { %3610 = vmatprep.mubr.msk.bf16.mxu0 %vm4433_vm0, %v4432_v1 }
  0x72   : > { %3611 = vmatmul.mubr.msk.bf16.gmra.mrb[48].mxu0 %vm639_vm1, %v4185_v15 }
  0x73   : > { %3614 = vmatprep.mubr.msk.bf16.mxu0 %vm4433_vm0, %v4432_v1 }
  0x7a   : > { %3615 = vmatmul.mubr.msk.bf16.gmra.mrb[52].mxu0 %vm639_vm1, %v4186_v16  ;;  %v4202_v16 = vld [vmem:[%s4499_s10 + $0xe8] sm:$0xff]  }
  0x7b   : > { %3618 = vmatprep.mubr.msk.bf16.mxu0 %vm4433_vm0, %v4432_v1 }
  0x82   : > { %3619 = vmatmul.mubr.msk.bf16.gmra.mrb[56].mxu0 %vm639_vm1, %v4187_v17 }
  0x83   : > { %3622 = vmatprep.mubr.msk.bf16.mxu0 %vm4433_vm0, %v4432_v1 }
  0x8a   : > { %3623 = vmatmul.mubr.msk.bf16.gmra.mrb[60].mxu0 %vm639_vm1, %v4188_v19 }
  0x8b   : > { %3626 = vmatprep.mubr.msk.bf16.mxu0 %vm4433_vm0, %v4432_v1 }
  0x92   : > { %3627 = vmatmul.mubr.msk.bf16.gmra.mrb[64].mxu0 %vm639_vm1, %v4189_v20 }
  0x93   : > { %3630 = vmatprep.mubr.msk.bf16.mxu0 %vm4433_vm0, %v4432_v1 }
  0x9a   : > { %3631 = vmatmul.mubr.msk.bf16.gmra.mrb[68].mxu0 %vm639_vm1, %v4190_v21 }
  0x9b   : > { %3634 = vmatprep.mubr.msk.bf16.mxu0 %vm4433_vm0, %v4432_v1 }
  0xa2   : > { %3635 = vmatmul.mubr.msk.bf16.gmra.mrb[72].mxu0 %vm639_vm1, %v4191_v22 }
  0xa3   : > { %3638 = vmatprep.mubr.msk.bf16.mxu0 %vm4433_vm0, %v4432_v1 }
  0xaa   : > { %3639 = vmatmul.mubr.msk.bf16.gmra.mrb[76].mxu0 %vm639_vm1, %v4192_v23 }
  0xab   : > { %3642 = vmatprep.mubr.msk.bf16.mxu0 %vm4433_vm0, %v4432_v1 }
  0xb2   : > { %3643 = vmatmul.mubr.msk.bf16.gmra.mrb[80].mxu0 %vm639_vm1, %v4193_v24 }
  0xb3   : > { %3646 = vmatprep.mubr.msk.bf16.mxu0 %vm4433_vm0, %v4432_v1 }
  0xba   : > { %3647 = vmatmul.mubr.msk.bf16.gmra.mrb[84].mxu0 %vm639_vm1, %v4194_v25 }
  0xbb   : > { %3650 = vmatprep.mubr.msk.bf16.mxu0 %vm4433_vm0, %v4432_v1 }
  0xc2   : > { %3651 = vmatmul.mubr.msk.bf16.gmra.mrb[88].mxu0 %vm639_vm1, %v4195_v26 }
  0xc3   : > { %3654 = vmatprep.mubr.msk.bf16.mxu0 %vm4433_vm0, %v4432_v1 }
  0xca   : > { %3655 = vmatmul.mubr.msk.bf16.gmra.mrb[92].mxu0 %vm639_vm1, %v4196_v29 }
  0xcb   : > { %3658 = vmatprep.mubr.msk.bf16.mxu0 %vm4433_vm0, %v4432_v1 }
  0xd2   : > { %3659 = vmatmul.mubr.msk.bf16.gmra.mrb[96].mxu0 %vm639_vm1, %v4197_v34 }
  0xd3   : > { %3662 = vmatprep.mubr.msk.bf16.mxu0 %vm4433_vm0, %v4432_v1 }
  0xda   : > { %3663 = vmatmul.mubr.msk.bf16.gmra.mrb[100].mxu0 %vm639_vm1, %v4198_v37 }
  0xdb   : > { %3666 = vmatprep.mubr.msk.bf16.mxu0 %vm4433_vm0, %v4432_v1 }
  0xe2   : > { %3667 = vmatmul.mubr.msk.bf16.gmra.mrb[104].mxu0 %vm639_vm1, %v4199_v40 }
  0xe3   : > { %3670 = vmatprep.mubr.msk.bf16.mxu0 %vm4433_vm0, %v4432_v1 }
  0xe5   : > { %v821_v44 = vpop.f32.mrb[0].mxu0 }
  0xe6   : > { %v1226_v46 = vsub.f32 %v821_v44, %v4615_v42  ;;  %v3564_v48 = vpop.f32.mrb[1].mxu0 }
  0xe7   : > { %v824_v50 = vpop.f32.mrb[2].mxu0  ;;  %v2088_v48 = vld [vmem:[%s5820_s6 + $0x1c8] sm:$0xff] }
  0xe8   : > { %v1330_v51 = vmul.f32 %v4622_v45, %v1226_v46  ;;  %v1227_v52 = vsub.f32 %v824_v50, %v4615_v42  ;;  %v3565_v53 = vpop.f32.mrb[3].mxu0  ;;  %2386 = vmatprep.mubr.f32.mxu1 %v2088_v48  ;;  %v4206_v48 = vld [vmem:[%s4499_s10 + $0x108] sm:$0xff]  }
  0xea   : > { %v1436_v55 = vmul.f32 %v4625_v47, %v1330_v51  ;;  %v1331_v56 = vmul.f32 %v4622_v45, %v1227_v52  ;;  %3671 = vmatmul.mubr.msk.bf16.gmra.mrb[108].mxu0 %vm639_vm1, %v4200_v49 }
  0xeb   : > { %3674 = vmatprep.mubr.msk.bf16.mxu0 %vm4433_vm0, %v4432_v1 }
  0xec   : > { %v1541_v57 = vadd.f32 %v4633_v54, %v1436_v55  ;;  %v1437_v58 = vmul.f32 %v4625_v47, %v1331_v56 }
  0xed   : > { %v829_v59 = vpop.f32.mrb[4].mxu0 }
  0xee   : > { %v1639_v60 = vmul.f32 0.5, %v1541_v57  ;;  %v1542_v61 = vadd.f32 %v4633_v54, %v1437_v58  ;;  %v1228_v62 = vsub.f32 %v829_v59, %v4615_v42  ;;  %v3568_v63 = vpop.f32.mrb[5].mxu0 }
  0xef   : > { %v832_v2 = vpop.f32.mrb[6].mxu0  ;;  %v4204_v63 = vld [vmem:[%s4499_s10 + $0xf8] sm:$0xff]  }
  0xf0   : > { %4224 = vtanh.f32 %v1639_v60  ;;  %v1640_v3 = vmul.f32 0.5, %v1542_v61  ;;  %v1332_v4 = vmul.f32 %v4622_v45, %v1228_v62  ;;  %v1229_v5 = vsub.f32 %v832_v2, %v4615_v42  ;;  %v3569_v6 = vpop.f32.mrb[7].mxu0 }
  0xf2   : > { %4226 = vtanh.f32 %v1640_v3  ;;  %v1438_v7 = vmul.f32 %v4625_v47, %v1332_v4  ;;  %v1333_v8 = vmul.f32 %v4622_v45, %v1229_v5  ;;  %3675 = vmatmul.mubr.msk.bf16.gmra.mrb[112].mxu0 %vm639_vm1, %v4201_v0 }
  0xf3   : > { %3678 = vmatprep.mubr.msk.bf16.mxu0 %vm4433_vm0, %v4432_v1 }
  0xf4   : > { %v1543_v9 = vadd.f32 %v4633_v54, %v1438_v7  ;;  %v1439_v10 = vmul.f32 %v4625_v47, %v1333_v8 }
  0xf5   : > { %v837_v11 = vpop.f32.mrb[8].mxu0 }
  0xf6   : > { %v1641_v12 = vmul.f32 0.5, %v1543_v9  ;;  %v1544_v13 = vadd.f32 %v4633_v54, %v1439_v10  ;;  %v1230_v14 = vsub.f32 %v837_v11, %v4615_v42  ;;  %v3572_v15 = vpop.f32.mrb[9].mxu0 }
  0xf7   : > { %v840_v17 = vpop.f32.mrb[10].mxu0 }
  0xf8   : > { %4228 = vtanh.f32 %v1641_v12  ;;  %v1642_v19 = vmul.f32 0.5, %v1544_v13  ;;  %v1334_v20 = vmul.f32 %v4622_v45, %v1230_v14  ;;  %v1231_v21 = vsub.f32 %v840_v17, %v4615_v42  ;;  %v3573_v22 = vpop.f32.mrb[11].mxu0 }
  0xfa   : > { %v4225_v23 = vpop.eup %4224  ;;  %4230 = vtanh.f32 %v1642_v19  ;;  %v1440_v24 = vmul.f32 %v4625_v47, %v1334_v20  ;;  %v1335_v25 = vmul.f32 %v4622_v45, %v1231_v21  ;;  %3679 = vmatmul.mubr.msk.bf16.gmra.mrb[116].mxu0 %vm639_vm1, %v4202_v16 }
  0xfb   : > { %3682 = vmatprep.mubr.msk.bf16.mxu0 %vm4433_vm0, %v4432_v1  ;;  %v1835_v26 = vmul.f32 0.5, %v4225_v23  ;;  %v4205_v23 = vld [vmem:[%s4499_s10 + $0x100] sm:$0xff]  }
  0xfc   : > { %v4227_v27 = vpop.eup %4226  ;;  %v1545_v28 = vadd.f32 %v4633_v54, %v1440_v24  ;;  %v1441_v29 = vmul.f32 %v4625_v47, %v1335_v25 }
  0xfd   : > { %v845_v30 = vpop.f32.mrb[12].mxu0  ;;  %v1836_v31 = vmul.f32 0.5, %v4227_v27  ;;  %v1933_v38 = vadd.f32 0.5, %v1835_v26 }
  0xfe   : > { %v1643_v32 = vmul.f32 0.5, %v1545_v28  ;;  %v1546_v33 = vadd.f32 %v4633_v54, %v1441_v29  ;;  %v1232_v34 = vsub.f32 %v845_v30, %v4615_v42  ;;  %v3576_v35 = vpop.f32.mrb[13].mxu0 }
  0xff   : > { %v848_v37 = vpop.f32.mrb[14].mxu0  ;;  %v1934_v39 = vadd.f32 0.5, %v1836_v31 }
 0x100   : > { %4232 = vtanh.f32 %v1643_v32  ;;  %v1644_v40 = vmul.f32 0.5, %v1546_v33  ;;  %v1336_v41 = vmul.f32 %v4622_v45, %v1232_v34  ;;  %v1233_v43 = vsub.f32 %v848_v37, %v4615_v42  ;;  %v3577_v44 = vpop.f32.mrb[15].mxu0 }
 0x101   : > { %v3838_v46 = vpack.c.bf16 %v1934_v39, %v1933_v38 }
 0x102   : > { %v4229_v49 = vpop.eup %4228  ;;  %4234 = vtanh.f32 %v1644_v40  ;;  %v1442_v50 = vmul.f32 %v4625_v47, %v1336_v41  ;;  %v1337_v51 = vmul.f32 %v4622_v45, %v1233_v43  ;;  %3683 = vmatmul.mubr.msk.bf16.gmra.mrb[120].mxu0 %vm639_vm1, %v4203_v36 }
 0x103   : > { %3839 = vmatpush1.bf16.msra.mxu0 %v3838_v46  ;;  %4000 = vmatpush1.bf16.msra.mxu1 %v3838_v46  ;;  %v1837_v52 = vmul.f32 0.5, %v4229_v49 }
 0x104   : > { %v4231_v53 = vpop.eup %4230  ;;  %v1547_v55 = vadd.f32 %v4633_v54, %v1442_v50  ;;  %v1443_v56 = vmul.f32 %v4625_v47, %v1337_v51  ;;  %3686 = vmatprep.mubr.msk.bf16.mxu0 %vm4433_vm0, %v4432_v1  ;;  %3840 = vmatprep.subr.bf16.mxu0 %v4434_v18 }
 0x105   : > { %v853_v57 = vpop.f32.mrb[16].mxu0  ;;  %3985 = vmatprep.subr.bf16.mxu1 %v4434_v18  ;;  %v1838_v58 = vmul.f32 0.5, %v4231_v53  ;;  %v1935_v2 = vadd.f32 0.5, %v1837_v52 }
 0x106   : > { %v1645_v59 = vmul.f32 0.5, %v1547_v55  ;;  %v1548_v60 = vadd.f32 %v4633_v54, %v1443_v56  ;;  %v1234_v61 = vsub.f32 %v853_v57, %v4615_v42  ;;  %v3580_v62 = vpop.f32.mrb[17].mxu0 }
 0x107   : > { %v856_v0 = vpop.f32.mrb[18].mxu0  ;;  %v1936_v3 = vadd.f32 0.5, %v1838_v58 }
 0x108   : > { %4236 = vtanh.f32 %v1645_v59  ;;  %v1646_v4 = vmul.f32 0.5, %v1548_v60  ;;  %v1338_v5 = vmul.f32 %v4622_v45, %v1234_v61  ;;  %v1235_v6 = vsub.f32 %v856_v0, %v4615_v42  ;;  %v3581_v7 = vpop.f32.mrb[19].mxu0 }
 0x109   : > { %v3841_v8 = vpack.c.bf16 %v1936_v3, %v1935_v2 }
 0x10a   : > { %v4233_v9 = vpop.eup %4232  ;;  %4238 = vtanh.f32 %v1646_v4  ;;  %v1444_v10 = vmul.f32 %v4625_v47, %v1338_v5  ;;  %v1339_v11 = vmul.f32 %v4622_v45, %v1235_v6  ;;  %3687 = vmatmul.mubr.msk.bf16.gmra.mrb[124].mxu0 %vm639_vm1, %v4204_v63 }
 0x10b   : > { %3842 = vmatpush1.bf16.msra.mxu0 %v3841_v8  ;;  %4001 = vmatpush1.bf16.msra.mxu1 %v3841_v8  ;;  %v1839_v12 = vmul.f32 0.5, %v4233_v9  ;;  %v4207_v8 = vld [vmem:[%s4499_s10 + $0x110] sm:$0xff]  }
 0x10c   : > { %v4235_v13 = vpop.eup %4234  ;;  %v1549_v14 = vadd.f32 %v4633_v54, %v1444_v10  ;;  %v1445_v15 = vmul.f32 %v4625_v47, %v1339_v11  ;;  %3690 = vmatprep.mubr.msk.bf16.mxu0 %vm4433_vm0, %v4432_v1  ;;  %3843 = vmatprep.subr.bf16.mxu0 %v4434_v18 }
 0x10d   : > { %v861_v16 = vpop.f32.mrb[20].mxu0  ;;  %3986 = vmatprep.subr.bf16.mxu1 %v4434_v18  ;;  %v1840_v17 = vmul.f32 0.5, %v4235_v13  ;;  %v1937_v25 = vadd.f32 0.5, %v1839_v12 }
 0x10e   : > { %v1647_v19 = vmul.f32 0.5, %v1549_v14  ;;  %v1550_v20 = vadd.f32 %v4633_v54, %v1445_v15  ;;  %v1236_v21 = vsub.f32 %v861_v16, %v4615_v42  ;;  %v3584_v22 = vpop.f32.mrb[21].mxu0 }
 0x10f   : > { %v864_v24 = vpop.f32.mrb[22].mxu0  ;;  %v1938_v26 = vadd.f32 0.5, %v1840_v17 }
 0x110   : > { %4240 = vtanh.f32 %v1647_v19  ;;  %v1648_v27 = vmul.f32 0.5, %v1550_v20  ;;  %v1340_v28 = vmul.f32 %v4622_v45, %v1236_v21  ;;  %v1237_v29 = vsub.f32 %v864_v24, %v4615_v42  ;;  %v3585_v30 = vpop.f32.mrb[23].mxu0 }
 0x111   : > { %v3844_v31 = vpack.c.bf16 %v1938_v26, %v1937_v25 }
 0x112   : > { %v4237_v32 = vpop.eup %4236  ;;  %4242 = vtanh.f32 %v1648_v27  ;;  %v1446_v33 = vmul.f32 %v4625_v47, %v1340_v28  ;;  %v1341_v34 = vmul.f32 %v4622_v45, %v1237_v29  ;;  %3691 = vmatmul.mubr.msk.bf16.gmra.mrb[128].mxu0 %vm639_vm1, %v4205_v23 }
 0x113   : > { %3845 = vmatpush1.bf16.msra.mxu0 %v3844_v31  ;;  %4002 = vmatpush1.bf16.msra.mxu1 %v3844_v31  ;;  %v1841_v35 = vmul.f32 0.5, %v4237_v32  ;;  %v4208_v31 = vld [vmem:[%s4499_s10 + $0x118] sm:$0xff]  }
 0x114   : > { %v4239_v36 = vpop.eup %4238  ;;  %v1551_v37 = vadd.f32 %v4633_v54, %v1446_v33  ;;  %v1447_v38 = vmul.f32 %v4625_v47, %v1341_v34  ;;  %3694 = vmatprep.mubr.msk.bf16.mxu0 %vm4433_vm0, %v4432_v1  ;;  %3846 = vmatprep.subr.bf16.mxu0 %v4434_v18 }
 0x115   : > { %v869_v39 = vpop.f32.mrb[24].mxu0  ;;  %3987 = vmatprep.subr.bf16.mxu1 %v4434_v18  ;;  %v1842_v40 = vmul.f32 0.5, %v4239_v36  ;;  %v1939_v50 = vadd.f32 0.5, %v1841_v35 }
 0x116   : > { %v1649_v41 = vmul.f32 0.5, %v1551_v37  ;;  %v1552_v43 = vadd.f32 %v4633_v54, %v1447_v38  ;;  %v1238_v44 = vsub.f32 %v869_v39, %v4615_v42  ;;  %v3588_v46 = vpop.f32.mrb[25].mxu0 }
 0x117   : > { %v872_v49 = vpop.f32.mrb[26].mxu0  ;;  %v1940_v51 = vadd.f32 0.5, %v1842_v40 }
 0x118   : > { %4244 = vtanh.f32 %v1649_v41  ;;  %v1650_v52 = vmul.f32 0.5, %v1552_v43  ;;  %v1342_v53 = vmul.f32 %v4622_v45, %v1238_v44  ;;  %v1239_v55 = vsub.f32 %v872_v49, %v4615_v42  ;;  %v3589_v56 = vpop.f32.mrb[27].mxu0 }
 0x119   : > { %v3847_v57 = vpack.c.bf16 %v1940_v51, %v1939_v50 }
 0x11a   : > { %v4241_v58 = vpop.eup %4240  ;;  %4246 = vtanh.f32 %v1650_v52  ;;  %v1448_v59 = vmul.f32 %v4625_v47, %v1342_v53  ;;  %v1343_v60 = vmul.f32 %v4622_v45, %v1239_v55  ;;  %3695 = vmatmul.mubr.msk.bf16.gmra.mrb[132].mxu0 %vm639_vm1, %v4206_v48 }
 0x11b   : > { %3848 = vmatpush1.bf16.msra.mxu0 %v3847_v57  ;;  %4003 = vmatpush1.bf16.msra.mxu1 %v3847_v57  ;;  %v1843_v61 = vmul.f32 0.5, %v4241_v58  ;;  %v4209_v57 = vld [vmem:[%s4499_s10 + $0x120] sm:$0xff]  }
 0x11c   : > { %v4243_v62 = vpop.eup %4242  ;;  %v1553_v63 = vadd.f32 %v4633_v54, %v1448_v59  ;;  %v1449_v0 = vmul.f32 %v4625_v47, %v1343_v60  ;;  %3698 = vmatprep.mubr.msk.bf16.mxu0 %vm4433_vm0, %v4432_v1  ;;  %3849 = vmatprep.subr.bf16.mxu0 %v4434_v18 }
 0x11d   : > { %v877_v2 = vpop.f32.mrb[28].mxu0  ;;  %3988 = vmatprep.subr.bf16.mxu1 %v4434_v18  ;;  %v1844_v3 = vmul.f32 0.5, %v4243_v62  ;;  %v1941_v10 = vadd.f32 0.5, %v1843_v61 }
 0x11e   : > { %v1651_v4 = vmul.f32 0.5, %v1553_v63  ;;  %v1554_v5 = vadd.f32 %v4633_v54, %v1449_v0  ;;  %v1240_v6 = vsub.f32 %v877_v2, %v4615_v42  ;;  %v3592_v7 = vpop.f32.mrb[29].mxu0 }
 0x11f   : > { %v880_v9 = vpop.f32.mrb[30].mxu0  ;;  %v1942_v11 = vadd.f32 0.5, %v1844_v3 }
 0x120   : > { %4248 = vtanh.f32 %v1651_v4  ;;  %v1652_v12 = vmul.f32 0.5, %v1554_v5  ;;  %v1344_v13 = vmul.f32 %v4622_v45, %v1240_v6  ;;  %v1241_v14 = vsub.f32 %v880_v9, %v4615_v42  ;;  %v3593_v15 = vpop.f32.mrb[31].mxu0 }
 0x121   : > { %v3850_v16 = vpack.c.bf16 %v1942_v11, %v1941_v10 }
 0x122   : > { %v4245_v17 = vpop.eup %4244  ;;  %4250 = vtanh.f32 %v1652_v12  ;;  %v1450_v19 = vmul.f32 %v4625_v47, %v1344_v13  ;;  %v1345_v20 = vmul.f32 %v4622_v45, %v1241_v14  ;;  %3699 = vmatmul.mubr.msk.bf16.gmra.mrb[136].mxu0 %vm639_vm1, %v4207_v8 }
 0x123   : > { %3851 = vmatpush1.bf16.msra.mxu0 %v3850_v16  ;;  %4004 = vmatpush1.bf16.msra.mxu1 %v3850_v16  ;;  %v1845_v21 = vmul.f32 0.5, %v4245_v17  ;;  %v4210_v16 = vld [vmem:[%s4499_s10 + $0x128] sm:$0xff]  }
 0x124   : > { %v4247_v22 = vpop.eup %4246  ;;  %v1555_v23 = vadd.f32 %v4633_v54, %v1450_v19  ;;  %v1451_v24 = vmul.f32 %v4625_v47, %v1345_v20  ;;  %3702 = vmatprep.mubr.msk.bf16.mxu0 %vm4433_vm0, %v4432_v1  ;;  %3852 = vmatprep.subr.bf16.mxu0 %v4434_v18 }
 0x125   : > { %v885_v25 = vpop.f32.mrb[32].mxu0  ;;  %3989 = vmatprep.subr.bf16.mxu1 %v4434_v18  ;;  %v1846_v26 = vmul.f32 0.5, %v4247_v22  ;;  %v1943_v33 = vadd.f32 0.5, %v1845_v21 }
 0x126   : > { %v1653_v27 = vmul.f32 0.5, %v1555_v23  ;;  %v1556_v28 = vadd.f32 %v4633_v54, %v1451_v24  ;;  %v1242_v29 = vsub.f32 %v885_v25, %v4615_v42  ;;  %v3596_v30 = vpop.f32.mrb[33].mxu0 }
 0x127   : > { %v888_v32 = vpop.f32.mrb[34].mxu0  ;;  %v1944_v34 = vadd.f32 0.5, %v1846_v26 }
 0x128   : > { %4252 = vtanh.f32 %v1653_v27  ;;  %v1654_v35 = vmul.f32 0.5, %v1556_v28  ;;  %v1346_v36 = vmul.f32 %v4622_v45, %v1242_v29  ;;  %v1243_v37 = vsub.f32 %v888_v32, %v4615_v42  ;;  %v3597_v38 = vpop.f32.mrb[35].mxu0 }
 0x129   : > { %v3853_v39 = vpack.c.bf16 %v1944_v34, %v1943_v33 }
 0x12a   : > { %v4249_v40 = vpop.eup %4248  ;;  %4254 = vtanh.f32 %v1654_v35  ;;  %v1452_v41 = vmul.f32 %v4625_v47, %v1346_v36  ;;  %v1347_v43 = vmul.f32 %v4622_v45, %v1243_v37  ;;  %3703 = vmatmul.mubr.msk.bf16.gmra.mrb[140].mxu0 %vm639_vm1, %v4208_v31 }
 0x12b   : > { %3854 = vmatpush1.bf16.msra.mxu0 %v3853_v39  ;;  %4005 = vmatpush1.bf16.msra.mxu1 %v3853_v39  ;;  %v1847_v44 = vmul.f32 0.5, %v4249_v40  ;;  %v4211_v39 = vld [vmem:[%s4499_s10 + $0x130] sm:$0xff]  }
 0x12c   : > { %v4251_v46 = vpop.eup %4250  ;;  %v1557_v48 = vadd.f32 %v4633_v54, %v1452_v41  ;;  %v1453_v49 = vmul.f32 %v4625_v47, %v1347_v43  ;;  %3706 = vmatprep.mubr.msk.bf16.mxu0 %vm4433_vm0, %v4432_v1  ;;  %3855 = vmatprep.subr.bf16.mxu0 %v4434_v18 }
 0x12d   : > { %v893_v50 = vpop.f32.mrb[36].mxu0  ;;  %3990 = vmatprep.subr.bf16.mxu1 %v4434_v18  ;;  %v1848_v51 = vmul.f32 0.5, %v4251_v46  ;;  %v1945_v59 = vadd.f32 0.5, %v1847_v44 }
 0x12e   : > { %v1655_v52 = vmul.f32 0.5, %v1557_v48  ;;  %v1558_v53 = vadd.f32 %v4633_v54, %v1453_v49  ;;  %v1244_v55 = vsub.f32 %v893_v50, %v4615_v42  ;;  %v3600_v56 = vpop.f32.mrb[37].mxu0 }
 0x12f   : > { %v896_v58 = vpop.f32.mrb[38].mxu0  ;;  %v1946_v60 = vadd.f32 0.5, %v1848_v51 }
 0x130   : > { %4256 = vtanh.f32 %v1655_v52  ;;  %v1656_v61 = vmul.f32 0.5, %v1558_v53  ;;  %v1348_v62 = vmul.f32 %v4622_v45, %v1244_v55  ;;  %v1245_v63 = vsub.f32 %v896_v58, %v4615_v42  ;;  %v3601_v0 = vpop.f32.mrb[39].mxu0 }
 0x131   : > { %v3856_v2 = vpack.c.bf16 %v1946_v60, %v1945_v59 }
 0x132   : > { %v4253_v3 = vpop.eup %4252  ;;  %4258 = vtanh.f32 %v1656_v61  ;;  %v1454_v4 = vmul.f32 %v4625_v47, %v1348_v62  ;;  %v1349_v5 = vmul.f32 %v4622_v45, %v1245_v63  ;;  %3707 = vmatmul.mubr.msk.bf16.gmra.mrb[144].mxu0 %vm639_vm1, %v4209_v57 }
 0x133   : > { %3857 = vmatpush1.bf16.msra.mxu0 %v3856_v2  ;;  %4006 = vmatpush1.bf16.msra.mxu1 %v3856_v2  ;;  %v1849_v6 = vmul.f32 0.5, %v4253_v3  ;;  %v4212_v2 = vld [vmem:[%s4499_s10 + $0x138] sm:$0xff]  }
 0x134   : > { %v4255_v7 = vpop.eup %4254  ;;  %v1559_v8 = vadd.f32 %v4633_v54, %v1454_v4  ;;  %v1455_v9 = vmul.f32 %v4625_v47, %v1349_v5  ;;  %3710 = vmatprep.mubr.msk.bf16.mxu0 %vm4433_vm0, %v4432_v1  ;;  %3858 = vmatprep.subr.bf16.mxu0 %v4434_v18 }
 0x135   : > { %v901_v10 = vpop.f32.mrb[40].mxu0  ;;  %3991 = vmatprep.subr.bf16.mxu1 %v4434_v18  ;;  %v1850_v11 = vmul.f32 0.5, %v4255_v7  ;;  %v1947_v19 = vadd.f32 0.5, %v1849_v6 }
 0x136   : > { %v1657_v12 = vmul.f32 0.5, %v1559_v8  ;;  %v1560_v13 = vadd.f32 %v4633_v54, %v1455_v9  ;;  %v1246_v14 = vsub.f32 %v901_v10, %v4615_v42  ;;  %v3604_v15 = vpop.f32.mrb[41].mxu0 }
 0x137   : > { %v904_v17 = vpop.f32.mrb[42].mxu0  ;;  %v1948_v20 = vadd.f32 0.5, %v1850_v11 }
 0x138   : > { %4260 = vtanh.f32 %v1657_v12  ;;  %v1658_v21 = vmul.f32 0.5, %v1560_v13  ;;  %v1350_v22 = vmul.f32 %v4622_v45, %v1246_v14  ;;  %v1247_v23 = vsub.f32 %v904_v17, %v4615_v42  ;;  %v3605_v24 = vpop.f32.mrb[43].mxu0 }
 0x139   : > { %v3859_v25 = vpack.c.bf16 %v1948_v20, %v1947_v19 }
 0x13a   : > { %v4257_v26 = vpop.eup %4256  ;;  %4262 = vtanh.f32 %v1658_v21  ;;  %v1456_v27 = vmul.f32 %v4625_v47, %v1350_v22  ;;  %v1351_v28 = vmul.f32 %v4622_v45, %v1247_v23  ;;  %3711 = vmatmul.mubr.msk.bf16.gmra.mrb[148].mxu0 %vm639_vm1, %v4210_v16 }
 0x13b   : > { %3860 = vmatpush1.bf16.msra.mxu0 %v3859_v25  ;;  %4007 = vmatpush1.bf16.msra.mxu1 %v3859_v25  ;;  %v1851_v29 = vmul.f32 0.5, %v4257_v26  ;;  %v4213_v25 = vld [vmem:[%s4499_s10 + $0x140] sm:$0xff]  }
 0x13c   : > { %v4259_v30 = vpop.eup %4258  ;;  %v1561_v31 = vadd.f32 %v4633_v54, %v1456_v27  ;;  %v1457_v32 = vmul.f32 %v4625_v47, %v1351_v28  ;;  %3714 = vmatprep.mubr.msk.bf16.mxu0 %vm4433_vm0, %v4432_v1  ;;  %3861 = vmatprep.subr.bf16.mxu0 %v4434_v18 }
 0x13d   : > { %v909_v33 = vpop.f32.mrb[44].mxu0  ;;  %3992 = vmatprep.subr.bf16.mxu1 %v4434_v18  ;;  %v1852_v34 = vmul.f32 0.5, %v4259_v30  ;;  %v1949_v41 = vadd.f32 0.5, %v1851_v29 }
 0x13e   : > { %v1659_v35 = vmul.f32 0.5, %v1561_v31  ;;  %v1562_v36 = vadd.f32 %v4633_v54, %v1457_v32  ;;  %v1248_v37 = vsub.f32 %v909_v33, %v4615_v42  ;;  %v3608_v38 = vpop.f32.mrb[45].mxu0 }
 0x13f   : > { %v912_v40 = vpop.f32.mrb[46].mxu0  ;;  %v1950_v43 = vadd.f32 0.5, %v1852_v34 }
 0x140   : > { %4264 = vtanh.f32 %v1659_v35  ;;  %v1660_v44 = vmul.f32 0.5, %v1562_v36  ;;  %v1352_v46 = vmul.f32 %v4622_v45, %v1248_v37  ;;  %v1249_v48 = vsub.f32 %v912_v40, %v4615_v42  ;;  %v3609_v49 = vpop.f32.mrb[47].mxu0 }
 0x141   : > { %v3862_v50 = vpack.c.bf16 %v1950_v43, %v1949_v41 }
 0x142   : > { %v4261_v51 = vpop.eup %4260  ;;  %4266 = vtanh.f32 %v1660_v44  ;;  %v1458_v52 = vmul.f32 %v4625_v47, %v1352_v46  ;;  %v1353_v53 = vmul.f32 %v4622_v45, %v1249_v48  ;;  %3715 = vmatmul.mubr.msk.bf16.gmra.mrb[152].mxu0 %vm639_vm1, %v4211_v39 }
 0x143   : > { %3863 = vmatpush1.bf16.msra.mxu0 %v3862_v50  ;;  %4008 = vmatpush1.bf16.msra.mxu1 %v3862_v50  ;;  %v1853_v55 = vmul.f32 0.5, %v4261_v51  ;;  %v4214_v50 = vld [vmem:[%s4499_s10 + $0x148] sm:$0xff]  }
 0x144   : > { %v4263_v56 = vpop.eup %4262  ;;  %v1563_v57 = vadd.f32 %v4633_v54, %v1458_v52  ;;  %v1459_v58 = vmul.f32 %v4625_v47, %v1353_v53  ;;  %3718 = vmatprep.mubr.msk.bf16.mxu0 %vm4433_vm0, %v4432_v1  ;;  %3864 = vmatprep.subr.bf16.mxu0 %v4434_v18 }
 0x145   : > { %v917_v59 = vpop.f32.mrb[48].mxu0  ;;  %3993 = vmatprep.subr.bf16.mxu1 %v4434_v18  ;;  %v1854_v60 = vmul.f32 0.5, %v4263_v56  ;;  %v1951_v4 = vadd.f32 0.5, %v1853_v55 }
 0x146   : > { %v1661_v61 = vmul.f32 0.5, %v1563_v57  ;;  %v1564_v62 = vadd.f32 %v4633_v54, %v1459_v58  ;;  %v1250_v63 = vsub.f32 %v917_v59, %v4615_v42  ;;  %v3612_v0 = vpop.f32.mrb[49].mxu0 }
 0x147   : > { %v920_v3 = vpop.f32.mrb[50].mxu0  ;;  %v1952_v5 = vadd.f32 0.5, %v1854_v60 }
 0x148   : > { %4268 = vtanh.f32 %v1661_v61  ;;  %v1662_v6 = vmul.f32 0.5, %v1564_v62  ;;  %v1354_v7 = vmul.f32 %v4622_v45, %v1250_v63  ;;  %v1251_v8 = vsub.f32 %v920_v3, %v4615_v42  ;;  %v3613_v9 = vpop.f32.mrb[51].mxu0 }
 0x149   : > { %v3865_v10 = vpack.c.bf16 %v1952_v5, %v1951_v4 }
 0x14a   : > { %v4265_v11 = vpop.eup %4264  ;;  %4270 = vtanh.f32 %v1662_v6  ;;  %v1460_v12 = vmul.f32 %v4625_v47, %v1354_v7  ;;  %v1355_v13 = vmul.f32 %v4622_v45, %v1251_v8  ;;  %3719 = vmatmul.mubr.msk.bf16.gmra.mrb[156].mxu0 %vm639_vm1, %v4212_v2 }
 0x14b   : > { %3866 = vmatpush1.bf16.msra.mxu0 %v3865_v10  ;;  %4009 = vmatpush1.bf16.msra.mxu1 %v3865_v10  ;;  %v1855_v14 = vmul.f32 0.5, %v4265_v11  ;;  %v4215_v10 = vld [vmem:[%s4499_s10 + $0x150] sm:$0xff]  }
 0x14c   : > { %v4267_v15 = vpop.eup %4266  ;;  %v1565_v16 = vadd.f32 %v4633_v54, %v1460_v12  ;;  %v1461_v17 = vmul.f32 %v4625_v47, %v1355_v13  ;;  %3722 = vmatprep.mubr.msk.bf16.mxu0 %vm4433_vm0, %v4432_v1  ;;  %3867 = vmatprep.subr.bf16.mxu0 %v4434_v18 }
 0x14d   : > { %v925_v19 = vpop.f32.mrb[52].mxu0  ;;  %3994 = vmatprep.subr.bf16.mxu1 %v4434_v18  ;;  %v1856_v20 = vmul.f32 0.5, %v4267_v15  ;;  %v1953_v27 = vadd.f32 0.5, %v1855_v14 }
 0x14e   : > { %v1663_v21 = vmul.f32 0.5, %v1565_v16  ;;  %v1566_v22 = vadd.f32 %v4633_v54, %v1461_v17  ;;  %v1252_v23 = vsub.f32 %v925_v19, %v4615_v42  ;;  %v3616_v24 = vpop.f32.mrb[53].mxu0 }
 0x14f   : > { %v928_v26 = vpop.f32.mrb[54].mxu0  ;;  %v1954_v28 = vadd.f32 0.5, %v1856_v20 }
 0x150   : > { %4272 = vtanh.f32 %v1663_v21  ;;  %v1664_v29 = vmul.f32 0.5, %v1566_v22  ;;  %v1356_v30 = vmul.f32 %v4622_v45, %v1252_v23  ;;  %v1253_v31 = vsub.f32 %v928_v26, %v4615_v42  ;;  %v3617_v32 = vpop.f32.mrb[55].mxu0 }
 0x151   : > { %v3868_v33 = vpack.c.bf16 %v1954_v28, %v1953_v27 }
 0x152   : > { %v4269_v34 = vpop.eup %4268  ;;  %4274 = vtanh.f32 %v1664_v29  ;;  %v1462_v35 = vmul.f32 %v4625_v47, %v1356_v30  ;;  %v1357_v36 = vmul.f32 %v4622_v45, %v1253_v31  ;;  %3723 = vmatmul.mubr.msk.bf16.gmra.mrb[160].mxu0 %vm639_vm1, %v4213_v25 }
 0x153   : > { %3869 = vmatpush1.bf16.msra.mxu0 %v3868_v33  ;;  %4010 = vmatpush1.bf16.msra.mxu1 %v3868_v33  ;;  %v1857_v37 = vmul.f32 0.5, %v4269_v34  ;;  %v4216_v33 = vld [vmem:[%s4499_s10 + $0x158] sm:$0xff]  }
 0x154   : > { %v4271_v38 = vpop.eup %4270  ;;  %v1567_v39 = vadd.f32 %v4633_v54, %v1462_v35  ;;  %v1463_v40 = vmul.f32 %v4625_v47, %v1357_v36  ;;  %3726 = vmatprep.mubr.msk.bf16.mxu0 %vm4433_vm0, %v4432_v1  ;;  %3870 = vmatprep.subr.bf16.mxu0 %v4434_v18 }
 0x155   : > { %v933_v41 = vpop.f32.mrb[56].mxu0  ;;  %3995 = vmatprep.subr.bf16.mxu1 %v4434_v18  ;;  %v1858_v43 = vmul.f32 0.5, %v4271_v38  ;;  %v1955_v52 = vadd.f32 0.5, %v1857_v37 }
 0x156   : > { %v1665_v44 = vmul.f32 0.5, %v1567_v39  ;;  %v1568_v46 = vadd.f32 %v4633_v54, %v1463_v40  ;;  %v1254_v48 = vsub.f32 %v933_v41, %v4615_v42  ;;  %v3620_v49 = vpop.f32.mrb[57].mxu0 }
 0x157   : > { %v936_v51 = vpop.f32.mrb[58].mxu0  ;;  %v1956_v53 = vadd.f32 0.5, %v1858_v43 }
 0x158   : > { %4276 = vtanh.f32 %v1665_v44  ;;  %v1666_v55 = vmul.f32 0.5, %v1568_v46  ;;  %v1358_v56 = vmul.f32 %v4622_v45, %v1254_v48  ;;  %v1255_v57 = vsub.f32 %v936_v51, %v4615_v42  ;;  %v3621_v58 = vpop.f32.mrb[59].mxu0 }
 0x159   : > { %v3871_v59 = vpack.c.bf16 %v1956_v53, %v1955_v52 }
 0x15a   : > { %v4273_v60 = vpop.eup %4272  ;;  %4278 = vtanh.f32 %v1666_v55  ;;  %v1464_v61 = vmul.f32 %v4625_v47, %v1358_v56  ;;  %v1359_v62 = vmul.f32 %v4622_v45, %v1255_v57  ;;  %3727 = vmatmul.mubr.msk.bf16.gmra.mrb[164].mxu0 %vm639_vm1, %v4214_v50 }
 0x15b   : > { %3872 = vmatpush1.bf16.msra.mxu0 %v3871_v59  ;;  %4011 = vmatpush1.bf16.msra.mxu1 %v3871_v59  ;;  %v1859_v63 = vmul.f32 0.5, %v4273_v60  ;;  %v4217_v59 = vld [vmem:[%s4499_s10 + $0x160] sm:$0xff]  }
 0x15c   : > { %v4275_v0 = vpop.eup %4274  ;;  %v1569_v2 = vadd.f32 %v4633_v54, %v1464_v61  ;;  %v1465_v3 = vmul.f32 %v4625_v47, %v1359_v62  ;;  %3730 = vmatprep.mubr.msk.bf16.mxu0 %vm4433_vm0, %v4432_v1  ;;  %3873 = vmatprep.subr.bf16.mxu0 %v4434_v18 }
 0x15d   : > { %v941_v4 = vpop.f32.mrb[60].mxu0  ;;  %3996 = vmatprep.subr.bf16.mxu1 %v4434_v18  ;;  %v1860_v5 = vmul.f32 0.5, %v4275_v0  ;;  %v1957_v12 = vadd.f32 0.5, %v1859_v63 }
 0x15e   : > { %v1667_v6 = vmul.f32 0.5, %v1569_v2  ;;  %v1570_v7 = vadd.f32 %v4633_v54, %v1465_v3  ;;  %v1256_v8 = vsub.f32 %v941_v4, %v4615_v42  ;;  %v3624_v9 = vpop.f32.mrb[61].mxu0 }
 0x15f   : > { %v944_v11 = vpop.f32.mrb[62].mxu0  ;;  %v1958_v13 = vadd.f32 0.5, %v1860_v5 }
 0x160   : > { %4280 = vtanh.f32 %v1667_v6  ;;  %v1668_v14 = vmul.f32 0.5, %v1570_v7  ;;  %v1360_v15 = vmul.f32 %v4622_v45, %v1256_v8  ;;  %v1257_v16 = vsub.f32 %v944_v11, %v4615_v42  ;;  %v3625_v17 = vpop.f32.mrb[63].mxu0 }
 0x161   : > { %v3874_v19 = vpack.c.bf16 %v1958_v13, %v1957_v12  ;;  %v4218_v17 = vld [vmem:[%s4499_s10 + $0x168] sm:$0xff]  }
 0x162   : > { %v4277_v20 = vpop.eup %4276  ;;  %4282 = vtanh.f32 %v1668_v14  ;;  %v1466_v21 = vmul.f32 %v4625_v47, %v1360_v15  ;;  %v1361_v22 = vmul.f32 %v4622_v45, %v1257_v16  ;;  %3731 = vmatmul.mubr.msk.bf16.gmra.mrb[168].mxu0 %vm639_vm1, %v4215_v10 }
 0x163   : > { %3875 = vmatpush1.bf16.msra.mxu0 %v3874_v19  ;;  %4012 = vmatpush1.bf16.msra.mxu1 %v3874_v19  ;;  %v1861_v23 = vmul.f32 0.5, %v4277_v20 }
 0x164   : > { %v4279_v24 = vpop.eup %4278  ;;  %v1571_v25 = vadd.f32 %v4633_v54, %v1466_v21  ;;  %v1467_v26 = vmul.f32 %v4625_v47, %v1361_v22  ;;  %3734 = vmatprep.mubr.msk.bf16.mxu0 %vm4433_vm0, %v4432_v1  ;;  %3876 = vmatprep.subr.bf16.mxu0 %v4434_v18 }
 0x165   : > { %v949_v27 = vpop.f32.mrb[64].mxu0  ;;  %3997 = vmatprep.subr.bf16.mxu1 %v4434_v18  ;;  %v1862_v28 = vmul.f32 0.5, %v4279_v24  ;;  %v1959_v35 = vadd.f32 0.5, %v1861_v23  ;;  %v4885_v23 = vld [vmem:[%s5818_s4] ss:$0 sm:$0xff] }
 0x166   : > { %v1669_v29 = vmul.f32 0.5, %v1571_v25  ;;  %v1572_v30 = vadd.f32 %v4633_v54, %v1467_v26  ;;  %v1258_v31 = vsub.f32 %v949_v27, %v4615_v42  ;;  %v3628_v32 = vpop.f32.mrb[65].mxu0 }
 0x167   : > { %v952_v34 = vpop.f32.mrb[66].mxu0  ;;  %v1960_v36 = vadd.f32 0.5, %v1862_v28 }
 0x168   : > { %4284 = vtanh.f32 %v1669_v29  ;;  %v1670_v37 = vmul.f32 0.5, %v1572_v30  ;;  %v1362_v38 = vmul.f32 %v4622_v45, %v1258_v31  ;;  %v1259_v39 = vsub.f32 %v952_v34, %v4615_v42  ;;  %v3629_v40 = vpop.f32.mrb[67].mxu0  ;;  %v2087_v30 = vld [vmem:[%s5820_s6 + $0x1c0] sm:$0xff] }
 0x169   : > { %v3877_v41 = vpack.c.bf16 %v1960_v36, %v1959_v35  ;;  %v2095_v36 = vld [vmem:[%s5820_s6 + $0x200] sm:$0xff] }
 0x16a   : > { %v4281_v43 = vpop.eup %4280  ;;  %4286 = vtanh.f32 %v1670_v37  ;;  %v1468_v44 = vmul.f32 %v4625_v47, %v1362_v38  ;;  %v1363_v46 = vmul.f32 %v4622_v45, %v1259_v39  ;;  %3735 = vmatmul.mubr.msk.bf16.gmra.mrb[172].mxu0 %vm639_vm1, %v4216_v33  ;;  %v4898_v33 = vld [vmem:[%s5819_s5] ss:$0 sm:$0xff] }
 0x16b   : > { %3878 = vmatpush1.bf16.msra.mxu0 %v3877_v41  ;;  %4013 = vmatpush1.bf16.msra.mxu1 %v3877_v41  ;;  %v1863_v48 = vmul.f32 0.5, %v4281_v43 }
 0x16c   : > { %v4283_v49 = vpop.eup %4282  ;;  %v1573_v50 = vadd.f32 %v4633_v54, %v1468_v44  ;;  %v1469_v51 = vmul.f32 %v4625_v47, %v1363_v46  ;;  %3738 = vmatprep.mubr.msk.bf16.mxu0 %vm4433_vm0, %v4432_v1  ;;  %3879 = vmatprep.subr.bf16.mxu0 %v4434_v18  ;;  %v4219_v44 = vld [vmem:[%s4499_s10 + $0x170] sm:$0xff]  }
 0x16d   : > { %v957_v52 = vpop.f32.mrb[68].mxu0  ;;  %3998 = vmatprep.subr.bf16.mxu1 %v4434_v18  ;;  %v1864_v53 = vmul.f32 0.5, %v4283_v49  ;;  %v1961_v61 = vadd.f32 0.5, %v1863_v48 }
 0x16e   : > { %v1671_v55 = vmul.f32 0.5, %v1573_v50  ;;  %v1574_v56 = vadd.f32 %v4633_v54, %v1469_v51  ;;  %v1260_v57 = vsub.f32 %v957_v52, %v4615_v42  ;;  %v3632_v58 = vpop.f32.mrb[69].mxu0  ;;  %v2094_v50 = vld [vmem:[%s5820_s6 + $0x1f8] sm:$0xff] }
 0x16f   : > { %v960_v60 = vpop.f32.mrb[70].mxu0  ;;  %v1962_v62 = vadd.f32 0.5, %v1864_v53 }
 0x170   : > { %4288 = vtanh.f32 %v1671_v55  ;;  %v1672_v63 = vmul.f32 0.5, %v1574_v56  ;;  %v1364_v0 = vmul.f32 %v4622_v45, %v1260_v57  ;;  %v1261_v2 = vsub.f32 %v960_v60, %v4615_v42  ;;  %v3633_v3 = vpop.f32.mrb[71].mxu0  ;;  %v2102_v57 = vld [vmem:[%s5820_s6 + $0x238] sm:$0xff] }
 0x171   : > { %v3880_v4 = vpack.c.bf16 %v1962_v62, %v1961_v61  ;;  %v2101_v62 = vld [vmem:[%s5820_s6 + $0x230] sm:$0xff] }
 0x172   : > { %v4285_v5 = vpop.eup %4284  ;;  %4290 = vtanh.f32 %v1672_v63  ;;  %v1470_v6 = vmul.f32 %v4625_v47, %v1364_v0  ;;  %v1365_v7 = vmul.f32 %v4622_v45, %v1261_v2  ;;  %3739 = vmatmul.mubr.msk.bf16.gmra.mrb[176].mxu0 %vm639_vm1, %v4217_v59  ;;  %v2109_v3 = vld [vmem:[%s5820_s6 + $0x270] sm:$0xff] }
 0x173   : > { %3881 = vmatpush1.bf16.msra.mxu0 %v3880_v4  ;;  %4014 = vmatpush1.bf16.msra.mxu1 %v3880_v4  ;;  %v1865_v8 = vmul.f32 0.5, %v4285_v5 }
 0x174   : > { %v4287_v9 = vpop.eup %4286  ;;  %v1575_v10 = vadd.f32 %v4633_v54, %v1470_v6  ;;  %v1471_v11 = vmul.f32 %v4625_v47, %v1365_v7  ;;  %3742 = vmatprep.mubr.msk.bf16.mxu0 %vm4433_vm0, %v4432_v1  ;;  %3882 = vmatprep.subr.bf16.mxu0 %v4434_v18 }
 0x175   : > { %v965_v12 = vpop.f32.mrb[72].mxu0  ;;  %3999 = vmatprep.subr.bf16.mxu1 %v4434_v18  ;;  %v1866_v45 = vmul.f32 0.5, %v4287_v9  ;;  %v1963_v20 = vadd.f32 0.5, %v1865_v8 }
 0x176   : > { %v1673_v13 = vmul.f32 0.5, %v1575_v10  ;;  %v1576_v14 = vadd.f32 %v4633_v54, %v1471_v11  ;;  %v1262_v15 = vsub.f32 %v965_v12, %v4615_v42  ;;  %v3636_v16 = vpop.f32.mrb[73].mxu0  ;;  %v4220_v10 = vld [vmem:[%s4499_s10 + $0x178] sm:$0xff]  }
 0x177   : > { %v968_v19 = vpop.f32.mrb[74].mxu0  ;;  %v1964_v21 = vadd.f32 0.5, %v1866_v45 }
 0x178   : > { %4292 = vtanh.f32 %v1673_v13  ;;  %v1674_v22 = vmul.f32 0.5, %v1576_v14  ;;  %v1366_v24 = vmul.f32 %v4885_v23, %v1262_v15  ;;  %v1263_v25 = vsub.f32 %v968_v19, %v4615_v42  ;;  %v3637_v26 = vpop.f32.mrb[75].mxu0  ;;  %v2108_v13 = vld [vmem:[%s5820_s6 + $0x268] sm:$0xff] }
 0x179   : > { %v3883_v54 = vpack.c.bf16 %v1964_v21, %v1963_v20  ;;  %v2116_v20 = vld [vmem:[%s5820_s6 + $0x2a8] sm:$0xff]  ;;  %v2115_v26 = vld [vmem:[%s5820_s6 + $0x2a0] sm:$0xff] }
 0x17a   : > { %v4289_v27 = vpop.eup %4288  ;;  %4294 = vtanh.f32 %v1674_v22  ;;  %v1472_v28 = vmul.f32 %v4625_v47, %v1366_v24  ;;  %v1367_v29 = vmul.f32 %v4885_v23, %v1263_v25  ;;  %3743 = vmatmul.mubr.msk.bf16.gmra.mrb[180].mxu0 %vm639_vm1, %v4218_v17 }
 0x17b   : > { %3884 = vmatpush1.bf16.msra.mxu0 %v3883_v54  ;;  %4015 = vmatpush1.bf16.msra.mxu1 %v3883_v54  ;;  %v1867_v31 = vmul.f32 0.5, %v4289_v27 }
 0x17c   : > { %v4291_v32 = vpop.eup %4290  ;;  %v1577_v34 = vadd.f32 %v4898_v33, %v1472_v28  ;;  %v1473_v35 = vmul.f32 %v4625_v47, %v1367_v29  ;;  %3746 = vmatprep.mubr.msk.bf16.mxu0 %vm4433_vm0, %v4432_v1  ;;  %3885 = vmatprep.subr.bf16.mxu1 %v4434_v18  ;;  %v2123_v29 = vld [vmem:[%s5820_s6 + $0x2e0] sm:$0xff] }
 0x17d   : > { %v973_v37 = vpop.f32.mrb[76].mxu0  ;;  %v1868_v38 = vmul.f32 0.5, %v4291_v32  ;;  %v1965_v48 = vadd.f32 0.5, %v1867_v31 }
 0x17e   : > { %v1675_v39 = vmul.f32 0.5, %v1577_v34  ;;  %v1578_v40 = vadd.f32 %v4898_v33, %v1473_v35  ;;  %v1264_v41 = vsub.f32 %v973_v37, %v4615_v42  ;;  %v3640_v43 = vpop.f32.mrb[77].mxu0  ;;  %2387 = vmatmul.mubr.f32.vlgmr.msra.gmra.mrb[0].mxu1 %v2087_v30  ;;  %v4221_v37 = vld [vmem:[%s4499_s10 + $0x180] sm:$0xff]  }
 0x17f   : > { %v976_v46 = vpop.f32.mrb[78].mxu0  ;;  %v1966_v49 = vadd.f32 0.5, %v1868_v38  ;;  %2391 = vmatprep.mubr.f32.mxu1 %v2095_v36 }
 0x180   : > { %4296 = vtanh.f32 %v1675_v39  ;;  %v1676_v51 = vmul.f32 0.5, %v1578_v40  ;;  %v1368_v52 = vmul.f32 %v4885_v23, %v1264_v41  ;;  %v1265_v53 = vsub.f32 %v976_v46, %v4615_v42  ;;  %v3641_v55 = vpop.f32.mrb[79].mxu0  ;;  %v2122_v41 = vld [vmem:[%s5820_s6 + $0x2d8] sm:$0xff] }
 0x181   : > { %v3886_v56 = vpack.c.bf16 %v1966_v49, %v1965_v48  ;;  %v2130_v49 = vld [vmem:[%s5820_s6 + $0x318] sm:$0xff] }
 0x182   : > { %v4293_v58 = vpop.eup %4292  ;;  %4298 = vtanh.f32 %v1676_v51  ;;  %v1474_v59 = vmul.f32 %v4625_v47, %v1368_v52  ;;  %v1369_v60 = vmul.f32 %v4885_v23, %v1265_v53  ;;  %3747 = vmatmul.mubr.msk.bf16.gmra.mrb[184].mxu0 %vm639_vm1, %v4219_v44  ;;  %2392 = vmatmul.mubr.f32.gmra.mrb[2].mxu1 %v2094_v50 }
 0x183   : > { %3887 = vmatpush1.bf16.msra.mxu1 %v3886_v56  ;;  %3750 = vmatprep.mubr.msk.bf16.mxu0 %vm4433_vm0, %v4432_v1  ;;  %v1869_v61 = vmul.f32 0.5, %v4293_v58  ;;  %v2129_v56 = vld [vmem:[%s5820_s6 + $0x310] sm:$0xff] }
 0x184   : > { %v4295_v63 = vpop.eup %4294  ;;  %v1579_v0 = vadd.f32 %v4898_v33, %v1474_v59  ;;  %v1475_v2 = vmul.f32 %v4625_v47, %v1369_v60  ;;  %3888 = vmatprep.subr.bf16.mxu1 %v4434_v18  ;;  %2396 = vmatprep.mubr.f32.mxu1 %v2102_v57  ;;  %v2137_v60 = vld [vmem:[%s5820_s6 + $0x350] sm:$0xff] }
 0x185   : > { %v981_v4 = vpop.f32.mrb[80].mxu0  ;;  %v1870_v5 = vmul.f32 0.5, %v4295_v63  ;;  %v1967_v12 = vadd.f32 0.5, %v1869_v61 }
 0x186   : > { %v1677_v6 = vmul.f32 0.5, %v1579_v0  ;;  %v1580_v7 = vadd.f32 %v4898_v33, %v1475_v2  ;;  %v1266_v8 = vsub.f32 %v981_v4, %v4615_v42  ;;  %v3644_v9 = vpop.f32.mrb[81].mxu0  ;;  %2397 = vmatmul.mubr.f32.gmra.mrb[4].mxu1 %v2101_v62 }
 0x187   : > { %v984_v11 = vpop.f32.mrb[82].mxu0  ;;  %v1968_v45 = vadd.f32 0.5, %v1870_v5  ;;  %2401 = vmatprep.mubr.f32.mxu1 %v2109_v3 }
 0x188   : > { %4300 = vtanh.f32 %v1677_v6  ;;  %v1678_v14 = vmul.f32 0.5, %v1580_v7  ;;  %v1370_v15 = vmul.f32 %v4885_v23, %v1266_v8  ;;  %v1267_v16 = vsub.f32 %v984_v11, %v4615_v42  ;;  %v3645_v17 = vpop.f32.mrb[83].mxu0  ;;  %v2136_v7 = vld [vmem:[%s5820_s6 + $0x348] sm:$0xff] }
 0x189   : > { %v3889_v19 = vpack.c.bf16 %v1968_v45, %v1967_v12  ;;  %v2144_v12 = vld [vmem:[%s5820_s6 + $0x388] sm:$0xff]  ;;  %v2143_v17 = vld [vmem:[%s5820_s6 + $0x380] sm:$0xff] }
 0x18a   : > { %v4297_v21 = vpop.eup %4296  ;;  %4302 = vtanh.f32 %v1678_v14  ;;  %v1476_v22 = vmul.f32 %v4625_v47, %v1370_v15  ;;  %v1371_v24 = vmul.f32 %v4885_v23, %v1267_v16  ;;  %3751 = vmatmul.mubr.msk.bf16.gmra.mrb[188].mxu0 %vm639_vm1, %v4220_v10  ;;  %2402 = vmatmul.mubr.f32.gmra.mrb[6].mxu1 %v2108_v13 }
 0x18b   : > { %3890 = vmatpush1.bf16.msra.mxu1 %v3889_v19  ;;  %3754 = vmatprep.mubr.msk.bf16.mxu0 %vm4433_vm0, %v4432_v1  ;;  %v1871_v25 = vmul.f32 0.5, %v4297_v21 }
 0x18c   : > { %v4299_v54 = vpop.eup %4298  ;;  %v1581_v27 = vadd.f32 %v4898_v33, %v1476_v22  ;;  %v1477_v28 = vmul.f32 %v4625_v47, %v1371_v24  ;;  %3891 = vmatprep.subr.bf16.mxu1 %v4434_v18  ;;  %2406 = vmatprep.mubr.f32.mxu1 %v2116_v20  ;;  %v2151_v22 = vld [vmem:[%s5820_s6 + $0x3c0] sm:$0xff] }
 0x18d   : > { %v989_v30 = vpop.f32.mrb[84].mxu0  ;;  %v1872_v31 = vmul.f32 0.5, %v4299_v54  ;;  %v1969_v39 = vadd.f32 0.5, %v1871_v25 }
 0x18e   : > { %v1679_v32 = vmul.f32 0.5, %v1581_v27  ;;  %v1582_v34 = vadd.f32 %v4898_v33, %v1477_v28  ;;  %v1268_v35 = vsub.f32 %v989_v30, %v4615_v42  ;;  %v3648_v36 = vpop.f32.mrb[85].mxu0  ;;  %2407 = vmatmul.mubr.f32.gmra.mrb[8].mxu1 %v2115_v26 }
 0x18f   : > { %v992_v38 = vpop.f32.mrb[86].mxu0  ;;  %v1970_v40 = vadd.f32 0.5, %v1872_v31  ;;  %2411 = vmatprep.mubr.f32.mxu1 %v2123_v29 }
 0x190   : > { %4304 = vtanh.f32 %v1679_v32  ;;  %v1680_v43 = vmul.f32 0.5, %v1582_v34  ;;  %v1372_v44 = vmul.f32 %v4885_v23, %v1268_v35  ;;  %v1269_v46 = vsub.f32 %v992_v38, %v4615_v42  ;;  %v3649_v48 = vpop.f32.mrb[87].mxu0  ;;  %v2150_v32 = vld [vmem:[%s5820_s6 + $0x3b8] sm:$0xff] }
 0x191   : > { %v3892_v50 = vpack.c.bf16 %v1970_v40, %v1969_v39  ;;  %v2158_v38 = vld [vmem:[%s5820_s6 + $0x3f8] sm:$0xff] }
 0x192   : > { %v4301_v51 = vpop.eup %4300  ;;  %4306 = vtanh.f32 %v1680_v43  ;;  %v1478_v52 = vmul.f32 %v4625_v47, %v1372_v44  ;;  %v1373_v53 = vmul.f32 %v4885_v23, %v1269_v46  ;;  %3755 = vmatmul.mubr.msk.bf16.gmra.mrb[192].mxu0 %vm639_vm1, %v4221_v37  ;;  %2412 = vmatmul.mubr.f32.gmra.mrb[10].mxu1 %v2122_v41  ;;  %v2157_v46 = vld [vmem:[%s5820_s6 + $0x3f0] sm:$0xff] }
 0x193   : > { %3893 = vmatpush1.bf16.msra.mxu1 %v3892_v50  ;;  %v1873_v55 = vmul.f32 0.5, %v4301_v51  ;;  %2416 = vmatprep.mubr.f32.mxu1 %v2130_v49  ;;  %v2165_v51 = vld [vmem:[%s5820_s6 + $0x430] sm:$0xff] }
 0x194   : > { %v4303_v57 = vpop.eup %4302  ;;  %v1583_v58 = vadd.f32 %v4898_v33, %v1478_v52  ;;  %v1479_v59 = vmul.f32 %v4625_v47, %v1373_v53  ;;  %3894 = vmatprep.subr.bf16.mxu1 %v4434_v18 }
 0x195   : > { %v997_v61 = vpop.f32.mrb[88].mxu0  ;;  %v1874_v62 = vmul.f32 0.5, %v4303_v57  ;;  %v1971_v5 = vadd.f32 0.5, %v1873_v55 }
 0x196   : > { %v1681_v63 = vmul.f32 0.5, %v1583_v58  ;;  %v1584_v0 = vadd.f32 %v4898_v33, %v1479_v59  ;;  %v1270_v2 = vsub.f32 %v997_v61, %v4615_v42  ;;  %v3652_v3 = vpop.f32.mrb[89].mxu0  ;;  %2417 = vmatmul.mubr.f32.gmra.mrb[12].mxu1 %v2129_v56 }
 0x197   : > { %v1000_v4 = vpop.f32.mrb[90].mxu0  ;;  %v1972_v6 = vadd.f32 0.5, %v1874_v62  ;;  %2421 = vmatprep.mubr.f32.mxu1 %v2137_v60  ;;  %v2164_v62 = vld [vmem:[%s5820_s6 + $0x428] sm:$0xff] }
 0x198   : > { %4308 = vtanh.f32 %v1681_v63  ;;  %v1682_v8 = vmul.f32 0.5, %v1584_v0  ;;  %v1374_v9 = vmul.f32 %v4885_v23, %v1270_v2  ;;  %v1271_v10 = vsub.f32 %v1000_v4, %v4615_v42  ;;  %v3653_v11 = vpop.f32.mrb[91].mxu0  ;;  %v2172_v4 = vld [vmem:[%s5820_s6 + $0x468] sm:$0xff] }
 0x199   : > { %v3895_v45 = vpack.c.bf16 %v1972_v6, %v1971_v5 }
 0x19a   : > { %v4305_v13 = vpop.eup %4304  ;;  %4310 = vtanh.f32 %v1682_v8  ;;  %v1480_v14 = vmul.f32 %v4625_v47, %v1374_v9  ;;  %v1375_v15 = vmul.f32 %v4885_v23, %v1271_v10  ;;  %2422 = vmatmul.mubr.f32.gmra.mrb[14].mxu1 %v2136_v7  ;;  %v2171_v10 = vld [vmem:[%s5820_s6 + $0x460] sm:$0xff] }
 0x19b   : > { %3896 = vmatpush1.bf16.msra.mxu1 %v3895_v45  ;;  %v1875_v16 = vmul.f32 0.5, %v4305_v13  ;;  %2426 = vmatprep.mubr.f32.mxu1 %v2144_v12  ;;  %v2179_v13 = vld [vmem:[%s5820_s6 + $0x4a0] sm:$0xff] }
 0x19c   : > { %v4307_v19 = vpop.eup %4306  ;;  %v1585_v20 = vadd.f32 %v4898_v33, %v1480_v14  ;;  %v1481_v21 = vmul.f32 %v4625_v47, %v1375_v15  ;;  %3897 = vmatprep.subr.bf16.mxu1 %v4434_v18 }
 0x19d   : > { %v1005_v24 = vpop.f32.mrb[92].mxu0  ;;  %v1876_v25 = vmul.f32 0.5, %v4307_v19  ;;  %v1973_v30 = vadd.f32 0.5, %v1875_v16 }
 0x19e   : > { %v1683_v26 = vmul.f32 0.5, %v1585_v20  ;;  %v1586_v54 = vadd.f32 %v4898_v33, %v1481_v21  ;;  %v1272_v27 = vsub.f32 %v1005_v24, %v4615_v42  ;;  %v3656_v28 = vpop.f32.mrb[93].mxu0  ;;  %2427 = vmatmul.mubr.f32.gmra.mrb[16].mxu1 %v2143_v17 }
 0x19f   : > { %v1008_v29 = vpop.f32.mrb[94].mxu0  ;;  %v1974_v31 = vadd.f32 0.5, %v1876_v25  ;;  %2431 = vmatprep.mubr.f32.mxu1 %v2151_v22  ;;  %v2178_v25 = vld [vmem:[%s5820_s6 + $0x498] sm:$0xff] }
 0x1a0   : > { %4312 = vtanh.f32 %v1683_v26  ;;  %v1684_v34 = vmul.f32 0.5, %v1586_v54  ;;  %v1376_v35 = vmul.f32 %v4885_v23, %v1272_v27  ;;  %v1273_v36 = vsub.f32 %v1008_v29, %v4615_v42  ;;  %v3657_v37 = vpop.f32.mrb[95].mxu0  ;;  %v2186_v29 = vld [vmem:[%s5820_s6 + $0x4d8] sm:$0xff] }
 0x1a1   : > { %v3898_v39 = vpack.c.bf16 %v1974_v31, %v1973_v30 }
 0x1a2   : > { %v4309_v40 = vpop.eup %4308  ;;  %4314 = vtanh.f32 %v1684_v34  ;;  %v1482_v41 = vmul.f32 %v4625_v47, %v1376_v35  ;;  %v1377_v43 = vmul.f32 %v4885_v23, %v1273_v36  ;;  %2432 = vmatmul.mubr.f32.gmra.mrb[18].mxu1 %v2150_v32  ;;  %v2185_v36 = vld [vmem:[%s5820_s6 + $0x4d0] sm:$0xff] }
 0x1a3   : > { %3899 = vmatpush1.bf16.msra.mxu1 %v3898_v39  ;;  %v1877_v44 = vmul.f32 0.5, %v4309_v40  ;;  %2436 = vmatprep.mubr.f32.mxu1 %v2158_v38  ;;  %v2193_v40 = vld [vmem:[%s5820_s6 + $0x510] sm:$0xff] }
 0x1a4   : > { %v4311_v48 = vpop.eup %4310  ;;  %v1587_v49 = vadd.f32 %v4898_v33, %v1482_v41  ;;  %v1483_v50 = vmul.f32 %v4625_v47, %v1377_v43  ;;  %3900 = vmatprep.subr.bf16.mxu1 %v4434_v18 }
 0x1a5   : > { %v1013_v52 = vpop.f32.mrb[96].mxu0  ;;  %v1878_v53 = vmul.f32 0.5, %v4311_v48  ;;  %v1975_v60 = vadd.f32 0.5, %v1877_v44 }
 0x1a6   : > { %v1685_v55 = vmul.f32 0.5, %v1587_v49  ;;  %v1588_v56 = vadd.f32 %v4898_v33, %v1483_v50  ;;  %v1274_v57 = vsub.f32 %v1013_v52, %v4615_v42  ;;  %v3660_v58 = vpop.f32.mrb[97].mxu0  ;;  %2437 = vmatmul.mubr.f32.gmra.mrb[20].mxu1 %v2157_v46 }
 0x1a7   : > { %v1016_v59 = vpop.f32.mrb[98].mxu0  ;;  %v1976_v61 = vadd.f32 0.5, %v1878_v53  ;;  %2441 = vmatprep.mubr.f32.mxu1 %v2165_v51  ;;  %v2192_v53 = vld [vmem:[%s5820_s6 + $0x508] sm:$0xff] }
 0x1a8   : > { %4316 = vtanh.f32 %v1685_v55  ;;  %v1686_v63 = vmul.f32 0.5, %v1588_v56  ;;  %v1378_v0 = vmul.f32 %v4885_v23, %v1274_v57  ;;  %v1275_v2 = vsub.f32 %v1016_v59, %v4615_v42  ;;  %v3661_v3 = vpop.f32.mrb[99].mxu0  ;;  %v2200_v59 = vld [vmem:[%s5820_s6 + $0x548] sm:$0xf] }
 0x1a9   : > { %v3901_v5 = vpack.c.bf16 %v1976_v61, %v1975_v60 }
 0x1aa   : > { %v4313_v6 = vpop.eup %4312  ;;  %4318 = vtanh.f32 %v1686_v63  ;;  %v1484_v7 = vmul.f32 %v4625_v47, %v1378_v0  ;;  %v1379_v8 = vmul.f32 %v4885_v23, %v1275_v2  ;;  %2442 = vmatmul.mubr.f32.gmra.mrb[22].mxu1 %v2164_v62  ;;  %v2199_v2 = vld [vmem:[%s5820_s6 + $0x540] sm:$0xf] }
 0x1ab   : > { %3902 = vmatpush1.bf16.msra.mxu1 %v3901_v5  ;;  %v1879_v9 = vmul.f32 0.5, %v4313_v6  ;;  %2446 = vmatprep.mubr.f32.mxu1 %v2172_v4  ;;  %v2034_v6 = vld [vmem:[%s5820_s6 + $0x18] sm:$0xff] }
 0x1ac   : > { %v4315_v11 = vpop.eup %4314  ;;  %v1589_v12 = vadd.f32 %v4898_v33, %v1484_v7  ;;  %v1485_v45 = vmul.f32 %v4625_v47, %v1379_v8  ;;  %3903 = vmatprep.subr.bf16.mxu1 %v4434_v18 }
 0x1ad   : > { %v1021_v14 = vpop.f32.mrb[100].mxu0  ;;  %v1880_v15 = vmul.f32 0.5, %v4315_v11  ;;  %v1977_v22 = vadd.f32 0.5, %v1879_v9 }
 0x1ae   : > { %v1687_v16 = vmul.f32 0.5, %v1589_v12  ;;  %v1590_v17 = vadd.f32 %v4898_v33, %v1485_v45  ;;  %v1276_v19 = vsub.f32 %v1021_v14, %v4615_v42  ;;  %v3664_v20 = vpop.f32.mrb[101].mxu0  ;;  %2447 = vmatmul.mubr.f32.gmra.mrb[24].mxu1 %v2171_v10 }
 0x1af   : > { %v1024_v21 = vpop.f32.mrb[102].mxu0  ;;  %v1978_v24 = vadd.f32 0.5, %v1880_v15  ;;  %2451 = vmatprep.mubr.f32.mxu1 %v2179_v13 }
 0x1b0   : > { %4320 = vtanh.f32 %v1687_v16  ;;  %v1688_v26 = vmul.f32 0.5, %v1590_v17  ;;  %v1380_v54 = vmul.f32 %v4885_v23, %v1276_v19  ;;  %v1277_v27 = vsub.f32 %v1024_v21, %v4615_v42  ;;  %v3665_v28 = vpop.f32.mrb[103].mxu0 }
 0x1b1   : > { %v3904_v30 = vpack.c.bf16 %v1978_v24, %v1977_v22 }
 0x1b2   : > { %v4317_v31 = vpop.eup %4316  ;;  %4322 = vtanh.f32 %v1688_v26  ;;  %v1486_v32 = vmul.f32 %v4625_v47, %v1380_v54  ;;  %v1381_v34 = vmul.f32 %v4885_v23, %v1277_v27  ;;  %2452 = vmatmul.mubr.f32.gmra.mrb[26].mxu1 %v2178_v25 }
 0x1b3   : > { %3905 = vmatpush1.bf16.msra.mxu1 %v3904_v30  ;;  %v1881_v35 = vmul.f32 0.5, %v4317_v31  ;;  %2456 = vmatprep.mubr.f32.mxu1 %v2186_v29 }
 0x1b4   : > { %v4319_v37 = vpop.eup %4318  ;;  %v1591_v38 = vadd.f32 %v4898_v33, %v1486_v32  ;;  %v1487_v39 = vmul.f32 %v4625_v47, %v1381_v34  ;;  %3906 = vmatprep.subr.bf16.mxu1 %v4434_v18 }
 0x1b5   : > { %v1029_v41 = vpop.f32.mrb[104].mxu0  ;;  %v1882_v43 = vmul.f32 0.5, %v4319_v37  ;;  %v1979_v51 = vadd.f32 0.5, %v1881_v35 }
 0x1b6   : > { %v1689_v44 = vmul.f32 0.5, %v1591_v38  ;;  %v1592_v46 = vadd.f32 %v4898_v33, %v1487_v39  ;;  %v1278_v48 = vsub.f32 %v1029_v41, %v4615_v42  ;;  %v3668_v49 = vpop.f32.mrb[105].mxu0  ;;  %2457 = vmatmul.mubr.f32.gmra.mrb[28].mxu1 %v2185_v36 }
 0x1b7   : > { %v1032_v50 = vpop.f32.mrb[106].mxu0  ;;  %v1980_v52 = vadd.f32 0.5, %v1882_v43  ;;  %2461 = vmatprep.mubr.f32.mxu1 %v2193_v40 }
 0x1b8   : > { %4324 = vtanh.f32 %v1689_v44  ;;  %v1690_v55 = vmul.f32 0.5, %v1592_v46  ;;  %v1382_v56 = vmul.f32 %v4885_v23, %v1278_v48  ;;  %v1279_v57 = vsub.f32 %v1032_v50, %v4615_v42  ;;  %v3669_v58 = vpop.f32.mrb[107].mxu0 }
 0x1b9   : > { %v3907_v60 = vpack.c.bf16 %v1980_v52, %v1979_v51 }
 0x1ba   : > { %v4321_v61 = vpop.eup %4320  ;;  %4326 = vtanh.f32 %v1690_v55  ;;  %v1488_v62 = vmul.f32 %v4625_v47, %v1382_v56  ;;  %v1383_v63 = vmul.f32 %v4885_v23, %v1279_v57  ;;  %2462 = vmatmul.mubr.f32.gmra.mrb[30].mxu1 %v2192_v53 }
 0x1bb   : > { %3908 = vmatpush1.bf16.msra.mxu1 %v3907_v60  ;;  %v1883_v0 = vmul.f32 0.5, %v4321_v61  ;;  %2466 = vmatprep.mubr.f32.mxu1 %v2200_v59 }
 0x1bc   : > { %v4323_v3 = vpop.eup %4322  ;;  %v1593_v4 = vadd.f32 %v4898_v33, %v1488_v62  ;;  %v1489_v5 = vmul.f32 %v4625_v47, %v1383_v63  ;;  %3909 = vmatprep.subr.bf16.mxu1 %v4434_v18 }
 0x1bd   : > { %v1037_v7 = vpop.f32.mrb[108].mxu0  ;;  %v1884_v8 = vmul.f32 0.5, %v4323_v3  ;;  %v1981_v13 = vadd.f32 0.5, %v1883_v0 }
 0x1be   : > { %v1691_v9 = vmul.f32 0.5, %v1593_v4  ;;  %v1594_v10 = vadd.f32 %v4898_v33, %v1489_v5  ;;  %v1280_v11 = vsub.f32 %v1037_v7, %v4615_v42  ;;  %v3672_v12 = vpop.f32.mrb[109].mxu0  ;;  %2467 = vmatmul.mubr.f32.gmra.mrb[32].mxu1 %v2199_v2 }
 0x1bf   : > { %v1040_v45 = vpop.f32.mrb[110].mxu0  ;;  %v1982_v14 = vadd.f32 0.5, %v1884_v8  ;;  %2536 = vmatprep.mubr.f32.mxu1 %v2034_v6 }
 0x1c0   : > { %4328 = vtanh.f32 %v1691_v9  ;;  %v1692_v15 = vmul.f32 0.5, %v1594_v10  ;;  %v1384_v16 = vmul.f32 %v4885_v23, %v1280_v11  ;;  %v1281_v17 = vsub.f32 %v1040_v45, %v4615_v42  ;;  %v3673_v19 = vpop.f32.mrb[111].mxu0 }
 0x1c1   : > { %v3910_v20 = vpack.c.bf16 %v1982_v14, %v1981_v13 }
 0x1c2   : > { %v4325_v21 = vpop.eup %4324  ;;  %4330 = vtanh.f32 %v1692_v15  ;;  %v1490_v22 = vmul.f32 %v4625_v47, %v1384_v16  ;;  %v1385_v24 = vmul.f32 %v4885_v23, %v1281_v17 }
 0x1c3   : > { %3911 = vmatpush1.bf16.msra.mxu1 %v3910_v20  ;;  %v1885_v25 = vmul.f32 0.5, %v4325_v21 }
 0x1c4   : > { %v4327_v26 = vpop.eup %4326  ;;  %v1595_v54 = vadd.f32 %v4898_v33, %v1490_v22  ;;  %v1491_v27 = vmul.f32 %v4625_v47, %v1385_v24  ;;  %3912 = vmatprep.subr.bf16.mxu1 %v4434_v18 }
 0x1c5   : > { %v1045_v28 = vpop.f32.mrb[112].mxu0  ;;  %v1886_v29 = vmul.f32 0.5, %v4327_v26  ;;  %v1983_v36 = vadd.f32 0.5, %v1885_v25 }
 0x1c6   : > { %v1693_v30 = vmul.f32 0.5, %v1595_v54  ;;  %v1596_v31 = vadd.f32 %v4898_v33, %v1491_v27  ;;  %v1282_v32 = vsub.f32 %v1045_v28, %v4615_v42  ;;  %v3676_v34 = vpop.f32.mrb[113].mxu0 }
 0x1c7   : > { %v1048_v35 = vpop.f32.mrb[114].mxu0  ;;  %v1984_v37 = vadd.f32 0.5, %v1886_v29 }
 0x1c8   : > { %4332 = vtanh.f32 %v1693_v30  ;;  %v1694_v38 = vmul.f32 0.5, %v1596_v31  ;;  %v1386_v39 = vmul.f32 %v4885_v23, %v1282_v32  ;;  %v1283_v40 = vsub.f32 %v1048_v35, %v4615_v42  ;;  %v3677_v41 = vpop.f32.mrb[115].mxu0 }
 0x1c9   : > { %v3913_v43 = vpack.c.bf16 %v1984_v37, %v1983_v36 }
 0x1ca   : > { %v4329_v44 = vpop.eup %4328  ;;  %4334 = vtanh.f32 %v1694_v38  ;;  %v1492_v46 = vmul.f32 %v4625_v47, %v1386_v39  ;;  %v1387_v48 = vmul.f32 %v4885_v23, %v1283_v40 }
 0x1cb   : > { %3914 = vmatpush1.bf16.msra.mxu1 %v3913_v43  ;;  %v1887_v49 = vmul.f32 0.5, %v4329_v44 }
 0x1cc   : > { %v4331_v50 = vpop.eup %4330  ;;  %v1597_v51 = vadd.f32 %v4898_v33, %v1492_v46  ;;  %v1493_v52 = vmul.f32 %v4625_v47, %v1387_v48  ;;  %3915 = vmatprep.subr.bf16.mxu1 %v4434_v18 }
 0x1cd   : > { %v1053_v53 = vpop.f32.mrb[116].mxu0  ;;  %v1888_v55 = vmul.f32 0.5, %v4331_v50  ;;  %v1985_v61 = vadd.f32 0.5, %v1887_v49 }
 0x1ce   : > { %v1695_v56 = vmul.f32 0.5, %v1597_v51  ;;  %v1598_v57 = vadd.f32 %v4898_v33, %v1493_v52  ;;  %v1284_v58 = vsub.f32 %v1053_v53, %v4615_v42  ;;  %v3680_v59 = vpop.f32.mrb[117].mxu0 }
 0x1cf   : > { %v1056_v60 = vpop.f32.mrb[118].mxu0  ;;  %v1986_v62 = vadd.f32 0.5, %v1888_v55 }
 0x1d0   : > { %4336 = vtanh.f32 %v1695_v56  ;;  %v1696_v63 = vmul.f32 0.5, %v1598_v57  ;;  %v1388_v0 = vmul.f32 %v4885_v23, %v1284_v58  ;;  %v1285_v2 = vsub.f32 %v1056_v60, %v4615_v42  ;;  %v3681_v3 = vpop.f32.mrb[119].mxu0 }
 0x1d1   : > { %v3916_v4 = vpack.c.bf16 %v1986_v62, %v1985_v61 }
 0x1d2   : > { %v4333_v5 = vpop.eup %4332  ;;  %4338 = vtanh.f32 %v1696_v63  ;;  %v1494_v6 = vmul.f32 %v4625_v47, %v1388_v0  ;;  %v1389_v7 = vmul.f32 %v4885_v23, %v1285_v2 }
 0x1d3   : > { %3917 = vmatpush1.bf16.msra.mxu1 %v3916_v4  ;;  %v1889_v8 = vmul.f32 0.5, %v4333_v5 }
 0x1d4   : > { %v4335_v9 = vpop.eup %4334  ;;  %v1599_v10 = vadd.f32 %v4898_v33, %v1494_v6  ;;  %v1495_v11 = vmul.f32 %v4625_v47, %v1389_v7  ;;  %3918 = vmatprep.subr.bf16.mxu1 %v4434_v18 }
 0x1d5   : > { %v1061_v12 = vpop.f32.mrb[120].mxu0  ;;  %v1890_v45 = vmul.f32 0.5, %v4335_v9  ;;  %v1987_v19 = vadd.f32 0.5, %v1889_v8 }
 0x1d6   : > { %v1697_v13 = vmul.f32 0.5, %v1599_v10  ;;  %v1600_v14 = vadd.f32 %v4898_v33, %v1495_v11  ;;  %v1286_v15 = vsub.f32 %v1061_v12, %v4615_v42  ;;  %v3684_v16 = vpop.f32.mrb[121].mxu0 }
 0x1d7   : > { %v1064_v17 = vpop.f32.mrb[122].mxu0  ;;  %v1988_v20 = vadd.f32 0.5, %v1890_v45 }
 0x1d8   : > { %4340 = vtanh.f32 %v1697_v13  ;;  %v1698_v21 = vmul.f32 0.5, %v1600_v14  ;;  %v1390_v22 = vmul.f32 %v4885_v23, %v1286_v15  ;;  %v1287_v24 = vsub.f32 %v1064_v17, %v4615_v42  ;;  %v3685_v25 = vpop.f32.mrb[123].mxu0 }
 0x1d9   : > { %v3919_v26 = vpack.c.bf16 %v1988_v20, %v1987_v19 }
 0x1da   : > { %v4337_v54 = vpop.eup %4336  ;;  %4342 = vtanh.f32 %v1698_v21  ;;  %v1496_v27 = vmul.f32 %v4625_v47, %v1390_v22  ;;  %v1391_v28 = vmul.f32 %v4885_v23, %v1287_v24 }
 0x1db   : > { %3920 = vmatpush1.bf16.msra.mxu1 %v3919_v26  ;;  %v1891_v29 = vmul.f32 0.5, %v4337_v54 }
 0x1dc   : > { %v4339_v30 = vpop.eup %4338  ;;  %v1601_v31 = vadd.f32 %v4898_v33, %v1496_v27  ;;  %v1497_v32 = vmul.f32 %v4625_v47, %v1391_v28  ;;  %3921 = vmatprep.subr.bf16.mxu1 %v4434_v18 }
 0x1dd   : > { %v1069_v34 = vpop.f32.mrb[124].mxu0  ;;  %v1892_v35 = vmul.f32 0.5, %v4339_v30  ;;  %v1989_v41 = vadd.f32 0.5, %v1891_v29 }
 0x1de   : > { %v1699_v36 = vmul.f32 0.5, %v1601_v31  ;;  %v1602_v37 = vadd.f32 %v4898_v33, %v1497_v32  ;;  %v1288_v38 = vsub.f32 %v1069_v34, %v4615_v42  ;;  %v3688_v39 = vpop.f32.mrb[125].mxu0 }
 0x1df   : > { %v1072_v40 = vpop.f32.mrb[126].mxu0  ;;  %v1990_v43 = vadd.f32 0.5, %v1892_v35 }
 0x1e0   : > { %4344 = vtanh.f32 %v1699_v36  ;;  %v1700_v44 = vmul.f32 0.5, %v1602_v37  ;;  %v1392_v46 = vmul.f32 %v4885_v23, %v1288_v38  ;;  %v1289_v48 = vsub.f32 %v1072_v40, %v4615_v42  ;;  %v3689_v49 = vpop.f32.mrb[127].mxu0 }
 0x1e1   : > { %v3922_v50 = vpack.c.bf16 %v1990_v43, %v1989_v41 }
 0x1e2   : > { %v4341_v51 = vpop.eup %4340  ;;  %4346 = vtanh.f32 %v1700_v44  ;;  %v1498_v52 = vmul.f32 %v4625_v47, %v1392_v46  ;;  %v1393_v53 = vmul.f32 %v4885_v23, %v1289_v48 }
 0x1e3   : > { %3923 = vmatpush1.bf16.msra.mxu1 %v3922_v50  ;;  %v1893_v55 = vmul.f32 0.5, %v4341_v51 }
 0x1e4   : > { %v4343_v56 = vpop.eup %4342  ;;  %v1603_v57 = vadd.f32 %v4898_v33, %v1498_v52  ;;  %v1499_v58 = vmul.f32 %v4625_v47, %v1393_v53  ;;  %3924 = vmatprep.subr.bf16.mxu1 %v4434_v18 }
 0x1e5   : > { %v1077_v59 = vpop.f32.mrb[128].mxu0  ;;  %v1894_v60 = vmul.f32 0.5, %v4343_v56  ;;  %v1991_v3 = vadd.f32 0.5, %v1893_v55 }
 0x1e6   : > { %v1701_v61 = vmul.f32 0.5, %v1603_v57  ;;  %v1604_v62 = vadd.f32 %v4898_v33, %v1499_v58  ;;  %v1290_v63 = vsub.f32 %v1077_v59, %v4615_v42  ;;  %v3692_v0 = vpop.f32.mrb[129].mxu0 }
 0x1e7   : > { %v1080_v2 = vpop.f32.mrb[130].mxu0  ;;  %v1992_v4 = vadd.f32 0.5, %v1894_v60  ;;  %v2033_v60 = vld [vmem:[%s5820_s6 + $0x10] sm:$0xff] }
 0x1e8   : > { %4348 = vtanh.f32 %v1701_v61  ;;  %v1702_v5 = vmul.f32 0.5, %v1604_v62  ;;  %v1394_v6 = vmul.f32 %v4885_v23, %v1290_v63  ;;  %v1291_v7 = vsub.f32 %v1080_v2, %v4615_v42  ;;  %v3693_v8 = vpop.f32.mrb[131].mxu0  ;;  %v2041_v2 = vld [vmem:[%s5820_s6 + $0x50] sm:$0xff] }
 0x1e9   : > { %v3925_v9 = vpack.c.bf16 %v1992_v4, %v1991_v3 }
 0x1ea   : > { %v4345_v10 = vpop.eup %4344  ;;  %4350 = vtanh.f32 %v1702_v5  ;;  %v1500_v11 = vmul.f32 %v4625_v47, %v1394_v6  ;;  %v1395_v12 = vmul.f32 %v4885_v23, %v1291_v7 }
 0x1eb   : > { %3926 = vmatpush1.bf16.msra.mxu1 %v3925_v9  ;;  %v1895_v45 = vmul.f32 0.5, %v4345_v10 }
 0x1ec   : > { %v4347_v13 = vpop.eup %4346  ;;  %v1605_v14 = vadd.f32 %v4898_v33, %v1500_v11  ;;  %v1501_v15 = vmul.f32 %v4625_v47, %v1395_v12  ;;  %3927 = vmatprep.subr.bf16.mxu1 %v4434_v18  ;;  %v2040_v12 = vld [vmem:[%s5820_s6 + $0x48] sm:$0xff] }
 0x1ed   : > { %v1085_v16 = vpop.f32.mrb[132].mxu0  ;;  %v1896_v17 = vmul.f32 0.5, %v4347_v13  ;;  %v1993_v25 = vadd.f32 0.5, %v1895_v45 }
 0x1ee   : > { %v1703_v19 = vmul.f32 0.5, %v1605_v14  ;;  %v1606_v20 = vadd.f32 %v4898_v33, %v1501_v15  ;;  %v1292_v21 = vsub.f32 %v1085_v16, %v4615_v42  ;;  %v3696_v22 = vpop.f32.mrb[133].mxu0  ;;  %v2048_v16 = vld [vmem:[%s5820_s6 + $0x88] sm:$0xff] }
 0x1ef   : > { %v1088_v24 = vpop.f32.mrb[134].mxu0  ;;  %v1994_v26 = vadd.f32 0.5, %v1896_v17 }
 0x1f0   : > { %4352 = vtanh.f32 %v1703_v19  ;;  %v1704_v54 = vmul.f32 0.5, %v1606_v20  ;;  %v1396_v27 = vmul.f32 %v4885_v23, %v1292_v21  ;;  %v1293_v28 = vsub.f32 %v1088_v24, %v4615_v42  ;;  %v3697_v29 = vpop.f32.mrb[135].mxu0  ;;  %v5178_v21 = vld [vmem:[%s5818_s4] ss:$0 sm:$0xff] }
 0x1f1   : > { %v3928_v30 = vpack.c.bf16 %v1994_v26, %v1993_v25  ;;  %v2047_v24 = vld [vmem:[%s5820_s6 + $0x80] sm:$0xff] }
 0x1f2   : > { %v4349_v31 = vpop.eup %4348  ;;  %4354 = vtanh.f32 %v1704_v54  ;;  %v1502_v32 = vmul.f32 %v4625_v47, %v1396_v27  ;;  %v1397_v34 = vmul.f32 %v4885_v23, %v1293_v28  ;;  %v2055_v27 = vld [vmem:[%s5820_s6 + $0xc0] sm:$0xff] }
 0x1f3   : > { %3929 = vmatpush1.bf16.msra.mxu1 %v3928_v30  ;;  %v1897_v35 = vmul.f32 0.5, %v4349_v31  ;;  %v5193_v31 = vld [vmem:[%s5819_s5] ss:$0 sm:$0xff] }
 0x1f4   : > { %v4351_v36 = vpop.eup %4350  ;;  %v1607_v37 = vadd.f32 %v4898_v33, %v1502_v32  ;;  %v1503_v38 = vmul.f32 %v4625_v47, %v1397_v34  ;;  %3930 = vmatprep.subr.bf16.mxu1 %v4434_v18 }
 0x1f5   : > { %v1093_v39 = vpop.f32.mrb[136].mxu0  ;;  %v1898_v40 = vmul.f32 0.5, %v4351_v36  ;;  %v1995_v49 = vadd.f32 0.5, %v1897_v35 }
 0x1f6   : > { %v1705_v41 = vmul.f32 0.5, %v1607_v37  ;;  %v1608_v43 = vadd.f32 %v4898_v33, %v1503_v38  ;;  %v1294_v44 = vsub.f32 %v1093_v39, %v4615_v42  ;;  %v3700_v46 = vpop.f32.mrb[137].mxu0  ;;  %v2054_v38 = vld [vmem:[%s5820_s6 + $0xb8] sm:$0xff] }
 0x1f7   : > { %v1096_v48 = vpop.f32.mrb[138].mxu0  ;;  %v1996_v50 = vadd.f32 0.5, %v1898_v40 }
 0x1f8   : > { %4356 = vtanh.f32 %v1705_v41  ;;  %v1706_v51 = vmul.f32 0.5, %v1608_v43  ;;  %v1398_v52 = vmul.f32 %v4885_v23, %v1294_v44  ;;  %v1295_v53 = vsub.f32 %v1096_v48, %v4615_v42  ;;  %v3701_v55 = vpop.f32.mrb[139].mxu0  ;;  %v2062_v44 = vld [vmem:[%s5820_s6 + $0xf8] sm:$0xff] }
 0x1f9   : > { %v3931_v56 = vpack.c.bf16 %v1996_v50, %v1995_v49 }
 0x1fa   : > { %v4353_v57 = vpop.eup %4352  ;;  %4358 = vtanh.f32 %v1706_v51  ;;  %v1504_v58 = vmul.f32 %v4625_v47, %v1398_v52  ;;  %v1399_v59 = vmul.f32 %v4885_v23, %v1295_v53  ;;  %v2061_v52 = vld [vmem:[%s5820_s6 + $0xf0] sm:$0xff] }
 0x1fb   : > { %3932 = vmatpush1.bf16.msra.mxu1 %v3931_v56  ;;  %v1899_v61 = vmul.f32 0.5, %v4353_v57  ;;  %v2069_v57 = vld [vmem:[%s5820_s6 + $0x130] sm:$0xff] }
 0x1fc   : > { %v4355_v62 = vpop.eup %4354  ;;  %v1609_v63 = vadd.f32 %v4898_v33, %v1504_v58  ;;  %v1505_v0 = vmul.f32 %v4625_v47, %v1399_v59  ;;  %3933 = vmatprep.subr.bf16.mxu1 %v4434_v18 }
 0x1fd   : > { %v1101_v3 = vpop.f32.mrb[140].mxu0  ;;  %v1900_v4 = vmul.f32 0.5, %v4355_v62  ;;  %v1997_v10 = vadd.f32 0.5, %v1899_v61 }
 0x1fe   : > { %v1707_v5 = vmul.f32 0.5, %v1609_v63  ;;  %v1610_v6 = vadd.f32 %v4898_v33, %v1505_v0  ;;  %v1296_v7 = vsub.f32 %v1101_v3, %v4615_v42  ;;  %v3704_v8 = vpop.f32.mrb[141].mxu0  ;;  %2537 = vmatmul.mubr.f32.vlgmr.msra.gmra.mrb[34].mxu1 %v2033_v60 }
 0x1ff   : > { %v1104_v9 = vpop.f32.mrb[142].mxu0  ;;  %v1998_v11 = vadd.f32 0.5, %v1900_v4  ;;  %2541 = vmatprep.mubr.f32.mxu1 %v2041_v2  ;;  %v2068_v4 = vld [vmem:[%s5820_s6 + $0x128] sm:$0xff] }
 0x200   : > { %4360 = vtanh.f32 %v1707_v5  ;;  %v1708_v45 = vmul.f32 0.5, %v1610_v6  ;;  %v1400_v13 = vmul.f32 %v4885_v23, %v1296_v7  ;;  %v1297_v14 = vsub.f32 %v1104_v9, %v4615_v42  ;;  %v3705_v15 = vpop.f32.mrb[143].mxu0  ;;  %v2076_v9 = vld [vmem:[%s5820_s6 + $0x168] sm:$0xff] }
 0x201   : > { %v3934_v17 = vpack.c.bf16 %v1998_v11, %v1997_v10 }
 0x202   : > { %v4357_v19 = vpop.eup %4356  ;;  %4362 = vtanh.f32 %v1708_v45  ;;  %v1506_v20 = vmul.f32 %v4625_v47, %v1400_v13  ;;  %v1401_v22 = vmul.f32 %v5178_v21, %v1297_v14  ;;  %2542 = vmatmul.mubr.f32.gmra.mrb[36].mxu1 %v2040_v12  ;;  %v2075_v14 = vld [vmem:[%s5820_s6 + $0x160] sm:$0xff] }
 0x203   : > { %3935 = vmatpush1.bf16.msra.mxu1 %v3934_v17  ;;  %v1901_v23 = vmul.f32 0.5, %v4357_v19  ;;  %2546 = vmatprep.mubr.f32.mxu1 %v2048_v16  ;;  %v2083_v19 = vld [vmem:[%s5820_s6 + $0x1a0] sm:$0xff] }
 0x204   : > { %v4359_v25 = vpop.eup %4358  ;;  %v1611_v26 = vadd.f32 %v4898_v33, %v1506_v20  ;;  %v1507_v54 = vmul.f32 %v4625_v47, %v1401_v22  ;;  %3936 = vmatprep.subr.bf16.mxu1 %v4434_v18 }
 0x205   : > { %v1109_v28 = vpop.f32.mrb[144].mxu0  ;;  %v1902_v29 = vmul.f32 0.5, %v4359_v25  ;;  %v1999_v36 = vadd.f32 0.5, %v1901_v23 }
 0x206   : > { %v1709_v30 = vmul.f32 0.5, %v1611_v26  ;;  %v1612_v32 = vadd.f32 %v5193_v31, %v1507_v54  ;;  %v1298_v33 = vsub.f32 %v1109_v28, %v4615_v42  ;;  %v3708_v34 = vpop.f32.mrb[145].mxu0  ;;  %2547 = vmatmul.mubr.f32.gmra.mrb[38].mxu1 %v2047_v24 }
 0x207   : > { %v1112_v35 = vpop.f32.mrb[146].mxu0  ;;  %v2000_v37 = vadd.f32 0.5, %v1902_v29  ;;  %2551 = vmatprep.mubr.f32.mxu1 %v2055_v27  ;;  %v2082_v29 = vld [vmem:[%s5820_s6 + $0x198] sm:$0xff] }
 0x208   : > { %4364 = vtanh.f32 %v1709_v30  ;;  %v1710_v39 = vmul.f32 0.5, %v1612_v32  ;;  %v1402_v40 = vmul.f32 %v5178_v21, %v1298_v33  ;;  %v1299_v41 = vsub.f32 %v1112_v35, %v4615_v42  ;;  %v3709_v43 = vpop.f32.mrb[147].mxu0  ;;  %v2090_v35 = vld [vmem:[%s5820_s6 + $0x1d8] sm:$0xff] }
 0x209   : > { %v3937_v46 = vpack.c.bf16 %v2000_v37, %v1999_v36 }
 0x20a   : > { %v4361_v48 = vpop.eup %4360  ;;  %4366 = vtanh.f32 %v1710_v39  ;;  %v1508_v49 = vmul.f32 %v4625_v47, %v1402_v40  ;;  %v1403_v50 = vmul.f32 %v5178_v21, %v1299_v41  ;;  %2552 = vmatmul.mubr.f32.gmra.mrb[40].mxu1 %v2054_v38  ;;  %v2089_v41 = vld [vmem:[%s5820_s6 + $0x1d0] sm:$0xff] }
 0x20b   : > { %3938 = vmatpush1.bf16.msra.mxu1 %v3937_v46  ;;  %v1903_v51 = vmul.f32 0.5, %v4361_v48  ;;  %2556 = vmatprep.mubr.f32.mxu1 %v2062_v44  ;;  %v2097_v48 = vld [vmem:[%s5820_s6 + $0x210] sm:$0xff] }
 0x20c   : > { %v4363_v53 = vpop.eup %4362  ;;  %v1613_v55 = vadd.f32 %v5193_v31, %v1508_v49  ;;  %v1509_v56 = vmul.f32 %v4625_v47, %v1403_v50  ;;  %3939 = vmatprep.subr.bf16.mxu1 %v4434_v18 }
 0x20d   : > { %v1117_v58 = vpop.f32.mrb[148].mxu0  ;;  %v1904_v59 = vmul.f32 0.5, %v4363_v53  ;;  %v2001_v2 = vadd.f32 0.5, %v1903_v51 }
 0x20e   : > { %v1711_v60 = vmul.f32 0.5, %v1613_v55  ;;  %v1614_v61 = vadd.f32 %v5193_v31, %v1509_v56  ;;  %v1300_v62 = vsub.f32 %v1117_v58, %v4615_v42  ;;  %v3712_v63 = vpop.f32.mrb[149].mxu0  ;;  %2557 = vmatmul.mubr.f32.gmra.mrb[42].mxu1 %v2061_v52 }
 0x20f   : > { %v1120_v0 = vpop.f32.mrb[150].mxu0  ;;  %v2002_v3 = vadd.f32 0.5, %v1904_v59  ;;  %2561 = vmatprep.mubr.f32.mxu1 %v2069_v57  ;;  %v2096_v59 = vld [vmem:[%s5820_s6 + $0x208] sm:$0xff] }
 0x210   : > { %4368 = vtanh.f32 %v1711_v60  ;;  %v1712_v5 = vmul.f32 0.5, %v1614_v61  ;;  %v1404_v6 = vmul.f32 %v5178_v21, %v1300_v62  ;;  %v1301_v7 = vsub.f32 %v1120_v0, %v4615_v42  ;;  %v3713_v8 = vpop.f32.mrb[151].mxu0  ;;  %v2104_v0 = vld [vmem:[%s5820_s6 + $0x248] sm:$0xff] }
 0x211   : > { %v3940_v10 = vpack.c.bf16 %v2002_v3, %v2001_v2 }
 0x212   : > { %v4365_v11 = vpop.eup %4364  ;;  %4370 = vtanh.f32 %v1712_v5  ;;  %v1510_v12 = vmul.f32 %v4625_v47, %v1404_v6  ;;  %v1405_v45 = vmul.f32 %v5178_v21, %v1301_v7  ;;  %2562 = vmatmul.mubr.f32.gmra.mrb[44].mxu1 %v2068_v4  ;;  %v2103_v7 = vld [vmem:[%s5820_s6 + $0x240] sm:$0xff] }
 0x213   : > { %3941 = vmatpush1.bf16.msra.mxu1 %v3940_v10  ;;  %v1905_v13 = vmul.f32 0.5, %v4365_v11  ;;  %2566 = vmatprep.mubr.f32.mxu1 %v2076_v9  ;;  %v2111_v11 = vld [vmem:[%s5820_s6 + $0x280] sm:$0xff] }
 0x214   : > { %v4367_v15 = vpop.eup %4366  ;;  %v1615_v16 = vadd.f32 %v5193_v31, %v1510_v12  ;;  %v1511_v17 = vmul.f32 %v4625_v47, %v1405_v45  ;;  %3942 = vmatprep.subr.bf16.mxu1 %v4434_v18 }
 0x215   : > { %v1125_v20 = vpop.f32.mrb[152].mxu0  ;;  %v1906_v22 = vmul.f32 0.5, %v4367_v15  ;;  %v2003_v27 = vadd.f32 0.5, %v1905_v13 }
 0x216   : > { %v1713_v23 = vmul.f32 0.5, %v1615_v16  ;;  %v1616_v24 = vadd.f32 %v5193_v31, %v1511_v17  ;;  %v1302_v25 = vsub.f32 %v1125_v20, %v4615_v42  ;;  %v3716_v26 = vpop.f32.mrb[153].mxu0  ;;  %2567 = vmatmul.mubr.f32.gmra.mrb[46].mxu1 %v2075_v14 }
 0x217   : > { %v1128_v54 = vpop.f32.mrb[154].mxu0  ;;  %v2004_v28 = vadd.f32 0.5, %v1906_v22  ;;  %2571 = vmatprep.mubr.f32.mxu1 %v2083_v19  ;;  %v2110_v22 = vld [vmem:[%s5820_s6 + $0x278] sm:$0xff] }
 0x218   : > { %4372 = vtanh.f32 %v1713_v23  ;;  %v1714_v30 = vmul.f32 0.5, %v1616_v24  ;;  %v1406_v32 = vmul.f32 %v5178_v21, %v1302_v25  ;;  %v1303_v33 = vsub.f32 %v1128_v54, %v4615_v42  ;;  %v3717_v34 = vpop.f32.mrb[155].mxu0  ;;  %v2118_v54 = vld [vmem:[%s5820_s6 + $0x2b8] sm:$0xff] }
 0x219   : > { %v3943_v36 = vpack.c.bf16 %v2004_v28, %v2003_v27 }
 0x21a   : > { %v4369_v37 = vpop.eup %4368  ;;  %4374 = vtanh.f32 %v1714_v30  ;;  %v1512_v38 = vmul.f32 %v4625_v47, %v1406_v32  ;;  %v1407_v39 = vmul.f32 %v5178_v21, %v1303_v33  ;;  %2572 = vmatmul.mubr.f32.gmra.mrb[48].mxu1 %v2082_v29  ;;  %v2117_v33 = vld [vmem:[%s5820_s6 + $0x2b0] sm:$0xff] }
 0x21b   : > { %3944 = vmatpush1.bf16.msra.mxu1 %v3943_v36  ;;  %v1907_v40 = vmul.f32 0.5, %v4369_v37  ;;  %2576 = vmatprep.mubr.f32.mxu1 %v2090_v35  ;;  %v2125_v37 = vld [vmem:[%s5820_s6 + $0x2f0] sm:$0xff] }
 0x21c   : > { %v4371_v43 = vpop.eup %4370  ;;  %v1617_v44 = vadd.f32 %v5193_v31, %v1512_v38  ;;  %v1513_v46 = vmul.f32 %v4625_v47, %v1407_v39  ;;  %3945 = vmatprep.subr.bf16.mxu1 %v4434_v18 }
 0x21d   : > { %v1133_v49 = vpop.f32.mrb[156].mxu0  ;;  %v1908_v50 = vmul.f32 0.5, %v4371_v43  ;;  %v2005_v57 = vadd.f32 0.5, %v1907_v40 }
 0x21e   : > { %v1715_v51 = vmul.f32 0.5, %v1617_v44  ;;  %v1618_v52 = vadd.f32 %v5193_v31, %v1513_v46  ;;  %v1304_v53 = vsub.f32 %v1133_v49, %v4615_v42  ;;  %v3720_v55 = vpop.f32.mrb[157].mxu0  ;;  %2577 = vmatmul.mubr.f32.gmra.mrb[0].mxu1 %v2089_v41 }
 0x21f   : > { %v1136_v56 = vpop.f32.mrb[158].mxu0  ;;  %v2006_v58 = vadd.f32 0.5, %v1908_v50  ;;  %2581 = vmatprep.mubr.f32.mxu1 %v2097_v48  ;;  %v2124_v50 = vld [vmem:[%s5820_s6 + $0x2e8] sm:$0xff] }
 0x220   : > { %4376 = vtanh.f32 %v1715_v51  ;;  %v1716_v60 = vmul.f32 0.5, %v1618_v52  ;;  %v1408_v61 = vmul.f32 %v5178_v21, %v1304_v53  ;;  %v1305_v62 = vsub.f32 %v1136_v56, %v4615_v42  ;;  %v3721_v63 = vpop.f32.mrb[159].mxu0  ;;  %v2132_v56 = vld [vmem:[%s5820_s6 + $0x328] sm:$0xff] }
 0x221   : > { %v3946_v2 = vpack.c.bf16 %v2006_v58, %v2005_v57 }
 0x222   : > { %v4373_v3 = vpop.eup %4372  ;;  %4378 = vtanh.f32 %v1716_v60  ;;  %v1514_v4 = vmul.f32 %v4625_v47, %v1408_v61  ;;  %v1409_v5 = vmul.f32 %v5178_v21, %v1305_v62  ;;  %2582 = vmatmul.mubr.f32.gmra.mrb[2].mxu1 %v2096_v59  ;;  %v2131_v62 = vld [vmem:[%s5820_s6 + $0x320] sm:$0xff] }
 0x223   : > { %3947 = vmatpush1.bf16.msra.mxu1 %v3946_v2  ;;  %v1909_v6 = vmul.f32 0.5, %v4373_v3  ;;  %2586 = vmatprep.mubr.f32.mxu1 %v2104_v0  ;;  %v2139_v3 = vld [vmem:[%s5820_s6 + $0x360] sm:$0xff] }
 0x224   : > { %v4375_v8 = vpop.eup %4374  ;;  %v1619_v9 = vadd.f32 %v5193_v31, %v1514_v4  ;;  %v1515_v10 = vmul.f32 %v4625_v47, %v1409_v5  ;;  %3948 = vmatprep.subr.bf16.mxu1 %v4434_v18 }
 0x225   : > { %v1141_v12 = vpop.f32.mrb[160].mxu0  ;;  %v1910_v45 = vmul.f32 0.5, %v4375_v8  ;;  %v2007_v19 = vadd.f32 0.5, %v1909_v6 }
 0x226   : > { %v1717_v13 = vmul.f32 0.5, %v1619_v9  ;;  %v1620_v14 = vadd.f32 %v5193_v31, %v1515_v10  ;;  %v1306_v15 = vsub.f32 %v1141_v12, %v4615_v42  ;;  %v3724_v16 = vpop.f32.mrb[161].mxu0  ;;  %2587 = vmatmul.mubr.f32.gmra.mrb[4].mxu1 %v2103_v7 }
 0x227   : > { %v1144_v17 = vpop.f32.mrb[162].mxu0  ;;  %v2008_v20 = vadd.f32 0.5, %v1910_v45  ;;  %2591 = vmatprep.mubr.f32.mxu1 %v2111_v11  ;;  %v2138_v45 = vld [vmem:[%s5820_s6 + $0x358] sm:$0xff] }
 0x228   : > { %4380 = vtanh.f32 %v1717_v13  ;;  %v1718_v23 = vmul.f32 0.5, %v1620_v14  ;;  %v1410_v24 = vmul.f32 %v5178_v21, %v1306_v15  ;;  %v1307_v25 = vsub.f32 %v1144_v17, %v4615_v42  ;;  %v3725_v26 = vpop.f32.mrb[163].mxu0  ;;  %v2146_v17 = vld [vmem:[%s5820_s6 + $0x398] sm:$0xff] }
 0x229   : > { %v3949_v27 = vpack.c.bf16 %v2008_v20, %v2007_v19 }
 0x22a   : > { %v4377_v28 = vpop.eup %4376  ;;  %4382 = vtanh.f32 %v1718_v23  ;;  %v1516_v29 = vmul.f32 %v4625_v47, %v1410_v24  ;;  %v1411_v30 = vmul.f32 %v5178_v21, %v1307_v25  ;;  %2592 = vmatmul.mubr.f32.gmra.mrb[6].mxu1 %v2110_v22  ;;  %v2145_v25 = vld [vmem:[%s5820_s6 + $0x390] sm:$0xff] }
 0x22b   : > { %3950 = vmatpush1.bf16.msra.mxu1 %v3949_v27  ;;  %v1911_v32 = vmul.f32 0.5, %v4377_v28  ;;  %2596 = vmatprep.mubr.f32.mxu1 %v2118_v54  ;;  %v2153_v28 = vld [vmem:[%s5820_s6 + $0x3d0] sm:$0xff] }
 0x22c   : > { %v4379_v34 = vpop.eup %4378  ;;  %v1621_v35 = vadd.f32 %v5193_v31, %v1516_v29  ;;  %v1517_v36 = vmul.f32 %v4625_v47, %v1411_v30  ;;  %3951 = vmatprep.subr.bf16.mxu1 %v4434_v18 }
 0x22d   : > { %v1149_v38 = vpop.f32.mrb[164].mxu0  ;;  %v1912_v39 = vmul.f32 0.5, %v4379_v34  ;;  %v2009_v48 = vadd.f32 0.5, %v1911_v32 }
 0x22e   : > { %v1719_v40 = vmul.f32 0.5, %v1621_v35  ;;  %v1622_v41 = vadd.f32 %v5193_v31, %v1517_v36  ;;  %v1308_v43 = vsub.f32 %v1149_v38, %v4615_v42  ;;  %v3728_v44 = vpop.f32.mrb[165].mxu0  ;;  %2597 = vmatmul.mubr.f32.gmra.mrb[8].mxu1 %v2117_v33 }
 0x22f   : > { %v1152_v46 = vpop.f32.mrb[166].mxu0  ;;  %v2010_v49 = vadd.f32 0.5, %v1912_v39  ;;  %2601 = vmatprep.mubr.f32.mxu1 %v2125_v37  ;;  %v2152_v39 = vld [vmem:[%s5820_s6 + $0x3c8] sm:$0xff] }
 0x230   : > { %4384 = vtanh.f32 %v1719_v40  ;;  %v1720_v51 = vmul.f32 0.5, %v1622_v41  ;;  %v1412_v52 = vmul.f32 %v5178_v21, %v1308_v43  ;;  %v1309_v53 = vsub.f32 %v1152_v46, %v4615_v42  ;;  %v3729_v55 = vpop.f32.mrb[167].mxu0  ;;  %v2160_v46 = vld [vmem:[%s5820_s6 + $0x408] sm:$0xff] }
 0x231   : > { %v3952_v57 = vpack.c.bf16 %v2010_v49, %v2009_v48 }
 0x232   : > { %v4381_v58 = vpop.eup %4380  ;;  %4386 = vtanh.f32 %v1720_v51  ;;  %v1518_v59 = vmul.f32 %v4625_v47, %v1412_v52  ;;  %v1413_v60 = vmul.f32 %v5178_v21, %v1309_v53  ;;  %2602 = vmatmul.mubr.f32.gmra.mrb[10].mxu1 %v2124_v50  ;;  %v2159_v53 = vld [vmem:[%s5820_s6 + $0x400] sm:$0xff] }
 0x233   : > { %3953 = vmatpush1.bf16.msra.mxu1 %v3952_v57  ;;  %v1913_v61 = vmul.f32 0.5, %v4381_v58  ;;  %2606 = vmatprep.mubr.f32.mxu1 %v2132_v56  ;;  %v2167_v58 = vld [vmem:[%s5820_s6 + $0x440] sm:$0xff] }
 0x234   : > { %v4383_v63 = vpop.eup %4382  ;;  %v1623_v0 = vadd.f32 %v5193_v31, %v1518_v59  ;;  %v1519_v2 = vmul.f32 %v4625_v47, %v1413_v60  ;;  %3954 = vmatprep.subr.bf16.mxu1 %v4434_v18 }
 0x235   : > { %v1157_v4 = vpop.f32.mrb[168].mxu0  ;;  %v1914_v5 = vmul.f32 0.5, %v4383_v63  ;;  %v2011_v11 = vadd.f32 0.5, %v1913_v61 }
 0x236   : > { %v1721_v6 = vmul.f32 0.5, %v1623_v0  ;;  %v1624_v7 = vadd.f32 %v5193_v31, %v1519_v2  ;;  %v1310_v8 = vsub.f32 %v1157_v4, %v4615_v42  ;;  %v3732_v9 = vpop.f32.mrb[169].mxu0  ;;  %2607 = vmatmul.mubr.f32.gmra.mrb[12].mxu1 %v2131_v62 }
 0x237   : > { %v1160_v10 = vpop.f32.mrb[170].mxu0  ;;  %v2012_v12 = vadd.f32 0.5, %v1914_v5  ;;  %2611 = vmatprep.mubr.f32.mxu1 %v2139_v3  ;;  %v2166_v5 = vld [vmem:[%s5820_s6 + $0x438] sm:$0xff] }
 0x238   : > { %4388 = vtanh.f32 %v1721_v6  ;;  %v1722_v13 = vmul.f32 0.5, %v1624_v7  ;;  %v1414_v14 = vmul.f32 %v5178_v21, %v1310_v8  ;;  %v1311_v15 = vsub.f32 %v1160_v10, %v4615_v42  ;;  %v3733_v16 = vpop.f32.mrb[171].mxu0  ;;  %v2174_v10 = vld [vmem:[%s5820_s6 + $0x478] sm:$0xff] }
 0x239   : > { %v3955_v19 = vpack.c.bf16 %v2012_v12, %v2011_v11 }
 0x23a   : > { %v4385_v20 = vpop.eup %4384  ;;  %4390 = vtanh.f32 %v1722_v13  ;;  %v1520_v22 = vmul.f32 %v4625_v47, %v1414_v14  ;;  %v1415_v23 = vmul.f32 %v5178_v21, %v1311_v15  ;;  %2612 = vmatmul.mubr.f32.gmra.mrb[14].mxu1 %v2138_v45  ;;  %v2173_v15 = vld [vmem:[%s5820_s6 + $0x470] sm:$0xff] }
 0x23b   : > { %3956 = vmatpush1.bf16.msra.mxu1 %v3955_v19  ;;  %v1915_v24 = vmul.f32 0.5, %v4385_v20  ;;  %2616 = vmatprep.mubr.f32.mxu1 %v2146_v17  ;;  %v2181_v20 = vld [vmem:[%s5820_s6 + $0x4b0] sm:$0xff] }
 0x23c   : > { %v4387_v26 = vpop.eup %4386  ;;  %v1625_v54 = vadd.f32 %v5193_v31, %v1520_v22  ;;  %v1521_v27 = vmul.f32 %v4625_v47, %v1415_v23  ;;  %3957 = vmatprep.subr.bf16.mxu1 %v4434_v18 }
 0x23d   : > { %v1165_v29 = vpop.f32.mrb[172].mxu0  ;;  %v1916_v30 = vmul.f32 0.5, %v4387_v26  ;;  %v2013_v37 = vadd.f32 0.5, %v1915_v24 }
 0x23e   : > { %v1723_v32 = vmul.f32 0.5, %v1625_v54  ;;  %v1626_v33 = vadd.f32 %v5193_v31, %v1521_v27  ;;  %v1312_v34 = vsub.f32 %v1165_v29, %v4615_v42  ;;  %v3736_v35 = vpop.f32.mrb[173].mxu0  ;;  %2617 = vmatmul.mubr.f32.gmra.mrb[16].mxu1 %v2145_v25 }
 0x23f   : > { %v1168_v36 = vpop.f32.mrb[174].mxu0  ;;  %v2014_v38 = vadd.f32 0.5, %v1916_v30  ;;  %2621 = vmatprep.mubr.f32.mxu1 %v2153_v28  ;;  %v2180_v30 = vld [vmem:[%s5820_s6 + $0x4a8] sm:$0xff] }
 0x240   : > { %4392 = vtanh.f32 %v1723_v32  ;;  %v1724_v40 = vmul.f32 0.5, %v1626_v33  ;;  %v1416_v41 = vmul.f32 %v5178_v21, %v1312_v34  ;;  %v1313_v43 = vsub.f32 %v1168_v36, %v4615_v42  ;;  %v3737_v44 = vpop.f32.mrb[175].mxu0  ;;  %v2188_v36 = vld [vmem:[%s5820_s6 + $0x4e8] sm:$0xff] }
 0x241   : > { %v3958_v48 = vpack.c.bf16 %v2014_v38, %v2013_v37 }
 0x242   : > { %v4389_v49 = vpop.eup %4388  ;;  %4394 = vtanh.f32 %v1724_v40  ;;  %v1522_v50 = vmul.f32 %v4625_v47, %v1416_v41  ;;  %v1417_v51 = vmul.f32 %v5178_v21, %v1313_v43  ;;  %2622 = vmatmul.mubr.f32.gmra.mrb[18].mxu1 %v2152_v39  ;;  %v2187_v43 = vld [vmem:[%s5820_s6 + $0x4e0] sm:$0xff] }
 0x243   : > { %3959 = vmatpush1.bf16.msra.mxu1 %v3958_v48  ;;  %v1917_v52 = vmul.f32 0.5, %v4389_v49  ;;  %2626 = vmatprep.mubr.f32.mxu1 %v2160_v46  ;;  %v2195_v49 = vld [vmem:[%s5820_s6 + $0x520] sm:$0xff] }
 0x244   : > { %v4391_v55 = vpop.eup %4390  ;;  %v1627_v56 = vadd.f32 %v5193_v31, %v1522_v50  ;;  %v1523_v57 = vmul.f32 %v4625_v47, %v1417_v51  ;;  %3960 = vmatprep.subr.bf16.mxu1 %v4434_v18 }
 0x245   : > { %v1173_v59 = vpop.f32.mrb[176].mxu0  ;;  %v1918_v60 = vmul.f32 0.5, %v4391_v55  ;;  %v2015_v3 = vadd.f32 0.5, %v1917_v52 }
 0x246   : > { %v1725_v61 = vmul.f32 0.5, %v1627_v56  ;;  %v1628_v62 = vadd.f32 %v5193_v31, %v1523_v57  ;;  %v1314_v63 = vsub.f32 %v1173_v59, %v4615_v42  ;;  %v3740_v0 = vpop.f32.mrb[177].mxu0  ;;  %2627 = vmatmul.mubr.f32.gmra.mrb[20].mxu1 %v2159_v53 }
 0x247   : > { %v1176_v2 = vpop.f32.mrb[178].mxu0  ;;  %v2016_v4 = vadd.f32 0.5, %v1918_v60  ;;  %2631 = vmatprep.mubr.f32.mxu1 %v2167_v58  ;;  %v2194_v60 = vld [vmem:[%s5820_s6 + $0x518] sm:$0xff] }
 0x248   : > { %4396 = vtanh.f32 %v1725_v61  ;;  %v1726_v6 = vmul.f32 0.5, %v1628_v62  ;;  %v1418_v7 = vmul.f32 %v5178_v21, %v1314_v63  ;;  %v1315_v8 = vsub.f32 %v1176_v2, %v4615_v42  ;;  %v3741_v9 = vpop.f32.mrb[179].mxu0  ;;  %v2202_v2 = vld [vmem:[%s5820_s6 + $0x558] sm:$0xf] }
 0x249   : > { %v3961_v11 = vpack.c.bf16 %v2016_v4, %v2015_v3 }
 0x24a   : > { %v4393_v12 = vpop.eup %4392  ;;  %4398 = vtanh.f32 %v1726_v6  ;;  %v1524_v45 = vmul.f32 %v4625_v47, %v1418_v7  ;;  %v1419_v13 = vmul.f32 %v5178_v21, %v1315_v8  ;;  %2632 = vmatmul.mubr.f32.gmra.mrb[22].mxu1 %v2166_v5  ;;  %v2201_v8 = vld [vmem:[%s5820_s6 + $0x550] sm:$0xf] }
 0x24b   : > { %3962 = vmatpush1.bf16.msra.mxu1 %v3961_v11  ;;  %v1919_v14 = vmul.f32 0.5, %v4393_v12  ;;  %2636 = vmatprep.mubr.f32.mxu1 %v2174_v10  ;;  %v2036_v12 = vld [vmem:[%s5820_s6 + $0x28] sm:$0xff] }
 0x24c   : > { %v4395_v16 = vpop.eup %4394  ;;  %v1629_v17 = vadd.f32 %v5193_v31, %v1524_v45  ;;  %v1525_v19 = vmul.f32 %v4625_v47, %v1419_v13  ;;  %3963 = vmatprep.subr.bf16.mxu1 %v4434_v18 }
 0x24d   : > { %v1181_v22 = vpop.f32.mrb[180].mxu0  ;;  %v1920_v23 = vmul.f32 0.5, %v4395_v16  ;;  %v2017_v28 = vadd.f32 0.5, %v1919_v14 }
 0x24e   : > { %v1727_v24 = vmul.f32 0.5, %v1629_v17  ;;  %v1630_v25 = vadd.f32 %v5193_v31, %v1525_v19  ;;  %v1316_v26 = vsub.f32 %v1181_v22, %v4615_v42  ;;  %v3744_v54 = vpop.f32.mrb[181].mxu0  ;;  %2637 = vmatmul.mubr.f32.gmra.mrb[24].mxu1 %v2173_v15  ;;  %v2032_v19 = vld [vmem:[%s5820_s6 + $0x8] sm:$0xff] }
 0x24f   : > { %v1184_v27 = vpop.f32.mrb[182].mxu0  ;;  %v2018_v29 = vadd.f32 0.5, %v1920_v23  ;;  %2641 = vmatprep.mubr.f32.mxu1 %v2181_v20  ;;  %2346 = vmatprep.mubr.f32.mxu0 %v2032_v19  ;;  %v2073_v19 = vld [vmem:[%s5820_s6 + $0x150] sm:$0xff] }
 0x250   : > { %4400 = vtanh.f32 %v1727_v24  ;;  %v1728_v32 = vmul.f32 0.5, %v1630_v25  ;;  %v1420_v33 = vmul.f32 %v5178_v21, %v1316_v26  ;;  %v1317_v34 = vsub.f32 %v1184_v27, %v4615_v42  ;;  %v3745_v35 = vpop.f32.mrb[183].mxu0  ;;  %v2031_v24 = vld [vmem:[%s5820_s6] sm:$0xff] }
 0x251   : > { %v3964_v37 = vpack.c.bf16 %v2018_v29, %v2017_v28  ;;  %2347 = vmatmul.mubr.f32.vlgmr.msra.gmra.mrb[196].mxu0 %v2031_v24  ;;  %v2038_v35 = vld [vmem:[%s5820_s6 + $0x38] sm:$0xff]  ;;  %v2035_v24 = vld [vmem:[%s5820_s6 + $0x20] sm:$0xff] }
 0x252   : > { %v4397_v38 = vpop.eup %4396  ;;  %4402 = vtanh.f32 %v1728_v32  ;;  %v1526_v39 = vmul.f32 %v4625_v47, %v1420_v33  ;;  %v1421_v40 = vmul.f32 %v5178_v21, %v1317_v34  ;;  %2642 = vmatmul.mubr.f32.gmra.mrb[26].mxu1 %v2180_v30  ;;  %v2039_v33 = vld [vmem:[%s5820_s6 + $0x40] sm:$0xff] }
 0x253   : > { %3965 = vmatpush1.bf16.msra.mxu1 %v3964_v37  ;;  %v1921_v41 = vmul.f32 0.5, %v4397_v38  ;;  %2646 = vmatprep.mubr.f32.mxu1 %v2188_v36 }
 0x254   : > { %v4399_v44 = vpop.eup %4398  ;;  %v1631_v46 = vadd.f32 %v5193_v31, %v1526_v39  ;;  %v1527_v48 = vmul.f32 %v4625_v47, %v1421_v40  ;;  %3966 = vmatprep.subr.bf16.mxu1 %v4434_v18  ;;  %2351 = vmatprep.mubr.f32.mxu0 %v2039_v33  ;;  %v2050_v33 = vld [vmem:[%s5820_s6 + $0x98] sm:$0xff] }
 0x255   : > { %v1189_v50 = vpop.f32.mrb[184].mxu0  ;;  %v1922_v51 = vmul.f32 0.5, %v4399_v44  ;;  %v2019_v58 = vadd.f32 0.5, %v1921_v41  ;;  %2352 = vmatmul.mubr.f32.gmra.mrb[198].mxu0 %v2038_v35  ;;  %v2057_v35 = vld [vmem:[%s5820_s6 + $0xd0] sm:$0xff] }
 0x256   : > { %v1729_v52 = vmul.f32 0.5, %v1631_v46  ;;  %v1632_v53 = vadd.f32 %v5193_v31, %v1527_v48  ;;  %v1318_v55 = vsub.f32 %v1189_v50, %v4615_v42  ;;  %v3748_v56 = vpop.f32.mrb[185].mxu0  ;;  %2647 = vmatmul.mubr.f32.gmra.mrb[28].mxu1 %v2187_v43  ;;  %v2046_v48 = vld [vmem:[%s5820_s6 + $0x78] sm:$0xff] }
 0x257   : > { %v1192_v57 = vpop.f32.mrb[186].mxu0  ;;  %v2020_v59 = vadd.f32 0.5, %v1922_v51  ;;  %2651 = vmatprep.mubr.f32.mxu1 %v2195_v49  ;;  %2356 = vmatprep.mubr.f32.mxu0 %v2046_v48  ;;  %v2092_v48 = vld [vmem:[%s5820_s6 + $0x1e8] sm:$0xff] }
 0x258   : > { %4404 = vtanh.f32 %v1729_v52  ;;  %v1730_v61 = vmul.f32 0.5, %v1632_v53  ;;  %v1422_v62 = vmul.f32 %v5178_v21, %v1318_v55  ;;  %v1319_v63 = vsub.f32 %v1192_v57, %v4615_v42  ;;  %v3749_v0 = vpop.f32.mrb[187].mxu0  ;;  %v2045_v52 = vld [vmem:[%s5820_s6 + $0x70] sm:$0xff] }
 0x259   : > { %v3967_v3 = vpack.c.bf16 %v2020_v59, %v2019_v58  ;;  %2357 = vmatmul.mubr.f32.gmra.mrb[200].mxu0 %v2045_v52  ;;  %v2106_v52 = vld [vmem:[%s5820_s6 + $0x258] sm:$0xff] }
 0x25a   : > { %v4401_v4 = vpop.eup %4400  ;;  %4406 = vtanh.f32 %v1730_v61  ;;  %v1528_v5 = vmul.f32 %v4625_v47, %v1422_v62  ;;  %v1423_v6 = vmul.f32 %v5178_v21, %v1319_v63  ;;  %2652 = vmatmul.mubr.f32.gmra.mrb[30].mxu1 %v2194_v60  ;;  %v2053_v62 = vld [vmem:[%s5820_s6 + $0xb0] sm:$0xff] }
 0x25b   : > { %3968 = vmatpush1.bf16.msra.mxu1 %v3967_v3  ;;  %v1923_v7 = vmul.f32 0.5, %v4401_v4  ;;  %2656 = vmatprep.mubr.f32.mxu1 %v2202_v2 }
 0x25c   : > { %v4403_v9 = vpop.eup %4402  ;;  %v1633_v10 = vadd.f32 %v5193_v31, %v1528_v5  ;;  %v1529_v11 = vmul.f32 %v4625_v47, %v1423_v6  ;;  %3969 = vmatprep.subr.bf16.mxu1 %v4434_v18  ;;  %2361 = vmatprep.mubr.f32.mxu0 %v2053_v62  ;;  %v2060_v6 = vld [vmem:[%s5820_s6 + $0xe8] sm:$0xff]  ;;  %v2133_v62 = vld [vmem:[%s5820_s6 + $0x330] sm:$0xff] }
 0x25d   : > { %v1197_v45 = vpop.f32.mrb[188].mxu0  ;;  %v1924_v13 = vmul.f32 0.5, %v4403_v9  ;;  %v2021_v22 = vadd.f32 0.5, %v1923_v7  ;;  %v2059_v9 = vld [vmem:[%s5820_s6 + $0xe0] sm:$0xff] }
 0x25e   : > { %v1731_v14 = vmul.f32 0.5, %v1633_v10  ;;  %v1634_v15 = vadd.f32 %v5193_v31, %v1529_v11  ;;  %v1320_v16 = vsub.f32 %v1197_v45, %v4615_v42  ;;  %v3752_v17 = vpop.f32.mrb[189].mxu0  ;;  %2657 = vmatmul.mubr.f32.gmra.mrb[32].mxu1 %v2201_v8  ;;  %v2066_v45 = vld [vmem:[%s5820_s6 + $0x118] sm:$0xff] }
 0x25f   : > { %v1200_v20 = vpop.f32.mrb[190].mxu0  ;;  %v2022_v23 = vadd.f32 0.5, %v1924_v13  ;;  %2726 = vmatprep.mubr.f32.mxu1 %v2036_v12 }
 0x260   : > { %4408 = vtanh.f32 %v1731_v14  ;;  %v1732_v25 = vmul.f32 0.5, %v1634_v15  ;;  %v1424_v26 = vmul.f32 %v5178_v21, %v1320_v16  ;;  %v1321_v54 = vsub.f32 %v1200_v20, %v4615_v42  ;;  %v3753_v27 = vpop.f32.mrb[191].mxu0  ;;  %v2074_v15 = vld [vmem:[%s5820_s6 + $0x158] sm:$0xff] }
 0x261   : > { %v3970_v28 = vpack.c.bf16 %v2022_v23, %v2021_v22  ;;  %v2081_v23 = vld [vmem:[%s5820_s6 + $0x190] sm:$0xff]  ;;  %v2043_v27 = vld [vmem:[%s5820_s6 + $0x60] sm:$0xff] }
 0x262   : > { %v4405_v29 = vpop.eup %4404  ;;  %4410 = vtanh.f32 %v1732_v25  ;;  %v1530_v30 = vmul.f32 %v4625_v47, %v1424_v26  ;;  %v1425_v32 = vmul.f32 %v5178_v21, %v1321_v54  ;;  %v2080_v26 = vld [vmem:[%s5820_s6 + $0x188] sm:$0xff] }
 0x263   : > { %3971 = vmatpush1.bf16.msra.mxu1 %v3970_v28  ;;  %v1925_v34 = vmul.f32 0.5, %v4405_v29 }
 0x264   : > { %v4407_v36 = vpop.eup %4406  ;;  %v1635_v37 = vadd.f32 %v5193_v31, %v1530_v30  ;;  %v1531_v38 = vmul.f32 %v4625_v47, %v1425_v32  ;;  %3972 = vmatprep.subr.bf16.mxu1 %v4434_v18  ;;  %v2042_v30 = vld [vmem:[%s5820_s6 + $0x58] sm:$0xff] }
 0x265   : > { %v1205_v39 = vpop.f32.mrb[192].mxu0  ;;  %v1926_v40 = vmul.f32 0.5, %v4407_v36  ;;  %v2023_v50 = vadd.f32 0.5, %v1925_v34  ;;  %v2056_v36 = vld [vmem:[%s5820_s6 + $0xc8] sm:$0xff] }
 0x266   : > { %v1733_v41 = vmul.f32 0.5, %v1635_v37  ;;  %v1636_v43 = vadd.f32 %v5193_v31, %v1531_v38  ;;  %v1322_v44 = vsub.f32 %v1205_v39, %v4615_v42  ;;  %v3756_v46 = vpop.f32.mrb[193].mxu0  ;;  %v2064_v37 = vld [vmem:[%s5820_s6 + $0x108] sm:$0xff]  ;;  %v2063_v38 = vld [vmem:[%s5820_s6 + $0x100] sm:$0xff] }
 0x267   : > { %v1208_v49 = vpop.f32.mrb[194].mxu0  ;;  %v2024_v51 = vadd.f32 0.5, %v1926_v40  ;;  %v2071_v39 = vld [vmem:[%s5820_s6 + $0x140] sm:$0xff]  ;;  %v2070_v40 = vld [vmem:[%s5820_s6 + $0x138] sm:$0xff]  ;;  %v2084_v46 = vld [vmem:[%s5820_s6 + $0x1a8] sm:$0xff] }
 0x268   : > { %4412 = vtanh.f32 %v1733_v41  ;;  %v1734_v53 = vmul.f32 0.5, %v1636_v43  ;;  %v1426_v55 = vmul.f32 %v5178_v21, %v1322_v44  ;;  %v1323_v56 = vsub.f32 %v1208_v49, %v4615_v42  ;;  %v3757_v57 = vpop.f32.mrb[195].mxu0  ;;  %v2052_v42 = vld [vmem:[%s5820_s6 + $0xa8] sm:$0xff]  ;;  %v2078_v41 = vld [vmem:[%s5820_s6 + $0x178] sm:$0xff]  ;;  %v2077_v43 = vld [vmem:[%s5820_s6 + $0x170] sm:$0xff] }
 0x269   : > { %v3973_v58 = vpack.c.bf16 %v2024_v51, %v2023_v50  ;;  %2362 = vmatmul.mubr.f32.gmra.mrb[202].mxu0 %v2052_v42  ;;  %v2085_v44 = vld [vmem:[%s5820_s6 + $0x1b0] sm:$0xff]  ;;  %v2091_v49 = vld [vmem:[%s5820_s6 + $0x1e0] sm:$0xff]  ;;  %v2098_v51 = vld [vmem:[%s5820_s6 + $0x218] sm:$0xff] }
 0x26a   : > { %v4409_v59 = vpop.eup %4408  ;;  %4414 = vtanh.f32 %v1734_v53  ;;  %v1532_v60 = vmul.f32 %v4625_v47, %v1426_v55  ;;  %v1427_v61 = vmul.f32 %v5178_v21, %v1323_v56  ;;  %2366 = vmatprep.mubr.f32.mxu0 %v2060_v6  ;;  %v2099_v50 = vld [vmem:[%s5820_s6 + $0x220] sm:$0xff]  ;;  %v2105_v53 = vld [vmem:[%s5820_s6 + $0x250] sm:$0xff]  ;;  %v2112_v56 = vld [vmem:[%s5820_s6 + $0x288] sm:$0xff] }
 0x26b   : > { %3974 = vmatpush1.bf16.msra.mxu1 %v3973_v58  ;;  %v1927_v63 = vmul.f32 0.5, %v4409_v59  ;;  %v2113_v55 = vld [vmem:[%s5820_s6 + $0x290] sm:$0xff]  ;;  %v2120_v57 = vld [vmem:[%s5820_s6 + $0x2c8] sm:$0xff]  ;;  %v2119_v58 = vld [vmem:[%s5820_s6 + $0x2c0] sm:$0xff] }
 0x26c   : > { %v4411_v0 = vpop.eup %4410  ;;  %v1637_v2 = vadd.f32 %v5193_v31, %v1532_v60  ;;  %v1533_v3 = vmul.f32 %v4625_v47, %v1427_v61  ;;  %3975 = vmatprep.subr.bf16.mxu1 %v4434_v18  ;;  %v2127_v59 = vld [vmem:[%s5820_s6 + $0x300] sm:$0xff]  ;;  %v2126_v60 = vld [vmem:[%s5820_s6 + $0x2f8] sm:$0xff]  ;;  %v2140_v42 = vld [vmem:[%s5820_s6 + $0x368] sm:$0xff] }
 0x26d   : > { %v1928_v21 = vmul.f32 0.5, %v4411_v0  ;;  %v2025_v7 = vadd.f32 0.5, %v1927_v63  ;;  %2367 = vmatmul.mubr.f32.gmra.mrb[204].mxu0 %v2059_v9  ;;  %v2134_v61 = vld [vmem:[%s5820_s6 + $0x338] sm:$0xff]  ;;  %v2141_v63 = vld [vmem:[%s5820_s6 + $0x370] sm:$0xff]  ;;  %v2148_v0 = vld [vmem:[%s5820_s6 + $0x3a8] sm:$0xff] }
 0x26e   : > { %v1735_v4 = vmul.f32 0.5, %v1637_v2  ;;  %v1638_v5 = vadd.f32 %v5193_v31, %v1533_v3  ;;  %v2067_v31 = vld [vmem:[%s5820_s6 + $0x120] sm:$0xff]  ;;  %v2169_v6 = vld [vmem:[%s5820_s6 + $0x450] sm:$0xff] }
 0x26f   : > { %v2026_v8 = vadd.f32 0.5, %v1928_v21  ;;  %2371 = vmatprep.mubr.f32.mxu0 %v2067_v31  ;;  %v2147_v2 = vld [vmem:[%s5820_s6 + $0x3a0] sm:$0xff]  ;;  %v2154_v21 = vld [vmem:[%s5820_s6 + $0x3d8] sm:$0xff]  ;;  %v2189_v31 = vld [vmem:[%s5820_s6 + $0x4f0] sm:$0xff] }
 0x270   : > { %4416 = vtanh.f32 %v1735_v4  ;;  %v1736_v47 = vmul.f32 0.5, %v1638_v5  ;;  %v2155_v3 = vld [vmem:[%s5820_s6 + $0x3e0] sm:$0xff]  ;;  %v2162_v4 = vld [vmem:[%s5820_s6 + $0x418] sm:$0xff]  ;;  %v2161_v5 = vld [vmem:[%s5820_s6 + $0x410] sm:$0xff] }
 0x271   : > { %v3976_v10 = vpack.c.bf16 %v2026_v8, %v2025_v7  ;;  %2372 = vmatmul.mubr.f32.gmra.mrb[206].mxu0 %v2066_v45  ;;  %v2168_v7 = vld [vmem:[%s5820_s6 + $0x448] sm:$0xff]  ;;  %v2175_v9 = vld [vmem:[%s5820_s6 + $0x480] sm:$0xff] }
 0x272   : > { %v4413_v11 = vpop.eup %4412  ;;  %4418 = vtanh.f32 %v1736_v47  ;;  %2376 = vmatprep.mubr.f32.mxu0 %v2074_v15  ;;  %v2176_v8 = vld [vmem:[%s5820_s6 + $0x488] sm:$0xff]  ;;  %v2183_v47 = vld [vmem:[%s5820_s6 + $0x4c0] sm:$0xff]  ;;  %v2037_v15 = vld [vmem:[%s5820_s6 + $0x30] sm:$0xff] }
 0x273   : > { %3977 = vmatpush1.bf16.msra.mxu1 %v3976_v10  ;;  %v1929_v12 = vmul.f32 0.5, %v4413_v11  ;;  %v2182_v10 = vld [vmem:[%s5820_s6 + $0x4b8] sm:$0xff]  ;;  %v2196_v45 = vld [vmem:[%s5820_s6 + $0x528] sm:$0xff] }
 0x274   : > { %v4415_v13 = vpop.eup %4414  ;;  %3978 = vmatprep.subr.bf16.mxu1 %v4434_v18  ;;  %v2190_v11 = vld [vmem:[%s5820_s6 + $0x4f8] sm:$0xff] }
 0x275   : > { %v1930_v14 = vmul.f32 0.5, %v4415_v13  ;;  %v2027_v16 = vadd.f32 0.5, %v1929_v12  ;;  %2377 = vmatmul.mubr.f32.gmra.mrb[208].mxu0 %v2073_v19  ;;  %v2197_v12 = vld [vmem:[%s5820_s6 + $0x530] sm:$0xff]  ;;  %v2204_v13 = vld [vmem:[%s5820_s6 + $0x568] sm:$0xf]  ;;  %v2058_v19 = vld [vmem:[%s5820_s6 + $0xd8] sm:$0xff] }
 0x276   : > { %2381 = vmatprep.mubr.f32.mxu0 %v2081_v23  ;;  %v2079_v23 = vld [vmem:[%s5820_s6 + $0x180] sm:$0xff] }
 0x277   : > { %v2028_v17 = vadd.f32 0.5, %v1930_v14  ;;  %v2203_v14 = vld [vmem:[%s5820_s6 + $0x560] sm:$0xf] }
 0x279   : > { %v3979_v20 = vpack.c.bf16 %v2028_v17, %v2027_v16  ;;  %2382 = vmatmul.mubr.f32.gmra.mrb[210].mxu0 %v2080_v26  ;;  %v2044_v16 = vld [vmem:[%s5820_s6 + $0x68] sm:$0xff]  ;;  %v2051_v17 = vld [vmem:[%s5820_s6 + $0xa0] sm:$0xff] }
 0x27a   : > { %v4417_v22 = vpop.eup %4416  ;;  %v2100_v26 = vld [vmem:[%s5820_s6 + $0x228] sm:$0xff] }
 0x27b   : > { %3980 = vmatpush1.bf16.msra.mxu1 %v3979_v20  ;;  %v1931_v25 = vmul.f32 0.5, %v4417_v22  ;;  %v2065_v20 = vld [vmem:[%s5820_s6 + $0x110] sm:$0xff]  ;;  %v2072_v22 = vld [vmem:[%s5820_s6 + $0x148] sm:$0xff] }
 0x27c   : > { %v4419_v54 = vpop.eup %4418  ;;  %3981 = vmatprep.subr.bf16.mxu1 %v4434_v18  ;;  %v2049_v18 = vld [vmem:[%s5820_s6 + $0x90] sm:$0xff] }
 0x27d   : > { %v1932_v28 = vmul.f32 0.5, %v4419_v54  ;;  %v2029_v29 = vadd.f32 0.5, %v1931_v25  ;;  %v2093_v25 = vld [vmem:[%s5820_s6 + $0x1f0] sm:$0xff]  ;;  %v2107_v54 = vld [vmem:[%s5820_s6 + $0x260] sm:$0xff] }
 0x27e   : > { %2727 = vmatmul.mubr.f32.vlgmr.msra.gmra.mrb[34].mxu1 %v2035_v24  ;;  %v2086_v24 = vld [vmem:[%s5820_s6 + $0x1b8] sm:$0xff] }
 0x27f   : > { %2731 = vmatprep.mubr.f32.mxu1 %v2043_v27  ;;  %v2030_v32 = vadd.f32 0.5, %v1932_v28  ;;  %v2114_v27 = vld [vmem:[%s5820_s6 + $0x298] sm:$0xff]  ;;  %v2121_v28 = vld [vmem:[%s5820_s6 + $0x2d0] sm:$0xff] }
 0x281   : > { %v3982_v34 = vpack.c.bf16 %v2030_v32, %v2029_v29  ;;  %v2128_v29 = vld [vmem:[%s5820_s6 + $0x308] sm:$0xff]  ;;  %v2142_v32 = vld [vmem:[%s5820_s6 + $0x378] sm:$0xff] }
 0x282   : > { %2732 = vmatmul.mubr.f32.gmra.mrb[36].mxu1 %v2042_v30  ;;  %v2135_v30 = vld [vmem:[%s5820_s6 + $0x340] sm:$0xff] }
 0x283   : > { %3983 = vmatpush3.bf16.msra.mxu1 %v3982_v34  ;;  %2736 = vmatprep.mubr.f32.mxu1 %v2050_v33  ;;  %v2149_v33 = vld [vmem:[%s5820_s6 + $0x3b0] sm:$0xff]  ;;  %v2156_v34 = vld [vmem:[%s5820_s6 + $0x3e8] sm:$0xff] }
 0x286   : > { %2737 = vmatmul.mubr.f32.gmra.mrb[38].mxu1 %v2049_v18  ;;  %v2163_v18 = vld [vmem:[%s5820_s6 + $0x420] sm:$0xff] }
 0x287   : > { %2741 = vmatprep.mubr.f32.mxu1 %v2057_v35  ;;  %v2170_v35 = vld [vmem:[%s5820_s6 + $0x458] sm:$0xff] }
 0x28a   : > { %2742 = vmatmul.mubr.f32.gmra.mrb[40].mxu1 %v2056_v36  ;;  %v2177_v36 = vld [vmem:[%s5820_s6 + $0x490] sm:$0xff] }
 0x28b   : > { %2746 = vmatprep.mubr.f32.mxu1 %v2064_v37  ;;  %v2184_v37 = vld [vmem:[%s5820_s6 + $0x4c8] sm:$0xff] }
 0x28e   : > { %2747 = vmatmul.mubr.f32.gmra.mrb[42].mxu1 %v2063_v38 }
 0x28f   : > { %2751 = vmatprep.mubr.f32.mxu1 %v2071_v39 }
 0x292   : > { %2752 = vmatmul.mubr.f32.gmra.mrb[44].mxu1 %v2070_v40  ;;  %v2191_v40 = vld [vmem:[%s5820_s6 + $0x500] sm:$0xff] }
 0x293   : > { %2756 = vmatprep.mubr.f32.mxu1 %v2078_v41 }
 0x296   : > { %2757 = vmatmul.mubr.f32.gmra.mrb[46].mxu1 %v2077_v43 }
 0x297   : > { %2761 = vmatprep.mubr.f32.mxu1 %v2085_v44  ;;  %v2198_v44 = vld [vmem:[%s5820_s6 + $0x538] sm:$0xff] }
 0x29a   : > { %2762 = vmatmul.mubr.f32.gmra.mrb[48].mxu1 %v2084_v46 }
 0x29b   : > { %2766 = vmatprep.mubr.f32.mxu1 %v2092_v48 }
 0x29e   : > { %2767 = vmatmul.mubr.f32.gmra.mrb[0].mxu1 %v2091_v49  ;;  %v2205_v49 = vld [vmem:[%s5820_s6 + $0x570] sm:$0xf] }
 0x29f   : > { %2771 = vmatprep.mubr.f32.mxu1 %v2099_v50 }
 0x2a2   : > { %2772 = vmatmul.mubr.f32.gmra.mrb[2].mxu1 %v2098_v51 }
 0x2a3   : > { %2776 = vmatprep.mubr.f32.mxu1 %v2106_v52 }
 0x2a6   : > { %2777 = vmatmul.mubr.f32.gmra.mrb[4].mxu1 %v2105_v53 }
 0x2a7   : > { %2781 = vmatprep.mubr.f32.mxu1 %v2113_v55 }
 0x2aa   : > { %2782 = vmatmul.mubr.f32.gmra.mrb[6].mxu1 %v2112_v56 }
 0x2ab   : > { %2786 = vmatprep.mubr.f32.mxu1 %v2120_v57 }
 0x2ae   : > { %2787 = vmatmul.mubr.f32.gmra.mrb[8].mxu1 %v2119_v58 }
 0x2af   : > { %2791 = vmatprep.mubr.f32.mxu1 %v2127_v59 }
 0x2b2   : > { %2792 = vmatmul.mubr.f32.gmra.mrb[10].mxu1 %v2126_v60 }
 0x2b3   : > { %2796 = vmatprep.mubr.f32.mxu1 %v2134_v61 }
 0x2b6   : > { %2797 = vmatmul.mubr.f32.gmra.mrb[12].mxu1 %v2133_v62 }
 0x2b7   : > { %2801 = vmatprep.mubr.f32.mxu1 %v2141_v63 }
 0x2ba   : > { %2802 = vmatmul.mubr.f32.gmra.mrb[14].mxu1 %v2140_v42 }
 0x2bb   : > { %2806 = vmatprep.mubr.f32.mxu1 %v2148_v0 }
 0x2be   : > { %2807 = vmatmul.mubr.f32.gmra.mrb[16].mxu1 %v2147_v2 }
 0x2bf   : > { %2811 = vmatprep.mubr.f32.mxu1 %v2155_v3 }
 0x2c2   : > { %2812 = vmatmul.mubr.f32.gmra.mrb[18].mxu1 %v2154_v21 }
 0x2c3   : > { %2816 = vmatprep.mubr.f32.mxu1 %v2162_v4 }
 0x2c6   : > { %2817 = vmatmul.mubr.f32.gmra.mrb[20].mxu1 %v2161_v5 }
 0x2c7   : > { %2821 = vmatprep.mubr.f32.mxu1 %v2169_v6 }
 0x2ca   : > { %2822 = vmatmul.mubr.f32.gmra.mrb[22].mxu1 %v2168_v7 }
 0x2cb   : > { %2826 = vmatprep.mubr.f32.mxu1 %v2176_v8 }
 0x2ce   : > { %2827 = vmatmul.mubr.f32.gmra.mrb[24].mxu1 %v2175_v9 }
 0x2cf   : > { %2831 = vmatprep.mubr.f32.mxu1 %v2183_v47 }
 0x2d2   : > { %2832 = vmatmul.mubr.f32.gmra.mrb[26].mxu1 %v2182_v10 }
 0x2d3   : > { %2836 = vmatprep.mubr.f32.mxu1 %v2190_v11 }
 0x2d6   : > { %2837 = vmatmul.mubr.f32.gmra.mrb[28].mxu1 %v2189_v31 }
 0x2d7   : > { %2841 = vmatprep.mubr.f32.mxu1 %v2197_v12 }
 0x2da   : > { %2842 = vmatmul.mubr.f32.gmra.mrb[30].mxu1 %v2196_v45 }
 0x2db   : > { %2846 = vmatprep.mubr.f32.mxu1 %v2204_v13 }
 0x2de   : > { %2847 = vmatmul.mubr.f32.gmra.mrb[32].mxu1 %v2203_v14 }
 0x2df   : > { %3762 = vmatprep.mubr.msk.f32.mxu1 %vm4433_vm0, %v4432_v1 }
 0x2e2   : > { %3763 = vmatmul.mubr.msk.f32.vlgmr.msra.gmra.mrb[34].mxu1 %vm2206_vm2, %v2037_v15 }
 0x2e3   : > { %3765 = vmatprep.mubr.msk.f32.mxu1 %vm4433_vm0, %v4432_v1 }
 0x2e6   : > { %3766 = vmatmul.mubr.msk.f32.gmra.mrb[36].mxu1 %vm2206_vm2, %v2044_v16 }
 0x2e7   : > { %3768 = vmatprep.mubr.msk.f32.mxu1 %vm4433_vm0, %v4432_v1 }
 0x2ea   : > { %3769 = vmatmul.mubr.msk.f32.gmra.mrb[38].mxu1 %vm2206_vm2, %v2051_v17 }
 0x2eb   : > { %3771 = vmatprep.mubr.msk.f32.mxu1 %vm4433_vm0, %v4432_v1 }
 0x2ee   : > { %3772 = vmatmul.mubr.msk.f32.gmra.mrb[40].mxu1 %vm2206_vm2, %v2058_v19 }
 0x2ef   : > { %3774 = vmatprep.mubr.msk.f32.mxu1 %vm4433_vm0, %v4432_v1 }
 0x2f2   : > { %3775 = vmatmul.mubr.msk.f32.gmra.mrb[42].mxu1 %vm2206_vm2, %v2065_v20 }
 0x2f3   : > { %3777 = vmatprep.mubr.msk.f32.mxu1 %vm4433_vm0, %v4432_v1 }
 0x2f6   : > { %3778 = vmatmul.mubr.msk.f32.gmra.mrb[44].mxu1 %vm2206_vm2, %v2072_v22 }
 0x2f7   : > { %3780 = vmatprep.mubr.msk.f32.mxu1 %vm4433_vm0, %v4432_v1 }
 0x2fa   : > { %3781 = vmatmul.mubr.msk.f32.gmra.mrb[46].mxu1 %vm2206_vm2, %v2079_v23 }
 0x2fb   : > { %3783 = vmatprep.mubr.msk.f32.mxu1 %vm4433_vm0, %v4432_v1 }
 0x2fe   : > { %3784 = vmatmul.mubr.msk.f32.gmra.mrb[48].mxu1 %vm2206_vm2, %v2086_v24 }
 0x2ff   : > { %3786 = vmatprep.mubr.msk.f32.mxu1 %vm4433_vm0, %v4432_v1 }
 0x302   : > { %3787 = vmatmul.mubr.msk.f32.gmra.mrb[0].mxu1 %vm2206_vm2, %v2093_v25 }
 0x303   : > { %3789 = vmatprep.mubr.msk.f32.mxu1 %vm4433_vm0, %v4432_v1 }
 0x306   : > { %3790 = vmatmul.mubr.msk.f32.gmra.mrb[2].mxu1 %vm2206_vm2, %v2100_v26 }
 0x307   : > { %3792 = vmatprep.mubr.msk.f32.mxu1 %vm4433_vm0, %v4432_v1 }
 0x30a   : > { %3793 = vmatmul.mubr.msk.f32.gmra.mrb[4].mxu1 %vm2206_vm2, %v2107_v54 }
 0x30b   : > { %3795 = vmatprep.mubr.msk.f32.mxu1 %vm4433_vm0, %v4432_v1 }
 0x30e   : > { %3796 = vmatmul.mubr.msk.f32.gmra.mrb[6].mxu1 %vm2206_vm2, %v2114_v27 }
 0x30f   : > { %3798 = vmatprep.mubr.msk.f32.mxu1 %vm4433_vm0, %v4432_v1 }
 0x312   : > { %3799 = vmatmul.mubr.msk.f32.gmra.mrb[8].mxu1 %vm2206_vm2, %v2121_v28 }
 0x313   : > { %3801 = vmatprep.mubr.msk.f32.mxu1 %vm4433_vm0, %v4432_v1 }
 0x316   : > { %3802 = vmatmul.mubr.msk.f32.gmra.mrb[10].mxu1 %vm2206_vm2, %v2128_v29 }
 0x317   : > { %3804 = vmatprep.mubr.msk.f32.mxu1 %vm4433_vm0, %v4432_v1 }
 0x31a   : > { %3805 = vmatmul.mubr.msk.f32.gmra.mrb[12].mxu1 %vm2206_vm2, %v2135_v30 }
 0x31b   : > { %3807 = vmatprep.mubr.msk.f32.mxu1 %vm4433_vm0, %v4432_v1 }
 0x31e   : > { %3808 = vmatmul.mubr.msk.f32.gmra.mrb[14].mxu1 %vm2206_vm2, %v2142_v32 }
 0x31f   : > { %3810 = vmatprep.mubr.msk.f32.mxu1 %vm4433_vm0, %v4432_v1 }
 0x322   : > { %3811 = vmatmul.mubr.msk.f32.gmra.mrb[16].mxu1 %vm2206_vm2, %v2149_v33 }
 0x323   : > { %3813 = vmatprep.mubr.msk.f32.mxu1 %vm4433_vm0, %v4432_v1 }
 0x324   : > { %v2348_v38 = vpop.f32.mrb[196].mxu0 }
 0x325   : > { %v2350_v39 = vpop.f32.mrb[197].mxu0 }
 0x326   : > { %3814 = vmatmul.mubr.msk.f32.gmra.mrb[18].mxu1 %vm2206_vm2, %v2156_v34 }
 0x327   : > { %3816 = vmatprep.mubr.msk.f32.mxu1 %vm4433_vm0, %v4432_v1 }
 0x328   : > { %v2353_v41 = vpop.f32.mrb[198].mxu0 }
 0x329   : > { %v2355_v43 = vpop.f32.mrb[199].mxu0 }
 0x32a   : > { %3817 = vmatmul.mubr.msk.f32.gmra.mrb[20].mxu1 %vm2206_vm2, %v2163_v18 }
 0x32b   : > { %3819 = vmatprep.mubr.msk.f32.mxu1 %vm4433_vm0, %v4432_v1 }
 0x32c   : > { %v2358_v46 = vpop.f32.mrb[200].mxu0 }
 0x32d   : > { %v2360_v48 = vpop.f32.mrb[201].mxu0 }
 0x32e   : > { %3820 = vmatmul.mubr.msk.f32.gmra.mrb[22].mxu1 %vm2206_vm2, %v2170_v35 }
 0x32f   : > { %3822 = vmatprep.mubr.msk.f32.mxu1 %vm4433_vm0, %v4432_v1 }
 0x332   : > { %3823 = vmatmul.mubr.msk.f32.gmra.mrb[24].mxu1 %vm2206_vm2, %v2177_v36 }
 0x333   : > { %3825 = vmatprep.mubr.msk.f32.mxu1 %vm4433_vm0, %v4432_v1 }
 0x336   : > { %3826 = vmatmul.mubr.msk.f32.gmra.mrb[26].mxu1 %vm2206_vm2, %v2184_v37 }
 0x337   : > { %3828 = vmatprep.mubr.msk.f32.mxu1 %vm4433_vm0, %v4432_v1 }
 0x33a   : > { %3829 = vmatmul.mubr.msk.f32.gmra.mrb[28].mxu1 %vm2206_vm2, %v2191_v40 }
 0x33b   : > { %3831 = vmatprep.mubr.msk.f32.mxu1 %vm4433_vm0, %v4432_v1 }
 0x33c   : > { %v2363_v50 = vpop.f32.mrb[202].mxu0 }
 0x33d   : > { %v2365_v51 = vpop.f32.mrb[203].mxu0 }
 0x33e   : > { %3832 = vmatmul.mubr.msk.f32.gmra.mrb[30].mxu1 %vm2206_vm2, %v2198_v44 }
 0x33f   : > { %3834 = vmatprep.mubr.msk.f32.mxu1 %vm4433_vm0, %v4432_v1 }
 0x340   : > { %v2368_v52 = vpop.f32.mrb[204].mxu0 }
 0x341   : > { %v2370_v53 = vpop.f32.mrb[205].mxu0 }
 0x342   : > { %3835 = vmatmul.mubr.msk.f32.gmra.mrb[32].mxu1 %vm2206_vm2, %v2205_v49 }
 0x344   : > { %v2373_v55 = vpop.f32.mrb[206].mxu0 }
 0x345   : > { %v2375_v56 = vpop.f32.mrb[207].mxu0 }
 0x348   : > { %v2378_v57 = vpop.f32.mrb[208].mxu0 }
 0x349   : > { %v2380_v58 = vpop.f32.mrb[209].mxu0 }
 0x34c   : > { %v2383_v59 = vpop.f32.mrb[210].mxu0 }
 0x34d   : > { %v2385_v60 = vpop.f32.mrb[211].mxu0 }
 0x3b5   : > { %v2918_v61 = vpop.f32.mrb[34].mxu1 }
 0x3b6   : > { %v4016_v62 = vadd.f32 %v2918_v61, %v2348_v38  ;;  %v3764_v1 = vpop.f32.mrb[35].mxu1 }
 0x3b9   : > { %v2923_v63 = vpop.f32.mrb[36].mxu1 }
 0x3ba   : > { %v4017_v42 = vadd.f32 %v2923_v63, %v2353_v41  ;;  %v3767_v0 = vpop.f32.mrb[37].mxu1 }
 0x3bc   : > { %v3412_v2 = vpack.c.bf16 %v4017_v42, %v4016_v62 }
 0x3bd   : > { %v2928_v3 = vpop.f32.mrb[38].mxu1 }
 0x3be   : > { %3413 = vst [vmem:[%s5796_s26] sm:$0xff] %v3412_v2   ;;  %v4018_v21 = vadd.f32 %v2928_v3, %v2358_v46  ;;  %v3770_v4 = vpop.f32.mrb[39].mxu1 }
 0x3c1   : > { %v2933_v5 = vpop.f32.mrb[40].mxu1 }
 0x3c2   : > { %v4019_v6 = vadd.f32 %v2933_v5, %v2363_v50  ;;  %v3773_v7 = vpop.f32.mrb[41].mxu1 }
 0x3c4   : > { %v3417_v8 = vpack.c.bf16 %v4019_v6, %v4018_v21 }
 0x3c5   : > { %v2938_v9 = vpop.f32.mrb[42].mxu1 }
 0x3c6   : > { %3469 = vst [vmem:[%s5796_s26 + $0x8] sm:$0xff] %v3417_v8   ;;  %v4020_v47 = vadd.f32 %v2938_v9, %v2368_v52  ;;  %v3776_v10 = vpop.f32.mrb[43].mxu1 }
 0x3c9   : > { %v2943_v11 = vpop.f32.mrb[44].mxu1 }
 0x3ca   : > { %v4021_v31 = vadd.f32 %v2943_v11, %v2373_v55  ;;  %v3779_v12 = vpop.f32.mrb[45].mxu1 }
 0x3cc   : > { %v3422_v45 = vpack.c.bf16 %v4021_v31, %v4020_v47 }
 0x3cd   : > { %v2948_v13 = vpop.f32.mrb[46].mxu1 }
 0x3ce   : > { %3470 = vst [vmem:[%s5796_s26 + $0x10] sm:$0xff] %v3422_v45   ;;  %v4022_v14 = vadd.f32 %v2948_v13, %v2378_v57  ;;  %v3782_v15 = vpop.f32.mrb[47].mxu1 }
 0x3d1   : > { %v2953_v16 = vpop.f32.mrb[48].mxu1 }
 0x3d2   : > { %v4023_v17 = vadd.f32 %v2953_v16, %v2383_v59  ;;  %v3785_v19 = vpop.f32.mrb[49].mxu1 }
 0x3d4   : > { %v3427_v20 = vpack.c.bf16 %v4023_v17, %v4022_v14 }
 0x3d5   : > { %v2958_v22 = vpop.f32.mrb[0].mxu1 }
 0x3d6   : > { %3471 = vst [vmem:[%s5796_s26 + $0x18] sm:$0xff] %v3427_v20   ;;  %v3788_v23 = vpop.f32.mrb[1].mxu1 }
 0x3d9   : > { %v2963_v24 = vpop.f32.mrb[2].mxu1 }
 0x3da   : > { %v3432_v25 = vpack.c.bf16 %v2963_v24, %v2958_v22  ;;  %v3791_v26 = vpop.f32.mrb[3].mxu1 }
 0x3dc   : > { %3472 = vst [vmem:[%s5796_s26 + $0x20] sm:$0xff] %v3432_v25  }
 0x3dd   : > { %v2968_v54 = vpop.f32.mrb[4].mxu1 }
 0x3de   : > { %v3794_v27 = vpop.f32.mrb[5].mxu1 }
 0x3e1   : > { %v2973_v28 = vpop.f32.mrb[6].mxu1 }
 0x3e2   : > { %v3437_v29 = vpack.c.bf16 %v2973_v28, %v2968_v54  ;;  %v3797_v30 = vpop.f32.mrb[7].mxu1 }
 0x3e4   : > { %3473 = vst [vmem:[%s5796_s26 + $0x28] sm:$0xff] %v3437_v29  }
 0x3e5   : > { %v2978_v32 = vpop.f32.mrb[8].mxu1 }
 0x3e6   : > { %v3800_v33 = vpop.f32.mrb[9].mxu1 }
 0x3e9   : > { %v2983_v34 = vpop.f32.mrb[10].mxu1 }
 0x3ea   : > { %v3442_v18 = vpack.c.bf16 %v2983_v34, %v2978_v32  ;;  %v3803_v35 = vpop.f32.mrb[11].mxu1 }
 0x3ec   : > { %3474 = vst [vmem:[%s5796_s26 + $0x30] sm:$0xff] %v3442_v18  }
 0x3ed   : > { %v2988_v36 = vpop.f32.mrb[12].mxu1 }
 0x3ee   : > { %v3806_v37 = vpop.f32.mrb[13].mxu1 }
 0x3f1   : > { %v2993_v38 = vpop.f32.mrb[14].mxu1 }
 0x3f2   : > { %v3447_v39 = vpack.c.bf16 %v2993_v38, %v2988_v36  ;;  %v3809_v40 = vpop.f32.mrb[15].mxu1 }
 0x3f4   : > { %3475 = vst [vmem:[%s5796_s26 + $0x38] sm:$0xff] %v3447_v39  }
 0x3f5   : > { %v2998_v41 = vpop.f32.mrb[16].mxu1 }
 0x3f6   : > { %v3812_v43 = vpop.f32.mrb[17].mxu1 }
 0x3f9   : > { %v3003_v44 = vpop.f32.mrb[18].mxu1 }
 0x3fa   : > { %v3452_v46 = vpack.c.bf16 %v3003_v44, %v2998_v41  ;;  %v3815_v48 = vpop.f32.mrb[19].mxu1 }
 0x3fc   : > { %3476 = vst [vmem:[%s5796_s26 + $0x40] sm:$0xff] %v3452_v46  }
 0x3fd   : > { %v3008_v49 = vpop.f32.mrb[20].mxu1 }
 0x3fe   : > { %v3818_v50 = vpop.f32.mrb[21].mxu1 }
 0x401   : > { %v3013_v51 = vpop.f32.mrb[22].mxu1 }
 0x402   : > { %v3457_v52 = vpack.c.bf16 %v3013_v51, %v3008_v49  ;;  %v3821_v53 = vpop.f32.mrb[23].mxu1 }
 0x404   : > { %3477 = vst [vmem:[%s5796_s26 + $0x48] sm:$0xff] %v3457_v52  }
 0x405   : > { %v3018_v55 = vpop.f32.mrb[24].mxu1 }
 0x406   : > { %v3824_v56 = vpop.f32.mrb[25].mxu1 }
 0x409   : > { %v3023_v57 = vpop.f32.mrb[26].mxu1 }
 0x40a   : > { %v3462_v58 = vpack.c.bf16 %v3023_v57, %v3018_v55  ;;  %v3827_v59 = vpop.f32.mrb[27].mxu1 }
 0x40c   : > { %3478 = vst [vmem:[%s5796_s26 + $0x50] sm:$0xff] %v3462_v58  }
 0x40d   : > { %v3028_v60 = vpop.f32.mrb[28].mxu1 }
 0x40e   : > { %v3830_v61 = vpop.f32.mrb[29].mxu1 }
 0x411   : > { %v3033_v62 = vpop.f32.mrb[30].mxu1 }
 0x412   : > { %v3467_v1 = vpack.c.bf16 %v3033_v62, %v3028_v60  ;;  %v3833_v63 = vpop.f32.mrb[31].mxu1 }
 0x414   : > { %3479 = vst [vmem:[%s5796_s26 + $0x58] sm:$0xff] %v3467_v1  }
 0x415   : > { %v3038_v42 = vpop.f32.mrb[32].mxu1 }
 0x416   : > { %v3408_v0 = vpack.c.bf16 %v3038_v42, %v3038_v42  ;;  %v3836_v2 = vpop.f32.mrb[33].mxu1 }
 0x418   : > { %3167 = vst [vmem:[%s5796_s26 + $0x60] sm:$0x3] %v3408_v0 }
 0x419 PF: > { %s17_s24 = sadd.s32 1, %s4430_s24  }
 0x41a   : > { %p14_p4 = scmp.ge.s32.totalorder %s17_s24, 4  }
 0x41c   :  { %16 = sbr.rel (!%p14_p4) target bundleno = 1 (0x1), region = 78 }

// kernel: lenet_forward.7
= control target key start
LH: loop header
LB: loop body
LE: loop exit
PB: predicated region body
PF: predicated region fallthrough
CT: control target
= control target key end

     0   :  { %s694_s12 = smov 0   ;;  %s771_s0 = inlined_call_operand.vmem [shape: bf16[2,100,160], index: 0, kind: input, shape index: {}]   ;;  %s772_s1 = inlined_call_operand.vmem [shape: bf16[160,128], index: 1, kind: input, shape index: {}]   ;;  %s773_s2 = inlined_call_operand.vmem [shape: f32[2,1,128], index: 2, kind: output, shape index: {0}]   ;;  %s774_s3 = inlined_call_operand.vmem [shape: f32[2,1,128], index: 3, kind: output, shape index: {1}]  }
   0x1 LB: > { %s566_s13 = sadd.s32 4294967295, %s671_s12   ;;  %p570_p0 = scmp.ge.s32.totalorder %s671_s12, 1  ;;  %s671_s12 = sphi %s694_s12, %s14_s12  }
   0x2   : > { %p140_p1 = scmp.lt.s32.totalorder %s671_s12, 3 }
   0x4   : > { %p141_p2 = pnand %p570_p0, %p140_p1 }
   0x5   : > { %v635_v0 = vld [vmem:[%s772_s1] sm:$0xff] (!%p141_p2)   ;;  %v673_v1 = vmov (!%p141_p2), 0   ;;  %p165_p3 = scmp.lt.s32.totalorder (!%p141_p2), %s566_s13, 1  ;;  %v636_v2 = vld [vmem:[%s772_s1 + $0x8] sm:$0xff] (!%p141_p2)   ;;  %v637_v3 = vld [vmem:[%s772_s1 + $0x10] sm:$0xff] (!%p141_p2)   ;;  %vm330_vm0 = vcmask (!%p141_p2), 261120  }
   0x6   : > { %144 = sbr.rel (%p141_p2) target bundleno = 311 (0x137), region = 28  ;;  %352 = vmatprep.subr.bf16.mxu0 (!%p141_p2), %v673_v1  ;;  %605 = vmatprep.subr.bf16.mxu1 (!%p141_p2), %v673_v1  ;;  %v638_v4 = vld [vmem:[%s772_s1 + $0x18] sm:$0xff] (!%p141_p2)   ;;  %v639_v6 = vld [vmem:[%s772_s1 + $0x20] sm:$0xff] (!%p141_p2)   ;;  %v640_v8 = vld [vmem:[%s772_s1 + $0x28] sm:$0xff] (!%p141_p2)   ;;  %vm451_vm1 = vcmask (!%p141_p2), 1043456  }
   0x7   : > { %353 = vmatpush1.bf16.msra.mxu0 (!%p141_p2), %v635_v0  ;;  %615 = vmatpush1.bf16.msra.mxu1 (!%p141_p2), %v635_v0  ;;  %v641_v9 = vld [vmem:[%s772_s1 + $0x30] sm:$0xff] (!%p141_p2)   ;;  %v642_v10 = vld [vmem:[%s772_s1 + $0x38] sm:$0xff] (!%p141_p2)   ;;  %v643_v11 = vld [vmem:[%s772_s1 + $0x40] sm:$0xff] (!%p141_p2)  }
   0x8   : > { %354 = vmatprep.subr.bf16.mxu0 (!%p141_p2), %v673_v1  ;;  %606 = vmatprep.subr.bf16.mxu1 (!%p141_p2), %v673_v1  ;;  %v644_v12 = vld [vmem:[%s772_s1 + $0x48] sm:$0xff] (!%p141_p2)  }
   0xb   : > { %355 = vmatpush1.bf16.msra.mxu0 (!%p141_p2), %v636_v2  ;;  %616 = vmatpush1.bf16.msra.mxu1 (!%p141_p2), %v636_v2 }
   0xc   : > { %356 = vmatprep.subr.bf16.mxu0 (!%p141_p2), %v673_v1  ;;  %607 = vmatprep.subr.bf16.mxu1 (!%p141_p2), %v673_v1 }
   0xd   : > { %s776_s13 = smov (!%p165_p3, %s566_s13), 1 }
   0xe   : > { %s625_s18 = smul.u32 104, %s776_s13  ;;  %s172_s15 = scalar_lea.vmem %s773_s2, %s776_s13 }
   0xf   : > { %357 = vmatpush1.bf16.msra.mxu0 %v637_v3  ;;  %617 = vmatpush1.bf16.msra.mxu1 %v637_v3 }
  0x10   : > { %s717_s23 = scalar_lea.vmem %s771_s0, %s625_s18  ;;  %358 = vmatprep.subr.bf16.mxu0 %v673_v1  ;;  %608 = vmatprep.subr.bf16.mxu1 %v673_v1  ;;  %s175_s18 = scalar_lea.vmem %s774_s3, %s776_s13 }
  0x11   : > { %v647_v5 = vld [vmem:[%s717_s23 + $0x4] ss:$8 sps:$4 sm:$0xff]   ;;  %v645_v13 = vld [vmem:[%s717_s23] ss:$8 sps:$4 sm:$0xff]   ;;  %v648_v15 = vld [vmem:[%s717_s23 + $0x14] ss:$8 sps:$4 sm:$0xff]  }
  0x12   : > { %596 = vmatprep.mubr.msk.bf16.mxu0 %vm330_vm0, %v647_v5  ;;  %v655_v7 = vld [vmem:[%s717_s23 + $0x44] ss:$8 sps:$4 sm:$0xff]   ;;  %v653_v14 = vld [vmem:[%s717_s23 + $0x40] ss:$8 sps:$4 sm:$0xff]   ;;  %v659_v16 = vld [vmem:[%s717_s23 + $0x54] ss:$8 sps:$4 sm:$0xff]  }
  0x13   : > { %359 = vmatpush1.bf16.msra.mxu0 %v638_v4  ;;  %618 = vmatpush1.bf16.msra.mxu1 %v638_v4  ;;  %v189_v17 = vld [vmem:[%s717_s23 + $0x60] sm:$0x33]  ;;  %v650_v18 = vld [vmem:[%s717_s23 + $0x10] ss:$8 sps:$4 sm:$0xff]   ;;  %v657_v24 = vld [vmem:[%s717_s23 + $0x34] ss:$8 sps:$4 sm:$0xff]  }
  0x14   : > { %360 = vmatprep.subr.bf16.mxu0 %v673_v1  ;;  %609 = vmatprep.subr.bf16.mxu1 %v673_v1  ;;  %v662_v19 = vld [vmem:[%s717_s23 + $0x50] ss:$8 sps:$4 sm:$0xff]   ;;  %v651_v20 = vld [vmem:[%s717_s23 + $0x24] ss:$8 sps:$4 sm:$0xff]   ;;  %v585_v21 = vcombine.high %v189_v17, %v189_v17  ;;  %v656_v22 = vld [vmem:[%s717_s23 + $0x20] ss:$8 sps:$4 sm:$0xff]   ;;  %v584_v23 = vcombine.low %v189_v17, %v189_v17 }
  0x15   : > { %600 = vmatprep.mubr.msk.bf16.mxu1 %vm330_vm0, %v655_v7  ;;  %v661_v25 = vld [vmem:[%s717_s23 + $0x30] ss:$8 sps:$4 sm:$0xff]  }
  0x17   : > { %361 = vmatpush1.bf16.msra.mxu0 %v639_v6  ;;  %619 = vmatpush1.bf16.msra.mxu1 %v639_v6 }
  0x18   : > { %362 = vmatprep.subr.bf16.mxu0 %v673_v1  ;;  %610 = vmatprep.subr.bf16.mxu1 %v673_v1 }
  0x1b   : > { %363 = vmatpush1.bf16.msra.mxu0 %v640_v8  ;;  %620 = vmatpush1.bf16.msra.mxu1 %v640_v8 }
  0x1c   : > { %364 = vmatprep.subr.bf16.mxu0 %v673_v1  ;;  %611 = vmatprep.subr.bf16.mxu1 %v673_v1 }
  0x1f   : > { %365 = vmatpush1.bf16.msra.mxu0 %v641_v9  ;;  %621 = vmatpush1.bf16.msra.mxu1 %v641_v9 }
  0x20   : > { %366 = vmatprep.subr.bf16.mxu0 %v673_v1  ;;  %612 = vmatprep.subr.bf16.mxu1 %v673_v1 }
  0x23   : > { %367 = vmatpush1.bf16.msra.mxu0 %v642_v10  ;;  %622 = vmatpush1.bf16.msra.mxu1 %v642_v10 }
  0x24   : > { %368 = vmatprep.subr.bf16.mxu0 %v673_v1  ;;  %613 = vmatprep.subr.bf16.mxu1 %v673_v1 }
  0x27   : > { %369 = vmatpush1.bf16.msra.mxu0 %v643_v11  ;;  %623 = vmatpush1.bf16.msra.mxu1 %v643_v11 }
  0x28   : > { %370 = vmatprep.subr.bf16.mxu0 %v673_v1  ;;  %614 = vmatprep.subr.bf16.mxu1 %v673_v1 }
  0x2b   : > { %371 = vmatpush1.bf16.msra.mxu0 %v644_v12  ;;  %624 = vmatpush1.bf16.msra.mxu1 %v644_v12 }
  0x2e   : > { %385 = vmatmul.mubr.bf16.vlgmr.msra.gmra.mrb[0].mxu0 %v645_v13  ;;  %417 = vmatmul.mubr.bf16.vlgmr.msra.gmra.mrb[0].mxu1 %v653_v14 }
  0x2f   : > { %597 = vmatprep.mubr.msk.bf16.mxu0 %vm330_vm0, %v648_v15  ;;  %601 = vmatprep.mubr.msk.bf16.mxu1 %vm330_vm0, %v659_v16 }
  0x36   : > { %393 = vmatmul.mubr.bf16.gmra.mrb[4].mxu0 %v650_v18  ;;  %425 = vmatmul.mubr.bf16.gmra.mrb[4].mxu1 %v662_v19 }
  0x37   : > { %598 = vmatprep.mubr.msk.bf16.mxu0 %vm330_vm0, %v651_v20  ;;  %602 = vmatprep.mubr.msk.bf16.mxu1 %vm330_vm0, %v585_v21 }
  0x3e   : > { %401 = vmatmul.mubr.bf16.gmra.mrb[8].mxu0 %v656_v22  ;;  %433 = vmatmul.mubr.bf16.gmra.mrb[8].mxu1 %v584_v23 }
  0x3f   : > { %599 = vmatprep.mubr.msk.bf16.mxu0 %vm330_vm0, %v657_v24 }
  0x46   : > { %409 = vmatmul.mubr.bf16.gmra.mrb[12].mxu0 %v661_v25 }
 0x101   : > { %v386_v26 = vpop.f32.mrb[0].mxu0  ;;  %v418_v27 = vpop.f32.mrb[0].mxu1 }
 0x102   : > { %v388_v28 = vpop.f32.mrb[1].mxu0  ;;  %v420_v29 = vpop.f32.mrb[1].mxu1  ;;  %v461_v32 = vmul.f32 %v386_v26, %v386_v26  ;;  %v469_v11 = vmul.f32 %v418_v27, %v418_v27 }
 0x103   : > { %v389_v30 = vpop.f32.mrb[2].mxu0  ;;  %v421_v31 = vpop.f32.mrb[2].mxu1 }
 0x104   : > { %v440_v33 = vadd.f32 %v389_v30, %v386_v26  ;;  %v462_v34 = vmul.f32 %v389_v30, %v389_v30  ;;  %v391_v35 = vpop.f32.mrb[3].mxu0  ;;  %v423_v36 = vpop.f32.mrb[3].mxu1  ;;  %v470_v14 = vmul.f32 %v421_v31, %v421_v31 }
 0x106   : > { %v474_v37 = vadd.f32 %v462_v34, %v461_v32 }
 0x109   : > { %v394_v38 = vpop.f32.mrb[4].mxu0  ;;  %v426_v39 = vpop.f32.mrb[4].mxu1 }
 0x10a   : > { %v441_v40 = vadd.f32 %v440_v33, %v394_v38  ;;  %v463_v41 = vmul.f32 %v394_v38, %v394_v38  ;;  %v396_v42 = vpop.f32.mrb[5].mxu0  ;;  %v428_v43 = vpop.f32.mrb[5].mxu1  ;;  %v471_v18 = vmul.f32 %v426_v39, %v426_v39 }
 0x10b   : > { %v397_v44 = vpop.f32.mrb[6].mxu0  ;;  %v429_v45 = vpop.f32.mrb[6].mxu1 }
 0x10c   : > { %v475_v46 = vadd.f32 %v474_v37, %v463_v41  ;;  %v442_v47 = vadd.f32 %v441_v40, %v397_v44  ;;  %v464_v48 = vmul.f32 %v397_v44, %v397_v44  ;;  %v399_v49 = vpop.f32.mrb[7].mxu0  ;;  %v431_v50 = vpop.f32.mrb[7].mxu1  ;;  %v472_v23 = vmul.f32 %v429_v45, %v429_v45 }
 0x10e   : > { %v476_v51 = vadd.f32 %v475_v46, %v464_v48 }
 0x111   : > { %v402_v52 = vpop.f32.mrb[8].mxu0  ;;  %v434_v53 = vpop.f32.mrb[8].mxu1 }
 0x112   : > { %v443_v54 = vadd.f32 %v442_v47, %v402_v52  ;;  %v465_v55 = vmul.f32 %v402_v52, %v402_v52  ;;  %v404_v56 = vpop.f32.mrb[9].mxu0  ;;  %v436_v57 = vpop.f32.mrb[9].mxu1  ;;  %v473_v17 = vmul.f32 %v434_v53, %v434_v53  ;;  %v452_v21 = vsel %vm451_vm1, %v434_v53, 0.0 }
 0x113   : > { %v405_v58 = vpop.f32.mrb[10].mxu0  ;;  %v437_v59 = vpop.f32.mrb[10].mxu1 }
 0x114   : > { %v477_v60 = vadd.f32 %v476_v51, %v465_v55  ;;  %v444_v61 = vadd.f32 %v443_v54, %v405_v58  ;;  %v466_v62 = vmul.f32 %v405_v58, %v405_v58  ;;  %v407_v63 = vpop.f32.mrb[11].mxu0  ;;  %v438_v0 = vpop.f32.mrb[11].mxu1  ;;  %v485_v25 = vsel %vm451_vm1, %v473_v17, 0.0 }
 0x116   : > { %v478_v1 = vadd.f32 %v477_v60, %v466_v62 }
 0x119   : > { %v410_v2 = vpop.f32.mrb[12].mxu0 }
 0x11a   : > { %v445_v3 = vadd.f32 %v444_v61, %v410_v2  ;;  %v467_v4 = vmul.f32 %v410_v2, %v410_v2  ;;  %v412_v5 = vpop.f32.mrb[13].mxu0 }
 0x11b   : > { %v413_v6 = vpop.f32.mrb[14].mxu0 }
 0x11c   : > { %v479_v7 = vadd.f32 %v478_v1, %v467_v4  ;;  %v446_v8 = vadd.f32 %v445_v3, %v413_v6  ;;  %v468_v9 = vmul.f32 %v413_v6, %v413_v6  ;;  %v415_v10 = vpop.f32.mrb[15].mxu0 }
 0x11e   : > { %v447_v12 = vadd.f32 %v446_v8, %v418_v27  ;;  %v480_v13 = vadd.f32 %v479_v7, %v468_v9 }
 0x120   : > { %v481_v15 = vadd.f32 %v480_v13, %v469_v11  ;;  %v448_v16 = vadd.f32 %v447_v12, %v421_v31 }
 0x122   : > { %v449_v19 = vadd.f32 %v448_v16, %v426_v39  ;;  %v482_v20 = vadd.f32 %v481_v15, %v470_v14 }
 0x124   : > { %v450_v22 = vadd.f32 %v449_v19, %v429_v45  ;;  %v483_v24 = vadd.f32 %v482_v20, %v471_v18 }
 0x126   : > { %v484_v26 = vadd.f32 %v483_v24, %v472_v23  ;;  %v453_v28 = vadd.f32 %v452_v21, %v450_v22 }
 0x128   : > { %v454_v29 = vrot.slane %v453_v28, 4  ;;  %v486_v27 = vadd.f32 %v485_v25, %v484_v26 }
 0x12a   : > { %v455_v30 = vadd.f32 %v454_v29, %v453_v28  ;;  %v487_v32 = vrot.slane %v486_v27, 4 }
 0x12c   : > { %v456_v33 = vrot.slane %v455_v30, 2  ;;  %v488_v31 = vadd.f32 %v487_v32, %v486_v27 }
 0x12e   : > { %v457_v34 = vadd.f32 %v456_v33, %v455_v30  ;;  %v489_v35 = vrot.slane %v488_v31, 2 }
 0x130   : > { %v458_v36 = vrot.slane %v457_v34, 1  ;;  %v490_v37 = vadd.f32 %v489_v35, %v488_v31 }
 0x132   : > { %v459_v38 = vadd.f32 %v458_v36, %v457_v34  ;;  %v491_v39 = vrot.slane %v490_v37, 1 }
 0x134   : > { %460 = vst [vmem:[%s172_s15] sm:$0x1] %v459_v38  ;;  %v492_v40 = vadd.f32 %v491_v39, %v490_v37 }
 0x136   : > { %493 = vst [vmem:[%s175_s18] sm:$0x1] %v492_v40 }
 0x137 PF: > { %s14_s12 = sadd.s32 1, %s671_s12  }
 0x138   : > { %p11_p4 = scmp.ge.s32.totalorder %s14_s12, 4  }
 0x13a   :  { %13 = sbr.rel (!%p11_p4) target bundleno = 1 (0x1), region = 70 }

// kernel: lenet_forward.8
= control target key start
LH: loop header
LB: loop body
LE: loop exit
PB: predicated region body
PF: predicated region fallthrough
CT: control target
= control target key end

     0   :  { %s1120_s24 = smov 0   ;;  %s1281_s0 = inlined_call_operand.vmem [shape: bf16[2,100,160], index: 0, kind: input, shape index: {}]   ;;  %s1282_s1 = inlined_call_operand.vmem [shape: bf16[160,128], index: 1, kind: input, shape index: {}]   ;;  %s1283_s2 = inlined_call_operand.vmem [shape: f32[1,128], index: 2, kind: input, shape index: {}]   ;;  %s1284_s3 = inlined_call_operand.vmem [shape: f32[1,128], index: 3, kind: input, shape index: {}]   ;;  %s1285_s4 = inlined_call_operand.vmem [shape: f32[1,128], index: 4, kind: input, shape index: {}]   ;;  %s1286_s5 = inlined_call_operand.vmem [shape: f32[1,128], index: 5, kind: input, shape index: {}]   ;;  %s1287_s6 = inlined_call_operand.vmem [shape: f32[25,100], index: 6, kind: input, shape index: {}]   ;;  %s1288_s7 = inlined_call_operand.vmem [shape: bf16[2,25,128], index: 7, kind: output, shape index: {}]  }
   0x1 LB: > { %s868_s25 = sadd.s32 4294967295, %s1077_s24   ;;  %p872_p0 = scmp.ge.s32.totalorder %s1077_s24, 1  ;;  %s1077_s24 = sphi %s1120_s24, %s17_s24  }
   0x2   : > { %p237_p1 = scmp.lt.s32.totalorder %s1077_s24, 3 }
   0x4   : > { %p238_p2 = pnand %p872_p0, %p237_p1 }
   0x5   : > { %v1013_v0 = vld [vmem:[%s1282_s1] sm:$0xff] (!%p238_p2)   ;;  %v1079_v1 = vmov (!%p238_p2), 0   ;;  %p269_p3 = scmp.lt.s32.totalorder (!%p238_p2), %s868_s25, 1  ;;  %v1014_v2 = vld [vmem:[%s1282_s1 + $0x8] sm:$0xff] (!%p238_p2)   ;;  %v1015_v3 = vld [vmem:[%s1282_s1 + $0x10] sm:$0xff] (!%p238_p2)   ;;  %vm433_vm0 = vcmask (!%p238_p2), 261120   ;;  %v552_v35 = vlaneseq (!%p238_p2) }
   0x6   : > { %241 = sbr.rel (%p238_p2) target bundleno = 553 (0x229), region = 48  ;;  %455 = vmatprep.subr.bf16.mxu0 (!%p238_p2), %v1079_v1  ;;  %v1016_v4 = vld [vmem:[%s1282_s1 + $0x18] sm:$0xff] (!%p238_p2)   ;;  %v1017_v6 = vld [vmem:[%s1282_s1 + $0x20] sm:$0xff] (!%p238_p2)   ;;  %v1018_v7 = vld [vmem:[%s1282_s1 + $0x28] sm:$0xff] (!%p238_p2)   ;;  %vm686_vm1 = vcmask (!%p238_p2), 818176   ;;  %vm699_vm2 = vcmask (!%p238_p2), 1043456  }
   0x7   : > { %456 = vmatpush1.bf16.msra.mxu0 (!%p238_p2), %v1013_v0  ;;  %v1019_v8 = vld [vmem:[%s1282_s1 + $0x30] sm:$0xff] (!%p238_p2)   ;;  %v1020_v9 = vld [vmem:[%s1282_s1 + $0x38] sm:$0xff] (!%p238_p2)   ;;  %v1021_v10 = vld [vmem:[%s1282_s1 + $0x40] sm:$0xff] (!%p238_p2)   ;;  %v553_v36 = vshrl.u32 (!%p238_p2), %v552_v35, 7  ;;  %vm807_vm3 = vcmask (!%p238_p2), 1040384  }
   0x8   : > { %457 = vmatprep.subr.bf16.mxu0 (!%p238_p2), %v1079_v1  ;;  %v1022_v11 = vld [vmem:[%s1282_s1 + $0x48] sm:$0xff] (!%p238_p2)   ;;  %v682_v26 = vld [vmem:[%s1287_s6] sm:$0xff] (!%p238_p2)  ;;  %vm808_vm4 = vsmask.f32 (!%p238_p2), 256 }
   0x9   : > { %973 = vmatprep.mubr.msk.f32.mxu1 (!%p238_p2), %vm686_vm1, %v682_v26  ;;  %v543_v27 = vld [vmem:[%s1283_s2] sm:$0x1] (!%p238_p2)  ;;  %v554_v37 = vsub.s32 (!%p238_p2), 0, %v553_v36  ;;  %vm809_vm5 = vmand (!%p238_p2), %vm807_vm3, %vm808_vm4 }
   0xa   : > { %v544_v28 = vmul.f32 (!%p238_p2), 0.005, %v543_v27  ;;  %v545_v29 = vld [vmem:[%s1284_s3] sm:$0x1] (!%p238_p2) }
   0xb   : > { %458 = vmatpush1.bf16.msra.mxu0 (!%p238_p2), %v1014_v2  ;;  %v546_v30 = vmul.f32 (!%p238_p2), 0.005, %v545_v29  ;;  %v1201_v41 = vld [vmem:[%s1285_s4] ss:$0 sm:$0xff] (!%p238_p2) }
   0xc   : > { %459 = vmatprep.subr.bf16.mxu0 (!%p238_p2), %v1079_v1  ;;  %v547_v31 = vmul.f32 (!%p238_p2), %v544_v28, %v544_v28  ;;  %v1196_v38 = vrot.slane (!%p238_p2), %v544_v28, %v554_v37  ;;  %v1211_v49 = vld [vmem:[%s1286_s5] ss:$0 sm:$0xff] (!%p238_p2) }
   0xd   : > { %s1290_s25 = smov (!%p269_p3, %s868_s25), 1 }
   0xe   : > { %s1003_s30 = smul.u32 104, %s1290_s25  ;;  %v548_v32 = vsub.f32 %v546_v30, %v547_v31  ;;  %s920_s22 = sshll.u32 %s1290_s25, 4 }
   0xf   : > { %460 = vmatpush1.bf16.msra.mxu0 %v1015_v3  ;;  %s278_s27 = scalar_lea.vmem %s1288_s7, %s920_s22 }
  0x10   : > { %s1143_s12 = scalar_lea.vmem %s1281_s0, %s1003_s30  ;;  %461 = vmatprep.subr.bf16.mxu0 %v1079_v1  ;;  %v549_v33 = vmax.f32 %v548_v32, 0.0 }
  0x11   : > { %v1025_v5 = vld [vmem:[%s1143_s12 + $0x4] ss:$8 sps:$4 sm:$0xff]   ;;  %v1023_v12 = vld [vmem:[%s1143_s12] ss:$8 sps:$4 sm:$0xff]   ;;  %v1026_v13 = vld [vmem:[%s1143_s12 + $0x14] ss:$8 sps:$4 sm:$0xff]  }
  0x12   : > { %900 = vmatprep.mubr.msk.bf16.mxu0 %vm433_vm0, %v1025_v5  ;;  %v1028_v14 = vld [vmem:[%s1143_s12 + $0x10] ss:$8 sps:$4 sm:$0xff]   ;;  %v1029_v15 = vld [vmem:[%s1143_s12 + $0x24] ss:$8 sps:$4 sm:$0xff]   ;;  %v1031_v16 = vld [vmem:[%s1143_s12 + $0x20] ss:$8 sps:$4 sm:$0xff]  }
  0x13   : > { %462 = vmatpush1.bf16.msra.mxu0 %v1016_v4  ;;  %v1032_v17 = vld [vmem:[%s1143_s12 + $0x34] ss:$8 sps:$4 sm:$0xff]   ;;  %v1034_v18 = vld [vmem:[%s1143_s12 + $0x30] ss:$8 sps:$4 sm:$0xff]   ;;  %v1035_v19 = vld [vmem:[%s1143_s12 + $0x44] ss:$8 sps:$4 sm:$0xff]  }
  0x14   : > { %463 = vmatprep.subr.bf16.mxu0 %v1079_v1  ;;  %v1037_v20 = vld [vmem:[%s1143_s12 + $0x40] ss:$8 sps:$4 sm:$0xff]   ;;  %v1038_v21 = vld [vmem:[%s1143_s12 + $0x54] ss:$8 sps:$4 sm:$0xff]   ;;  %v1040_v23 = vld [vmem:[%s1143_s12 + $0x50] ss:$8 sps:$4 sm:$0xff]  }
  0x15   : > { %v292_v22 = vld [vmem:[%s1143_s12 + $0x60] sm:$0x33]  ;;  %v589_v34 = vadd.f32 1e-05, %v549_v33 }
  0x16   : > { %v889_v24 = vcombine.high %v292_v22, %v292_v22  ;;  %v888_v25 = vcombine.low %v292_v22, %v292_v22 }
  0x17   : > { %464 = vmatpush1.bf16.msra.mxu0 %v1017_v6  ;;  %1043 = vrsqrt.f32 %v589_v34 }
  0x18   : > { %465 = vmatprep.subr.bf16.mxu0 %v1079_v1 }
  0x1b   : > { %466 = vmatpush1.bf16.msra.mxu0 %v1018_v7 }
  0x1c   : > { %467 = vmatprep.subr.bf16.mxu0 %v1079_v1 }
  0x1f   : > { %468 = vmatpush1.bf16.msra.mxu0 %v1019_v8 }
  0x20   : > { %469 = vmatprep.subr.bf16.mxu0 %v1079_v1 }
  0x21   : > { %v1044_v39 = vpop.eup %1043 }
  0x22   : > { %v1204_v43 = vrot.slane %v1044_v39, %v554_v37 }
  0x23   : > { %470 = vmatpush1.bf16.msra.mxu0 %v1020_v9 }
  0x24   : > { %471 = vmatprep.subr.bf16.mxu0 %v1079_v1 }
  0x27   : > { %472 = vmatpush1.bf16.msra.mxu0 %v1021_v10 }
  0x28   : > { %473 = vmatprep.subr.bf16.mxu0 %v1079_v1 }
  0x2b   : > { %474 = vmatpush1.bf16.msra.mxu0 %v1022_v11 }
  0x2e   : > { %488 = vmatmul.mubr.bf16.vlgmr.msra.gmra.mrb[0].mxu0 %v1023_v12 }
  0x2f   : > { %901 = vmatprep.mubr.msk.bf16.mxu0 %vm433_vm0, %v1026_v13 }
  0x36   : > { %496 = vmatmul.mubr.bf16.gmra.mrb[4].mxu0 %v1028_v14 }
  0x37   : > { %902 = vmatprep.mubr.msk.bf16.mxu0 %vm433_vm0, %v1029_v15 }
  0x3e   : > { %504 = vmatmul.mubr.bf16.gmra.mrb[8].mxu0 %v1031_v16 }
  0x3f   : > { %903 = vmatprep.mubr.msk.bf16.mxu0 %vm433_vm0, %v1032_v17 }
  0x46   : > { %512 = vmatmul.mubr.bf16.gmra.mrb[12].mxu0 %v1034_v18 }
  0x47   : > { %904 = vmatprep.mubr.msk.bf16.mxu0 %vm433_vm0, %v1035_v19 }
  0x4e   : > { %520 = vmatmul.mubr.bf16.gmra.mrb[16].mxu0 %v1037_v20 }
  0x4f   : > { %905 = vmatprep.mubr.msk.bf16.mxu0 %vm433_vm0, %v1038_v21 }
  0x56   : > { %528 = vmatmul.mubr.bf16.gmra.mrb[20].mxu0 %v1040_v23 }
  0x57   : > { %906 = vmatprep.mubr.msk.bf16.mxu0 %vm433_vm0, %v889_v24 }
  0x5e   : > { %536 = vmatmul.mubr.bf16.gmra.mrb[24].mxu0 %v888_v25 }
 0x101   : > { %v489_v40 = vpop.f32.mrb[0].mxu0 }
 0x102   : > { %v557_v42 = vsub.f32 %v489_v40, %v1196_v38  ;;  %v491_v44 = vpop.f32.mrb[1].mxu0 }
 0x103   : > { %v492_v45 = vpop.f32.mrb[2].mxu0 }
 0x104   : > { %v576_v46 = vmul.f32 %v1201_v41, %v557_v42  ;;  %v558_v47 = vsub.f32 %v492_v45, %v1196_v38  ;;  %v494_v48 = vpop.f32.mrb[3].mxu0 }
 0x106   : > { %v597_v50 = vmul.f32 %v1204_v43, %v576_v46  ;;  %v577_v51 = vmul.f32 %v1201_v41, %v558_v47 }
 0x108   : > { %v617_v52 = vadd.f32 %v1211_v49, %v597_v50  ;;  %v598_v53 = vmul.f32 %v1204_v43, %v577_v51 }
 0x109   : > { %v497_v54 = vpop.f32.mrb[4].mxu0 }
 0x10a   : > { %v630_v55 = vmul.f32 0.5, %v617_v52  ;;  %v618_v56 = vadd.f32 %v1211_v49, %v598_v53  ;;  %v559_v57 = vsub.f32 %v497_v54, %v1196_v38  ;;  %v499_v58 = vpop.f32.mrb[5].mxu0 }
 0x10b   : > { %v500_v59 = vpop.f32.mrb[6].mxu0 }
 0x10c   : > { %v631_v60 = vmul.f32 0.5, %v618_v56  ;;  %v578_v61 = vmul.f32 %v1201_v41, %v559_v57  ;;  %v560_v62 = vsub.f32 %v500_v59, %v1196_v38  ;;  %v502_v63 = vpop.f32.mrb[7].mxu0  ;;  %1045 = vtanh.f32 %v630_v55 }
 0x10e   : > { %v599_v0 = vmul.f32 %v1204_v43, %v578_v61  ;;  %v579_v1 = vmul.f32 %v1201_v41, %v560_v62  ;;  %1047 = vtanh.f32 %v631_v60 }
 0x110   : > { %v619_v2 = vadd.f32 %v1211_v49, %v599_v0  ;;  %v600_v3 = vmul.f32 %v1204_v43, %v579_v1 }
 0x111   : > { %v505_v4 = vpop.f32.mrb[8].mxu0 }
 0x112   : > { %v632_v5 = vmul.f32 0.5, %v619_v2  ;;  %v620_v6 = vadd.f32 %v1211_v49, %v600_v3  ;;  %v561_v7 = vsub.f32 %v505_v4, %v1196_v38  ;;  %v507_v8 = vpop.f32.mrb[9].mxu0 }
 0x113   : > { %v508_v9 = vpop.f32.mrb[10].mxu0 }
 0x114   : > { %1049 = vtanh.f32 %v632_v5  ;;  %v633_v10 = vmul.f32 0.5, %v620_v6  ;;  %v580_v11 = vmul.f32 %v1201_v41, %v561_v7  ;;  %v562_v12 = vsub.f32 %v508_v9, %v1196_v38  ;;  %v510_v13 = vpop.f32.mrb[11].mxu0 }
 0x116   : > { %v1046_v14 = vpop.eup %1045  ;;  %1051 = vtanh.f32 %v633_v10  ;;  %v601_v15 = vmul.f32 %v1204_v43, %v580_v11  ;;  %v581_v16 = vmul.f32 %v1201_v41, %v562_v12 }
 0x117   : > { %v656_v17 = vmul.f32 0.5, %v1046_v14 }
 0x118   : > { %v1048_v18 = vpop.eup %1047  ;;  %v621_v19 = vadd.f32 %v1211_v49, %v601_v15  ;;  %v602_v20 = vmul.f32 %v1204_v43, %v581_v16 }
 0x119   : > { %v513_v21 = vpop.f32.mrb[12].mxu0  ;;  %v657_v22 = vmul.f32 0.5, %v1048_v18  ;;  %v669_v28 = vadd.f32 0.5, %v656_v17 }
 0x11a   : > { %v634_v23 = vmul.f32 0.5, %v621_v19  ;;  %v622_v24 = vadd.f32 %v1211_v49, %v602_v20  ;;  %v563_v25 = vsub.f32 %v513_v21, %v1196_v38  ;;  %v515_v26 = vpop.f32.mrb[13].mxu0 }
 0x11b   : > { %v516_v27 = vpop.f32.mrb[14].mxu0  ;;  %v670_v29 = vadd.f32 0.5, %v657_v22 }
 0x11c   : > { %1053 = vtanh.f32 %v634_v23  ;;  %v635_v30 = vmul.f32 0.5, %v622_v24  ;;  %v582_v31 = vmul.f32 %v1201_v41, %v563_v25  ;;  %v564_v32 = vsub.f32 %v516_v27, %v1196_v38  ;;  %v518_v33 = vpop.f32.mrb[15].mxu0 }
 0x11d   : > { %v979_v34 = vpack.c.bf16 %v670_v29, %v669_v28 }
 0x11e   : > { %v1050_v35 = vpop.eup %1049  ;;  %1055 = vtanh.f32 %v635_v30  ;;  %v603_v36 = vmul.f32 %v1204_v43, %v582_v31  ;;  %v583_v37 = vmul.f32 %v1201_v41, %v564_v32 }
 0x11f   : > { %980 = vmatprep.subr.bf16.mxu1 %v979_v34  ;;  %v658_v39 = vmul.f32 0.5, %v1050_v35 }
 0x120   : > { %v1052_v40 = vpop.eup %1051  ;;  %v623_v42 = vadd.f32 %v1211_v49, %v603_v36  ;;  %v604_v44 = vmul.f32 %v1204_v43, %v583_v37  ;;  %982 = vmatpush3.bf16.msra.mxu1 %v979_v34 }
 0x121   : > { %v521_v45 = vpop.f32.mrb[16].mxu0  ;;  %v659_v46 = vmul.f32 0.5, %v1052_v40  ;;  %v671_v53 = vadd.f32 0.5, %v658_v39 }
 0x122   : > { %v636_v47 = vmul.f32 0.5, %v623_v42  ;;  %v624_v48 = vadd.f32 %v1211_v49, %v604_v44  ;;  %v565_v50 = vsub.f32 %v521_v45, %v1196_v38  ;;  %v523_v51 = vpop.f32.mrb[17].mxu0 }
 0x123   : > { %v524_v52 = vpop.f32.mrb[18].mxu0  ;;  %v672_v54 = vadd.f32 0.5, %v659_v46 }
 0x124   : > { %1057 = vtanh.f32 %v636_v47  ;;  %v637_v55 = vmul.f32 0.5, %v624_v48  ;;  %v584_v56 = vmul.f32 %v1201_v41, %v565_v50  ;;  %v566_v57 = vsub.f32 %v524_v52, %v1196_v38  ;;  %v526_v58 = vpop.f32.mrb[19].mxu0 }
 0x125   : > { %v983_v59 = vpack.c.bf16 %v672_v54, %v671_v53  ;;  %v684_v58 = vld [vmem:[%s1287_s6 + $0x10] sm:$0xff] }
 0x126   : > { %v1054_v60 = vpop.eup %1053  ;;  %1059 = vtanh.f32 %v637_v55  ;;  %v605_v61 = vmul.f32 %v1204_v43, %v584_v56  ;;  %v585_v62 = vmul.f32 %v1201_v41, %v566_v57  ;;  %v683_v57 = vld [vmem:[%s1287_s6 + $0x8] sm:$0xff] }
 0x127   : > { %984 = vmatprep.subr.bf16.mxu1 %v983_v59  ;;  %v660_v63 = vmul.f32 0.5, %v1054_v60 }
 0x128   : > { %v1056_v0 = vpop.eup %1055  ;;  %v625_v1 = vadd.f32 %v1211_v49, %v605_v61  ;;  %v606_v2 = vmul.f32 %v1204_v43, %v585_v62  ;;  %986 = vmatpush3.bf16.msra.mxu1 %v983_v59  ;;  %v685_v59 = vld [vmem:[%s1287_s6 + $0x18] sm:$0x1] }
 0x129   : > { %v529_v3 = vpop.f32.mrb[20].mxu0  ;;  %v661_v4 = vmul.f32 0.5, %v1056_v0  ;;  %v673_v10 = vadd.f32 0.5, %v660_v63  ;;  %v810_v0 = vld [vmem:[%s278_s27 + $0xc] sm:$0x1] }
 0x12a   : > { %v638_v5 = vmul.f32 0.5, %v625_v1  ;;  %v626_v6 = vadd.f32 %v1211_v49, %v606_v2  ;;  %v567_v7 = vsub.f32 %v529_v3, %v1196_v38  ;;  %v531_v8 = vpop.f32.mrb[21].mxu0 }
 0x12b   : > { %v532_v9 = vpop.f32.mrb[22].mxu0  ;;  %v674_v11 = vadd.f32 0.5, %v661_v4 }
 0x12c   : > { %1061 = vtanh.f32 %v638_v5  ;;  %v639_v12 = vmul.f32 0.5, %v626_v6  ;;  %v586_v13 = vmul.f32 %v1201_v41, %v567_v7  ;;  %v568_v14 = vsub.f32 %v532_v9, %v1196_v38  ;;  %v534_v15 = vpop.f32.mrb[23].mxu0 }
 0x12d   : > { %v987_v16 = vpack.c.bf16 %v674_v11, %v673_v10 }
 0x12e   : > { %v1058_v17 = vpop.eup %1057  ;;  %1063 = vtanh.f32 %v639_v12  ;;  %v607_v18 = vmul.f32 %v1204_v43, %v586_v13  ;;  %v587_v19 = vmul.f32 %v1201_v41, %v568_v14 }
 0x12f   : > { %988 = vmatprep.subr.bf16.mxu1 %v987_v16  ;;  %v662_v20 = vmul.f32 0.5, %v1058_v17 }
 0x130   : > { %v1060_v21 = vpop.eup %1059  ;;  %v627_v22 = vadd.f32 %v1211_v49, %v607_v18  ;;  %v608_v23 = vmul.f32 %v1204_v43, %v587_v19  ;;  %990 = vmatpush3.bf16.msra.mxu1 %v987_v16 }
 0x131   : > { %v537_v24 = vpop.f32.mrb[24].mxu0  ;;  %v663_v25 = vmul.f32 0.5, %v1060_v21  ;;  %v675_v31 = vadd.f32 0.5, %v662_v20 }
 0x132   : > { %v640_v26 = vmul.f32 0.5, %v627_v22  ;;  %v628_v27 = vadd.f32 %v1211_v49, %v608_v23  ;;  %v569_v28 = vsub.f32 %v537_v24, %v1196_v38  ;;  %v539_v29 = vpop.f32.mrb[25].mxu0 }
 0x133   : > { %v540_v30 = vpop.f32.mrb[26].mxu0  ;;  %v676_v32 = vadd.f32 0.5, %v663_v25 }
 0x134   : > { %1065 = vtanh.f32 %v640_v26  ;;  %v641_v33 = vmul.f32 0.5, %v628_v27  ;;  %v588_v34 = vmul.f32 %v1201_v41, %v569_v28  ;;  %v541_v35 = vpop.f32.mrb[27].mxu0 }
 0x135   : > { %v991_v36 = vpack.c.bf16 %v676_v32, %v675_v31 }
 0x136   : > { %v1062_v37 = vpop.eup %1061  ;;  %1067 = vtanh.f32 %v641_v33  ;;  %v609_v39 = vmul.f32 %v1204_v43, %v588_v34 }
 0x137   : > { %992 = vmatprep.subr.bf16.mxu1 %v991_v36  ;;  %v664_v40 = vmul.f32 0.5, %v1062_v37 }
 0x138   : > { %v1064_v42 = vpop.eup %1063  ;;  %v629_v44 = vadd.f32 %v1211_v49, %v609_v39  ;;  %994 = vmatpush3.bf16.msra.mxu1 %v991_v36 }
 0x139   : > { %v665_v38 = vmul.f32 0.5, %v1064_v42  ;;  %v677_v46 = vadd.f32 0.5, %v664_v40 }
 0x13a   : > { %v642_v45 = vmul.f32 0.5, %v629_v44 }
 0x13b   : > { %v678_v47 = vadd.f32 0.5, %v665_v38 }
 0x13c   : > { %1069 = vtanh.f32 %v642_v45 }
 0x13d   : > { %v995_v48 = vpack.c.bf16 %v678_v47, %v677_v46 }
 0x13e   : > { %v1066_v50 = vpop.eup %1065 }
 0x13f   : > { %996 = vmatprep.subr.bf16.mxu1 %v995_v48  ;;  %v666_v41 = vmul.f32 0.5, %v1066_v50 }
 0x140   : > { %v1068_v51 = vpop.eup %1067  ;;  %998 = vmatpush3.bf16.msra.mxu1 %v995_v48 }
 0x141   : > { %v667_v52 = vmul.f32 0.5, %v1068_v51  ;;  %v679_v53 = vadd.f32 0.5, %v666_v41 }
 0x143   : > { %v680_v43 = vadd.f32 0.5, %v667_v52 }
 0x145   : > { %v999_v54 = vpack.c.bf16 %v680_v43, %v679_v53 }
 0x146   : > { %v1070_v55 = vpop.eup %1069 }
 0x147   : > { %1000 = vmatprep.subr.bf16.mxu1 %v999_v54  ;;  %v668_v49 = vmul.f32 0.5, %v1070_v55 }
 0x148   : > { %1002 = vmatpush3.bf16.msra.mxu1 %v999_v54 }
 0x149   : > { %v681_v56 = vadd.f32 0.5, %v668_v49 }
 0x14b   : > { %971 = vmatprep.subr.msk.mxu1 %vm699_vm2, %v681_v56 }
 0x14c   : > { %972 = vmatpush3.msk.msra.mxu1 %vm699_vm2, %v681_v56 }
 0x14d   : > { %974 = vmatmul.mubr.msk.f32.vlgmr.msra.gmra.mrb[0].mxu1 %vm686_vm1, %v683_v57 }
 0x14e   : > { %976 = vmatprep.mubr.msk.f32.mxu1 %vm686_vm1, %v684_v58 }
 0x151   : > { %977 = vmatmul.mubr.msk.f32.gmra.mrb[2].mxu1 %vm686_vm1, %v685_v59 }
 0x220   : > { %v975_v60 = vpop.f32.mrb[0].mxu1 }
 0x221   : > { %v769_v61 = vpop.f32.mrb[1].mxu1 }
 0x222   : > { %v928_v62 = vpack.c.bf16 %v975_v60, %v769_v61 }
 0x224   : > { %929 = vst [vmem:[%s278_s27] sm:$0xff] %v928_v62   ;;  %v978_v63 = vpop.f32.mrb[2].mxu1 }
 0x225   : > { %v924_v1 = vpack.c.bf16 %v978_v63, %v978_v63  ;;  %v779_v2 = vpop.f32.mrb[3].mxu1 }
 0x226   : > { %v923_v3 = vpack.c.bf16 %v779_v2, %v779_v2 }
 0x227   : > { %v811_v4 = vsel %vm809_vm5, %v924_v1, %v810_v0 }
 0x228   : > { %812 = vst [vmem:[%s278_s27 + $0xc] sm:$0x1] %v811_v4  ;;  %806 = vst [vmem:[%s278_s27 + $0x8] sm:$0xf] %v923_v3 }
 0x229 PF: > { %s17_s24 = sadd.s32 1, %s1077_s24  }
 0x22a   : > { %p14_p4 = scmp.ge.s32.totalorder %s17_s24, 4  }
 0x22c   :  { %16 = sbr.rel (!%p14_p4) target bundleno = 1 (0x1), region = 78 }

// kernel: lenet_forward.9
= control target key start
LH: loop header
LB: loop body
LE: loop exit
PB: predicated region body
PF: predicated region fallthrough
CT: control target
= control target key end

     0   :  { %v446_v29 = vlaneseq  ;;  %v3497_v35 = vmov 1966171168   ;;  %vm3499_vm0 = vmmov 0   ;;  %s4308_s0 = inlined_call_operand.vmem [shape: bf16[2,3200], index: 0, kind: input, shape index: {}]   ;;  %s4309_s1 = inlined_call_operand.vmem [shape: bf16[3200,128], index: 1, kind: input, shape index: {}]   ;;  %s4310_s2 = inlined_call_operand.vmem [shape: f32[1,128], index: 2, kind: input, shape index: {}]   ;;  %s4311_s3 = inlined_call_operand.vmem [shape: f32[1,128], index: 3, kind: input, shape index: {}]   ;;  %s4312_s4 = inlined_call_operand.vmem [shape: bf16[128,128], index: 4, kind: input, shape index: {}]   ;;  %s4313_s5 = inlined_call_operand.vmem [shape: f32[1,128], index: 5, kind: input, shape index: {}]   ;;  %s4314_s6 = inlined_call_operand.vmem [shape: f32[1,128], index: 6, kind: input, shape index: {}]   ;;  %s4315_s7 = inlined_call_operand.vmem [shape: bf16[128,128], index: 7, kind: input, shape index: {}]   ;;  %s4316_s8 = inlined_call_operand.vmem [shape: f32[1,128], index: 8, kind: input, shape index: {}]   ;;  %s4317_s9 = inlined_call_operand.hbm [shape: f32[2,128], index: 9, kind: output, shape index: {}]  }
   0x1   :  { %v3246_v0 = vld [vmem:[%s4309_s1 + $0x40] sm:$0xff]   ;;  %v3250_v4 = vld [vmem:[%s4309_s1 + $0x48] sm:$0xff]   ;;  %v3254_v8 = vld [vmem:[%s4309_s1 + $0x50] sm:$0xff]   ;;  %v444_v36 = vunpack.c.l.s4 %v3497_v35 }
   0x2   :  { %v3247_v1 = vld [vmem:[%s4309_s1 + $0xc0] sm:$0xff]   ;;  %2891 = vmatprep.subr.bf16.mxu0 %v3246_v0  ;;  %v3251_v5 = vld [vmem:[%s4309_s1 + $0xc8] sm:$0xff]   ;;  %v3255_v9 = vld [vmem:[%s4309_s1 + $0xd0] sm:$0xff]   ;;  %v447_v33 = vshrl.u32 %v446_v29, 7 }
   0x3   :  { %v3248_v2 = vld [vmem:[%s4309_s1] sm:$0xff]   ;;  %2913 = vmatprep.subr.bf16.mxu1 %v3247_v1  ;;  %v3252_v6 = vld [vmem:[%s4309_s1 + $0x8] sm:$0xff]   ;;  %v3256_v10 = vld [vmem:[%s4309_s1 + $0x10] sm:$0xff]   ;;  %v445_v39 = vunpack.c.0.s8 %v444_v36 }
   0x4   :  { %v3249_v3 = vld [vmem:[%s4309_s1 + $0x80] sm:$0xff]   ;;  %2892 = vmatpush3.bf16.msra.mxu0 %v3248_v2  ;;  %v3253_v7 = vld [vmem:[%s4309_s1 + $0x88] sm:$0xff]   ;;  %v3257_v11 = vld [vmem:[%s4309_s1 + $0x90] sm:$0xff]  }
   0x5   :  { %2914 = vmatpush3.bf16.msra.mxu1 %v3249_v3  ;;  %2893 = vmatprep.subr.bf16.mxu0 %v3250_v4  ;;  %v3258_v12 = vld [vmem:[%s4309_s1 + $0x58] sm:$0xff]   ;;  %v3262_v16 = vld [vmem:[%s4309_s1 + $0x60] sm:$0xff]   ;;  %v3266_v20 = vld [vmem:[%s4309_s1 + $0x68] sm:$0xff]   ;;  %v3656_v41 = vsub.s32 %v445_v39, %v447_v33 }
   0x6   :  { %2915 = vmatprep.subr.bf16.mxu1 %v3251_v5  ;;  %v3259_v13 = vld [vmem:[%s4309_s1 + $0xd8] sm:$0xff]   ;;  %v3263_v17 = vld [vmem:[%s4309_s1 + $0xe0] sm:$0xff]   ;;  %v3267_v21 = vld [vmem:[%s4309_s1 + $0xe8] sm:$0xff]  }
   0x7   :  { %v3260_v14 = vld [vmem:[%s4309_s1 + $0x18] sm:$0xff]   ;;  %v3264_v18 = vld [vmem:[%s4309_s1 + $0x20] sm:$0xff]   ;;  %v3268_v22 = vld [vmem:[%s4309_s1 + $0x28] sm:$0xff]  }
   0x8   :  { %2894 = vmatpush3.bf16.msra.mxu0 %v3252_v6  ;;  %v3261_v15 = vld [vmem:[%s4309_s1 + $0x98] sm:$0xff]   ;;  %v3265_v19 = vld [vmem:[%s4309_s1 + $0xa0] sm:$0xff]   ;;  %v3269_v23 = vld [vmem:[%s4309_s1 + $0xa8] sm:$0xff]  }
   0x9   :  { %2916 = vmatpush3.bf16.msra.mxu1 %v3253_v7  ;;  %2895 = vmatprep.subr.bf16.mxu0 %v3254_v8  ;;  %v3270_v24 = vld [vmem:[%s4309_s1 + $0x70] sm:$0xff]   ;;  %v3274_v28 = vld [vmem:[%s4309_s1 + $0x78] sm:$0xff]   ;;  %v3279_v34 = vld [vmem:[%s4309_s1 + $0x140] sm:$0xff]  }
   0xa   :  { %2917 = vmatprep.subr.bf16.mxu1 %v3255_v9  ;;  %v3271_v25 = vld [vmem:[%s4309_s1 + $0xf0] sm:$0xff]   ;;  %v3275_v30 = vld [vmem:[%s4309_s1 + $0xf8] sm:$0xff]   ;;  %v34_v37 = vld [vmem:[%s4308_s0] sm:$0xff] }
   0xb   :  { %v3272_v26 = vld [vmem:[%s4309_s1 + $0x30] sm:$0xff]   ;;  %v3276_v31 = vld [vmem:[%s4309_s1 + $0x38] sm:$0xff]   ;;  %v442_v38 = vcombine.high %v34_v37, %v34_v37  ;;  %v3281_v40 = vld [vmem:[%s4309_s1 + $0x1c0] sm:$0xff]   ;;  %v449_v42 = vrot.slane %v34_v37, %v3656_v41 }
   0xc   :  { %2896 = vmatpush3.bf16.msra.mxu0 %v3256_v10  ;;  %v3273_v27 = vld [vmem:[%s4309_s1 + $0xb0] sm:$0xff]   ;;  %v3277_v32 = vld [vmem:[%s4309_s1 + $0xb8] sm:$0xff]   ;;  %v3280_v48 = vld [vmem:[%s4309_s1 + $0x100] sm:$0xff]  }
   0xd   :  { %2918 = vmatpush3.bf16.msra.mxu1 %v3257_v11  ;;  %2897 = vmatprep.subr.bf16.mxu0 %v3258_v12  ;;  %v3660_v43 = vrot.slane %v442_v38, %v3656_v41  ;;  %v457_v44 = vcombine.high %v449_v42, %v449_v42  ;;  %v465_v45 = vrot.slane %v449_v42, %v3656_v41  ;;  %v3283_v51 = vld [vmem:[%s4309_s1 + $0x148] sm:$0xff]   ;;  %v3282_v53 = vld [vmem:[%s4309_s1 + $0x180] sm:$0xff]   ;;  %v3287_v57 = vld [vmem:[%s4309_s1 + $0x150] sm:$0xff]  }
   0xe   :  { %2919 = vmatprep.subr.bf16.mxu1 %v3259_v13  ;;  %v3285_v54 = vld [vmem:[%s4309_s1 + $0x1c8] sm:$0xff]   ;;  %v3289_v59 = vld [vmem:[%s4309_s1 + $0x1d0] sm:$0xff]   ;;  %v3291_v61 = vld [vmem:[%s4309_s1 + $0x158] sm:$0xff]  }
   0xf   :  { %v458_v46 = vcombine.high %v3660_v43, %v3660_v43  ;;  %v479_v47 = vrot.slane %v457_v44, %v3656_v41  ;;  %v487_v50 = vcombine.high %v465_v45, %v465_v45  ;;  %v3284_v56 = vld [vmem:[%s4309_s1 + $0x108] sm:$0xff]   ;;  %v3288_v60 = vld [vmem:[%s4309_s1 + $0x110] sm:$0xff]   ;;  %v3293_v63 = vld [vmem:[%s4309_s1 + $0x1d8] sm:$0xff]  }
  0x10   :  { %2898 = vmatpush3.bf16.msra.mxu0 %v3260_v14  ;;  %v3286_v58 = vld [vmem:[%s4309_s1 + $0x188] sm:$0xff]   ;;  %v3290_v62 = vld [vmem:[%s4309_s1 + $0x190] sm:$0xff]   ;;  %v3292_v0 = vld [vmem:[%s4309_s1 + $0x118] sm:$0xff]  }
  0x11   :  { %2920 = vmatpush3.bf16.msra.mxu1 %v3261_v15  ;;  %2899 = vmatprep.subr.bf16.mxu0 %v3262_v16  ;;  %v486_v49 = vrot.slane %v458_v46, %v3656_v41  ;;  %v489_v52 = vcombine.high %v479_v47, %v479_v47  ;;  %v3295_v1 = vld [vmem:[%s4309_s1 + $0x160] sm:$0xff]   ;;  %v3294_v2 = vld [vmem:[%s4309_s1 + $0x198] sm:$0xff]   ;;  %v3299_v5 = vld [vmem:[%s4309_s1 + $0x168] sm:$0xff]  }
  0x12   :  { %2921 = vmatprep.subr.bf16.mxu1 %v3263_v17  ;;  %1860 = vmatprep.mubr.bf16.mxu0 %v479_v47  ;;  %v3297_v3 = vld [vmem:[%s4309_s1 + $0x1e0] sm:$0xff]   ;;  %v3301_v7 = vld [vmem:[%s4309_s1 + $0x1e8] sm:$0xff]   ;;  %v3303_v9 = vld [vmem:[%s4309_s1 + $0x170] sm:$0xff]   ;;  %v472_v17 = vrot.slane %v3660_v43, %v3656_v41 }
  0x13   :  { %v490_v55 = vcombine.high %v486_v49, %v486_v49  ;;  %1900 = vmatprep.mubr.bf16.mxu1 %v489_v52  ;;  %v3296_v4 = vld [vmem:[%s4309_s1 + $0x120] sm:$0xff]   ;;  %v3300_v8 = vld [vmem:[%s4309_s1 + $0x128] sm:$0xff]   ;;  %v3305_v11 = vld [vmem:[%s4309_s1 + $0x1f0] sm:$0xff]  }
  0x14   :  { %2900 = vmatpush3.bf16.msra.mxu0 %v3264_v18  ;;  %v3298_v6 = vld [vmem:[%s4309_s1 + $0x1a0] sm:$0xff]   ;;  %v3302_v10 = vld [vmem:[%s4309_s1 + $0x1a8] sm:$0xff]   ;;  %v3304_v12 = vld [vmem:[%s4309_s1 + $0x130] sm:$0xff]  }
  0x15   :  { %2922 = vmatpush3.bf16.msra.mxu1 %v3265_v19  ;;  %2901 = vmatprep.subr.bf16.mxu0 %v3266_v20  ;;  %v3307_v13 = vld [vmem:[%s4309_s1 + $0x178] sm:$0xff]   ;;  %v3306_v14 = vld [vmem:[%s4309_s1 + $0x1b0] sm:$0xff]   ;;  %v3311_v18 = vld [vmem:[%s4309_s1 + $0x240] sm:$0xff]  }
  0x16   :  { %2923 = vmatprep.subr.bf16.mxu1 %v3267_v21  ;;  %v3309_v15 = vld [vmem:[%s4309_s1 + $0x1f8] sm:$0xff]   ;;  %v3313_v20 = vld [vmem:[%s4309_s1 + $0x2c0] sm:$0xff]   ;;  %v3321_v29 = vld [vmem:[%s4309_s1 + $0x2d0] sm:$0xff]  }
  0x17   :  { %v3308_v16 = vld [vmem:[%s4309_s1 + $0x138] sm:$0xff]   ;;  %v3312_v21 = vld [vmem:[%s4309_s1 + $0x200] sm:$0xff]   ;;  %v3331_v39 = vld [vmem:[%s4309_s1 + $0x268] sm:$0xff]  }
  0x18   :  { %2902 = vmatpush3.bf16.msra.mxu0 %v3268_v22  ;;  %v3310_v19 = vld [vmem:[%s4309_s1 + $0x1b8] sm:$0xff]   ;;  %v488_v22 = vcombine.high %v472_v17, %v472_v17  ;;  %v3327_v35 = vld [vmem:[%s4309_s1 + $0x260] sm:$0xff]   ;;  %v3333_v42 = vld [vmem:[%s4309_s1 + $0x2e8] sm:$0xff]  }
  0x19   :  { %2924 = vmatpush3.bf16.msra.mxu1 %v3269_v23  ;;  %2903 = vmatprep.subr.bf16.mxu0 %v3270_v24  ;;  %v3315_v23 = vld [vmem:[%s4309_s1 + $0x248] sm:$0xff]   ;;  %v3314_v24 = vld [vmem:[%s4309_s1 + $0x280] sm:$0xff]   ;;  %v3325_v33 = vld [vmem:[%s4309_s1 + $0x2d8] sm:$0xff]  }
  0x1a   :  { %2925 = vmatprep.subr.bf16.mxu1 %v3271_v25  ;;  %v3317_v25 = vld [vmem:[%s4309_s1 + $0x2c8] sm:$0xff]   ;;  %v3326_v36 = vld [vmem:[%s4309_s1 + $0x298] sm:$0xff]   ;;  %v3329_v37 = vld [vmem:[%s4309_s1 + $0x2e0] sm:$0xff]  }
  0x1b   :  { %v3328_v38 = vld [vmem:[%s4309_s1 + $0x220] sm:$0xff]   ;;  %v3332_v43 = vld [vmem:[%s4309_s1 + $0x228] sm:$0xff]   ;;  %v3336_v52 = vld [vmem:[%s4309_s1 + $0x230] sm:$0xff]  }
  0x1c   :  { %2904 = vmatpush3.bf16.msra.mxu0 %v3272_v26  ;;  %v3316_v26 = vld [vmem:[%s4309_s1 + $0x208] sm:$0xff]  }
  0x1d   :  { %2926 = vmatpush3.bf16.msra.mxu1 %v3273_v27  ;;  %2905 = vmatprep.subr.bf16.mxu0 %v3274_v28  ;;  %v3319_v27 = vld [vmem:[%s4309_s1 + $0x250] sm:$0xff]   ;;  %v3318_v28 = vld [vmem:[%s4309_s1 + $0x288] sm:$0xff]  }
  0x1e   :  { %2927 = vmatprep.subr.bf16.mxu1 %v3275_v30  ;;  %v3320_v30 = vld [vmem:[%s4309_s1 + $0x210] sm:$0xff]   ;;  %v35_v44 = vld [vmem:[%s4308_s0 + $0x8] sm:$0xff] }
  0x1f   :  { %v498_v46 = vrot.slane %v35_v44, %v3656_v41  ;;  %v491_v47 = vcombine.high %v35_v44, %v35_v44  ;;  %v3383_v44 = vld [vmem:[%s4309_s1 + $0x488] sm:$0xff]  }
  0x20   :  { %2906 = vmatpush3.bf16.msra.mxu0 %v3276_v31  ;;  %v3323_v31 = vld [vmem:[%s4309_s1 + $0x258] sm:$0xff]  }
  0x21   :  { %2928 = vmatpush3.bf16.msra.mxu1 %v3277_v32  ;;  %2935 = vmatprep.subr.bf16.mxu0 %v3279_v34  ;;  %v3322_v32 = vld [vmem:[%s4309_s1 + $0x290] sm:$0xff]   ;;  %v3324_v34 = vld [vmem:[%s4309_s1 + $0x218] sm:$0xff]  }
  0x22   :  { %2957 = vmatprep.subr.bf16.mxu1 %v3281_v40  ;;  %v3330_v40 = vld [vmem:[%s4309_s1 + $0x2a0] sm:$0xff]  }
  0x23   :  { %1861 = vmatmul.mubr.bf16.vlgmr.msra.gmra.mrb[0].mxu0 %v465_v45  ;;  %v3335_v45 = vld [vmem:[%s4309_s1 + $0x270] sm:$0xff]  }
  0x24   :  { %2936 = vmatpush3.bf16.msra.mxu0 %v3280_v48  ;;  %1901 = vmatmul.mubr.bf16.vlgmr.msra.gmra.mrb[0].mxu1 %v487_v50  ;;  %v3334_v48 = vld [vmem:[%s4309_s1 + $0x2a8] sm:$0xff]   ;;  %v506_v50 = vcombine.high %v498_v46, %v498_v46 }
  0x25   :  { %2937 = vmatprep.subr.bf16.mxu0 %v3283_v51  ;;  %2958 = vmatpush3.bf16.msra.mxu1 %v3282_v53  ;;  %v3842_v51 = vrot.slane %v491_v47, %v3656_v41  ;;  %v3339_v53 = vld [vmem:[%s4309_s1 + $0x278] sm:$0xff]  }
  0x26   :  { %1940 = vmatprep.mubr.bf16.mxu0 %v486_v49  ;;  %2959 = vmatprep.subr.bf16.mxu1 %v3285_v54  ;;  %v3337_v49 = vld [vmem:[%s4309_s1 + $0x2f0] sm:$0xff]   ;;  %v528_v54 = vrot.slane %v506_v50, %v3656_v41  ;;  %v3388_v47 = vld [vmem:[%s4309_s1 + $0x458] sm:$0xff]  }
  0x27   :  { %1980 = vmatprep.mubr.bf16.mxu1 %v490_v55  ;;  %v3338_v55 = vld [vmem:[%s4309_s1 + $0x2b0] sm:$0xff]   ;;  %v3389_v50 = vld [vmem:[%s4309_s1 + $0x418] sm:$0xff]  }
  0x28   :  { %2938 = vmatpush3.bf16.msra.mxu0 %v3284_v56  ;;  %v507_v56 = vcombine.high %v3842_v51, %v3842_v51 }
  0x29   :  { %2939 = vmatprep.subr.bf16.mxu0 %v3287_v57  ;;  %2960 = vmatpush3.bf16.msra.mxu1 %v3286_v58  ;;  %v3341_v57 = vld [vmem:[%s4309_s1 + $0x2f8] sm:$0xff]   ;;  %v538_v58 = vcombine.high %v528_v54, %v528_v54 }
  0x2a   :  { %2961 = vmatprep.subr.bf16.mxu1 %v3289_v59  ;;  %v3340_v59 = vld [vmem:[%s4309_s1 + $0x238] sm:$0xff]  }
  0x2c   :  { %2940 = vmatpush3.bf16.msra.mxu0 %v3288_v60  ;;  %v514_v60 = vrot.slane %v498_v46, %v3656_v41  ;;  %v3385_v46 = vld [vmem:[%s4309_s1 + $0x410] sm:$0xff]  }
  0x2d   :  { %2941 = vmatprep.subr.bf16.mxu0 %v3291_v61  ;;  %2962 = vmatpush3.bf16.msra.mxu1 %v3290_v62  ;;  %v3343_v61 = vld [vmem:[%s4309_s1 + $0x340] sm:$0xff]   ;;  %v3342_v62 = vld [vmem:[%s4309_s1 + $0x2b8] sm:$0xff]  }
  0x2e   :  { %2963 = vmatprep.subr.bf16.mxu1 %v3293_v63  ;;  %v535_v63 = vrot.slane %v507_v56, %v3656_v41  ;;  %v3395_v56 = vld [vmem:[%s4309_s1 + $0x4a0] sm:$0xff]  }
  0x30   :  { %2942 = vmatpush3.bf16.msra.mxu0 %v3292_v0  ;;  %v3345_v0 = vld [vmem:[%s4309_s1 + $0x3c0] sm:$0xff]  }
  0x31   :  { %2943 = vmatprep.subr.bf16.mxu0 %v3295_v1  ;;  %2964 = vmatpush3.bf16.msra.mxu1 %v3294_v2  ;;  %v3344_v1 = vld [vmem:[%s4309_s1 + $0x300] sm:$0xff]   ;;  %v536_v2 = vcombine.high %v514_v60, %v514_v60 }
  0x32   :  { %2965 = vmatprep.subr.bf16.mxu1 %v3297_v3  ;;  %v3347_v3 = vld [vmem:[%s4309_s1 + $0x348] sm:$0xff]  }
  0x34   :  { %2944 = vmatpush3.bf16.msra.mxu0 %v3296_v4  ;;  %v3346_v4 = vld [vmem:[%s4309_s1 + $0x380] sm:$0xff]  }
  0x35   :  { %2945 = vmatprep.subr.bf16.mxu0 %v3299_v5  ;;  %2966 = vmatpush3.bf16.msra.mxu1 %v3298_v6  ;;  %v539_v5 = vcombine.high %v535_v63, %v535_v63  ;;  %v3349_v6 = vld [vmem:[%s4309_s1 + $0x3c8] sm:$0xff]  }
  0x36   :  { %2967 = vmatprep.subr.bf16.mxu1 %v3301_v7  ;;  %v3348_v7 = vld [vmem:[%s4309_s1 + $0x308] sm:$0xff]  }
  0x38   :  { %2946 = vmatpush3.bf16.msra.mxu0 %v3300_v8  ;;  %v3351_v8 = vld [vmem:[%s4309_s1 + $0x350] sm:$0xff]  }
  0x39   :  { %2947 = vmatprep.subr.bf16.mxu0 %v3303_v9  ;;  %2968 = vmatpush3.bf16.msra.mxu1 %v3302_v10  ;;  %v3350_v9 = vld [vmem:[%s4309_s1 + $0x388] sm:$0xff]   ;;  %v3353_v10 = vld [vmem:[%s4309_s1 + $0x3d0] sm:$0xff]  }
  0x3a   :  { %2969 = vmatprep.subr.bf16.mxu1 %v3305_v11  ;;  %v3352_v11 = vld [vmem:[%s4309_s1 + $0x310] sm:$0xff]  }
  0x3c   :  { %2948 = vmatpush3.bf16.msra.mxu0 %v3304_v12  ;;  %v3355_v12 = vld [vmem:[%s4309_s1 + $0x358] sm:$0xff]  }
  0x3d   :  { %2949 = vmatprep.subr.bf16.mxu0 %v3307_v13  ;;  %2970 = vmatpush3.bf16.msra.mxu1 %v3306_v14  ;;  %v3354_v13 = vld [vmem:[%s4309_s1 + $0x390] sm:$0xff]   ;;  %v3357_v14 = vld [vmem:[%s4309_s1 + $0x3d8] sm:$0xff]  }
  0x3e   :  { %2971 = vmatprep.subr.bf16.mxu1 %v3309_v15  ;;  %v3356_v15 = vld [vmem:[%s4309_s1 + $0x318] sm:$0xff]  }
  0x40   :  { %2950 = vmatpush3.bf16.msra.mxu0 %v3308_v16  ;;  %v3359_v16 = vld [vmem:[%s4309_s1 + $0x360] sm:$0xff]  }
  0x41   :  { %2979 = vmatprep.subr.bf16.mxu0 %v3311_v18  ;;  %2972 = vmatpush3.bf16.msra.mxu1 %v3310_v19  ;;  %v3361_v18 = vld [vmem:[%s4309_s1 + $0x3e0] sm:$0xff]  }
  0x42   :  { %3001 = vmatprep.subr.bf16.mxu1 %v3313_v20  ;;  %v3360_v19 = vld [vmem:[%s4309_s1 + $0x320] sm:$0xff]   ;;  %v3363_v20 = vld [vmem:[%s4309_s1 + $0x368] sm:$0xff]  }
  0x43   :  { %1941 = vmatmul.mubr.bf16.vlgmr.msra.gmra.mrb[4].mxu0 %v472_v17  ;;  %v3358_v17 = vld [vmem:[%s4309_s1 + $0x398] sm:$0xff]  }
  0x44   :  { %2980 = vmatpush3.bf16.msra.mxu0 %v3312_v21  ;;  %1981 = vmatmul.mubr.bf16.vlgmr.msra.gmra.mrb[4].mxu1 %v488_v22  ;;  %v3362_v21 = vld [vmem:[%s4309_s1 + $0x3a0] sm:$0xff]   ;;  %v3365_v22 = vld [vmem:[%s4309_s1 + $0x3e8] sm:$0xff]  }
  0x45   :  { %2981 = vmatprep.subr.bf16.mxu0 %v3315_v23  ;;  %3002 = vmatpush3.bf16.msra.mxu1 %v3314_v24  ;;  %v3364_v23 = vld [vmem:[%s4309_s1 + $0x328] sm:$0xff]   ;;  %v3367_v24 = vld [vmem:[%s4309_s1 + $0x370] sm:$0xff]  }
  0x46   :  { %3003 = vmatprep.subr.bf16.mxu1 %v3317_v25  ;;  %2020 = vmatprep.mubr.bf16.mxu0 %v528_v54  ;;  %v3366_v25 = vld [vmem:[%s4309_s1 + $0x3a8] sm:$0xff]   ;;  %v3393_v54 = vld [vmem:[%s4309_s1 + $0x420] sm:$0xff]  }
  0x47   :  { %2060 = vmatprep.mubr.bf16.mxu1 %v538_v58  ;;  %v3397_v58 = vld [vmem:[%s4309_s1 + $0x428] sm:$0xff]  }
  0x48   :  { %2982 = vmatpush3.bf16.msra.mxu0 %v3316_v26  ;;  %v3369_v26 = vld [vmem:[%s4309_s1 + $0x3f0] sm:$0xff]  }
  0x49   :  { %2983 = vmatprep.subr.bf16.mxu0 %v3319_v27  ;;  %3004 = vmatpush3.bf16.msra.mxu1 %v3318_v28  ;;  %v3368_v27 = vld [vmem:[%s4309_s1 + $0x330] sm:$0xff]   ;;  %v3371_v28 = vld [vmem:[%s4309_s1 + $0x378] sm:$0xff]  }
  0x4a   :  { %3005 = vmatprep.subr.bf16.mxu1 %v3321_v29  ;;  %v3370_v29 = vld [vmem:[%s4309_s1 + $0x3b0] sm:$0xff]  }
  0x4c   :  { %2984 = vmatpush3.bf16.msra.mxu0 %v3320_v30  ;;  %v3373_v30 = vld [vmem:[%s4309_s1 + $0x3f8] sm:$0xff]  }
  0x4d   :  { %2985 = vmatprep.subr.bf16.mxu0 %v3323_v31  ;;  %3006 = vmatpush3.bf16.msra.mxu1 %v3322_v32  ;;  %v3372_v31 = vld [vmem:[%s4309_s1 + $0x338] sm:$0xff]   ;;  %v521_v32 = vrot.slane %v3842_v51, %v3656_v41  ;;  %v3392_v51 = vld [vmem:[%s4309_s1 + $0x460] sm:$0xff]  }
  0x4e   :  { %3007 = vmatprep.subr.bf16.mxu1 %v3325_v33  ;;  %v3376_v33 = vld [vmem:[%s4309_s1 + $0x440] sm:$0xff]  }
  0x50   :  { %2986 = vmatpush3.bf16.msra.mxu0 %v3324_v34  ;;  %v3375_v34 = vld [vmem:[%s4309_s1 + $0x3b8] sm:$0xff]  }
  0x51   :  { %2987 = vmatprep.subr.bf16.mxu0 %v3327_v35  ;;  %3008 = vmatpush3.bf16.msra.mxu1 %v3326_v36  ;;  %v3378_v35 = vld [vmem:[%s4309_s1 + $0x4c0] sm:$0xff]  }
  0x52   :  { %3009 = vmatprep.subr.bf16.mxu1 %v3329_v37  ;;  %v3377_v36 = vld [vmem:[%s4309_s1 + $0x400] sm:$0xff]   ;;  %v537_v37 = vcombine.high %v521_v32, %v521_v32 }
  0x54   :  { %2988 = vmatpush3.bf16.msra.mxu0 %v3328_v38  ;;  %v3380_v38 = vld [vmem:[%s4309_s1 + $0x448] sm:$0xff]  }
  0x55   :  { %2989 = vmatprep.subr.bf16.mxu0 %v3331_v39  ;;  %3010 = vmatpush3.bf16.msra.mxu1 %v3330_v40  ;;  %v3379_v39 = vld [vmem:[%s4309_s1 + $0x480] sm:$0xff]   ;;  %v3382_v40 = vld [vmem:[%s4309_s1 + $0x4c8] sm:$0xff]  }
  0x56   :  { %3011 = vmatprep.subr.bf16.mxu1 %v3333_v42  ;;  %v3381_v42 = vld [vmem:[%s4309_s1 + $0x408] sm:$0xff]  }
  0x58   :  { %2990 = vmatpush3.bf16.msra.mxu0 %v3332_v43  ;;  %v3384_v43 = vld [vmem:[%s4309_s1 + $0x450] sm:$0xff]  }
  0x59   :  { %2991 = vmatprep.subr.bf16.mxu0 %v3335_v45  ;;  %3012 = vmatpush3.bf16.msra.mxu1 %v3334_v48  ;;  %v3386_v45 = vld [vmem:[%s4309_s1 + $0x4d0] sm:$0xff]  }
  0x5a   :  { %3013 = vmatprep.subr.bf16.mxu1 %v3337_v49  ;;  %v3387_v48 = vld [vmem:[%s4309_s1 + $0x490] sm:$0xff]   ;;  %v3390_v49 = vld [vmem:[%s4309_s1 + $0x4d8] sm:$0xff]  }
  0x5c   :  { %2992 = vmatpush3.bf16.msra.mxu0 %v3336_v52  ;;  %v3391_v52 = vld [vmem:[%s4309_s1 + $0x498] sm:$0xff]  }
  0x5d   :  { %2993 = vmatprep.subr.bf16.mxu0 %v3339_v53  ;;  %3014 = vmatpush3.bf16.msra.mxu1 %v3338_v55  ;;  %v3394_v53 = vld [vmem:[%s4309_s1 + $0x4e0] sm:$0xff]   ;;  %v3396_v55 = vld [vmem:[%s4309_s1 + $0x468] sm:$0xff]  }
  0x5e   :  { %3015 = vmatprep.subr.bf16.mxu1 %v3341_v57  ;;  %v3398_v57 = vld [vmem:[%s4309_s1 + $0x4e8] sm:$0xff]  }
  0x60   :  { %2994 = vmatpush3.bf16.msra.mxu0 %v3340_v59  ;;  %v36_v59 = vld [vmem:[%s4308_s0 + $0x10] sm:$0xff] }
  0x61   :  { %3023 = vmatprep.subr.bf16.mxu0 %v3343_v61  ;;  %3016 = vmatpush3.bf16.msra.mxu1 %v3342_v62  ;;  %v547_v61 = vrot.slane %v36_v59, %v3656_v41  ;;  %v540_v62 = vcombine.high %v36_v59, %v36_v59 }
  0x62   :  { %3045 = vmatprep.subr.bf16.mxu1 %v3345_v0  ;;  %v3402_v0 = vld [vmem:[%s4309_s1 + $0x4f0] sm:$0xff]  }
  0x63   :  { %2021 = vmatmul.mubr.bf16.vlgmr.msra.gmra.mrb[8].mxu0 %v514_v60  ;;  %v3400_v60 = vld [vmem:[%s4309_s1 + $0x470] sm:$0xff]  }
  0x64   :  { %3024 = vmatpush3.bf16.msra.mxu0 %v3344_v1  ;;  %2100 = vmatprep.mubr.bf16.mxu0 %v535_v63  ;;  %v3399_v63 = vld [vmem:[%s4309_s1 + $0x4a8] sm:$0xff]   ;;  %v555_v1 = vcombine.high %v547_v61, %v547_v61 }
  0x65   :  { %2061 = vmatmul.mubr.bf16.vlgmr.msra.gmra.mrb[8].mxu1 %v536_v2  ;;  %3025 = vmatprep.subr.bf16.mxu0 %v3347_v3  ;;  %v4048_v2 = vrot.slane %v540_v62, %v3656_v41  ;;  %v3401_v3 = vld [vmem:[%s4309_s1 + $0x430] sm:$0xff]  }
  0x66   :  { %3046 = vmatpush3.bf16.msra.mxu1 %v3346_v4  ;;  %2140 = vmatprep.mubr.bf16.mxu1 %v539_v5  ;;  %v3404_v4 = vld [vmem:[%s4309_s1 + $0x478] sm:$0xff]   ;;  %v577_v5 = vrot.slane %v555_v1, %v3656_v41 }
  0x67   :  { %3047 = vmatprep.subr.bf16.mxu1 %v3349_v6  ;;  %v3403_v6 = vld [vmem:[%s4309_s1 + $0x4b0] sm:$0xff]  }
  0x68   :  { %3026 = vmatpush3.bf16.msra.mxu0 %v3348_v7  ;;  %v556_v7 = vcombine.high %v4048_v2, %v4048_v2 }
  0x69   :  { %3027 = vmatprep.subr.bf16.mxu0 %v3351_v8  ;;  %v3406_v8 = vld [vmem:[%s4309_s1 + $0x4f8] sm:$0xff]  }
  0x6a   :  { %3048 = vmatpush3.bf16.msra.mxu1 %v3350_v9  ;;  %v587_v9 = vcombine.high %v577_v5, %v577_v5 }
  0x6b   :  { %3049 = vmatprep.subr.bf16.mxu1 %v3353_v10  ;;  %v3405_v10 = vld [vmem:[%s4309_s1 + $0x438] sm:$0xff]  }
  0x6c   :  { %3028 = vmatpush3.bf16.msra.mxu0 %v3352_v11  ;;  %v563_v11 = vrot.slane %v547_v61, %v3656_v41 }
  0x6d   :  { %3029 = vmatprep.subr.bf16.mxu0 %v3355_v12  ;;  %v3408_v12 = vld [vmem:[%s4309_s1 + $0x540] sm:$0xff]  }
  0x6e   :  { %3050 = vmatpush3.bf16.msra.mxu1 %v3354_v13  ;;  %v3407_v13 = vld [vmem:[%s4309_s1 + $0x4b8] sm:$0xff]  }
  0x6f   :  { %3051 = vmatprep.subr.bf16.mxu1 %v3357_v14  ;;  %v584_v14 = vrot.slane %v556_v7, %v3656_v41 }
  0x70   :  { %3030 = vmatpush3.bf16.msra.mxu0 %v3356_v15  ;;  %v3410_v15 = vld [vmem:[%s4309_s1 + $0x5c0] sm:$0xff]  }
  0x71   :  { %3031 = vmatprep.subr.bf16.mxu0 %v3359_v16  ;;  %v3409_v16 = vld [vmem:[%s4309_s1 + $0x500] sm:$0xff]  }
  0x72   :  { %3052 = vmatpush3.bf16.msra.mxu1 %v3358_v17  ;;  %v585_v17 = vcombine.high %v563_v11, %v563_v11 }
  0x73   :  { %3053 = vmatprep.subr.bf16.mxu1 %v3361_v18  ;;  %v3412_v18 = vld [vmem:[%s4309_s1 + $0x548] sm:$0xff]  }
  0x74   :  { %3032 = vmatpush3.bf16.msra.mxu0 %v3360_v19  ;;  %v3411_v19 = vld [vmem:[%s4309_s1 + $0x580] sm:$0xff]  }
  0x75   :  { %3033 = vmatprep.subr.bf16.mxu0 %v3363_v20  ;;  %v588_v20 = vcombine.high %v584_v14, %v584_v14 }
  0x76   :  { %3054 = vmatpush3.bf16.msra.mxu1 %v3362_v21  ;;  %v3414_v21 = vld [vmem:[%s4309_s1 + $0x5c8] sm:$0xff]  }
  0x77   :  { %3055 = vmatprep.subr.bf16.mxu1 %v3365_v22  ;;  %v3413_v22 = vld [vmem:[%s4309_s1 + $0x508] sm:$0xff]  }
  0x78   :  { %3034 = vmatpush3.bf16.msra.mxu0 %v3364_v23  ;;  %v3416_v23 = vld [vmem:[%s4309_s1 + $0x550] sm:$0xff]  }
  0x79   :  { %3035 = vmatprep.subr.bf16.mxu0 %v3367_v24  ;;  %v3415_v24 = vld [vmem:[%s4309_s1 + $0x588] sm:$0xff]  }
  0x7a   :  { %3056 = vmatpush3.bf16.msra.mxu1 %v3366_v25  ;;  %v3418_v25 = vld [vmem:[%s4309_s1 + $0x5d0] sm:$0xff]  }
  0x7b   :  { %3057 = vmatprep.subr.bf16.mxu1 %v3369_v26  ;;  %v3417_v26 = vld [vmem:[%s4309_s1 + $0x510] sm:$0xff]  }
  0x7c   :  { %3036 = vmatpush3.bf16.msra.mxu0 %v3368_v27  ;;  %v3420_v27 = vld [vmem:[%s4309_s1 + $0x558] sm:$0xff]  }
  0x7d   :  { %3037 = vmatprep.subr.bf16.mxu0 %v3371_v28  ;;  %v3419_v28 = vld [vmem:[%s4309_s1 + $0x590] sm:$0xff]  }
  0x7e   :  { %3058 = vmatpush3.bf16.msra.mxu1 %v3370_v29  ;;  %v3422_v29 = vld [vmem:[%s4309_s1 + $0x5d8] sm:$0xff]  }
  0x7f   :  { %3059 = vmatprep.subr.bf16.mxu1 %v3373_v30  ;;  %v3421_v30 = vld [vmem:[%s4309_s1 + $0x518] sm:$0xff]  }
  0x80   :  { %3038 = vmatpush3.bf16.msra.mxu0 %v3372_v31  ;;  %v3424_v31 = vld [vmem:[%s4309_s1 + $0x560] sm:$0xff]  }
  0x81   :  { %3067 = vmatprep.subr.bf16.mxu0 %v3376_v33  ;;  %v3426_v33 = vld [vmem:[%s4309_s1 + $0x5e0] sm:$0xff]  }
  0x82   :  { %3060 = vmatpush3.bf16.msra.mxu1 %v3375_v34  ;;  %v3425_v34 = vld [vmem:[%s4309_s1 + $0x520] sm:$0xff]  }
  0x83   :  { %2101 = vmatmul.mubr.bf16.vlgmr.msra.gmra.mrb[12].mxu0 %v521_v32  ;;  %3089 = vmatprep.subr.bf16.mxu1 %v3378_v35  ;;  %v3423_v32 = vld [vmem:[%s4309_s1 + $0x598] sm:$0xff]   ;;  %v3428_v35 = vld [vmem:[%s4309_s1 + $0x568] sm:$0xff]  }
  0x84   :  { %3068 = vmatpush3.bf16.msra.mxu0 %v3377_v36  ;;  %2180 = vmatprep.mubr.bf16.mxu0 %v577_v5  ;;  %v3427_v36 = vld [vmem:[%s4309_s1 + $0x5a0] sm:$0xff]  }
  0x85   :  { %2141 = vmatmul.mubr.bf16.vlgmr.msra.gmra.mrb[12].mxu1 %v537_v37  ;;  %3069 = vmatprep.subr.bf16.mxu0 %v3380_v38  ;;  %v3430_v37 = vld [vmem:[%s4309_s1 + $0x5e8] sm:$0xff]  }
  0x86   :  { %3090 = vmatpush3.bf16.msra.mxu1 %v3379_v39  ;;  %2220 = vmatprep.mubr.bf16.mxu1 %v587_v9  ;;  %v3429_v38 = vld [vmem:[%s4309_s1 + $0x528] sm:$0xff]   ;;  %v3432_v39 = vld [vmem:[%s4309_s1 + $0x570] sm:$0xff]  }
  0x87   :  { %3091 = vmatprep.subr.bf16.mxu1 %v3382_v40  ;;  %v3431_v40 = vld [vmem:[%s4309_s1 + $0x5a8] sm:$0xff]  }
  0x88   :  { %3070 = vmatpush3.bf16.msra.mxu0 %v3381_v42  ;;  %v3434_v42 = vld [vmem:[%s4309_s1 + $0x5f0] sm:$0xff]  }
  0x89   :  { %3071 = vmatprep.subr.bf16.mxu0 %v3384_v43  ;;  %v3433_v43 = vld [vmem:[%s4309_s1 + $0x530] sm:$0xff]  }
  0x8a   :  { %3092 = vmatpush3.bf16.msra.mxu1 %v3383_v44  ;;  %v3436_v44 = vld [vmem:[%s4309_s1 + $0x578] sm:$0xff]  }
  0x8b   :  { %3093 = vmatprep.subr.bf16.mxu1 %v3386_v45  ;;  %v3435_v45 = vld [vmem:[%s4309_s1 + $0x5b0] sm:$0xff]  }
  0x8c   :  { %3072 = vmatpush3.bf16.msra.mxu0 %v3385_v46  ;;  %v3438_v46 = vld [vmem:[%s4309_s1 + $0x5f8] sm:$0xff]  }
  0x8d   :  { %3073 = vmatprep.subr.bf16.mxu0 %v3388_v47  ;;  %v3437_v47 = vld [vmem:[%s4309_s1 + $0x538] sm:$0xff]  }
  0x8e   :  { %3094 = vmatpush3.bf16.msra.mxu1 %v3387_v48  ;;  %v570_v48 = vrot.slane %v4048_v2, %v3656_v41 }
  0x8f   :  { %3095 = vmatprep.subr.bf16.mxu1 %v3390_v49  ;;  %v3440_v49 = vld [vmem:[%s4309_s1 + $0x5b8] sm:$0xff]  }
  0x90   :  { %3074 = vmatpush3.bf16.msra.mxu0 %v3389_v50  ;;  %v3441_v50 = vld [vmem:[%s4309_s1 + $0x600] sm:$0xff]  }
  0x91   :  { %3075 = vmatprep.subr.bf16.mxu0 %v3392_v51  ;;  %v3498_v51 = vmov 0.0  }
  0x92   :  { %3096 = vmatpush3.bf16.msra.mxu1 %v3391_v52  ;;  %v586_v52 = vcombine.high %v570_v48, %v570_v48 }
  0x93   :  { %3097 = vmatprep.subr.bf16.mxu1 %v3394_v53  ;;  %v3442_v53 = vld [vmem:[%s4309_s1 + $0x608] sm:$0xff]  }
  0x94   :  { %3076 = vmatpush3.bf16.msra.mxu0 %v3393_v54  ;;  %v3443_v54 = vld [vmem:[%s4309_s1 + $0x610] sm:$0xff]  }
  0x95   :  { %3077 = vmatprep.subr.bf16.mxu0 %v3396_v55 }
  0x96   :  { %3098 = vmatpush3.bf16.msra.mxu1 %v3395_v56 }
  0x97   :  { %3099 = vmatprep.subr.bf16.mxu1 %v3398_v57 }
  0x98   :  { %3078 = vmatpush3.bf16.msra.mxu0 %v3397_v58 }
  0x99   :  { %3079 = vmatprep.subr.bf16.mxu0 %v3400_v60 }
  0x9a   :  { %3100 = vmatpush3.bf16.msra.mxu1 %v3399_v63 }
  0x9b   :  { %3101 = vmatprep.subr.bf16.mxu1 %v3402_v0 }
  0x9c   :  { %3080 = vmatpush3.bf16.msra.mxu0 %v3401_v3 }
  0x9d   :  { %3081 = vmatprep.subr.bf16.mxu0 %v3404_v4 }
  0x9e   :  { %3102 = vmatpush3.bf16.msra.mxu1 %v3403_v6 }
  0x9f   :  { %3103 = vmatprep.subr.bf16.mxu1 %v3406_v8 }
  0xa0   :  { %3082 = vmatpush3.bf16.msra.mxu0 %v3405_v10 }
  0xa1   :  { %3111 = vmatprep.subr.bf16.mxu0 %v3408_v12 }
  0xa2   :  { %3104 = vmatpush3.bf16.msra.mxu1 %v3407_v13 }
  0xa3   :  { %2181 = vmatmul.mubr.bf16.vlgmr.msra.gmra.mrb[16].mxu0 %v563_v11  ;;  %3133 = vmatprep.subr.bf16.mxu1 %v3410_v15 }
  0xa4   :  { %3112 = vmatpush3.bf16.msra.mxu0 %v3409_v16  ;;  %2260 = vmatprep.mubr.bf16.mxu0 %v584_v14 }
  0xa5   :  { %2221 = vmatmul.mubr.bf16.vlgmr.msra.gmra.mrb[16].mxu1 %v585_v17  ;;  %3113 = vmatprep.subr.bf16.mxu0 %v3412_v18 }
  0xa6   :  { %3134 = vmatpush3.bf16.msra.mxu1 %v3411_v19  ;;  %2300 = vmatprep.mubr.bf16.mxu1 %v588_v20 }
  0xa7   :  { %3135 = vmatprep.subr.bf16.mxu1 %v3414_v21 }
  0xa8   :  { %3114 = vmatpush3.bf16.msra.mxu0 %v3413_v22 }
  0xa9   :  { %3115 = vmatprep.subr.bf16.mxu0 %v3416_v23 }
  0xaa   :  { %3136 = vmatpush3.bf16.msra.mxu1 %v3415_v24 }
  0xab   :  { %3137 = vmatprep.subr.bf16.mxu1 %v3418_v25 }
  0xac   :  { %3116 = vmatpush3.bf16.msra.mxu0 %v3417_v26 }
  0xad   :  { %3117 = vmatprep.subr.bf16.mxu0 %v3420_v27 }
  0xae   :  { %3138 = vmatpush3.bf16.msra.mxu1 %v3419_v28 }
  0xaf   :  { %3139 = vmatprep.subr.bf16.mxu1 %v3422_v29 }
  0xb0   :  { %3118 = vmatpush3.bf16.msra.mxu0 %v3421_v30 }
  0xb1   :  { %3119 = vmatprep.subr.bf16.mxu0 %v3424_v31 }
  0xb2   :  { %3140 = vmatpush3.bf16.msra.mxu1 %v3423_v32 }
  0xb3   :  { %3141 = vmatprep.subr.bf16.mxu1 %v3426_v33 }
  0xb4   :  { %3120 = vmatpush3.bf16.msra.mxu0 %v3425_v34 }
  0xb5   :  { %3121 = vmatprep.subr.bf16.mxu0 %v3428_v35 }
  0xb6   :  { %3142 = vmatpush3.bf16.msra.mxu1 %v3427_v36 }
  0xb7   :  { %3143 = vmatprep.subr.bf16.mxu1 %v3430_v37 }
  0xb8   :  { %3122 = vmatpush3.bf16.msra.mxu0 %v3429_v38 }
  0xb9   :  { %3123 = vmatprep.subr.bf16.mxu0 %v3432_v39 }
  0xba   :  { %3144 = vmatpush3.bf16.msra.mxu1 %v3431_v40 }
  0xbb   :  { %3145 = vmatprep.subr.bf16.mxu1 %v3434_v42 }
  0xbc   :  { %3124 = vmatpush3.bf16.msra.mxu0 %v3433_v43 }
  0xbd   :  { %3125 = vmatprep.subr.bf16.mxu0 %v3436_v44 }
  0xbe   :  { %3146 = vmatpush3.bf16.msra.mxu1 %v3435_v45 }
  0xbf   :  { %3147 = vmatprep.subr.bf16.mxu1 %v3438_v46 }
  0xc0   :  { %3126 = vmatpush3.bf16.msra.mxu0 %v3437_v47 }
  0xc1   :  { %3182 = vmatprep.subr.bf16.mxu0 %v3498_v51 }
  0xc2   :  { %3148 = vmatpush3.bf16.msra.mxu1 %v3440_v49 }
  0xc3   :  { %2261 = vmatmul.mubr.bf16.vlgmr.msra.gmra.mrb[20].mxu0 %v570_v48  ;;  %3202 = vmatprep.subr.bf16.mxu1 %v3498_v51 }
  0xc4   :  { %3183 = vmatpush3.bf16.msra.mxu0 %v3441_v50  ;;  %3198 = vmatprep.mubr.msk.bf16.mxu0 %vm3499_vm0, %v3498_v51 }
  0xc5   :  { %2301 = vmatmul.mubr.bf16.vlgmr.msra.gmra.mrb[20].mxu1 %v586_v52  ;;  %3184 = vmatprep.subr.bf16.mxu0 %v3498_v51 }
  0xc6   :  { %3218 = vmatprep.mubr.msk.bf16.mxu1 %vm3499_vm0, %v3498_v51 }
  0xc8   :  { %3185 = vmatpush3.bf16.msra.mxu0 %v3442_v53 }
  0xc9   :  { %3186 = vmatprep.subr.bf16.mxu0 %v3498_v51 }
  0xca   :  { %14 = vsyncpa [#allocation3], 0  ;;  %v3444_v55 = vld [vmem:[%s4309_s1 + $0x618] sm:$0xff]   ;;  %v3445_v56 = vld [vmem:[%s4309_s1 + $0x620] sm:$0xff]   ;;  %vm2350_vm1 = vcmask 1041408  }
  0xcb   :  { %v3446_v57 = vld [vmem:[%s4309_s1 + $0x628] sm:$0xff]   ;;  %v3447_v58 = vld [vmem:[%s4309_s1 + $0x630] sm:$0xff]   ;;  %v3448_v59 = vld [vmem:[%s4309_s1 + $0x638] sm:$0xff]  }
  0xcc   :  { %3187 = vmatpush3.bf16.msra.mxu0 %v3443_v54  ;;  %v2669_v60 = vld.sshfl [vmem:[%s4308_s0 + $0x18] sm:$0x1 pattern:$0x75316420]  ;;  %v3449_v32 = vld [vmem:[%s4312_s4] sm:$0xff]   ;;  %v3450_v35 = vld [vmem:[%s4312_s4 + $0x8] sm:$0xff]  }
  0xcd   :  { %3188 = vmatprep.subr.bf16.mxu0 %v3498_v51  ;;  %v602_v61 = vrot.slane %v2669_v60, %v3656_v41  ;;  %3203 = vmatpush3.bf16.msra.mxu1 %v3449_v32  ;;  %v3451_v46 = vld [vmem:[%s4312_s4 + $0x10] sm:$0xff]   ;;  %v3452_v48 = vld [vmem:[%s4312_s4 + $0x18] sm:$0xff]   ;;  %v3453_v49 = vld [vmem:[%s4312_s4 + $0x20] sm:$0xff]  }
  0xce   :  { %3204 = vmatprep.subr.bf16.mxu1 %v3498_v51  ;;  %v3454_v50 = vld [vmem:[%s4312_s4 + $0x28] sm:$0xff]   ;;  %v3455_v52 = vld [vmem:[%s4312_s4 + $0x30] sm:$0xff]   ;;  %v3456_v53 = vld [vmem:[%s4312_s4 + $0x38] sm:$0xff]  }
  0xd0   :  { %3189 = vmatpush3.bf16.msra.mxu0 %v3444_v55 }
  0xd1   :  { %3190 = vmatprep.subr.bf16.mxu0 %v3498_v51  ;;  %3205 = vmatpush3.bf16.msra.mxu1 %v3450_v35 }
  0xd2   :  { %3206 = vmatprep.subr.bf16.mxu1 %v3498_v51 }
  0xd4   :  { %3191 = vmatpush3.bf16.msra.mxu0 %v3445_v56 }
  0xd5   :  { %3192 = vmatprep.subr.bf16.mxu0 %v3498_v51  ;;  %3207 = vmatpush3.bf16.msra.mxu1 %v3451_v46 }
  0xd6   :  { %3208 = vmatprep.subr.bf16.mxu1 %v3498_v51 }
  0xd8   :  { %3193 = vmatpush3.bf16.msra.mxu0 %v3446_v57 }
  0xd9   :  { %3194 = vmatprep.subr.bf16.mxu0 %v3498_v51  ;;  %3209 = vmatpush3.bf16.msra.mxu1 %v3452_v48 }
  0xda   :  { %3210 = vmatprep.subr.bf16.mxu1 %v3498_v51 }
  0xdc   :  { %3195 = vmatpush3.bf16.msra.mxu0 %v3447_v58 }
  0xdd   :  { %3196 = vmatprep.subr.bf16.mxu0 %v3498_v51  ;;  %3211 = vmatpush3.bf16.msra.mxu1 %v3453_v49 }
  0xde   :  { %3212 = vmatprep.subr.bf16.mxu1 %v3498_v51 }
  0xe0   :  { %3197 = vmatpush3.bf16.msra.mxu0 %v3448_v59 }
  0xe1   :  { %3222 = vmatprep.subr.bf16.mxu0 %v3498_v51  ;;  %3213 = vmatpush3.bf16.msra.mxu1 %v3454_v50 }
  0xe2   :  { %3214 = vmatprep.subr.bf16.mxu1 %v3498_v51 }
  0xe3   :  { %3199 = vmatmul.mubr.bf16.vlgmr.msra.gmra.mrb[24].mxu0 %v602_v61 }
  0xe4   :  { %3238 = vmatprep.mubr.msk.bf16.mxu0 %vm3499_vm0, %v3498_v51 }
  0xe5   :  { %3215 = vmatpush3.bf16.msra.mxu1 %v3455_v52 }
  0xe6   :  { %3216 = vmatprep.subr.bf16.mxu1 %v3498_v51 }
  0xe9   :  { %3217 = vmatpush3.bf16.msra.mxu1 %v3456_v53  ;;  %v3457_v53 = vld [vmem:[%s4315_s7] sm:$0xff]  }
  0xea   :  { %3223 = vmatpush3.bf16.msra.mxu0 %v3457_v53 }
  0xeb   :  { %3224 = vmatprep.subr.bf16.mxu0 %v3498_v51 }
  0xf6   :  { %v2907_v62 = vpop.f32.mrb[0].mxu0 }
  0xf7   :  { %v2908_v63 = vpop.f32.mrb[1].mxu0  ;;  %v2929_v0 = vpop.f32.mrb[0].mxu1 }
  0xf8   :  { %v2909_v1 = vadd.f32 %v2908_v63, %v2907_v62  ;;  %v2910_v2 = vpop.f32.mrb[2].mxu0  ;;  %v2930_v3 = vpop.f32.mrb[1].mxu1 }
  0xf9   :  { %v2911_v4 = vpop.f32.mrb[3].mxu0  ;;  %v2931_v5 = vadd.f32 %v2930_v3, %v2929_v0  ;;  %v2932_v6 = vpop.f32.mrb[2].mxu1 }
  0xfa   :  { %v2933_v7 = vpop.f32.mrb[3].mxu1 }
  0xfb   :  { %v1903_v8 = vadd.f32 %v2931_v5, %v2909_v1 }
 0x116   :  { %v2951_v9 = vpop.f32.mrb[4].mxu0 }
 0x117   :  { %v2952_v41 = vpop.f32.mrb[5].mxu0  ;;  %v2973_v12 = vpop.f32.mrb[4].mxu1 }
 0x118   :  { %v2953_v10 = vadd.f32 %v2952_v41, %v2951_v9  ;;  %v2954_v11 = vpop.f32.mrb[6].mxu0  ;;  %v2974_v14 = vpop.f32.mrb[5].mxu1 }
 0x119   :  { %v2955_v13 = vpop.f32.mrb[7].mxu0  ;;  %v2975_v16 = vadd.f32 %v2974_v14, %v2973_v12  ;;  %v2976_v17 = vpop.f32.mrb[6].mxu1 }
 0x11a   :  { %v1943_v15 = vadd.f32 %v2953_v10, %v1903_v8  ;;  %v2977_v18 = vpop.f32.mrb[7].mxu1 }
 0x11c   :  { %v1983_v19 = vadd.f32 %v2975_v16, %v1943_v15 }
 0x136   :  { %v2995_v20 = vpop.f32.mrb[8].mxu0 }
 0x137   :  { %v2996_v21 = vpop.f32.mrb[9].mxu0 }
 0x138   :  { %v2997_v22 = vadd.f32 %v2996_v21, %v2995_v20  ;;  %v2998_v23 = vpop.f32.mrb[10].mxu0  ;;  %v3017_v24 = vpop.f32.mrb[8].mxu1 }
 0x139   :  { %v2999_v25 = vpop.f32.mrb[11].mxu0  ;;  %v3018_v26 = vpop.f32.mrb[9].mxu1 }
 0x13a   :  { %v2023_v27 = vadd.f32 %v2997_v22, %v1983_v19  ;;  %v3019_v28 = vadd.f32 %v3018_v26, %v3017_v24  ;;  %v3020_v29 = vpop.f32.mrb[10].mxu1 }
 0x13b   :  { %v3021_v30 = vpop.f32.mrb[11].mxu1 }
 0x13c   :  { %v2063_v31 = vadd.f32 %v3019_v28, %v2023_v27 }
 0x156   :  { %v3039_v33 = vpop.f32.mrb[12].mxu0 }
 0x157   :  { %v3040_v34 = vpop.f32.mrb[13].mxu0 }
 0x158   :  { %v3041_v36 = vadd.f32 %v3040_v34, %v3039_v33  ;;  %v3042_v37 = vpop.f32.mrb[14].mxu0  ;;  %v3061_v38 = vpop.f32.mrb[12].mxu1 }
 0x159   :  { %v3043_v39 = vpop.f32.mrb[15].mxu0  ;;  %v3062_v40 = vpop.f32.mrb[13].mxu1 }
 0x15a   :  { %v2103_v42 = vadd.f32 %v3041_v36, %v2063_v31  ;;  %v3063_v43 = vadd.f32 %v3062_v40, %v3061_v38  ;;  %v3064_v44 = vpop.f32.mrb[14].mxu1  ;;  %v2870_v40 = vld [vmem:[%s4310_s2] ss:$0 sm:$0xff] }
 0x15b   :  { %v3065_v45 = vpop.f32.mrb[15].mxu1  ;;  %v2871_v44 = vld [vmem:[%s4311_s3] ss:$0 sm:$0xff] }
 0x15c   :  { %v2143_v47 = vadd.f32 %v3063_v43, %v2103_v42 }
 0x176   :  { %v3083_v54 = vpop.f32.mrb[16].mxu0 }
 0x177   :  { %v3084_v55 = vpop.f32.mrb[17].mxu0 }
 0x178   :  { %v3085_v56 = vadd.f32 %v3084_v55, %v3083_v54  ;;  %v3086_v57 = vpop.f32.mrb[18].mxu0  ;;  %v3105_v58 = vpop.f32.mrb[16].mxu1  ;;  %v3458_v54 = vld [vmem:[%s4315_s7 + $0x8] sm:$0xff]   ;;  %v3459_v55 = vld [vmem:[%s4315_s7 + $0x10] sm:$0xff]  }
 0x179   :  { %v3087_v59 = vpop.f32.mrb[19].mxu0  ;;  %v3106_v60 = vpop.f32.mrb[17].mxu1  ;;  %3225 = vmatpush3.bf16.msra.mxu0 %v3458_v54  ;;  %v3461_v57 = vld [vmem:[%s4315_s7 + $0x20] sm:$0xff]  }
 0x17a   :  { %v2183_v61 = vadd.f32 %v3085_v56, %v2143_v47  ;;  %v3107_v62 = vadd.f32 %v3106_v60, %v3105_v58  ;;  %v3108_v63 = vpop.f32.mrb[18].mxu1  ;;  %3226 = vmatprep.subr.bf16.mxu0 %v3498_v51  ;;  %v3460_v56 = vld [vmem:[%s4315_s7 + $0x18] sm:$0xff]   ;;  %v3462_v58 = vld [vmem:[%s4315_s7 + $0x28] sm:$0xff]   ;;  %v3463_v59 = vld [vmem:[%s4315_s7 + $0x30] sm:$0xff]  }
 0x17b   :  { %v3109_v0 = vpop.f32.mrb[19].mxu1  ;;  %v3464_v60 = vld [vmem:[%s4315_s7 + $0x38] sm:$0xff]  }
 0x17c   :  { %v2223_v1 = vadd.f32 %v3107_v62, %v2183_v61 }
 0x17d   :  { %3227 = vmatpush3.bf16.msra.mxu0 %v3459_v55 }
 0x17e   :  { %3228 = vmatprep.subr.bf16.mxu0 %v3498_v51 }
 0x181   :  { %3229 = vmatpush3.bf16.msra.mxu0 %v3460_v56 }
 0x182   :  { %3230 = vmatprep.subr.bf16.mxu0 %v3498_v51 }
 0x185   :  { %3231 = vmatpush3.bf16.msra.mxu0 %v3461_v57 }
 0x186   :  { %3232 = vmatprep.subr.bf16.mxu0 %v3498_v51 }
 0x189   :  { %3233 = vmatpush3.bf16.msra.mxu0 %v3462_v58 }
 0x18a   :  { %3234 = vmatprep.subr.bf16.mxu0 %v3498_v51 }
 0x18d   :  { %3235 = vmatpush3.bf16.msra.mxu0 %v3463_v59 }
 0x18e   :  { %3236 = vmatprep.subr.bf16.mxu0 %v3498_v51 }
 0x191   :  { %3237 = vmatpush3.bf16.msra.mxu0 %v3464_v60 }
 0x196   :  { %v3127_v2 = vpop.f32.mrb[20].mxu0 }
 0x197   :  { %v3128_v3 = vpop.f32.mrb[21].mxu0 }
 0x198   :  { %v3129_v4 = vadd.f32 %v3128_v3, %v3127_v2  ;;  %v3130_v5 = vpop.f32.mrb[22].mxu0  ;;  %v3149_v6 = vpop.f32.mrb[20].mxu1 }
 0x199   :  { %v3131_v7 = vpop.f32.mrb[23].mxu0  ;;  %v3150_v8 = vpop.f32.mrb[21].mxu1 }
 0x19a   :  { %v2263_v9 = vadd.f32 %v3129_v4, %v2223_v1  ;;  %v3151_v41 = vadd.f32 %v3150_v8, %v3149_v6  ;;  %v3152_v10 = vpop.f32.mrb[22].mxu1 }
 0x19b   :  { %v3153_v11 = vpop.f32.mrb[23].mxu1 }
 0x19c   :  { %v2303_v12 = vadd.f32 %v3151_v41, %v2263_v9 }
 0x1b6   :  { %v2342_v13 = vpop.f32.mrb[24].mxu0 }
 0x1b7   :  { %v2343_v14 = vadd.f32 %v2342_v13, %v2303_v12  ;;  %v3200_v15 = vpop.f32.mrb[25].mxu0 }
 0x1b8   :  { %v2345_v16 = vpop.f32.mrb[26].mxu0 }
 0x1b9   :  { %v2351_v17 = vsel %vm2350_vm1, %v2343_v14, 0.0  ;;  %v2358_v18 = vmul.f32 %v2343_v14, %v2343_v14  ;;  %v3201_v19 = vpop.f32.mrb[27].mxu0 }
 0x1ba   :  { %v2352_v20 = vrot.slane %v2351_v17, 4 }
 0x1bb   :  { %v2359_v21 = vsel %vm2350_vm1, %v2358_v18, 0.0 }
 0x1bc   :  { %v2353_v22 = vadd.f32 %v2352_v20, %v2351_v17  ;;  %v2360_v23 = vrot.slane %v2359_v21, 4 }
 0x1be   :  { %v2354_v24 = vrot.slane %v2353_v22, 2  ;;  %v2361_v25 = vadd.f32 %v2360_v23, %v2359_v21  ;;  %v2880_v21 = vld [vmem:[%s4313_s5] ss:$0 sm:$0xff]  ;;  %s3500_s5 = smov [#allocation2]  }
 0x1bf   :  { %s2661_s10 = sshll.u32 %s3500_s5, 4  ;;  %s2662_s10 = int_to_ptr.vmem [resolvable:$true] %s2661_s10 }
 0x1c0   :  { %v2355_v26 = vadd.f32 %v2354_v24, %v2353_v22  ;;  %v2362_v27 = vrot.slane %v2361_v25, 2  ;;  %v2881_v24 = vld [vmem:[%s4314_s6] ss:$0 sm:$0xff]  ;;  %s3473_s6 = scalar_lea.vmem %s2662_s10, 32  ;;  %p3478_p1 = scmp.lt.s32.totalorder %s2662_s10, %s2662_s10 }
 0x1c1   :  { %p3474_p0 = scmp.ne.s32.totalorder %s2662_s10, %s3473_s6  ;;  %p3479_p2 = scmp.lt.s32.totalorder %s3473_s6, %s3473_s6 }
 0x1c2   :  { %v2356_v28 = vrot.slane %v2355_v26, 1  ;;  %v2363_v29 = vadd.f32 %v2362_v27, %v2361_v25 }
 0x1c3   :  { %p3480_p3 = por %p3479_p2, %p3478_p1 }
 0x1c4   :  { %v2357_v30 = vadd.f32 %v2356_v28, %v2355_v26  ;;  %v2364_v31 = vrot.slane %v2363_v29, 1 }
 0x1c5   :  { %p3481_p4 = pnand %p3480_p3, %p3474_p0 }
 0x1c6   :  { %v2365_v32 = vadd.f32 %v2364_v31, %v2363_v29  ;;  %v2366_v33 = vmul.f32 0.5, %v2357_v30 }
 0x1c8   :  { %v2367_v34 = vmul.f32 0.5, %v2365_v32  ;;  %v2368_v35 = vmul.f32 %v2366_v33, %v2366_v33  ;;  %v2371_v39 = vsub.f32 %v2343_v14, %v2366_v33  ;;  %v2882_v32 = vld [vmem:[%s4316_s8] ss:$0 sm:$0xff] }
 0x1ca   :  { %v2369_v36 = vsub.f32 %v2367_v34, %v2368_v35  ;;  %v2378_v42 = vmul.f32 %v2870_v40, %v2371_v39 }
 0x1cc   :  { %v2370_v37 = vmax.f32 %v2369_v36, 0.0 }
 0x1ce   :  { %v2379_v38 = vadd.f32 1e-05, %v2370_v37 }
 0x1d0   :  { %3465 = vrsqrt.f32 %v2379_v38 }
 0x1da   :  { %v3466_v43 = vpop.eup %3465 }
 0x1db   :  { %v2381_v45 = vmul.f32 %v3466_v43, %v2378_v42 }
 0x1dd   :  { %v2388_v46 = vadd.f32 %v2871_v44, %v2381_v45 }
 0x1df   :  { %v2389_v47 = vmul.f32 0.5, %v2388_v46 }
 0x1e1   :  { %3467 = vtanh.f32 %v2389_v47 }
 0x1eb   :  { %v3468_v48 = vpop.eup %3467 }
 0x1ec   :  { %v2391_v49 = vmul.f32 0.5, %v3468_v48 }
 0x1ee   :  { %v2392_v50 = vadd.f32 0.5, %v2391_v49 }
 0x1f0   :  { %v2393_v52 = vpack.c.bf16 %v2392_v50, %v2392_v50 }
 0x1f2   :  { %3219 = vmatmul.mubr.bf16.vlgmr.msra.gmra.mrb[24].mxu1 %v2393_v52 }
 0x2c5   :  { %v2492_v61 = vpop.f32.mrb[24].mxu1 }
 0x2c6   :  { %v2500_v62 = vsel %vm2350_vm1, %v2492_v61, 0.0  ;;  %v2507_v63 = vmul.f32 %v2492_v61, %v2492_v61  ;;  %v3220_v0 = vpop.f32.mrb[25].mxu1 }
 0x2c7   :  { %v2501_v1 = vrot.slane %v2500_v62, 4  ;;  %v2495_v2 = vpop.f32.mrb[26].mxu1 }
 0x2c8   :  { %v2508_v3 = vsel %vm2350_vm1, %v2507_v63, 0.0  ;;  %v3221_v4 = vpop.f32.mrb[27].mxu1 }
 0x2c9   :  { %v2502_v5 = vadd.f32 %v2501_v1, %v2500_v62  ;;  %v2509_v6 = vrot.slane %v2508_v3, 4 }
 0x2cb   :  { %v2503_v7 = vrot.slane %v2502_v5, 2  ;;  %v2510_v8 = vadd.f32 %v2509_v6, %v2508_v3 }
 0x2cd   :  { %v2504_v9 = vadd.f32 %v2503_v7, %v2502_v5  ;;  %v2511_v41 = vrot.slane %v2510_v8, 2 }
 0x2cf   :  { %v2505_v10 = vrot.slane %v2504_v9, 1  ;;  %v2512_v11 = vadd.f32 %v2511_v41, %v2510_v8 }
 0x2d1   :  { %v2506_v51 = vadd.f32 %v2505_v10, %v2504_v9  ;;  %v2513_v12 = vrot.slane %v2512_v11, 1 }
 0x2d3   :  { %v2514_v13 = vadd.f32 %v2513_v12, %v2512_v11  ;;  %v2515_v14 = vmul.f32 0.5, %v2506_v51 }
 0x2d5   :  { %v2516_v15 = vmul.f32 0.5, %v2514_v13  ;;  %v2517_v16 = vmul.f32 %v2515_v14, %v2515_v14  ;;  %v2520_v20 = vsub.f32 %v2492_v61, %v2515_v14 }
 0x2d7   :  { %v2518_v17 = vsub.f32 %v2516_v15, %v2517_v16  ;;  %v2527_v22 = vmul.f32 %v2880_v21, %v2520_v20 }
 0x2d9   :  { %v2519_v18 = vmax.f32 %v2518_v17, 0.0 }
 0x2db   :  { %v2528_v19 = vadd.f32 1e-05, %v2519_v18 }
 0x2dd   :  { %3469 = vrsqrt.f32 %v2528_v19 }
 0x2e7   :  { %v3470_v23 = vpop.eup %3469 }
 0x2e8   :  { %v2530_v25 = vmul.f32 %v3470_v23, %v2527_v22 }
 0x2ea   :  { %v2537_v26 = vadd.f32 %v2881_v24, %v2530_v25 }
 0x2ec   :  { %v2538_v27 = vmul.f32 0.5, %v2537_v26 }
 0x2ee   :  { %3471 = vtanh.f32 %v2538_v27 }
 0x2f8   :  { %v3472_v28 = vpop.eup %3471 }
 0x2f9   :  { %v2540_v29 = vmul.f32 0.5, %v3472_v28 }
 0x2fb   :  { %v2541_v30 = vadd.f32 0.5, %v2540_v29 }
 0x2fd   :  { %v2542_v31 = vpack.c.bf16 %v2541_v30, %v2541_v30 }
 0x2ff   :  { %3239 = vmatmul.mubr.bf16.vlgmr.msra.gmra.mrb[28].mxu0 %v2542_v31 }
 0x3d2   :  { %v2648_v33 = vpop.f32.mrb[28].mxu0 }
 0x3d3   :  { %v2649_v34 = vadd.f32 %v2882_v32, %v2648_v33  ;;  %v3240_v35 = vpop.f32.mrb[29].mxu0 }
 0x3d4   :  { %v2651_v36 = vpop.f32.mrb[30].mxu0 }
 0x3d5   :  { %2654 = vst [vmem:[#allocation2] sm:$0x3] %v2649_v34  ;;  %v3241_v37 = vpop.f32.mrb[31].mxu0 }
 0x3d6   :  { %3484 = shalt.err (!%p3481_p4)
}
 0x3d7   :  { %s3485_s8 = scalar_lea.hbm %s4317_s9, 32 }
 0x3d8   :  { %p3486_p5 = scmp.ne.s32.totalorder %s4317_s9, %s3485_s8  ;;  %p3489_p6 = scmp.lt.u32.totalorder %s3485_s8, %s4317_s9 }
 0x3da   :  { %p3491_p7 = pnand %p3489_p6, %p3486_p5 }
 0x3dc   :  { %3494 = shalt.err (!%p3491_p7)
}
 0x3dd   :  { %2664 = dma.vmem_to_hbm [thread:$0]  %s2662_s10, 32, %s4317_s9, [#allocation3]  }
 0x3de   :  { %3495 = dma.done.wait [#allocation3], 32  }
 0x3df   :  { %3496 = vsyncadd [#allocation3], 4294967264 }
 0x3e0   :  { %2668 = vsyncpa [#allocation3], 1 }

</bundles_post_ra>
